<compile_context>
chip_gen: v6e
topology: v6e:2x2x1
jax: 0.10.0
libtpu: 0.0.40
codegen_flags: <defaults>
</compile_context>

<pallas_src>
import collections
import functools
import math

import jax
import jax.numpy as jnp
import numpy as np
from jax.experimental import pallas as pl
from jax.experimental.pallas import tpu as pltpu


# ---------------------------------------------------------------------------
# Pallas kernel: fused (Cout, Kd) @ (Kd, tM) GEMM + bias + activation.
# Output is lane-dense: last dim = flattened spatial positions.
# ---------------------------------------------------------------------------
def _gemm_bias_act_kernel(x_ref, w_ref, b_ref, o_ref, *, act):
    x = x_ref[0, 0].astype(jnp.float32)          # (Kd, tM)
    w = w_ref[0].astype(jnp.float32)             # (Cout, Kd)
    b = b_ref[0].astype(jnp.float32)             # (Cout, 1)
    acc = jnp.dot(w, x, preferred_element_type=jnp.float32)   # MXU, f32 acc
    acc = acc + b                                 # lane-broadcast bias
    if act == "relu":
        acc = jnp.maximum(acc, 0.0)
    elif act == "sigmoid":
        acc = 1.0 / (1.0 + jnp.exp(-acc))
    o_ref[...] = acc[None, None].astype(o_ref.dtype)


def _choose_tile_m(m, kd, bytes_budget=4 << 20):
    """Largest lane tile (multiple of 128) fitting the VMEM budget, else full M."""
    for t in (2048, 1024, 512, 256, 128):
        if m >= t and m % t == 0 and kd * t * 4 <= bytes_budget:
            return t
    return m


def gemm_bias_act(x_col, w_mat, b, act):
    """x_col: (G, N, Kd, M); w_mat: (G, Cout, Kd); b: (G, Cout) -> (G, N, Cout, M)."""
    G, N, Kd, M = x_col.shape
    Cout = w_mat.shape[1]
    tm = _choose_tile_m(M, Kd)
    b2 = b.reshape(G, Cout, 1)
    kernel = functools.partial(_gemm_bias_act_kernel, act=act)
    return pl.pallas_call(
        kernel,
        out_shape=jax.ShapeDtypeStruct((G, N, Cout, M), x_col.dtype),
        grid=(G, N, M // tm),
        in_specs=[
            pl.BlockSpec((1, 1, Kd, tm), lambda g, n, m: (g, n, 0, m)),
            pl.BlockSpec((1, Cout, Kd), lambda g, n, m: (g, 0, 0)),
            pl.BlockSpec((1, Cout, 1), lambda g, n, m: (g, 0, 0)),
        ],
        out_specs=pl.BlockSpec((1, 1, Cout, tm), lambda g, n, m: (g, n, 0, m)),
        compiler_params=pltpu.CompilerParams(
            dimension_semantics=("parallel", "parallel", "parallel")),
    )(x_col, w_mat, b2)


# ---------------------------------------------------------------------------
# JAX glue: padding / input dilation and im2col patch extraction (NCDHW).
# ---------------------------------------------------------------------------
def _im2col(xp, K, stride, out_spatial):
    """xp: (..., C, Dp, Hp, Wp) -> (..., C*K^3, Do*Ho*Wo); (ci, kd, kh, kw)-major."""
    Do, Ho, Wo = out_spatial
    lead = xp.shape[:-4]
    C = xp.shape[-4]
    nl = len(lead)
    M = Do * Ho * Wo
    cols = []
    for kd in range(K):
        for kh in range(K):
            for kw in range(K):
                xs = jax.lax.slice(
                    xp,
                    (0,) * nl + (0, kd, kh, kw),
                    lead + (C,
                            kd + (Do - 1) * stride + 1,
                            kh + (Ho - 1) * stride + 1,
                            kw + (Wo - 1) * stride + 1),
                    (1,) * nl + (1, stride, stride, stride))
                cols.append(xs.reshape(lead + (C, 1, M)))
    x_col = jnp.concatenate(cols, axis=-2)        # (..., C, K^3, M)
    return x_col.reshape(lead + (C * K ** 3, M))


def _conv_layer_grouped(x, w_mat, b, *, K, conv_stride, edge_pad, interior, act):
    """x: (G, N, C, D, H, W); returns (G, N, Cout, Do, Ho, Wo)."""
    G, N = x.shape[:2]
    pad_cfg = [(0, 0, 0)] * 3 + [(edge_pad, edge_pad, interior)] * 3
    xp = jax.lax.pad(x, jnp.array(0, x.dtype), pad_cfg)
    Dp, Hp, Wp = xp.shape[-3:]
    Do = (Dp - K) // conv_stride + 1
    Ho = (Hp - K) // conv_stride + 1
    Wo = (Wp - K) // conv_stride + 1
    x_col = _im2col(xp, K, conv_stride, (Do, Ho, Wo))
    out = gemm_bias_act(x_col, w_mat, b, act)
    Cout = w_mat.shape[1]
    return out.reshape(G, N, Cout, Do, Ho, Wo)


# ---------------------------------------------------------------------------
# FCNwoLSTM layer configuration & parameters (3 networks stacked on axis 0).
# ---------------------------------------------------------------------------
LayerCfg = collections.namedtuple(
    "LayerCfg", ["kind", "cin", "cout", "K", "stride", "pad", "act"])


def fcn_layer_cfgs(inc, outc, ic):
    return (
        LayerCfg("conv",  inc,     ic,      4, 2, 1, "relu"),
        LayerCfg("conv",  ic,      2 * ic,  4, 2, 1, "relu"),
        LayerCfg("conv",  2 * ic,  4 * ic,  4, 2, 1, "relu"),
        LayerCfg("conv",  4 * ic,  8 * ic,  4, 2, 1, "relu"),
        LayerCfg("convT", 8 * ic,  4 * ic,  4, 2, 1, "relu"),
        LayerCfg("convT", 4 * ic,  2 * ic,  4, 2, 1, "relu"),
        LayerCfg("convT", 2 * ic,  ic,      4, 2, 1, "relu"),
        LayerCfg("convT", ic,      ic // 2, 4, 2, 1, "relu"),
        LayerCfg("conv",  ic // 2, outc,    3, 1, 1, "sigmoid"),
    )


def init_rmasknet_params(key, cfgs, num_nets=3):
    params = []
    for cfg in cfgs:
        ws, bs = [], []
        for _ in range(num_nets):
            key, kw_, kb_ = jax.random.split(key, 3)
            if cfg.kind == "conv":
                shape = (cfg.cout, cfg.cin, cfg.K, cfg.K, cfg.K)
                fan_in = cfg.cin * cfg.K ** 3
            else:  # PyTorch ConvTranspose3d weight layout: (Cin, Cout, K, K, K)
                shape = (cfg.cin, cfg.cout, cfg.K, cfg.K, cfg.K)
                fan_in = cfg.cout * cfg.K ** 3
            bound = 1.0 / math.sqrt(fan_in)
            ws.append(jax.random.uniform(kw_, shape, jnp.float32, -bound, bound))
            bs.append(jax.random.uniform(kb_, (cfg.cout,), jnp.float32, -bound, bound))
        params.append({"w": jnp.stack(ws), "b": jnp.stack(bs)})
    return params


# ---------------------------------------------------------------------------
# Forward (Pallas path).
# ---------------------------------------------------------------------------
def fcn_grouped_forward(cfgs, params, x):
    """x: (G, N, C, D, H, W); runs the G stacked FCNwoLSTM networks layer by layer."""
    h = x
    for cfg, p in zip(cfgs, params):
        w, b = p["w"], p["b"]
        if cfg.kind == "conv":
            w_conv = w                                     # (G, Cout, Cin, K, K, K)
            conv_stride, edge_pad, interior = cfg.stride, cfg.pad, 0
        else:
            # ConvTranspose == input-dilated stride-1 conv, flipped / IO-swapped kernel
            w_conv = jnp.flip(w, axis=(3, 4, 5)).transpose(0, 2, 1, 3, 4, 5)
            conv_stride, edge_pad, interior = 1, cfg.K - 1 - cfg.pad, cfg.stride - 1
        G = w_conv.shape[0]
        w_mat = w_conv.reshape(G, cfg.cout, -1)            # (G, Cout, Cin*K^3)
        h = _conv_layer_grouped(h, w_mat, b, K=cfg.K, conv_stride=conv_stride,
                                edge_pad=edge_pad, interior=interior, act=cfg.act)
    return h


def rmasknet_forward(cfgs, params, s, e):
    u = jnp.concatenate([s[:, 0:1], e[:, 0:1]], axis=1)
    v = jnp.concatenate([s[:, 1:2], e[:, 1:2]], axis=1)
    w = jnp.concatenate([s[:, 2:3], e[:, 2:3]], axis=1)
    x = jnp.stack([u, v, w], axis=0)           # (3, N, 2, D, H, W)
    y = fcn_grouped_forward(cfgs, params, x)   # (3, N, outc, D, H, W)
    return y[0], y[1], y[2]


# ---------------------------------------------------------------------------
# Pure-JAX reference (lax.conv_general_dilated) for correctness checking.
# ---------------------------------------------------------------------------
def _fcn_reference(cfgs, params, x, g):
    h = x
    for cfg, p in zip(cfgs, params):
        w = p["w"][g]
        b = p["b"][g]
        if cfg.kind == "conv":
            h = jax.lax.conv_general_dilated(
                h, w, window_strides=(cfg.stride,) * 3,
                padding=[(cfg.pad, cfg.pad)] * 3,
                dimension_numbers=("NCDHW", "OIDHW", "NCDHW"),
                precision=jax.lax.Precision.HIGHEST)
        else:
            w_conv = jnp.flip(w, axis=(2, 3, 4)).transpose(1, 0, 2, 3, 4)
            pd = cfg.K - 1 - cfg.pad
            h = jax.lax.conv_general_dilated(
                h, w_conv, window_strides=(1, 1, 1),
                padding=[(pd, pd)] * 3, lhs_dilation=(cfg.stride,) * 3,
                dimension_numbers=("NCDHW", "OIDHW", "NCDHW"),
                precision=jax.lax.Precision.HIGHEST)
        h = h + b.reshape(1, -1, 1, 1, 1)
        if cfg.act == "relu":
            h = jnp.maximum(h, 0.0)
        elif cfg.act == "sigmoid":
            h = jax.nn.sigmoid(h)
    return h


def rmasknet_reference(cfgs, params, s, e):
    slabs = [jnp.concatenate([s[:, i:i + 1], e[:, i:i + 1]], axis=1) for i in range(3)]
    return tuple(_fcn_reference(cfgs, params, slabs[g], g) for g in range(3))


if __name__ == "__main__":
    # RMaskNet(inc=2, outc=2, init_channels=4) on (N=2, 3, 16, 16, 16) inputs.
    N, Dsp, Hsp, Wsp = 2, 16, 16, 16
    inc, outc, init_channels = 2, 2, 4
    cfgs = fcn_layer_cfgs(inc, outc, init_channels)

    key = jax.random.PRNGKey(0)
    key, ks, ke = jax.random.split(key, 3)
    s = jax.random.normal(ks, (N, 3, Dsp, Hsp, Wsp), jnp.float32)
    e = jax.random.normal(ke, (N, 3, Dsp, Hsp, Wsp), jnp.float32)
    params = init_rmasknet_params(key, cfgs)

    fwd = jax.jit(functools.partial(rmasknet_forward, cfgs))
    m_u, m_v, m_w = jax.block_until_ready(fwd(params, s, e))

    assert m_u.shape == (N, outc, Dsp, Hsp, Wsp), m_u.shape
    assert m_v.shape == (N, outc, Dsp, Hsp, Wsp), m_v.shape
    assert m_w.shape == (N, outc, Dsp, Hsp, Wsp), m_w.shape
    assert m_u.dtype == jnp.float32

    ref_u, ref_v, ref_w = jax.block_until_ready(
        jax.jit(functools.partial(rmasknet_reference, cfgs))(params, s, e))
    for got, ref in ((m_u, ref_u), (m_v, ref_v), (m_w, ref_w)):
        np.testing.assert_allclose(np.asarray(got), np.asarray(ref),
                                   rtol=5e-3, atol=5e-3)

    print("KERNEL_OK")
</pallas_src>

<mosaic_0001>
module attributes {stable_mosaic.version = 11 : i64} {
  func.func @_gemm_bias_act_kernel(%arg0: i32, %arg1: i32, %arg2: i32, %arg3: memref<1x1x128x512xf32, #tpu.memory_space<vmem>>, %arg4: memref<1x4x128xf32, #tpu.memory_space<vmem>>, %arg5: memref<1x4x1xf32, #tpu.memory_space<vmem>>, %arg6: memref<1x1x4x512xf32, #tpu.memory_space<vmem>>) attributes {dimension_semantics = [#tpu.dimension_semantics<parallel>, #tpu.dimension_semantics<parallel>, #tpu.dimension_semantics<parallel>], iteration_bounds = array<i64: 3, 2, 1>, scalar_prefetch = 0 : i64, scratch_operands = 0 : i64, tpu.core_type = #tpu.core_type<tc>, window_params = [{transform_indices = @transform_0, window_bounds = array<i64: 1, 1, 128, 512>}, {transform_indices = @transform_1, window_bounds = array<i64: 1, 4, 128>}, {transform_indices = @transform_2, window_bounds = array<i64: 1, 4, 1>}, {transform_indices = @transform_3, window_bounds = array<i64: 1, 1, 4, 512>}]} {
    %c0 = arith.constant 0 : index
    %c0_0 = arith.constant 0 : index
    %c0_1 = arith.constant 0 : index
    %c0_2 = arith.constant 0 : index
    %0 = vector.load %arg3[%c0, %c0_0, %c0_1, %c0_2] : memref<1x1x128x512xf32, #tpu.memory_space<vmem>>, vector<1x1x128x512xf32>
    %1 = vector.shape_cast %0 : vector<1x1x128x512xf32> to vector<128x512xf32>
    %c0_3 = arith.constant 0 : index
    %c0_4 = arith.constant 0 : index
    %c0_5 = arith.constant 0 : index
    %2 = vector.load %arg4[%c0_3, %c0_4, %c0_5] : memref<1x4x128xf32, #tpu.memory_space<vmem>>, vector<1x4x128xf32>
    %3 = vector.shape_cast %2 : vector<1x4x128xf32> to vector<4x128xf32>
    %c0_6 = arith.constant 0 : index
    %c0_7 = arith.constant 0 : index
    %c0_8 = arith.constant 0 : index
    %4 = vector.load %arg5[%c0_6, %c0_7, %c0_8] : memref<1x4x1xf32, #tpu.memory_space<vmem>>, vector<1x4x1xf32>
    %5 = vector.shape_cast %4 : vector<1x4x1xf32> to vector<4x1xf32>
    %cst = arith.constant dense<0.000000e+00> : vector<4x512xf32>
    %6 = tpu.matmul %3, %1, %cst {dimension_numbers = #tpu.dot_dimension_numbers<[1], [0], [0], [1], [0, 0, 1, 1], [], []>} : vector<4x128xf32>, vector<128x512xf32>, vector<4x512xf32> -> vector<4x512xf32>
    %7 = vector.broadcast %5 : vector<4x1xf32> to vector<4x512xf32>
    %8 = arith.addf %6, %7 : vector<4x512xf32>
    %cst_9 = arith.constant 0.000000e+00 : f32
    %9 = vector.broadcast %cst_9 : f32 to vector<4x512xf32>
    %10 = arith.maximumf %8, %9 : vector<4x512xf32>
    %11 = vector.shape_cast %10 : vector<4x512xf32> to vector<1x1x4x512xf32>
    %c0_10 = arith.constant 0 : index
    %c0_11 = arith.constant 0 : index
    %c0_12 = arith.constant 0 : index
    %c0_13 = arith.constant 0 : index
    %12 = vector.load %arg6[%c0_10, %c0_11, %c0_12, %c0_13] : memref<1x1x4x512xf32, #tpu.memory_space<vmem>>, vector<1x1x4x512xf32>
    tpu.vector_store %arg6[%c0_10, %c0_11, %c0_12, %c0_13], %11 {strides = array<i32>} : memref<1x1x4x512xf32, #tpu.memory_space<vmem>>, vector<1x1x4x512xf32>,
    return
  }
  func.func @transform_0(%arg0: i32, %arg1: i32, %arg2: i32) -> (i32, i32, i32, i32) {
    %c0_i32 = arith.constant 0 : i32
    %c0_i32_0 = arith.constant 0 : i32
    return %arg0, %arg1, %c0_i32, %arg2 : i32, i32, i32, i32
  }
  func.func @transform_1(%arg0: i32, %arg1: i32, %arg2: i32) -> (i32, i32, i32) {
    %c0_i32 = arith.constant 0 : i32
    %c0_i32_0 = arith.constant 0 : i32
    %c0_i32_1 = arith.constant 0 : i32
    return %arg0, %c0_i32, %c0_i32_0 : i32, i32, i32
  }
  func.func @transform_2(%arg0: i32, %arg1: i32, %arg2: i32) -> (i32, i32, i32) {
    %c0_i32 = arith.constant 0 : i32
    %c0_i32_0 = arith.constant 0 : i32
    %c0_i32_1 = arith.constant 0 : i32
    return %arg0, %c0_i32, %c0_i32_0 : i32, i32, i32
  }
  func.func @transform_3(%arg0: i32, %arg1: i32, %arg2: i32) -> (i32, i32, i32, i32) {
    %c0_i32 = arith.constant 0 : i32
    %c0_i32_0 = arith.constant 0 : i32
    return %arg0, %arg1, %c0_i32, %arg2 : i32, i32, i32, i32
  }
}

module attributes {stable_mosaic.version = 11 : i64} {
  func.func @_gemm_bias_act_kernel(%arg0: i32, %arg1: i32, %arg2: i32, %arg3: memref<1x1x256x64xf32, #tpu.memory_space<vmem>>, %arg4: memref<1x8x256xf32, #tpu.memory_space<vmem>>, %arg5: memref<1x8x1xf32, #tpu.memory_space<vmem>>, %arg6: memref<1x1x8x64xf32, #tpu.memory_space<vmem>>) attributes {dimension_semantics = [#tpu.dimension_semantics<parallel>, #tpu.dimension_semantics<parallel>, #tpu.dimension_semantics<parallel>], iteration_bounds = array<i64: 3, 2, 1>, scalar_prefetch = 0 : i64, scratch_operands = 0 : i64, tpu.core_type = #tpu.core_type<tc>, window_params = [{transform_indices = @transform_0, window_bounds = array<i64: 1, 1, 256, 64>}, {transform_indices = @transform_1, window_bounds = array<i64: 1, 8, 256>}, {transform_indices = @transform_2, window_bounds = array<i64: 1, 8, 1>}, {transform_indices = @transform_3, window_bounds = array<i64: 1, 1, 8, 64>}]} {
    %c0 = arith.constant 0 : index
    %c0_0 = arith.constant 0 : index
    %c0_1 = arith.constant 0 : index
    %c0_2 = arith.constant 0 : index
    %0 = vector.load %arg3[%c0, %c0_0, %c0_1, %c0_2] : memref<1x1x256x64xf32, #tpu.memory_space<vmem>>, vector<1x1x256x64xf32>
    %1 = vector.shape_cast %0 : vector<1x1x256x64xf32> to vector<256x64xf32>
    %c0_3 = arith.constant 0 : index
    %c0_4 = arith.constant 0 : index
    %c0_5 = arith.constant 0 : index
    %2 = vector.load %arg4[%c0_3, %c0_4, %c0_5] : memref<1x8x256xf32, #tpu.memory_space<vmem>>, vector<1x8x256xf32>
    %3 = vector.shape_cast %2 : vector<1x8x256xf32> to vector<8x256xf32>
    %c0_6 = arith.constant 0 : index
    %c0_7 = arith.constant 0 : index
    %c0_8 = arith.constant 0 : index
    %4 = vector.load %arg5[%c0_6, %c0_7, %c0_8] : memref<1x8x1xf32, #tpu.memory_space<vmem>>, vector<1x8x1xf32>
    %5 = vector.shape_cast %4 : vector<1x8x1xf32> to vector<8x1xf32>
    %cst = arith.constant dense<0.000000e+00> : vector<8x64xf32>
    %6 = tpu.matmul %3, %1, %cst {dimension_numbers = #tpu.dot_dimension_numbers<[1], [0], [0], [1], [0, 0, 1, 1], [], []>} : vector<8x256xf32>, vector<256x64xf32>, vector<8x64xf32> -> vector<8x64xf32>
    %7 = vector.broadcast %5 : vector<8x1xf32> to vector<8x64xf32>
    %8 = arith.addf %6, %7 : vector<8x64xf32>
    %cst_9 = arith.constant 0.000000e+00 : f32
    %9 = vector.broadcast %cst_9 : f32 to vector<8x64xf32>
    %10 = arith.maximumf %8, %9 : vector<8x64xf32>
    %11 = vector.shape_cast %10 : vector<8x64xf32> to vector<1x1x8x64xf32>
    %c0_10 = arith.constant 0 : index
    %c0_11 = arith.constant 0 : index
    %c0_12 = arith.constant 0 : index
    %c0_13 = arith.constant 0 : index
    %12 = vector.load %arg6[%c0_10, %c0_11, %c0_12, %c0_13] : memref<1x1x8x64xf32, #tpu.memory_space<vmem>>, vector<1x1x8x64xf32>
    tpu.vector_store %arg6[%c0_10, %c0_11, %c0_12, %c0_13], %11 {strides = array<i32>} : memref<1x1x8x64xf32, #tpu.memory_space<vmem>>, vector<1x1x8x64xf32>,
    return
  }
  func.func @transform_0(%arg0: i32, %arg1: i32, %arg2: i32) -> (i32, i32, i32, i32) {
    %c0_i32 = arith.constant 0 : i32
    %c0_i32_0 = arith.constant 0 : i32
    return %arg0, %arg1, %c0_i32, %arg2 : i32, i32, i32, i32
  }
  func.func @transform_1(%arg0: i32, %arg1: i32, %arg2: i32) -> (i32, i32, i32) {
    %c0_i32 = arith.constant 0 : i32
    %c0_i32_0 = arith.constant 0 : i32
    %c0_i32_1 = arith.constant 0 : i32
    return %arg0, %c0_i32, %c0_i32_0 : i32, i32, i32
  }
  func.func @transform_2(%arg0: i32, %arg1: i32, %arg2: i32) -> (i32, i32, i32) {
    %c0_i32 = arith.constant 0 : i32
    %c0_i32_0 = arith.constant 0 : i32
    %c0_i32_1 = arith.constant 0 : i32
    return %arg0, %c0_i32, %c0_i32_0 : i32, i32, i32
  }
  func.func @transform_3(%arg0: i32, %arg1: i32, %arg2: i32) -> (i32, i32, i32, i32) {
    %c0_i32 = arith.constant 0 : i32
    %c0_i32_0 = arith.constant 0 : i32
    return %arg0, %arg1, %c0_i32, %arg2 : i32, i32, i32, i32
  }
}

module attributes {stable_mosaic.version = 11 : i64} {
  func.func @_gemm_bias_act_kernel(%arg0: i32, %arg1: i32, %arg2: i32, %arg3: memref<1x1x512x8xf32, #tpu.memory_space<vmem>>, %arg4: memref<1x16x512xf32, #tpu.memory_space<vmem>>, %arg5: memref<1x16x1xf32, #tpu.memory_space<vmem>>, %arg6: memref<1x1x16x8xf32, #tpu.memory_space<vmem>>) attributes {dimension_semantics = [#tpu.dimension_semantics<parallel>, #tpu.dimension_semantics<parallel>, #tpu.dimension_semantics<parallel>], iteration_bounds = array<i64: 3, 2, 1>, scalar_prefetch = 0 : i64, scratch_operands = 0 : i64, tpu.core_type = #tpu.core_type<tc>, window_params = [{transform_indices = @transform_0, window_bounds = array<i64: 1, 1, 512, 8>}, {transform_indices = @transform_1, window_bounds = array<i64: 1, 16, 512>}, {transform_indices = @transform_2, window_bounds = array<i64: 1, 16, 1>}, {transform_indices = @transform_3, window_bounds = array<i64: 1, 1, 16, 8>}]} {
    %c0 = arith.constant 0 : index
    %c0_0 = arith.constant 0 : index
    %c0_1 = arith.constant 0 : index
    %c0_2 = arith.constant 0 : index
    %0 = vector.load %arg3[%c0, %c0_0, %c0_1, %c0_2] : memref<1x1x512x8xf32, #tpu.memory_space<vmem>>, vector<1x1x512x8xf32>
    %1 = vector.shape_cast %0 : vector<1x1x512x8xf32> to vector<512x8xf32>
    %c0_3 = arith.constant 0 : index
    %c0_4 = arith.constant 0 : index
    %c0_5 = arith.constant 0 : index
    %2 = vector.load %arg4[%c0_3, %c0_4, %c0_5] : memref<1x16x512xf32, #tpu.memory_space<vmem>>, vector<1x16x512xf32>
    %3 = vector.shape_cast %2 : vector<1x16x512xf32> to vector<16x512xf32>
    %c0_6 = arith.constant 0 : index
    %c0_7 = arith.constant 0 : index
    %c0_8 = arith.constant 0 : index
    %4 = vector.load %arg5[%c0_6, %c0_7, %c0_8] : memref<1x16x1xf32, #tpu.memory_space<vmem>>, vector<1x16x1xf32>
    %5 = vector.shape_cast %4 : vector<1x16x1xf32> to vector<16x1xf32>
    %cst = arith.constant dense<0.000000e+00> : vector<16x8xf32>
    %6 = tpu.matmul %3, %1, %cst {dimension_numbers = #tpu.dot_dimension_numbers<[1], [0], [0], [1], [0, 0, 1, 1], [], []>} : vector<16x512xf32>, vector<512x8xf32>, vector<16x8xf32> -> vector<16x8xf32>
    %7 = vector.broadcast %5 : vector<16x1xf32> to vector<16x8xf32>
    %8 = arith.addf %6, %7 : vector<16x8xf32>
    %cst_9 = arith.constant 0.000000e+00 : f32
    %9 = vector.broadcast %cst_9 : f32 to vector<16x8xf32>
    %10 = arith.maximumf %8, %9 : vector<16x8xf32>
    %11 = vector.shape_cast %10 : vector<16x8xf32> to vector<1x1x16x8xf32>
    %c0_10 = arith.constant 0 : index
    %c0_11 = arith.constant 0 : index
    %c0_12 = arith.constant 0 : index
    %c0_13 = arith.constant 0 : index
    %12 = vector.load %arg6[%c0_10, %c0_11, %c0_12, %c0_13] : memref<1x1x16x8xf32, #tpu.memory_space<vmem>>, vector<1x1x16x8xf32>
    tpu.vector_store %arg6[%c0_10, %c0_11, %c0_12, %c0_13], %11 {strides = array<i32>} : memref<1x1x16x8xf32, #tpu.memory_space<vmem>>, vector<1x1x16x8xf32>,
    return
  }
  func.func @transform_0(%arg0: i32, %arg1: i32, %arg2: i32) -> (i32, i32, i32, i32) {
    %c0_i32 = arith.constant 0 : i32
    %c0_i32_0 = arith.constant 0 : i32
    return %arg0, %arg1, %c0_i32, %arg2 : i32, i32, i32, i32
  }
  func.func @transform_1(%arg0: i32, %arg1: i32, %arg2: i32) -> (i32, i32, i32) {
    %c0_i32 = arith.constant 0 : i32
    %c0_i32_0 = arith.constant 0 : i32
    %c0_i32_1 = arith.constant 0 : i32
    return %arg0, %c0_i32, %c0_i32_0 : i32, i32, i32
  }
  func.func @transform_2(%arg0: i32, %arg1: i32, %arg2: i32) -> (i32, i32, i32) {
    %c0_i32 = arith.constant 0 : i32
    %c0_i32_0 = arith.constant 0 : i32
    %c0_i32_1 = arith.constant 0 : i32
    return %arg0, %c0_i32, %c0_i32_0 : i32, i32, i32
  }
  func.func @transform_3(%arg0: i32, %arg1: i32, %arg2: i32) -> (i32, i32, i32, i32) {
    %c0_i32 = arith.constant 0 : i32
    %c0_i32_0 = arith.constant 0 : i32
    return %arg0, %arg1, %c0_i32, %arg2 : i32, i32, i32, i32
  }
}

module attributes {stable_mosaic.version = 11 : i64} {
  func.func @_gemm_bias_act_kernel(%arg0: i32, %arg1: i32, %arg2: i32, %arg3: memref<1x1x1024x1xf32, #tpu.memory_space<vmem>>, %arg4: memref<1x32x1024xf32, #tpu.memory_space<vmem>>, %arg5: memref<1x32x1xf32, #tpu.memory_space<vmem>>, %arg6: memref<1x1x32x1xf32, #tpu.memory_space<vmem>>) attributes {dimension_semantics = [#tpu.dimension_semantics<parallel>, #tpu.dimension_semantics<parallel>, #tpu.dimension_semantics<parallel>], iteration_bounds = array<i64: 3, 2, 1>, scalar_prefetch = 0 : i64, scratch_operands = 0 : i64, tpu.core_type = #tpu.core_type<tc>, window_params = [{transform_indices = @transform_0, window_bounds = array<i64: 1, 1, 1024, 1>}, {transform_indices = @transform_1, window_bounds = array<i64: 1, 32, 1024>}, {transform_indices = @transform_2, window_bounds = array<i64: 1, 32, 1>}, {transform_indices = @transform_3, window_bounds = array<i64: 1, 1, 32, 1>}]} {
    %c0 = arith.constant 0 : index
    %c0_0 = arith.constant 0 : index
    %c0_1 = arith.constant 0 : index
    %c0_2 = arith.constant 0 : index
    %0 = vector.load %arg3[%c0, %c0_0, %c0_1, %c0_2] : memref<1x1x1024x1xf32, #tpu.memory_space<vmem>>, vector<1x1x1024x1xf32>
    %1 = vector.shape_cast %0 : vector<1x1x1024x1xf32> to vector<1024x1xf32>
    %c0_3 = arith.constant 0 : index
    %c0_4 = arith.constant 0 : index
    %c0_5 = arith.constant 0 : index
    %2 = vector.load %arg4[%c0_3, %c0_4, %c0_5] : memref<1x32x1024xf32, #tpu.memory_space<vmem>>, vector<1x32x1024xf32>
    %3 = vector.shape_cast %2 : vector<1x32x1024xf32> to vector<32x1024xf32>
    %c0_6 = arith.constant 0 : index
    %c0_7 = arith.constant 0 : index
    %c0_8 = arith.constant 0 : index
    %4 = vector.load %arg5[%c0_6, %c0_7, %c0_8] : memref<1x32x1xf32, #tpu.memory_space<vmem>>, vector<1x32x1xf32>
    %5 = vector.shape_cast %4 : vector<1x32x1xf32> to vector<32x1xf32>
    %cst = arith.constant dense<0.000000e+00> : vector<32x1xf32>
    %6 = tpu.matmul %3, %1, %cst {dimension_numbers = #tpu.dot_dimension_numbers<[1], [0], [0], [1], [0, 0, 1, 1], [], []>} : vector<32x1024xf32>, vector<1024x1xf32>, vector<32x1xf32> -> vector<32x1xf32>
    %7 = arith.addf %6, %5 : vector<32x1xf32>
    %cst_9 = arith.constant 0.000000e+00 : f32
    %8 = vector.broadcast %cst_9 : f32 to vector<32x1xf32>
    %9 = arith.maximumf %7, %8 : vector<32x1xf32>
    %10 = vector.shape_cast %9 : vector<32x1xf32> to vector<1x1x32x1xf32>
    %c0_10 = arith.constant 0 : index
    %c0_11 = arith.constant 0 : index
    %c0_12 = arith.constant 0 : index
    %c0_13 = arith.constant 0 : index
    %11 = vector.load %arg6[%c0_10, %c0_11, %c0_12, %c0_13] : memref<1x1x32x1xf32, #tpu.memory_space<vmem>>, vector<1x1x32x1xf32>
    tpu.vector_store %arg6[%c0_10, %c0_11, %c0_12, %c0_13], %10 {strides = array<i32>} : memref<1x1x32x1xf32, #tpu.memory_space<vmem>>, vector<1x1x32x1xf32>,
    return
  }
  func.func @transform_0(%arg0: i32, %arg1: i32, %arg2: i32) -> (i32, i32, i32, i32) {
    %c0_i32 = arith.constant 0 : i32
    %c0_i32_0 = arith.constant 0 : i32
    return %arg0, %arg1, %c0_i32, %arg2 : i32, i32, i32, i32
  }
  func.func @transform_1(%arg0: i32, %arg1: i32, %arg2: i32) -> (i32, i32, i32) {
    %c0_i32 = arith.constant 0 : i32
    %c0_i32_0 = arith.constant 0 : i32
    %c0_i32_1 = arith.constant 0 : i32
    return %arg0, %c0_i32, %c0_i32_0 : i32, i32, i32
  }
  func.func @transform_2(%arg0: i32, %arg1: i32, %arg2: i32) -> (i32, i32, i32) {
    %c0_i32 = arith.constant 0 : i32
    %c0_i32_0 = arith.constant 0 : i32
    %c0_i32_1 = arith.constant 0 : i32
    return %arg0, %c0_i32, %c0_i32_0 : i32, i32, i32
  }
  func.func @transform_3(%arg0: i32, %arg1: i32, %arg2: i32) -> (i32, i32, i32, i32) {
    %c0_i32 = arith.constant 0 : i32
    %c0_i32_0 = arith.constant 0 : i32
    return %arg0, %arg1, %c0_i32, %arg2 : i32, i32, i32, i32
  }
}

module attributes {stable_mosaic.version = 11 : i64} {
  func.func @_gemm_bias_act_kernel(%arg0: i32, %arg1: i32, %arg2: i32, %arg3: memref<1x1x2048x8xf32, #tpu.memory_space<vmem>>, %arg4: memref<1x16x2048xf32, #tpu.memory_space<vmem>>, %arg5: memref<1x16x1xf32, #tpu.memory_space<vmem>>, %arg6: memref<1x1x16x8xf32, #tpu.memory_space<vmem>>) attributes {dimension_semantics = [#tpu.dimension_semantics<parallel>, #tpu.dimension_semantics<parallel>, #tpu.dimension_semantics<parallel>], iteration_bounds = array<i64: 3, 2, 1>, scalar_prefetch = 0 : i64, scratch_operands = 0 : i64, tpu.core_type = #tpu.core_type<tc>, window_params = [{transform_indices = @transform_0, window_bounds = array<i64: 1, 1, 2048, 8>}, {transform_indices = @transform_1, window_bounds = array<i64: 1, 16, 2048>}, {transform_indices = @transform_2, window_bounds = array<i64: 1, 16, 1>}, {transform_indices = @transform_3, window_bounds = array<i64: 1, 1, 16, 8>}]} {
    %c0 = arith.constant 0 : index
    %c0_0 = arith.constant 0 : index
    %c0_1 = arith.constant 0 : index
    %c0_2 = arith.constant 0 : index
    %0 = vector.load %arg3[%c0, %c0_0, %c0_1, %c0_2] : memref<1x1x2048x8xf32, #tpu.memory_space<vmem>>, vector<1x1x2048x8xf32>
    %1 = vector.shape_cast %0 : vector<1x1x2048x8xf32> to vector<2048x8xf32>
    %c0_3 = arith.constant 0 : index
    %c0_4 = arith.constant 0 : index
    %c0_5 = arith.constant 0 : index
    %2 = vector.load %arg4[%c0_3, %c0_4, %c0_5] : memref<1x16x2048xf32, #tpu.memory_space<vmem>>, vector<1x16x2048xf32>
    %3 = vector.shape_cast %2 : vector<1x16x2048xf32> to vector<16x2048xf32>
    %c0_6 = arith.constant 0 : index
    %c0_7 = arith.constant 0 : index
    %c0_8 = arith.constant 0 : index
    %4 = vector.load %arg5[%c0_6, %c0_7, %c0_8] : memref<1x16x1xf32, #tpu.memory_space<vmem>>, vector<1x16x1xf32>
    %5 = vector.shape_cast %4 : vector<1x16x1xf32> to vector<16x1xf32>
    %cst = arith.constant dense<0.000000e+00> : vector<16x8xf32>
    %6 = tpu.matmul %3, %1, %cst {dimension_numbers = #tpu.dot_dimension_numbers<[1], [0], [0], [1], [0, 0, 1, 1], [], []>} : vector<16x2048xf32>, vector<2048x8xf32>, vector<16x8xf32> -> vector<16x8xf32>
    %7 = vector.broadcast %5 : vector<16x1xf32> to vector<16x8xf32>
    %8 = arith.addf %6, %7 : vector<16x8xf32>
    %cst_9 = arith.constant 0.000000e+00 : f32
    %9 = vector.broadcast %cst_9 : f32 to vector<16x8xf32>
    %10 = arith.maximumf %8, %9 : vector<16x8xf32>
    %11 = vector.shape_cast %10 : vector<16x8xf32> to vector<1x1x16x8xf32>
    %c0_10 = arith.constant 0 : index
    %c0_11 = arith.constant 0 : index
    %c0_12 = arith.constant 0 : index
    %c0_13 = arith.constant 0 : index
    %12 = vector.load %arg6[%c0_10, %c0_11, %c0_12, %c0_13] : memref<1x1x16x8xf32, #tpu.memory_space<vmem>>, vector<1x1x16x8xf32>
    tpu.vector_store %arg6[%c0_10, %c0_11, %c0_12, %c0_13], %11 {strides = array<i32>} : memref<1x1x16x8xf32, #tpu.memory_space<vmem>>, vector<1x1x16x8xf32>,
    return
  }
  func.func @transform_0(%arg0: i32, %arg1: i32, %arg2: i32) -> (i32, i32, i32, i32) {
    %c0_i32 = arith.constant 0 : i32
    %c0_i32_0 = arith.constant 0 : i32
    return %arg0, %arg1, %c0_i32, %arg2 : i32, i32, i32, i32
  }
  func.func @transform_1(%arg0: i32, %arg1: i32, %arg2: i32) -> (i32, i32, i32) {
    %c0_i32 = arith.constant 0 : i32
    %c0_i32_0 = arith.constant 0 : i32
    %c0_i32_1 = arith.constant 0 : i32
    return %arg0, %c0_i32, %c0_i32_0 : i32, i32, i32
  }
  func.func @transform_2(%arg0: i32, %arg1: i32, %arg2: i32) -> (i32, i32, i32) {
    %c0_i32 = arith.constant 0 : i32
    %c0_i32_0 = arith.constant 0 : i32
    %c0_i32_1 = arith.constant 0 : i32
    return %arg0, %c0_i32, %c0_i32_0 : i32, i32, i32
  }
  func.func @transform_3(%arg0: i32, %arg1: i32, %arg2: i32) -> (i32, i32, i32, i32) {
    %c0_i32 = arith.constant 0 : i32
    %c0_i32_0 = arith.constant 0 : i32
    return %arg0, %arg1, %c0_i32, %arg2 : i32, i32, i32, i32
  }
}

module attributes {stable_mosaic.version = 11 : i64} {
  func.func @_gemm_bias_act_kernel(%arg0: i32, %arg1: i32, %arg2: i32, %arg3: memref<1x1x1024x64xf32, #tpu.memory_space<vmem>>, %arg4: memref<1x8x1024xf32, #tpu.memory_space<vmem>>, %arg5: memref<1x8x1xf32, #tpu.memory_space<vmem>>, %arg6: memref<1x1x8x64xf32, #tpu.memory_space<vmem>>) attributes {dimension_semantics = [#tpu.dimension_semantics<parallel>, #tpu.dimension_semantics<parallel>, #tpu.dimension_semantics<parallel>], iteration_bounds = array<i64: 3, 2, 1>, scalar_prefetch = 0 : i64, scratch_operands = 0 : i64, tpu.core_type = #tpu.core_type<tc>, window_params = [{transform_indices = @transform_0, window_bounds = array<i64: 1, 1, 1024, 64>}, {transform_indices = @transform_1, window_bounds = array<i64: 1, 8, 1024>}, {transform_indices = @transform_2, window_bounds = array<i64: 1, 8, 1>}, {transform_indices = @transform_3, window_bounds = array<i64: 1, 1, 8, 64>}]} {
    %c0 = arith.constant 0 : index
    %c0_0 = arith.constant 0 : index
    %c0_1 = arith.constant 0 : index
    %c0_2 = arith.constant 0 : index
    %0 = vector.load %arg3[%c0, %c0_0, %c0_1, %c0_2] : memref<1x1x1024x64xf32, #tpu.memory_space<vmem>>, vector<1x1x1024x64xf32>
    %1 = vector.shape_cast %0 : vector<1x1x1024x64xf32> to vector<1024x64xf32>
    %c0_3 = arith.constant 0 : index
    %c0_4 = arith.constant 0 : index
    %c0_5 = arith.constant 0 : index
    %2 = vector.load %arg4[%c0_3, %c0_4, %c0_5] : memref<1x8x1024xf32, #tpu.memory_space<vmem>>, vector<1x8x1024xf32>
    %3 = vector.shape_cast %2 : vector<1x8x1024xf32> to vector<8x1024xf32>
    %c0_6 = arith.constant 0 : index
    %c0_7 = arith.constant 0 : index
    %c0_8 = arith.constant 0 : index
    %4 = vector.load %arg5[%c0_6, %c0_7, %c0_8] : memref<1x8x1xf32, #tpu.memory_space<vmem>>, vector<1x8x1xf32>
    %5 = vector.shape_cast %4 : vector<1x8x1xf32> to vector<8x1xf32>
    %cst = arith.constant dense<0.000000e+00> : vector<8x64xf32>
    %6 = tpu.matmul %3, %1, %cst {dimension_numbers = #tpu.dot_dimension_numbers<[1], [0], [0], [1], [0, 0, 1, 1], [], []>} : vector<8x1024xf32>, vector<1024x64xf32>, vector<8x64xf32> -> vector<8x64xf32>
    %7 = vector.broadcast %5 : vector<8x1xf32> to vector<8x64xf32>
    %8 = arith.addf %6, %7 : vector<8x64xf32>
    %cst_9 = arith.constant 0.000000e+00 : f32
    %9 = vector.broadcast %cst_9 : f32 to vector<8x64xf32>
    %10 = arith.maximumf %8, %9 : vector<8x64xf32>
    %11 = vector.shape_cast %10 : vector<8x64xf32> to vector<1x1x8x64xf32>
    %c0_10 = arith.constant 0 : index
    %c0_11 = arith.constant 0 : index
    %c0_12 = arith.constant 0 : index
    %c0_13 = arith.constant 0 : index
    %12 = vector.load %arg6[%c0_10, %c0_11, %c0_12, %c0_13] : memref<1x1x8x64xf32, #tpu.memory_space<vmem>>, vector<1x1x8x64xf32>
    tpu.vector_store %arg6[%c0_10, %c0_11, %c0_12, %c0_13], %11 {strides = array<i32>} : memref<1x1x8x64xf32, #tpu.memory_space<vmem>>, vector<1x1x8x64xf32>,
    return
  }
  func.func @transform_0(%arg0: i32, %arg1: i32, %arg2: i32) -> (i32, i32, i32, i32) {
    %c0_i32 = arith.constant 0 : i32
    %c0_i32_0 = arith.constant 0 : i32
    return %arg0, %arg1, %c0_i32, %arg2 : i32, i32, i32, i32
  }
  func.func @transform_1(%arg0: i32, %arg1: i32, %arg2: i32) -> (i32, i32, i32) {
    %c0_i32 = arith.constant 0 : i32
    %c0_i32_0 = arith.constant 0 : i32
    %c0_i32_1 = arith.constant 0 : i32
    return %arg0, %c0_i32, %c0_i32_0 : i32, i32, i32
  }
  func.func @transform_2(%arg0: i32, %arg1: i32, %arg2: i32) -> (i32, i32, i32) {
    %c0_i32 = arith.constant 0 : i32
    %c0_i32_0 = arith.constant 0 : i32
    %c0_i32_1 = arith.constant 0 : i32
    return %arg0, %c0_i32, %c0_i32_0 : i32, i32, i32
  }
  func.func @transform_3(%arg0: i32, %arg1: i32, %arg2: i32) -> (i32, i32, i32, i32) {
    %c0_i32 = arith.constant 0 : i32
    %c0_i32_0 = arith.constant 0 : i32
    return %arg0, %arg1, %c0_i32, %arg2 : i32, i32, i32, i32
  }
}

module attributes {stable_mosaic.version = 11 : i64} {
  func.func @_gemm_bias_act_kernel(%arg0: i32, %arg1: i32, %arg2: i32, %arg3: memref<1x1x512x512xf32, #tpu.memory_space<vmem>>, %arg4: memref<1x4x512xf32, #tpu.memory_space<vmem>>, %arg5: memref<1x4x1xf32, #tpu.memory_space<vmem>>, %arg6: memref<1x1x4x512xf32, #tpu.memory_space<vmem>>) attributes {dimension_semantics = [#tpu.dimension_semantics<parallel>, #tpu.dimension_semantics<parallel>, #tpu.dimension_semantics<parallel>], iteration_bounds = array<i64: 3, 2, 1>, scalar_prefetch = 0 : i64, scratch_operands = 0 : i64, tpu.core_type = #tpu.core_type<tc>, window_params = [{transform_indices = @transform_0, window_bounds = array<i64: 1, 1, 512, 512>}, {transform_indices = @transform_1, window_bounds = array<i64: 1, 4, 512>}, {transform_indices = @transform_2, window_bounds = array<i64: 1, 4, 1>}, {transform_indices = @transform_3, window_bounds = array<i64: 1, 1, 4, 512>}]} {
    %c0 = arith.constant 0 : index
    %c0_0 = arith.constant 0 : index
    %c0_1 = arith.constant 0 : index
    %c0_2 = arith.constant 0 : index
    %0 = vector.load %arg3[%c0, %c0_0, %c0_1, %c0_2] : memref<1x1x512x512xf32, #tpu.memory_space<vmem>>, vector<1x1x512x512xf32>
    %1 = vector.shape_cast %0 : vector<1x1x512x512xf32> to vector<512x512xf32>
    %c0_3 = arith.constant 0 : index
    %c0_4 = arith.constant 0 : index
    %c0_5 = arith.constant 0 : index
    %2 = vector.load %arg4[%c0_3, %c0_4, %c0_5] : memref<1x4x512xf32, #tpu.memory_space<vmem>>, vector<1x4x512xf32>
    %3 = vector.shape_cast %2 : vector<1x4x512xf32> to vector<4x512xf32>
    %c0_6 = arith.constant 0 : index
    %c0_7 = arith.constant 0 : index
    %c0_8 = arith.constant 0 : index
    %4 = vector.load %arg5[%c0_6, %c0_7, %c0_8] : memref<1x4x1xf32, #tpu.memory_space<vmem>>, vector<1x4x1xf32>
    %5 = vector.shape_cast %4 : vector<1x4x1xf32> to vector<4x1xf32>
    %cst = arith.constant dense<0.000000e+00> : vector<4x512xf32>
    %6 = tpu.matmul %3, %1, %cst {dimension_numbers = #tpu.dot_dimension_numbers<[1], [0], [0], [1], [0, 0, 1, 1], [], []>} : vector<4x512xf32>, vector<512x512xf32>, vector<4x512xf32> -> vector<4x512xf32>
    %7 = vector.broadcast %5 : vector<4x1xf32> to vector<4x512xf32>
    %8 = arith.addf %6, %7 : vector<4x512xf32>
    %cst_9 = arith.constant 0.000000e+00 : f32
    %9 = vector.broadcast %cst_9 : f32 to vector<4x512xf32>
    %10 = arith.maximumf %8, %9 : vector<4x512xf32>
    %11 = vector.shape_cast %10 : vector<4x512xf32> to vector<1x1x4x512xf32>
    %c0_10 = arith.constant 0 : index
    %c0_11 = arith.constant 0 : index
    %c0_12 = arith.constant 0 : index
    %c0_13 = arith.constant 0 : index
    %12 = vector.load %arg6[%c0_10, %c0_11, %c0_12, %c0_13] : memref<1x1x4x512xf32, #tpu.memory_space<vmem>>, vector<1x1x4x512xf32>
    tpu.vector_store %arg6[%c0_10, %c0_11, %c0_12, %c0_13], %11 {strides = array<i32>} : memref<1x1x4x512xf32, #tpu.memory_space<vmem>>, vector<1x1x4x512xf32>,
    return
  }
  func.func @transform_0(%arg0: i32, %arg1: i32, %arg2: i32) -> (i32, i32, i32, i32) {
    %c0_i32 = arith.constant 0 : i32
    %c0_i32_0 = arith.constant 0 : i32
    return %arg0, %arg1, %c0_i32, %arg2 : i32, i32, i32, i32
  }
  func.func @transform_1(%arg0: i32, %arg1: i32, %arg2: i32) -> (i32, i32, i32) {
    %c0_i32 = arith.constant 0 : i32
    %c0_i32_0 = arith.constant 0 : i32
    %c0_i32_1 = arith.constant 0 : i32
    return %arg0, %c0_i32, %c0_i32_0 : i32, i32, i32
  }
  func.func @transform_2(%arg0: i32, %arg1: i32, %arg2: i32) -> (i32, i32, i32) {
    %c0_i32 = arith.constant 0 : i32
    %c0_i32_0 = arith.constant 0 : i32
    %c0_i32_1 = arith.constant 0 : i32
    return %arg0, %c0_i32, %c0_i32_0 : i32, i32, i32
  }
  func.func @transform_3(%arg0: i32, %arg1: i32, %arg2: i32) -> (i32, i32, i32, i32) {
    %c0_i32 = arith.constant 0 : i32
    %c0_i32_0 = arith.constant 0 : i32
    return %arg0, %arg1, %c0_i32, %arg2 : i32, i32, i32, i32
  }
}

module attributes {stable_mosaic.version = 11 : i64} {
  func.func @_gemm_bias_act_kernel(%arg0: i32, %arg1: i32, %arg2: i32, %arg3: memref<1x1x256x2048xf32, #tpu.memory_space<vmem>>, %arg4: memref<1x2x256xf32, #tpu.memory_space<vmem>>, %arg5: memref<1x2x1xf32, #tpu.memory_space<vmem>>, %arg6: memref<1x1x2x2048xf32, #tpu.memory_space<vmem>>) attributes {dimension_semantics = [#tpu.dimension_semantics<parallel>, #tpu.dimension_semantics<parallel>, #tpu.dimension_semantics<parallel>], iteration_bounds = array<i64: 3, 2, 2>, scalar_prefetch = 0 : i64, scratch_operands = 0 : i64, tpu.core_type = #tpu.core_type<tc>, window_params = [{transform_indices = @transform_0, window_bounds = array<i64: 1, 1, 256, 2048>}, {transform_indices = @transform_1, window_bounds = array<i64: 1, 2, 256>}, {transform_indices = @transform_2, window_bounds = array<i64: 1, 2, 1>}, {transform_indices = @transform_3, window_bounds = array<i64: 1, 1, 2, 2048>}]} {
    %c0 = arith.constant 0 : index
    %c0_0 = arith.constant 0 : index
    %c0_1 = arith.constant 0 : index
    %c0_2 = arith.constant 0 : index
    %0 = vector.load %arg3[%c0, %c0_0, %c0_1, %c0_2] : memref<1x1x256x2048xf32, #tpu.memory_space<vmem>>, vector<1x1x256x2048xf32>
    %1 = vector.shape_cast %0 : vector<1x1x256x2048xf32> to vector<256x2048xf32>
    %c0_3 = arith.constant 0 : index
    %c0_4 = arith.constant 0 : index
    %c0_5 = arith.constant 0 : index
    %2 = vector.load %arg4[%c0_3, %c0_4, %c0_5] : memref<1x2x256xf32, #tpu.memory_space<vmem>>, vector<1x2x256xf32>
    %3 = vector.shape_cast %2 : vector<1x2x256xf32> to vector<2x256xf32>
    %c0_6 = arith.constant 0 : index
    %c0_7 = arith.constant 0 : index
    %c0_8 = arith.constant 0 : index
    %4 = vector.load %arg5[%c0_6, %c0_7, %c0_8] : memref<1x2x1xf32, #tpu.memory_space<vmem>>, vector<1x2x1xf32>
    %5 = vector.shape_cast %4 : vector<1x2x1xf32> to vector<2x1xf32>
    %cst = arith.constant dense<0.000000e+00> : vector<2x2048xf32>
    %6 = tpu.matmul %3, %1, %cst {dimension_numbers = #tpu.dot_dimension_numbers<[1], [0], [0], [1], [0, 0, 1, 1], [], []>} : vector<2x256xf32>, vector<256x2048xf32>, vector<2x2048xf32> -> vector<2x2048xf32>
    %7 = vector.broadcast %5 : vector<2x1xf32> to vector<2x2048xf32>
    %8 = arith.addf %6, %7 : vector<2x2048xf32>
    %cst_9 = arith.constant 0.000000e+00 : f32
    %9 = vector.broadcast %cst_9 : f32 to vector<2x2048xf32>
    %10 = arith.maximumf %8, %9 : vector<2x2048xf32>
    %11 = vector.shape_cast %10 : vector<2x2048xf32> to vector<1x1x2x2048xf32>
    %c0_10 = arith.constant 0 : index
    %c0_11 = arith.constant 0 : index
    %c0_12 = arith.constant 0 : index
    %c0_13 = arith.constant 0 : index
    %12 = vector.load %arg6[%c0_10, %c0_11, %c0_12, %c0_13] : memref<1x1x2x2048xf32, #tpu.memory_space<vmem>>, vector<1x1x2x2048xf32>
    tpu.vector_store %arg6[%c0_10, %c0_11, %c0_12, %c0_13], %11 {strides = array<i32>} : memref<1x1x2x2048xf32, #tpu.memory_space<vmem>>, vector<1x1x2x2048xf32>,
    return
  }
  func.func @transform_0(%arg0: i32, %arg1: i32, %arg2: i32) -> (i32, i32, i32, i32) {
    %c0_i32 = arith.constant 0 : i32
    %c0_i32_0 = arith.constant 0 : i32
    return %arg0, %arg1, %c0_i32, %arg2 : i32, i32, i32, i32
  }
  func.func @transform_1(%arg0: i32, %arg1: i32, %arg2: i32) -> (i32, i32, i32) {
    %c0_i32 = arith.constant 0 : i32
    %c0_i32_0 = arith.constant 0 : i32
    %c0_i32_1 = arith.constant 0 : i32
    return %arg0, %c0_i32, %c0_i32_0 : i32, i32, i32
  }
  func.func @transform_2(%arg0: i32, %arg1: i32, %arg2: i32) -> (i32, i32, i32) {
    %c0_i32 = arith.constant 0 : i32
    %c0_i32_0 = arith.constant 0 : i32
    %c0_i32_1 = arith.constant 0 : i32
    return %arg0, %c0_i32, %c0_i32_0 : i32, i32, i32
  }
  func.func @transform_3(%arg0: i32, %arg1: i32, %arg2: i32) -> (i32, i32, i32, i32) {
    %c0_i32 = arith.constant 0 : i32
    %c0_i32_0 = arith.constant 0 : i32
    return %arg0, %arg1, %c0_i32, %arg2 : i32, i32, i32, i32
  }
}

module attributes {stable_mosaic.version = 11 : i64} {
  func.func @_gemm_bias_act_kernel(%arg0: i32, %arg1: i32, %arg2: i32, %arg3: memref<1x1x54x2048xf32, #tpu.memory_space<vmem>>, %arg4: memref<1x2x54xf32, #tpu.memory_space<vmem>>, %arg5: memref<1x2x1xf32, #tpu.memory_space<vmem>>, %arg6: memref<1x1x2x2048xf32, #tpu.memory_space<vmem>>) attributes {dimension_semantics = [#tpu.dimension_semantics<parallel>, #tpu.dimension_semantics<parallel>, #tpu.dimension_semantics<parallel>], iteration_bounds = array<i64: 3, 2, 2>, scalar_prefetch = 0 : i64, scratch_operands = 0 : i64, tpu.core_type = #tpu.core_type<tc>, window_params = [{transform_indices = @transform_0, window_bounds = array<i64: 1, 1, 54, 2048>}, {transform_indices = @transform_1, window_bounds = array<i64: 1, 2, 54>}, {transform_indices = @transform_2, window_bounds = array<i64: 1, 2, 1>}, {transform_indices = @transform_3, window_bounds = array<i64: 1, 1, 2, 2048>}]} {
    %c0 = arith.constant 0 : index
    %c0_0 = arith.constant 0 : index
    %c0_1 = arith.constant 0 : index
    %c0_2 = arith.constant 0 : index
    %0 = vector.load %arg3[%c0, %c0_0, %c0_1, %c0_2] : memref<1x1x54x2048xf32, #tpu.memory_space<vmem>>, vector<1x1x54x2048xf32>
    %1 = vector.shape_cast %0 : vector<1x1x54x2048xf32> to vector<54x2048xf32>
    %c0_3 = arith.constant 0 : index
    %c0_4 = arith.constant 0 : index
    %c0_5 = arith.constant 0 : index
    %2 = vector.load %arg4[%c0_3, %c0_4, %c0_5] : memref<1x2x54xf32, #tpu.memory_space<vmem>>, vector<1x2x54xf32>
    %3 = vector.shape_cast %2 : vector<1x2x54xf32> to vector<2x54xf32>
    %c0_6 = arith.constant 0 : index
    %c0_7 = arith.constant 0 : index
    %c0_8 = arith.constant 0 : index
    %4 = vector.load %arg5[%c0_6, %c0_7, %c0_8] : memref<1x2x1xf32, #tpu.memory_space<vmem>>, vector<1x2x1xf32>
    %5 = vector.shape_cast %4 : vector<1x2x1xf32> to vector<2x1xf32>
    %cst = arith.constant dense<0.000000e+00> : vector<2x2048xf32>
    %6 = tpu.matmul %3, %1, %cst {dimension_numbers = #tpu.dot_dimension_numbers<[1], [0], [0], [1], [0, 0, 1, 1], [], []>} : vector<2x54xf32>, vector<54x2048xf32>, vector<2x2048xf32> -> vector<2x2048xf32>
    %7 = vector.broadcast %5 : vector<2x1xf32> to vector<2x2048xf32>
    %8 = arith.addf %6, %7 : vector<2x2048xf32>
    %cst_9 = arith.constant 0.000000e+00 : f32
    %9 = vector.broadcast %cst_9 : f32 to vector<2x2048xf32>
    %10 = arith.subf %9, %8 : vector<2x2048xf32>
    %11 = math.exp %10 : vector<2x2048xf32>
    %cst_10 = arith.constant 1.000000e+00 : f32
    %12 = vector.broadcast %cst_10 : f32 to vector<2x2048xf32>
    %13 = arith.addf %12, %11 : vector<2x2048xf32>
    %cst_11 = arith.constant 1.000000e+00 : f32
    %14 = vector.broadcast %cst_11 : f32 to vector<2x2048xf32>
    %15 = arith.divf %14, %13 : vector<2x2048xf32>
    %16 = vector.shape_cast %15 : vector<2x2048xf32> to vector<1x1x2x2048xf32>
    %c0_12 = arith.constant 0 : index
    %c0_13 = arith.constant 0 : index
    %c0_14 = arith.constant 0 : index
    %c0_15 = arith.constant 0 : index
    %17 = vector.load %arg6[%c0_12, %c0_13, %c0_14, %c0_15] : memref<1x1x2x2048xf32, #tpu.memory_space<vmem>>, vector<1x1x2x2048xf32>
    tpu.vector_store %arg6[%c0_12, %c0_13, %c0_14, %c0_15], %16 {strides = array<i32>} : memref<1x1x2x2048xf32, #tpu.memory_space<vmem>>, vector<1x1x2x2048xf32>,
    return
  }
  func.func @transform_0(%arg0: i32, %arg1: i32, %arg2: i32) -> (i32, i32, i32, i32) {
    %c0_i32 = arith.constant 0 : i32
    %c0_i32_0 = arith.constant 0 : i32
    return %arg0, %arg1, %c0_i32, %arg2 : i32, i32, i32, i32
  }
  func.func @transform_1(%arg0: i32, %arg1: i32, %arg2: i32) -> (i32, i32, i32) {
    %c0_i32 = arith.constant 0 : i32
    %c0_i32_0 = arith.constant 0 : i32
    %c0_i32_1 = arith.constant 0 : i32
    return %arg0, %c0_i32, %c0_i32_0 : i32, i32, i32
  }
  func.func @transform_2(%arg0: i32, %arg1: i32, %arg2: i32) -> (i32, i32, i32) {
    %c0_i32 = arith.constant 0 : i32
    %c0_i32_0 = arith.constant 0 : i32
    %c0_i32_1 = arith.constant 0 : i32
    return %arg0, %c0_i32, %c0_i32_0 : i32, i32, i32
  }
  func.func @transform_3(%arg0: i32, %arg1: i32, %arg2: i32) -> (i32, i32, i32, i32) {
    %c0_i32 = arith.constant 0 : i32
    %c0_i32_0 = arith.constant 0 : i32
    return %arg0, %arg1, %c0_i32, %arg2 : i32, i32, i32, i32
  }
}

</mosaic_0001>

<bundles_post_ra>
// kernel: rmasknet_forward.9
= control target key start
LH: loop header
LB: loop body
LE: loop exit
PB: predicated region body
PF: predicated region fallthrough
CT: control target
= control target key end

     0   :  { %s761_s12 = smov 0   ;;  %s763_s13 = smov 0   ;;  %s897_s0 = inlined_call_operand.vmem [shape: f32[3,2,128,512], index: 0, kind: input, shape index: {}]   ;;  %s898_s1 = inlined_call_operand.vmem [shape: f32[3,4,128], index: 1, kind: input, shape index: {}]   ;;  %s899_s2 = inlined_call_operand.vmem [shape: f32[3,4,1], index: 2, kind: input, shape index: {}]   ;;  %s900_s3 = inlined_call_operand.vmem [shape: f32[3,2,4,512], index: 3, kind: output, shape index: {}]  }
   0x1   :  { %s765_s14 = smov 0   ;;  %s767_s15 = smov 0  }
   0x2   :  { %s769_s16 = smov 0  }
   0x3 LB: > { %s28_s17 = sadd.s32 1, %s729_s14  ;;  %s32_s18 = sadd.s32 1, %s733_s15  ;;  %s737_s16 = sphi %s769_s16, %s13_s16   ;;  %s733_s15 = sphi %s767_s15, %s904_s15   ;;  %s729_s14 = sphi %s765_s14, %s903_s14   ;;  %s725_s13 = sphi %s763_s13, %s902_s13   ;;  %s721_s12 = sphi %s761_s12, %s901_s12  }
   0x4   : > { %p30_p0 = scmp.ge.s32.totalorder %s28_s17, 2  ;;  %p645_p1 = scmp.ge.s32.totalorder %s737_s16, 1 }
   0x5   : > { %p191_p2 = scmp.lt.s32.totalorder %s737_s16, 7 }
   0x6   : > { %s906_s17 = smov (%p30_p0, %s28_s17), 0  ;;  %s908_s18 = smov (!%p30_p0, %s32_s18), %s733_s15 }
   0x7   : > { %p192_p3 = pnand %p645_p1, %p191_p2  ;;  %p34_p4 = scmp.ge.s32.totalorder %s908_s18, 3 }
   0x8   : > { %p240_p5 = scmp.lt.s32.totalorder (!%p192_p3), %s725_s13, 2  ;;  %p242_p6 = scmp.lt.s32.totalorder (!%p192_p3), %s721_s12, 1 }
   0x9   : > { %s910_s18 = smov (%p34_p4, %s908_s18), 0  ;;  %195 = sbr.rel (%p192_p3) target bundleno = 254 (0xfe), region = 32 }
   0xe   : > { %v739_v0 = vmov 0.0   ;;  %s912_s13 = smov (!%p240_p5, %s725_s13), 2  ;;  %v740_v1 = vmov 0   ;;  %s914_s12 = smov (!%p242_p6, %s721_s12), 1 }
   0xf   : > { %410 = vmatprep.mubr.f32.mxu0 %v739_v0  ;;  %481 = vmatprep.mubr.f32.mxu1 %v739_v0  ;;  %s647_s19 = sshll.u32 %s912_s13, 7  ;;  %s646_s20 = sshll.u32 %s914_s12, 6 }
  0x10   : > { %698 = vset.pattern.permute.xlu0 %v740_v1  ;;  %s649_s21 = sshll.u32 %s912_s13, 2  ;;  %s249_s22 = sadd.s32 %s647_s19, %s646_s20 }
  0x11   : > { %s260_s25 = scalar_lea.vmem %s899_s2, %s649_s21  ;;  %s648_s26 = sshll.u32 %s249_s22, 3 }
  0x12   : > { %v340_v2 = vld [vmem:[%s260_s25] sm:$0xf]  ;;  %s806_s29 = scalar_lea.vmem %s897_s0, %s648_s26  ;;  %s256_s5 = scalar_lea.vmem %s898_s1, %s649_s21 }
  0x13   : > { %343 = vperm.xlu0 %698, %v340_v2   ;;  %v336_v3 = vld [vmem:[%s806_s29 + $0x1e8] sm:$0xff]  ;;  %v338_v4 = vld [vmem:[%s806_s29 + $0x1f8] sm:$0xff]  ;;  %v335_v5 = vld [vmem:[%s806_s29 + $0x1e0] sm:$0xff]  ;;  %s651_s6 = sshll.u32 %s914_s12, 2  ;;  %s652_s7 = sshll.u32 %s912_s13, 3 }
  0x14   : > { %346 = vmatprep.subr.mxu0 %v336_v3  ;;  %417 = vmatprep.subr.mxu1 %v338_v4  ;;  %v337_v6 = vld [vmem:[%s806_s29 + $0x1f0] sm:$0xff]  ;;  %v332_v7 = vld [vmem:[%s806_s29 + $0x1c8] sm:$0xff]  ;;  %v334_v8 = vld [vmem:[%s806_s29 + $0x1d8] sm:$0xff]  ;;  %s271_s8 = sadd.s32 %s652_s7, %s651_s6 }
  0x15   : > { %347 = vmatpush1.msra.mxu0 %v335_v5  ;;  %418 = vmatpush1.msra.mxu1 %v337_v6  ;;  %v331_v9 = vld [vmem:[%s806_s29 + $0x1c0] sm:$0xff]  ;;  %v333_v10 = vld [vmem:[%s806_s29 + $0x1d0] sm:$0xff]  ;;  %v328_v11 = vld [vmem:[%s806_s29 + $0x1a8] sm:$0xff]  ;;  %s653_s9 = sshll.u32 %s271_s8, 2 }
  0x16   : > { %348 = vmatprep.subr.mxu0 %v332_v7  ;;  %419 = vmatprep.subr.mxu1 %v334_v8  ;;  %v330_v12 = vld [vmem:[%s806_s29 + $0x1b8] sm:$0xff]  ;;  %v327_v13 = vld [vmem:[%s806_s29 + $0x1a0] sm:$0xff]  ;;  %v329_v14 = vld [vmem:[%s806_s29 + $0x1b0] sm:$0xff]  ;;  %s273_s12 = scalar_lea.vmem %s900_s3, %s653_s9 }
  0x17   : > { %349 = vmatpush1.msra.mxu0 %v331_v9  ;;  %420 = vmatpush1.msra.mxu1 %v333_v10  ;;  %v324_v15 = vld [vmem:[%s806_s29 + $0x188] sm:$0xff]  ;;  %v326_v16 = vld [vmem:[%s806_s29 + $0x198] sm:$0xff]  ;;  %v323_v17 = vld [vmem:[%s806_s29 + $0x180] sm:$0xff] }
  0x18   : > { %350 = vmatprep.subr.mxu0 %v328_v11  ;;  %421 = vmatprep.subr.mxu1 %v330_v12  ;;  %v325_v18 = vld [vmem:[%s806_s29 + $0x190] sm:$0xff]  ;;  %v320_v19 = vld [vmem:[%s806_s29 + $0x168] sm:$0xff]  ;;  %v322_v20 = vld [vmem:[%s806_s29 + $0x178] sm:$0xff] }
  0x19   : > { %351 = vmatpush1.msra.mxu0 %v327_v13  ;;  %422 = vmatpush1.msra.mxu1 %v329_v14  ;;  %v319_v21 = vld [vmem:[%s806_s29 + $0x160] sm:$0xff]  ;;  %v321_v22 = vld [vmem:[%s806_s29 + $0x170] sm:$0xff]  ;;  %v316_v23 = vld [vmem:[%s806_s29 + $0x148] sm:$0xff] }
  0x1a   : > { %352 = vmatprep.subr.mxu0 %v324_v15  ;;  %423 = vmatprep.subr.mxu1 %v326_v16  ;;  %v318_v24 = vld [vmem:[%s806_s29 + $0x158] sm:$0xff]  ;;  %v315_v25 = vld [vmem:[%s806_s29 + $0x140] sm:$0xff]  ;;  %v317_v26 = vld [vmem:[%s806_s29 + $0x150] sm:$0xff] }
  0x1b   : > { %353 = vmatpush1.msra.mxu0 %v323_v17  ;;  %424 = vmatpush1.msra.mxu1 %v325_v18  ;;  %v312_v27 = vld [vmem:[%s806_s29 + $0x128] sm:$0xff]  ;;  %v314_v28 = vld [vmem:[%s806_s29 + $0x138] sm:$0xff]  ;;  %v311_v29 = vld [vmem:[%s806_s29 + $0x120] sm:$0xff] }
  0x1c   : > { %354 = vmatprep.subr.mxu0 %v320_v19  ;;  %425 = vmatprep.subr.mxu1 %v322_v20  ;;  %v313_v30 = vld [vmem:[%s806_s29 + $0x130] sm:$0xff]  ;;  %v308_v31 = vld [vmem:[%s806_s29 + $0x108] sm:$0xff]  ;;  %v310_v32 = vld [vmem:[%s806_s29 + $0x118] sm:$0xff] }
  0x1d   : > { %355 = vmatpush1.msra.mxu0 %v319_v21  ;;  %426 = vmatpush1.msra.mxu1 %v321_v22  ;;  %v307_v33 = vld [vmem:[%s806_s29 + $0x100] sm:$0xff]  ;;  %v309_v34 = vld [vmem:[%s806_s29 + $0x110] sm:$0xff]  ;;  %v304_v35 = vld [vmem:[%s806_s29 + $0xe8] sm:$0xff] }
  0x1e   : > { %356 = vmatprep.subr.mxu0 %v316_v23  ;;  %427 = vmatprep.subr.mxu1 %v318_v24  ;;  %v306_v36 = vld [vmem:[%s806_s29 + $0xf8] sm:$0xff]  ;;  %v303_v37 = vld [vmem:[%s806_s29 + $0xe0] sm:$0xff]  ;;  %v305_v38 = vld [vmem:[%s806_s29 + $0xf0] sm:$0xff] }
  0x1f   : > { %357 = vmatpush1.msra.mxu0 %v315_v25  ;;  %428 = vmatpush1.msra.mxu1 %v317_v26  ;;  %v300_v39 = vld [vmem:[%s806_s29 + $0xc8] sm:$0xff]  ;;  %v302_v40 = vld [vmem:[%s806_s29 + $0xd8] sm:$0xff]  ;;  %v299_v41 = vld [vmem:[%s806_s29 + $0xc0] sm:$0xff] }
  0x20   : > { %358 = vmatprep.subr.mxu0 %v312_v27  ;;  %429 = vmatprep.subr.mxu1 %v314_v28  ;;  %v301_v42 = vld [vmem:[%s806_s29 + $0xd0] sm:$0xff]  ;;  %v296_v43 = vld [vmem:[%s806_s29 + $0xa8] sm:$0xff]  ;;  %v298_v44 = vld [vmem:[%s806_s29 + $0xb8] sm:$0xff] }
  0x21   : > { %359 = vmatpush1.msra.mxu0 %v311_v29  ;;  %430 = vmatpush1.msra.mxu1 %v313_v30  ;;  %v295_v45 = vld [vmem:[%s806_s29 + $0xa0] sm:$0xff]  ;;  %v297_v46 = vld [vmem:[%s806_s29 + $0xb0] sm:$0xff]  ;;  %v292_v47 = vld [vmem:[%s806_s29 + $0x88] sm:$0xff] }
  0x22   : > { %360 = vmatprep.subr.mxu0 %v308_v31  ;;  %431 = vmatprep.subr.mxu1 %v310_v32  ;;  %v294_v48 = vld [vmem:[%s806_s29 + $0x98] sm:$0xff]  ;;  %v291_v49 = vld [vmem:[%s806_s29 + $0x80] sm:$0xff]  ;;  %v293_v50 = vld [vmem:[%s806_s29 + $0x90] sm:$0xff] }
  0x23   : > { %361 = vmatpush1.msra.mxu0 %v307_v33  ;;  %432 = vmatpush1.msra.mxu1 %v309_v34  ;;  %v288_v51 = vld [vmem:[%s806_s29 + $0x68] sm:$0xff]  ;;  %v290_v52 = vld [vmem:[%s806_s29 + $0x78] sm:$0xff]  ;;  %v287_v53 = vld [vmem:[%s806_s29 + $0x60] sm:$0xff] }
  0x24   : > { %362 = vmatprep.subr.mxu0 %v304_v35  ;;  %433 = vmatprep.subr.mxu1 %v306_v36  ;;  %v289_v54 = vld [vmem:[%s806_s29 + $0x70] sm:$0xff]  ;;  %v284_v55 = vld [vmem:[%s806_s29 + $0x48] sm:$0xff]  ;;  %v286_v56 = vld [vmem:[%s806_s29 + $0x58] sm:$0xff] }
  0x25   : > { %363 = vmatpush1.msra.mxu0 %v303_v37  ;;  %434 = vmatpush1.msra.mxu1 %v305_v38  ;;  %v283_v57 = vld [vmem:[%s806_s29 + $0x40] sm:$0xff]  ;;  %v285_v58 = vld [vmem:[%s806_s29 + $0x50] sm:$0xff]  ;;  %v280_v59 = vld [vmem:[%s806_s29 + $0x28] sm:$0xff] }
  0x26   : > { %364 = vmatprep.subr.mxu0 %v300_v39  ;;  %435 = vmatprep.subr.mxu1 %v302_v40  ;;  %v282_v60 = vld [vmem:[%s806_s29 + $0x38] sm:$0xff]  ;;  %v279_v61 = vld [vmem:[%s806_s29 + $0x20] sm:$0xff]  ;;  %v281_v62 = vld [vmem:[%s806_s29 + $0x30] sm:$0xff] }
  0x27   : > { %365 = vmatpush1.msra.mxu0 %v299_v41  ;;  %436 = vmatpush1.msra.mxu1 %v301_v42  ;;  %v276_v63 = vld [vmem:[%s806_s29 + $0x8] sm:$0xff]  ;;  %v278_v0 = vld [vmem:[%s806_s29 + $0x18] sm:$0xff]  ;;  %v275_v1 = vld [vmem:[%s806_s29] sm:$0xff] }
  0x28   : > { %366 = vmatprep.subr.mxu0 %v296_v43  ;;  %437 = vmatprep.subr.mxu1 %v298_v44  ;;  %v277_v2 = vld [vmem:[%s806_s29 + $0x10] sm:$0xff]  ;;  %v339_v3 = vld [vmem:[%s256_s5] sm:$0xf] }
  0x29   : > { %367 = vmatpush1.msra.mxu0 %v295_v45  ;;  %438 = vmatpush1.msra.mxu1 %v297_v46 }
  0x2a   : > { %368 = vmatprep.subr.mxu0 %v292_v47  ;;  %439 = vmatprep.subr.mxu1 %v294_v48 }
  0x2b   : > { %369 = vmatpush1.msra.mxu0 %v291_v49  ;;  %440 = vmatpush1.msra.mxu1 %v293_v50 }
  0x2c   : > { %370 = vmatprep.subr.mxu0 %v288_v51  ;;  %441 = vmatprep.subr.mxu1 %v290_v52 }
  0x2d   : > { %371 = vmatpush1.msra.mxu0 %v287_v53  ;;  %442 = vmatpush1.msra.mxu1 %v289_v54 }
  0x2e   : > { %372 = vmatprep.subr.mxu0 %v284_v55  ;;  %443 = vmatprep.subr.mxu1 %v286_v56 }
  0x2f   : > { %373 = vmatpush1.msra.mxu0 %v283_v57  ;;  %444 = vmatpush1.msra.mxu1 %v285_v58 }
  0x30   : > { %374 = vmatprep.subr.mxu0 %v280_v59  ;;  %445 = vmatprep.subr.mxu1 %v282_v60 }
  0x31   : > { %375 = vmatpush1.msra.mxu0 %v279_v61  ;;  %446 = vmatpush1.msra.mxu1 %v281_v62 }
  0x32   : > { %376 = vmatprep.subr.mxu0 %v276_v63  ;;  %447 = vmatprep.subr.mxu1 %v278_v0 }
  0x33   : > { %377 = vmatpush1.msra.mxu0 %v275_v1  ;;  %448 = vmatpush1.msra.mxu1 %v277_v2 }
  0x34   : > { %411 = vmatmul.mubr.f32.vlgmr.msra.gmra.mxu0 %v339_v3  ;;  %482 = vmatmul.mubr.f32.vlgmr.msra.gmra.mxu1 %v339_v3 }
  0x8e   : > { %v344_v4 = vpop.permute.xlu0 %343 }
  0xf4   : > { %v412_v5 = vpop.f32.mrf.mxu0  ;;  %v483_v6 = vpop.f32.mrf.mxu1 }
  0xf5   : > { %v413_v7 = vadd.f32 %v412_v5, %v344_v4  ;;  %v484_v8 = vadd.f32 %v483_v6, %v344_v4 }
  0xf6   : > { %v414_v9 = vpop.f32.mrf.mxu0  ;;  %v485_v10 = vpop.f32.mrf.mxu1 }
  0xf7   : > { %v415_v11 = vadd.f32 %v414_v9, %v344_v4  ;;  %v486_v12 = vadd.f32 %v485_v10, %v344_v4  ;;  %v488_v13 = vmax.f32 %v413_v7, 0.0  ;;  %v490_v14 = vmax.f32 %v484_v8, 0.0 }
  0xf9   : > { %v489_v15 = vmax.f32 %v415_v11, 0.0  ;;  %v491_v16 = vmax.f32 %v486_v12, 0.0 }
  0xfb   : > { %v496_v17 = vcombine.low %v488_v13, %v489_v15  ;;  %v497_v18 = vcombine.low %v490_v14, %v491_v16 }
  0xfd   : > { %500 = vst [vmem:[%s273_s12] sm:$0xff] %v496_v17  ;;  %501 = vst [vmem:[%s273_s12 + $0x8] sm:$0xff] %v497_v18 }
  0xfe PF: > { %s13_s16 = sadd.s32 1, %s737_s16   ;;  %s901_s12 = smov %s729_s14 }
  0xff   : > { %p10_p7 = scmp.ge.s32.totalorder %s13_s16, 8   ;;  %s902_s13 = smov %s733_s15 }
 0x100   : > { %s903_s14 = smov %s906_s17  ;;  %s904_s15 = smov %s910_s18 }
 0x101   :  { %12 = sbr.rel (!%p10_p7) target bundleno = 3 (0x3), region = 68 }

// kernel: rmasknet_forward.10
= control target key start
LH: loop header
LB: loop body
LE: loop exit
PB: predicated region body
PF: predicated region fallthrough
CT: control target
= control target key end

     0   :  { %s664_s12 = smov 0   ;;  %s666_s13 = smov 0   ;;  %s769_s0 = inlined_call_operand.vmem [shape: f32[3,2,256,64], index: 0, kind: input, shape index: {}]   ;;  %s770_s1 = inlined_call_operand.vmem [shape: f32[3,8,256], index: 1, kind: input, shape index: {}]   ;;  %s771_s2 = inlined_call_operand.vmem [shape: f32[3,8,1], index: 2, kind: input, shape index: {}]   ;;  %s772_s3 = inlined_call_operand.vmem [shape: f32[3,2,8,64], index: 3, kind: output, shape index: {}]  }
   0x1   :  { %s668_s14 = smov 0   ;;  %s670_s15 = smov 0  }
   0x2   :  { %s672_s16 = smov 0  }
   0x3 LB: > { %s28_s17 = sadd.s32 1, %s633_s14  ;;  %s32_s18 = sadd.s32 1, %s637_s15  ;;  %s641_s16 = sphi %s672_s16, %s13_s16   ;;  %s637_s15 = sphi %s670_s15, %s776_s15   ;;  %s633_s14 = sphi %s668_s14, %s775_s14   ;;  %s629_s13 = sphi %s666_s13, %s774_s13   ;;  %s625_s12 = sphi %s664_s12, %s773_s12  }
   0x4   : > { %p30_p0 = scmp.ge.s32.totalorder %s28_s17, 2  ;;  %p514_p1 = scmp.ge.s32.totalorder %s641_s16, 1 }
   0x5   : > { %p190_p2 = scmp.lt.s32.totalorder %s641_s16, 7 }
   0x6   : > { %s778_s17 = smov (%p30_p0, %s28_s17), 0  ;;  %s780_s18 = smov (!%p30_p0, %s32_s18), %s637_s15 }
   0x7   : > { %p191_p3 = pnand %p514_p1, %p190_p2  ;;  %p34_p4 = scmp.ge.s32.totalorder %s780_s18, 3 }
   0x8   : > { %p236_p5 = scmp.lt.s32.totalorder (!%p191_p3), %s629_s13, 2  ;;  %p238_p6 = scmp.lt.s32.totalorder (!%p191_p3), %s625_s12, 1 }
   0x9   : > { %s782_s18 = smov (%p34_p4, %s780_s18), 0  ;;  %194 = sbr.rel (%p191_p3) target bundleno = 255 (0xff), region = 32 }
   0xe   : > { %v643_v0 = vmov 0   ;;  %s784_s13 = smov (!%p236_p5, %s629_s13), 2  ;;  %s786_s12 = smov (!%p238_p6, %s625_s12), 1  ;;  %vm379_vm0 = vcmask 523264  }
   0xf   : > { %602 = vset.pattern.permute.xlu0 %v643_v0  ;;  %s516_s19 = sshll.u32 %s784_s13, 6  ;;  %s525_s20 = sshll.u32 %s784_s13, 4 }
  0x10   : > { %s515_s21 = sshll.u32 %s786_s12, 5  ;;  %s704_s24 = scalar_lea.vmem %s770_s1, %s525_s20 }
  0x11   : > { %s245_s25 = sadd.s32 %s516_s19, %s515_s21  ;;  %v301_v1 = vld [vmem:[%s704_s24 + $0x8] sm:$0xff]  ;;  %s520_s26 = sshll.u32 %s784_s13, 3  ;;  %v300_v35 = vld [vmem:[%s704_s24] sm:$0xff] }
  0x12   : > { %s517_s27 = sshll.u32 %s245_s25, 3  ;;  %372 = vmatprep.mubr.f32.mxu0 %v301_v1  ;;  %s256_s30 = scalar_lea.vmem %s771_s2, %s520_s26 }
  0x13   : > { %s714_s6 = scalar_lea.vmem %s769_s0, %s517_s27  ;;  %v302_v2 = vld [vmem:[%s256_s30] sm:$0xff]  ;;  %s521_s7 = sshll.u32 %s784_s13, 1 }
  0x14   : > { %v299_v3 = vld [vmem:[%s714_s6 + $0xf8] sm:$0xff]  ;;  %v298_v5 = vld [vmem:[%s714_s6 + $0xf0] sm:$0xff]  ;;  %305 = vperm.xlu0 %602, %v302_v2   ;;  %v297_v7 = vld [vmem:[%s714_s6 + $0xe8] sm:$0xff]  ;;  %s265_s8 = sadd.s32 %s521_s7, %s786_s12 }
  0x15   : > { %v283_v4 = vld [vmem:[%s714_s6 + $0x78] sm:$0xff]  ;;  %526 = vmatprep.subr.mxu0 %v299_v3  ;;  %v282_v6 = vld [vmem:[%s714_s6 + $0x70] sm:$0xff]  ;;  %v281_v8 = vld [vmem:[%s714_s6 + $0x68] sm:$0xff]  ;;  %s522_s9 = sshll.u32 %s265_s8, 3 }
  0x16   : > { %527 = vmatpush3.msra.mxu0 %v283_v4  ;;  %v296_v9 = vld [vmem:[%s714_s6 + $0xe0] sm:$0xff]  ;;  %v295_v11 = vld [vmem:[%s714_s6 + $0xd8] sm:$0xff]  ;;  %v294_v13 = vld [vmem:[%s714_s6 + $0xd0] sm:$0xff]  ;;  %s267_s19 = scalar_lea.vmem %s772_s3, %s522_s9 }
  0x17   : > { %528 = vmatprep.subr.mxu0 %v298_v5  ;;  %v280_v10 = vld [vmem:[%s714_s6 + $0x60] sm:$0xff]  ;;  %v279_v12 = vld [vmem:[%s714_s6 + $0x58] sm:$0xff]  ;;  %v278_v14 = vld [vmem:[%s714_s6 + $0x50] sm:$0xff] }
  0x18   : > { %529 = vmatpush3.msra.mxu0 %v282_v6  ;;  %v293_v15 = vld [vmem:[%s714_s6 + $0xc8] sm:$0xff]  ;;  %v292_v17 = vld [vmem:[%s714_s6 + $0xc0] sm:$0xff]  ;;  %v291_v19 = vld [vmem:[%s714_s6 + $0xb8] sm:$0xff] }
  0x19   : > { %530 = vmatprep.subr.mxu0 %v297_v7  ;;  %v277_v16 = vld [vmem:[%s714_s6 + $0x48] sm:$0xff]  ;;  %v276_v18 = vld [vmem:[%s714_s6 + $0x40] sm:$0xff]  ;;  %v275_v20 = vld [vmem:[%s714_s6 + $0x38] sm:$0xff] }
  0x1a   : > { %531 = vmatpush3.msra.mxu0 %v281_v8  ;;  %v290_v21 = vld [vmem:[%s714_s6 + $0xb0] sm:$0xff]  ;;  %v289_v23 = vld [vmem:[%s714_s6 + $0xa8] sm:$0xff]  ;;  %v288_v25 = vld [vmem:[%s714_s6 + $0xa0] sm:$0xff] }
  0x1b   : > { %532 = vmatprep.subr.mxu0 %v296_v9  ;;  %v274_v22 = vld [vmem:[%s714_s6 + $0x30] sm:$0xff]  ;;  %v273_v24 = vld [vmem:[%s714_s6 + $0x28] sm:$0xff]  ;;  %v272_v26 = vld [vmem:[%s714_s6 + $0x20] sm:$0xff] }
  0x1c   : > { %533 = vmatpush3.msra.mxu0 %v280_v10  ;;  %v287_v27 = vld [vmem:[%s714_s6 + $0x98] sm:$0xff]  ;;  %v286_v29 = vld [vmem:[%s714_s6 + $0x90] sm:$0xff]  ;;  %v285_v31 = vld [vmem:[%s714_s6 + $0x88] sm:$0xff] }
  0x1d   : > { %534 = vmatprep.subr.mxu0 %v295_v11  ;;  %v271_v28 = vld [vmem:[%s714_s6 + $0x18] sm:$0xff]  ;;  %v270_v30 = vld [vmem:[%s714_s6 + $0x10] sm:$0xff]  ;;  %v269_v32 = vld [vmem:[%s714_s6 + $0x8] sm:$0xff] }
  0x1e   : > { %535 = vmatpush3.msra.mxu0 %v279_v12  ;;  %v284_v33 = vld [vmem:[%s714_s6 + $0x80] sm:$0xff] }
  0x1f   : > { %536 = vmatprep.subr.mxu0 %v294_v13  ;;  %v268_v34 = vld [vmem:[%s714_s6] sm:$0xff] }
  0x20   : > { %537 = vmatpush3.msra.mxu0 %v278_v14 }
  0x21   : > { %538 = vmatprep.subr.mxu0 %v293_v15 }
  0x22   : > { %539 = vmatpush3.msra.mxu0 %v277_v16 }
  0x23   : > { %540 = vmatprep.subr.mxu0 %v292_v17 }
  0x24   : > { %541 = vmatpush3.msra.mxu0 %v276_v18 }
  0x25   : > { %542 = vmatprep.subr.mxu0 %v291_v19 }
  0x26   : > { %543 = vmatpush3.msra.mxu0 %v275_v20 }
  0x27   : > { %544 = vmatprep.subr.mxu0 %v290_v21 }
  0x28   : > { %545 = vmatpush3.msra.mxu0 %v274_v22 }
  0x29   : > { %546 = vmatprep.subr.mxu0 %v289_v23 }
  0x2a   : > { %547 = vmatpush3.msra.mxu0 %v273_v24 }
  0x2b   : > { %548 = vmatprep.subr.mxu0 %v288_v25 }
  0x2c   : > { %549 = vmatpush3.msra.mxu0 %v272_v26 }
  0x2d   : > { %550 = vmatprep.subr.mxu0 %v287_v27 }
  0x2e   : > { %551 = vmatpush3.msra.mxu0 %v271_v28 }
  0x2f   : > { %552 = vmatprep.subr.mxu0 %v286_v29 }
  0x30   : > { %553 = vmatpush3.msra.mxu0 %v270_v30 }
  0x31   : > { %554 = vmatprep.subr.mxu0 %v285_v31 }
  0x32   : > { %555 = vmatpush3.msra.mxu0 %v269_v32 }
  0x33   : > { %556 = vmatprep.subr.mxu0 %v284_v33 }
  0x34   : > { %557 = vmatpush3.msra.mxu0 %v268_v34 }
  0x35   : > { %373 = vmatmul.mubr.f32.vlgmr.msra.gmra.mxu0 %v300_v35 }
  0x8f   : > { %v306_v38 = vpop.permute.xlu0 %305 }
  0xf5   : > { %v558_v36 = vpop.f32.mrf.mxu0 }
  0xf7   : > { %v559_v37 = vpop.f32.mrf.mxu0 }
  0xf8   : > { %v560_v39 = vadd.f32 %v559_v37, %v558_v36 }
  0xfa   : > { %v375_v40 = vadd.f32 %v560_v39, %v306_v38 }
  0xfc   : > { %v378_v41 = vmax.f32 %v375_v40, 0.0 }
  0xfe   : > { %380 = vst.msk [vmem:[%s267_s19] sm:$0xff] %vm379_vm0, %v378_v41 }
  0xff PF: > { %s13_s16 = sadd.s32 1, %s641_s16   ;;  %s773_s12 = smov %s633_s14 }
 0x100   : > { %p10_p7 = scmp.ge.s32.totalorder %s13_s16, 8   ;;  %s774_s13 = smov %s637_s15 }
 0x101   : > { %s775_s14 = smov %s778_s17  ;;  %s776_s15 = smov %s782_s18 }
 0x102   :  { %12 = sbr.rel (!%p10_p7) target bundleno = 3 (0x3), region = 68 }

// kernel: rmasknet_forward.11
= control target key start
LH: loop header
LB: loop body
LE: loop exit
PB: predicated region body
PF: predicated region fallthrough
CT: control target
= control target key end

     0   :  { %s845_s12 = smov 0   ;;  %s847_s13 = smov 0   ;;  %s992_s0 = inlined_call_operand.vmem [shape: f32[3,2,512,8], index: 0, kind: input, shape index: {}]   ;;  %s993_s1 = inlined_call_operand.vmem [shape: f32[3,16,512], index: 1, kind: input, shape index: {}]   ;;  %s994_s2 = inlined_call_operand.vmem [shape: f32[3,16,1], index: 2, kind: input, shape index: {}]   ;;  %s995_s3 = inlined_call_operand.vmem [shape: f32[3,2,16,8], index: 3, kind: output, shape index: {}]  }
   0x1   :  { %s849_s14 = smov 0   ;;  %s851_s15 = smov 0  }
   0x2   :  { %s853_s16 = smov 0  }
   0x3 LB: > { %s28_s17 = sadd.s32 1, %s814_s14  ;;  %s32_s18 = sadd.s32 1, %s818_s15  ;;  %s822_s16 = sphi %s853_s16, %s13_s16   ;;  %s818_s15 = sphi %s851_s15, %s999_s15   ;;  %s814_s14 = sphi %s849_s14, %s998_s14   ;;  %s810_s13 = sphi %s847_s13, %s997_s13   ;;  %s806_s12 = sphi %s845_s12, %s996_s12  }
   0x4   : > { %p30_p0 = scmp.ge.s32.totalorder %s28_s17, 2  ;;  %p651_p1 = scmp.ge.s32.totalorder %s822_s16, 1 }
   0x5   : > { %p191_p2 = scmp.lt.s32.totalorder %s822_s16, 7 }
   0x6   : > { %s1001_s17 = smov (%p30_p0, %s28_s17), 0  ;;  %s1003_s18 = smov (!%p30_p0, %s32_s18), %s818_s15 }
   0x7   : > { %p192_p3 = pnand %p651_p1, %p191_p2  ;;  %p34_p4 = scmp.ge.s32.totalorder %s1003_s18, 3 }
   0x8   : > { %p239_p5 = scmp.lt.s32.totalorder (!%p192_p3), %s810_s13, 2  ;;  %p241_p6 = scmp.lt.s32.totalorder (!%p192_p3), %s806_s12, 1 }
   0x9   : > { %s1005_s18 = smov (%p34_p4, %s1003_s18), 0  ;;  %195 = sbr.rel (%p192_p3) target bundleno = 262 (0x106), region = 32 }
   0xe   : > { %v824_v0 = vmov 0   ;;  %s1007_s13 = smov (!%p239_p5, %s810_s13), 2  ;;  %s1009_s12 = smov (!%p241_p6, %s806_s12), 1  ;;  %vm509_vm0 = vcmask 64512  }
   0xf   : > { %783 = vset.pattern.permute.xlu0 %v824_v0  ;;  %s653_s19 = sshll.u32 %s1007_s13, 7  ;;  %s664_s20 = sshll.u32 %s1007_s13, 6 }
  0x10   : > { %s652_s21 = sshll.u32 %s1009_s12, 6  ;;  %s885_s24 = scalar_lea.vmem %s993_s1, %s664_s20 }
  0x11   : > { %s248_s25 = sadd.s32 %s653_s19, %s652_s21  ;;  %v338_v1 = vld [vmem:[%s885_s24 + $0x8] sm:$0xff]  ;;  %v340_v2 = vld [vmem:[%s885_s24 + $0x18] sm:$0xff]  ;;  %s665_s26 = sshll.u32 %s1007_s13, 4 }
  0x12   : > { %s654_s27 = sshll.u32 %s248_s25, 3  ;;  %421 = vmatprep.mubr.f32.mxu0 %v338_v1  ;;  %496 = vmatprep.mubr.f32.mxu1 %v340_v2  ;;  %s893_s30 = scalar_lea.vmem %s994_s2, %s665_s26 }
  0x13   : > { %s898_s6 = scalar_lea.vmem %s992_s0, %s654_s27  ;;  %v345_v3 = vld [vmem:[%s893_s30] sm:$0xff]  ;;  %s659_s7 = sshll.u32 %s1009_s12, 1 }
  0x14   : > { %v304_v4 = vld [vmem:[%s898_s6 + $0xf8] sm:$0xff]  ;;  %349 = vperm.xlu0 %783, %v345_v3   ;;  %v303_v8 = vld [vmem:[%s898_s6 + $0xf0] sm:$0xff]  ;;  %v302_v12 = vld [vmem:[%s898_s6 + $0xe8] sm:$0xff]  ;;  %s660_s8 = sshll.u32 %s1007_s13, 2 }
  0x15   : > { %v336_v5 = vld [vmem:[%s898_s6 + $0x1f8] sm:$0xff]  ;;  %666 = vmatprep.subr.mxu0 %v304_v4  ;;  %v335_v9 = vld [vmem:[%s898_s6 + $0x1f0] sm:$0xff]  ;;  %v334_v13 = vld [vmem:[%s898_s6 + $0x1e8] sm:$0xff]  ;;  %s270_s9 = sadd.s32 %s660_s8, %s659_s7 }
  0x16   : > { %v288_v6 = vld [vmem:[%s898_s6 + $0x78] sm:$0xff]  ;;  %704 = vmatprep.subr.mxu1 %v336_v5  ;;  %v287_v10 = vld [vmem:[%s898_s6 + $0x70] sm:$0xff]  ;;  %v286_v14 = vld [vmem:[%s898_s6 + $0x68] sm:$0xff]  ;;  %s661_s10 = sshll.u32 %s270_s9, 3 }
  0x17   : > { %v320_v7 = vld [vmem:[%s898_s6 + $0x178] sm:$0xff]  ;;  %667 = vmatpush3.msra.mxu0 %v288_v6  ;;  %v319_v11 = vld [vmem:[%s898_s6 + $0x170] sm:$0xff]  ;;  %v318_v15 = vld [vmem:[%s898_s6 + $0x168] sm:$0xff]  ;;  %s272_s12 = scalar_lea.vmem %s995_s3, %s661_s10 }
  0x18   : > { %705 = vmatpush3.msra.mxu1 %v320_v7  ;;  %668 = vmatprep.subr.mxu0 %v303_v8  ;;  %v301_v16 = vld [vmem:[%s898_s6 + $0xe0] sm:$0xff]  ;;  %v300_v20 = vld [vmem:[%s898_s6 + $0xd8] sm:$0xff]  ;;  %v299_v24 = vld [vmem:[%s898_s6 + $0xd0] sm:$0xff] }
  0x19   : > { %706 = vmatprep.subr.mxu1 %v335_v9  ;;  %669 = vmatpush3.msra.mxu0 %v287_v10  ;;  %v333_v17 = vld [vmem:[%s898_s6 + $0x1e0] sm:$0xff]  ;;  %v332_v21 = vld [vmem:[%s898_s6 + $0x1d8] sm:$0xff]  ;;  %v331_v25 = vld [vmem:[%s898_s6 + $0x1d0] sm:$0xff] }
  0x1a   : > { %707 = vmatpush3.msra.mxu1 %v319_v11  ;;  %670 = vmatprep.subr.mxu0 %v302_v12  ;;  %v285_v18 = vld [vmem:[%s898_s6 + $0x60] sm:$0xff]  ;;  %v284_v22 = vld [vmem:[%s898_s6 + $0x58] sm:$0xff]  ;;  %v283_v26 = vld [vmem:[%s898_s6 + $0x50] sm:$0xff] }
  0x1b   : > { %708 = vmatprep.subr.mxu1 %v334_v13  ;;  %v317_v19 = vld [vmem:[%s898_s6 + $0x160] sm:$0xff]  ;;  %671 = vmatpush3.msra.mxu0 %v286_v14  ;;  %v316_v23 = vld [vmem:[%s898_s6 + $0x158] sm:$0xff]  ;;  %v315_v27 = vld [vmem:[%s898_s6 + $0x150] sm:$0xff] }
  0x1c   : > { %709 = vmatpush3.msra.mxu1 %v318_v15  ;;  %672 = vmatprep.subr.mxu0 %v301_v16  ;;  %v298_v28 = vld [vmem:[%s898_s6 + $0xc8] sm:$0xff]  ;;  %v297_v32 = vld [vmem:[%s898_s6 + $0xc0] sm:$0xff]  ;;  %v296_v36 = vld [vmem:[%s898_s6 + $0xb8] sm:$0xff] }
  0x1d   : > { %710 = vmatprep.subr.mxu1 %v333_v17  ;;  %673 = vmatpush3.msra.mxu0 %v285_v18  ;;  %v330_v29 = vld [vmem:[%s898_s6 + $0x1c8] sm:$0xff]  ;;  %v329_v33 = vld [vmem:[%s898_s6 + $0x1c0] sm:$0xff]  ;;  %v328_v37 = vld [vmem:[%s898_s6 + $0x1b8] sm:$0xff] }
  0x1e   : > { %711 = vmatpush3.msra.mxu1 %v317_v19  ;;  %674 = vmatprep.subr.mxu0 %v300_v20  ;;  %v282_v30 = vld [vmem:[%s898_s6 + $0x48] sm:$0xff]  ;;  %v281_v34 = vld [vmem:[%s898_s6 + $0x40] sm:$0xff]  ;;  %v280_v38 = vld [vmem:[%s898_s6 + $0x38] sm:$0xff] }
  0x1f   : > { %712 = vmatprep.subr.mxu1 %v332_v21  ;;  %675 = vmatpush3.msra.mxu0 %v284_v22  ;;  %v314_v31 = vld [vmem:[%s898_s6 + $0x148] sm:$0xff]  ;;  %v313_v35 = vld [vmem:[%s898_s6 + $0x140] sm:$0xff]  ;;  %v312_v39 = vld [vmem:[%s898_s6 + $0x138] sm:$0xff] }
  0x20   : > { %713 = vmatpush3.msra.mxu1 %v316_v23  ;;  %676 = vmatprep.subr.mxu0 %v299_v24  ;;  %v295_v40 = vld [vmem:[%s898_s6 + $0xb0] sm:$0xff]  ;;  %v294_v44 = vld [vmem:[%s898_s6 + $0xa8] sm:$0xff]  ;;  %v293_v48 = vld [vmem:[%s898_s6 + $0xa0] sm:$0xff] }
  0x21   : > { %714 = vmatprep.subr.mxu1 %v331_v25  ;;  %677 = vmatpush3.msra.mxu0 %v283_v26  ;;  %v327_v41 = vld [vmem:[%s898_s6 + $0x1b0] sm:$0xff]  ;;  %v326_v45 = vld [vmem:[%s898_s6 + $0x1a8] sm:$0xff]  ;;  %v325_v49 = vld [vmem:[%s898_s6 + $0x1a0] sm:$0xff] }
  0x22   : > { %715 = vmatpush3.msra.mxu1 %v315_v27  ;;  %678 = vmatprep.subr.mxu0 %v298_v28  ;;  %v279_v42 = vld [vmem:[%s898_s6 + $0x30] sm:$0xff]  ;;  %v278_v46 = vld [vmem:[%s898_s6 + $0x28] sm:$0xff]  ;;  %v277_v50 = vld [vmem:[%s898_s6 + $0x20] sm:$0xff] }
  0x23   : > { %716 = vmatprep.subr.mxu1 %v330_v29  ;;  %679 = vmatpush3.msra.mxu0 %v282_v30  ;;  %v311_v43 = vld [vmem:[%s898_s6 + $0x130] sm:$0xff]  ;;  %v310_v47 = vld [vmem:[%s898_s6 + $0x128] sm:$0xff]  ;;  %v309_v51 = vld [vmem:[%s898_s6 + $0x120] sm:$0xff] }
  0x24   : > { %717 = vmatpush3.msra.mxu1 %v314_v31  ;;  %680 = vmatprep.subr.mxu0 %v297_v32  ;;  %v292_v52 = vld [vmem:[%s898_s6 + $0x98] sm:$0xff]  ;;  %v291_v56 = vld [vmem:[%s898_s6 + $0x90] sm:$0xff]  ;;  %v290_v60 = vld [vmem:[%s898_s6 + $0x88] sm:$0xff] }
  0x25   : > { %718 = vmatprep.subr.mxu1 %v329_v33  ;;  %681 = vmatpush3.msra.mxu0 %v281_v34  ;;  %v324_v53 = vld [vmem:[%s898_s6 + $0x198] sm:$0xff]  ;;  %v323_v57 = vld [vmem:[%s898_s6 + $0x190] sm:$0xff]  ;;  %v322_v61 = vld [vmem:[%s898_s6 + $0x188] sm:$0xff] }
  0x26   : > { %719 = vmatpush3.msra.mxu1 %v313_v35  ;;  %682 = vmatprep.subr.mxu0 %v296_v36  ;;  %v276_v54 = vld [vmem:[%s898_s6 + $0x18] sm:$0xff]  ;;  %v275_v58 = vld [vmem:[%s898_s6 + $0x10] sm:$0xff]  ;;  %v274_v62 = vld [vmem:[%s898_s6 + $0x8] sm:$0xff] }
  0x27   : > { %720 = vmatprep.subr.mxu1 %v328_v37  ;;  %683 = vmatpush3.msra.mxu0 %v280_v38  ;;  %v308_v55 = vld [vmem:[%s898_s6 + $0x118] sm:$0xff]  ;;  %v307_v59 = vld [vmem:[%s898_s6 + $0x110] sm:$0xff]  ;;  %v306_v63 = vld [vmem:[%s898_s6 + $0x108] sm:$0xff] }
  0x28   : > { %721 = vmatpush3.msra.mxu1 %v312_v39  ;;  %684 = vmatprep.subr.mxu0 %v295_v40  ;;  %v289_v0 = vld [vmem:[%s898_s6 + $0x80] sm:$0xff]  ;;  %v339_v5 = vld [vmem:[%s885_s24 + $0x10] sm:$0xff]  ;;  %v342_v6 = vld [vmem:[%s885_s24 + $0x28] sm:$0xff] }
  0x29   : > { %722 = vmatprep.subr.mxu1 %v327_v41  ;;  %685 = vmatpush3.msra.mxu0 %v279_v42  ;;  %v321_v1 = vld [vmem:[%s898_s6 + $0x180] sm:$0xff]  ;;  %v344_v7 = vld [vmem:[%s885_s24 + $0x38] sm:$0xff]  ;;  %v346_v8 = vld [vmem:[%s893_s30 + $0x8] sm:$0xff] }
  0x2a   : > { %723 = vmatpush3.msra.mxu1 %v311_v43  ;;  %686 = vmatprep.subr.mxu0 %v294_v44  ;;  %v273_v2 = vld [vmem:[%s898_s6] sm:$0xff]  ;;  %v343_v10 = vld [vmem:[%s885_s24 + $0x30] sm:$0xff] }
  0x2b   : > { %724 = vmatprep.subr.mxu1 %v326_v45  ;;  %687 = vmatpush3.msra.mxu0 %v278_v46  ;;  %v305_v3 = vld [vmem:[%s898_s6 + $0x100] sm:$0xff] }
  0x2c   : > { %725 = vmatpush3.msra.mxu1 %v310_v47  ;;  %688 = vmatprep.subr.mxu0 %v293_v48  ;;  %v337_v4 = vld [vmem:[%s885_s24] sm:$0xff] }
  0x2d   : > { %726 = vmatprep.subr.mxu1 %v325_v49  ;;  %689 = vmatpush3.msra.mxu0 %v277_v50  ;;  %v341_v9 = vld [vmem:[%s885_s24 + $0x20] sm:$0xff] }
  0x2e   : > { %727 = vmatpush3.msra.mxu1 %v309_v51  ;;  %690 = vmatprep.subr.mxu0 %v292_v52 }
  0x2f   : > { %728 = vmatprep.subr.mxu1 %v324_v53  ;;  %691 = vmatpush3.msra.mxu0 %v276_v54 }
  0x30   : > { %729 = vmatpush3.msra.mxu1 %v308_v55  ;;  %692 = vmatprep.subr.mxu0 %v291_v56 }
  0x31   : > { %730 = vmatprep.subr.mxu1 %v323_v57  ;;  %693 = vmatpush3.msra.mxu0 %v275_v58 }
  0x32   : > { %731 = vmatpush3.msra.mxu1 %v307_v59  ;;  %694 = vmatprep.subr.mxu0 %v290_v60 }
  0x33   : > { %732 = vmatprep.subr.mxu1 %v322_v61  ;;  %695 = vmatpush3.msra.mxu0 %v274_v62 }
  0x34   : > { %733 = vmatpush3.msra.mxu1 %v306_v63  ;;  %696 = vmatprep.subr.mxu0 %v289_v0 }
  0x35   : > { %734 = vmatprep.subr.mxu1 %v321_v1  ;;  %697 = vmatpush3.msra.mxu0 %v273_v2 }
  0x36   : > { %735 = vmatpush3.msra.mxu1 %v305_v3  ;;  %422 = vmatmul.mubr.f32.vlgmr.msra.gmra.mxu0 %v337_v4 }
  0x37   : > { %497 = vmatmul.mubr.f32.vlgmr.msra.gmra.mxu1 %v339_v5  ;;  %426 = vmatprep.mubr.f32.mxu0 %v342_v6 }
  0x38   : > { %501 = vmatprep.mubr.f32.mxu1 %v344_v7  ;;  %354 = vperm.xlu0 %783, %v346_v8  }
  0x3a   : > { %427 = vmatmul.mubr.f32.gmra.mxu0 %v341_v9 }
  0x3b   : > { %502 = vmatmul.mubr.f32.gmra.mxu1 %v343_v10 }
  0x8f   : > { %v350_v13 = vpop.permute.xlu0 %349 }
  0xb3   : > { %v355_v25 = vpop.permute.xlu0 %354 }
  0xf6   : > { %v698_v11 = vpop.f32.mrf.mxu0 }
  0xf7   : > { %v736_v12 = vpop.f32.mrf.mxu1 }
  0xf8   : > { %v699_v14 = vpop.f32.mrf.mxu0 }
  0xf9   : > { %v737_v15 = vpop.f32.mrf.mxu1  ;;  %v700_v16 = vadd.f32 %v699_v14, %v698_v11 }
  0xfa   : > { %v701_v17 = vpop.f32.mrf.mxu0  ;;  %v738_v20 = vadd.f32 %v737_v15, %v736_v12 }
  0xfb   : > { %v739_v18 = vpop.f32.mrf.mxu1  ;;  %v424_v19 = vadd.f32 %v700_v16, %v350_v13 }
  0xfc   : > { %v702_v21 = vpop.f32.mrf.mxu0 }
  0xfd   : > { %v740_v22 = vpop.f32.mrf.mxu1  ;;  %v499_v23 = vadd.f32 %v738_v20, %v424_v19  ;;  %v703_v24 = vadd.f32 %v702_v21, %v701_v17 }
  0xfe   : > { %v741_v28 = vadd.f32 %v740_v22, %v739_v18 }
  0xff   : > { %v507_v26 = vmax.f32 %v499_v23, 0.0  ;;  %v429_v27 = vadd.f32 %v703_v24, %v355_v25 }
 0x101   : > { %510 = vst.msk [vmem:[%s272_s12] sm:$0xff] %vm509_vm0, %v507_v26  ;;  %v504_v29 = vadd.f32 %v741_v28, %v429_v27 }
 0x103   : > { %v508_v30 = vmax.f32 %v504_v29, 0.0 }
 0x105   : > { %511 = vst.msk [vmem:[%s272_s12 + $0x8] sm:$0xff] %vm509_vm0, %v508_v30 }
 0x106 PF: > { %s13_s16 = sadd.s32 1, %s822_s16   ;;  %s996_s12 = smov %s814_s14 }
 0x107   : > { %p10_p7 = scmp.ge.s32.totalorder %s13_s16, 8   ;;  %s997_s13 = smov %s818_s15 }
 0x108   : > { %s998_s14 = smov %s1001_s17  ;;  %s999_s15 = smov %s1005_s18 }
 0x109   :  { %12 = sbr.rel (!%p10_p7) target bundleno = 3 (0x3), region = 68 }

// kernel: rmasknet_forward.12
= control target key start
LH: loop header
LB: loop body
LE: loop exit
PB: predicated region body
PF: predicated region fallthrough
CT: control target
= control target key end

     0   :  { %s1216_s12 = smov 0   ;;  %s1218_s13 = smov 0   ;;  %s1462_s0 = inlined_call_operand.vmem [shape: f32[3,2,1024,1], index: 0, kind: input, shape index: {}]   ;;  %s1463_s1 = inlined_call_operand.vmem [shape: f32[3,32,1024], index: 1, kind: input, shape index: {}]   ;;  %s1464_s2 = inlined_call_operand.vmem [shape: f32[3,32,1], index: 2, kind: input, shape index: {}]   ;;  %s1465_s3 = inlined_call_operand.vmem [shape: f32[3,2,32,1], index: 3, kind: output, shape index: {}]  }
   0x1   :  { %s1220_s14 = smov 0   ;;  %s1222_s15 = smov 0  }
   0x2   :  { %s1224_s16 = smov 0  }
   0x3 LB: > { %s28_s17 = sadd.s32 1, %s1186_s14  ;;  %s32_s18 = sadd.s32 1, %s1190_s15  ;;  %s1194_s16 = sphi %s1224_s16, %s13_s16   ;;  %s1190_s15 = sphi %s1222_s15, %s1469_s15   ;;  %s1186_s14 = sphi %s1220_s14, %s1468_s14   ;;  %s1182_s13 = sphi %s1218_s13, %s1467_s13   ;;  %s1178_s12 = sphi %s1216_s12, %s1466_s12  }
   0x4   : > { %p30_p0 = scmp.ge.s32.totalorder %s28_s17, 2  ;;  %p925_p1 = scmp.ge.s32.totalorder %s1194_s16, 1 }
   0x5   : > { %p191_p2 = scmp.lt.s32.totalorder %s1194_s16, 7 }
   0x6   : > { %s1471_s17 = smov (%p30_p0, %s28_s17), 0  ;;  %s1473_s18 = smov (!%p30_p0, %s32_s18), %s1190_s15 }
   0x7   : > { %p192_p3 = pnand %p925_p1, %p191_p2  ;;  %p34_p4 = scmp.ge.s32.totalorder %s1473_s18, 3 }
   0x8   : > { %p239_p5 = scmp.lt.s32.totalorder (!%p192_p3), %s1182_s13, 2  ;;  %p241_p6 = scmp.lt.s32.totalorder (!%p192_p3), %s1178_s12, 1 }
   0x9   : > { %s1475_s18 = smov (%p34_p4, %s1473_s18), 0  ;;  %195 = sbr.rel (%p192_p3) target bundleno = 309 (0x135), region = 32 }
   0xe   : > { %s1477_s13 = smov (!%p239_p5, %s1182_s13), 2  ;;  %s1479_s12 = smov (!%p241_p6, %s1178_s12), 1  ;;  %vm781_vm0 = vcmask 7168  }
   0xf   : > { %s927_s19 = sshll.u32 %s1477_s13, 8  ;;  %s926_s20 = sshll.u32 %s1479_s12, 7 }
  0x10   : > { %s1255_s23 = scalar_lea.vmem %s1463_s1, %s927_s19  ;;  %s248_s24 = sadd.s32 %s927_s19, %s926_s20 }
  0x11   : > { %v402_v0 = vld [vmem:[%s1255_s23 + $0x8] sm:$0xff]  ;;  %v404_v1 = vld [vmem:[%s1255_s23 + $0x18] sm:$0xff]  ;;  %s928_s25 = sshll.u32 %s248_s24, 3  ;;  %s939_s29 = sshll.u32 %s1477_s13, 5 }
  0x12   : > { %501 = vmatprep.mubr.f32.mxu0 %v402_v0  ;;  %586 = vmatprep.mubr.f32.mxu1 %v404_v1  ;;  %s1262_s28 = scalar_lea.vmem %s1462_s0, %s928_s25  ;;  %s1426_s5 = scalar_lea.vmem %s1464_s2, %s939_s29 }
  0x13   : > { %v304_v2 = vld [vmem:[%s1262_s28 + $0xf8] sm:$0xff]  ;;  %v303_v6 = vld [vmem:[%s1262_s28 + $0xf0] sm:$0xff]  ;;  %v302_v10 = vld [vmem:[%s1262_s28 + $0xe8] sm:$0xff]  ;;  %s933_s6 = sshll.u32 %s1479_s12, 2  ;;  %s934_s7 = sshll.u32 %s1477_s13, 3 }
  0x14   : > { %v336_v3 = vld [vmem:[%s1262_s28 + $0x1f8] sm:$0xff]  ;;  %940 = vmatprep.subr.mxu0 %v304_v2  ;;  %v335_v7 = vld [vmem:[%s1262_s28 + $0x1f0] sm:$0xff]  ;;  %v334_v11 = vld [vmem:[%s1262_s28 + $0x1e8] sm:$0xff]  ;;  %s270_s8 = sadd.s32 %s934_s7, %s933_s6 }
  0x15   : > { %v288_v4 = vld [vmem:[%s1262_s28 + $0x78] sm:$0xff]  ;;  %984 = vmatprep.subr.mxu1 %v336_v3  ;;  %v287_v8 = vld [vmem:[%s1262_s28 + $0x70] sm:$0xff]  ;;  %v286_v12 = vld [vmem:[%s1262_s28 + $0x68] sm:$0xff]  ;;  %s935_s9 = sshll.u32 %s270_s8, 3 }
  0x16   : > { %v320_v5 = vld [vmem:[%s1262_s28 + $0x178] sm:$0xff]  ;;  %941 = vmatpush3.msra.mxu0 %v288_v4  ;;  %v319_v9 = vld [vmem:[%s1262_s28 + $0x170] sm:$0xff]  ;;  %v318_v13 = vld [vmem:[%s1262_s28 + $0x168] sm:$0xff]  ;;  %s1437_s12 = scalar_lea.vmem %s1465_s3, %s935_s9 }
  0x17   : > { %985 = vmatpush3.msra.mxu1 %v320_v5  ;;  %942 = vmatprep.subr.mxu0 %v303_v6  ;;  %v301_v14 = vld [vmem:[%s1262_s28 + $0xe0] sm:$0xff]  ;;  %v300_v18 = vld [vmem:[%s1262_s28 + $0xd8] sm:$0xff]  ;;  %v299_v22 = vld [vmem:[%s1262_s28 + $0xd0] sm:$0xff] }
  0x18   : > { %986 = vmatprep.subr.mxu1 %v335_v7  ;;  %943 = vmatpush3.msra.mxu0 %v287_v8  ;;  %v333_v15 = vld [vmem:[%s1262_s28 + $0x1e0] sm:$0xff]  ;;  %v332_v19 = vld [vmem:[%s1262_s28 + $0x1d8] sm:$0xff]  ;;  %v331_v23 = vld [vmem:[%s1262_s28 + $0x1d0] sm:$0xff] }
  0x19   : > { %987 = vmatpush3.msra.mxu1 %v319_v9  ;;  %944 = vmatprep.subr.mxu0 %v302_v10  ;;  %v285_v16 = vld [vmem:[%s1262_s28 + $0x60] sm:$0xff]  ;;  %v284_v20 = vld [vmem:[%s1262_s28 + $0x58] sm:$0xff]  ;;  %v283_v24 = vld [vmem:[%s1262_s28 + $0x50] sm:$0xff] }
  0x1a   : > { %988 = vmatprep.subr.mxu1 %v334_v11  ;;  %v317_v17 = vld [vmem:[%s1262_s28 + $0x160] sm:$0xff]  ;;  %945 = vmatpush3.msra.mxu0 %v286_v12  ;;  %v316_v21 = vld [vmem:[%s1262_s28 + $0x158] sm:$0xff]  ;;  %v315_v25 = vld [vmem:[%s1262_s28 + $0x150] sm:$0xff] }
  0x1b   : > { %989 = vmatpush3.msra.mxu1 %v318_v13  ;;  %946 = vmatprep.subr.mxu0 %v301_v14  ;;  %v298_v26 = vld [vmem:[%s1262_s28 + $0xc8] sm:$0xff]  ;;  %v297_v30 = vld [vmem:[%s1262_s28 + $0xc0] sm:$0xff]  ;;  %v296_v34 = vld [vmem:[%s1262_s28 + $0xb8] sm:$0xff] }
  0x1c   : > { %990 = vmatprep.subr.mxu1 %v333_v15  ;;  %947 = vmatpush3.msra.mxu0 %v285_v16  ;;  %v330_v27 = vld [vmem:[%s1262_s28 + $0x1c8] sm:$0xff]  ;;  %v329_v31 = vld [vmem:[%s1262_s28 + $0x1c0] sm:$0xff]  ;;  %v328_v35 = vld [vmem:[%s1262_s28 + $0x1b8] sm:$0xff] }
  0x1d   : > { %991 = vmatpush3.msra.mxu1 %v317_v17  ;;  %948 = vmatprep.subr.mxu0 %v300_v18  ;;  %v282_v28 = vld [vmem:[%s1262_s28 + $0x48] sm:$0xff]  ;;  %v281_v32 = vld [vmem:[%s1262_s28 + $0x40] sm:$0xff]  ;;  %v280_v36 = vld [vmem:[%s1262_s28 + $0x38] sm:$0xff] }
  0x1e   : > { %992 = vmatprep.subr.mxu1 %v332_v19  ;;  %949 = vmatpush3.msra.mxu0 %v284_v20  ;;  %v314_v29 = vld [vmem:[%s1262_s28 + $0x148] sm:$0xff]  ;;  %v313_v33 = vld [vmem:[%s1262_s28 + $0x140] sm:$0xff]  ;;  %v312_v37 = vld [vmem:[%s1262_s28 + $0x138] sm:$0xff] }
  0x1f   : > { %993 = vmatpush3.msra.mxu1 %v316_v21  ;;  %950 = vmatprep.subr.mxu0 %v299_v22  ;;  %v295_v38 = vld [vmem:[%s1262_s28 + $0xb0] sm:$0xff]  ;;  %v294_v42 = vld [vmem:[%s1262_s28 + $0xa8] sm:$0xff]  ;;  %v293_v46 = vld [vmem:[%s1262_s28 + $0xa0] sm:$0xff] }
  0x20   : > { %994 = vmatprep.subr.mxu1 %v331_v23  ;;  %951 = vmatpush3.msra.mxu0 %v283_v24  ;;  %v327_v39 = vld [vmem:[%s1262_s28 + $0x1b0] sm:$0xff]  ;;  %v326_v43 = vld [vmem:[%s1262_s28 + $0x1a8] sm:$0xff]  ;;  %v325_v47 = vld [vmem:[%s1262_s28 + $0x1a0] sm:$0xff] }
  0x21   : > { %995 = vmatpush3.msra.mxu1 %v315_v25  ;;  %952 = vmatprep.subr.mxu0 %v298_v26  ;;  %v279_v40 = vld [vmem:[%s1262_s28 + $0x30] sm:$0xff]  ;;  %v278_v44 = vld [vmem:[%s1262_s28 + $0x28] sm:$0xff]  ;;  %v277_v48 = vld [vmem:[%s1262_s28 + $0x20] sm:$0xff] }
  0x22   : > { %996 = vmatprep.subr.mxu1 %v330_v27  ;;  %953 = vmatpush3.msra.mxu0 %v282_v28  ;;  %v311_v41 = vld [vmem:[%s1262_s28 + $0x130] sm:$0xff]  ;;  %v310_v45 = vld [vmem:[%s1262_s28 + $0x128] sm:$0xff]  ;;  %v309_v49 = vld [vmem:[%s1262_s28 + $0x120] sm:$0xff] }
  0x23   : > { %997 = vmatpush3.msra.mxu1 %v314_v29  ;;  %954 = vmatprep.subr.mxu0 %v297_v30  ;;  %v292_v50 = vld [vmem:[%s1262_s28 + $0x98] sm:$0xff]  ;;  %v291_v54 = vld [vmem:[%s1262_s28 + $0x90] sm:$0xff]  ;;  %v290_v58 = vld [vmem:[%s1262_s28 + $0x88] sm:$0xff] }
  0x24   : > { %998 = vmatprep.subr.mxu1 %v329_v31  ;;  %955 = vmatpush3.msra.mxu0 %v281_v32  ;;  %v324_v51 = vld [vmem:[%s1262_s28 + $0x198] sm:$0xff]  ;;  %v323_v55 = vld [vmem:[%s1262_s28 + $0x190] sm:$0xff]  ;;  %v322_v59 = vld [vmem:[%s1262_s28 + $0x188] sm:$0xff] }
  0x25   : > { %999 = vmatpush3.msra.mxu1 %v313_v33  ;;  %956 = vmatprep.subr.mxu0 %v296_v34  ;;  %v276_v52 = vld [vmem:[%s1262_s28 + $0x18] sm:$0xff]  ;;  %v275_v56 = vld [vmem:[%s1262_s28 + $0x10] sm:$0xff]  ;;  %v274_v60 = vld [vmem:[%s1262_s28 + $0x8] sm:$0xff] }
  0x26   : > { %1000 = vmatprep.subr.mxu1 %v328_v35  ;;  %957 = vmatpush3.msra.mxu0 %v280_v36  ;;  %v308_v53 = vld [vmem:[%s1262_s28 + $0x118] sm:$0xff]  ;;  %v307_v57 = vld [vmem:[%s1262_s28 + $0x110] sm:$0xff]  ;;  %v306_v61 = vld [vmem:[%s1262_s28 + $0x108] sm:$0xff] }
  0x27   : > { %1001 = vmatpush3.msra.mxu1 %v312_v37  ;;  %958 = vmatprep.subr.mxu0 %v295_v38  ;;  %v289_v62 = vld [vmem:[%s1262_s28 + $0x80] sm:$0xff]  ;;  %v368_v3 = vld [vmem:[%s1262_s28 + $0x2f8] sm:$0xff]  ;;  %v403_v5 = vld [vmem:[%s1255_s23 + $0x10] sm:$0xff] }
  0x28   : > { %1002 = vmatprep.subr.mxu1 %v327_v39  ;;  %959 = vmatpush3.msra.mxu0 %v279_v40  ;;  %v321_v63 = vld [vmem:[%s1262_s28 + $0x180] sm:$0xff]  ;;  %v400_v4 = vld [vmem:[%s1262_s28 + $0x3f8] sm:$0xff]  ;;  %v367_v8 = vld [vmem:[%s1262_s28 + $0x2f0] sm:$0xff] }
  0x29   : > { %1003 = vmatpush3.msra.mxu1 %v311_v41  ;;  %960 = vmatprep.subr.mxu0 %v294_v42  ;;  %v273_v0 = vld [vmem:[%s1262_s28] sm:$0xff]  ;;  %v352_v6 = vld [vmem:[%s1262_s28 + $0x278] sm:$0xff]  ;;  %v399_v9 = vld [vmem:[%s1262_s28 + $0x3f0] sm:$0xff] }
  0x2a   : > { %1004 = vmatprep.subr.mxu1 %v326_v43  ;;  %961 = vmatpush3.msra.mxu0 %v278_v44  ;;  %v305_v1 = vld [vmem:[%s1262_s28 + $0x100] sm:$0xff]  ;;  %v384_v7 = vld [vmem:[%s1262_s28 + $0x378] sm:$0xff]  ;;  %v351_v10 = vld [vmem:[%s1262_s28 + $0x270] sm:$0xff] }
  0x2b   : > { %1005 = vmatpush3.msra.mxu1 %v310_v45  ;;  %962 = vmatprep.subr.mxu0 %v293_v46  ;;  %v401_v2 = vld [vmem:[%s1255_s23] sm:$0xff]  ;;  %v383_v11 = vld [vmem:[%s1262_s28 + $0x370] sm:$0xff]  ;;  %v366_v12 = vld [vmem:[%s1262_s28 + $0x2e8] sm:$0xff] }
  0x2c   : > { %1006 = vmatprep.subr.mxu1 %v325_v47  ;;  %963 = vmatpush3.msra.mxu0 %v277_v48  ;;  %v398_v13 = vld [vmem:[%s1262_s28 + $0x3e8] sm:$0xff]  ;;  %v365_v16 = vld [vmem:[%s1262_s28 + $0x2e0] sm:$0xff]  ;;  %v364_v20 = vld [vmem:[%s1262_s28 + $0x2d8] sm:$0xff] }
  0x2d   : > { %1007 = vmatpush3.msra.mxu1 %v309_v49  ;;  %964 = vmatprep.subr.mxu0 %v292_v50  ;;  %v350_v14 = vld [vmem:[%s1262_s28 + $0x268] sm:$0xff]  ;;  %v397_v17 = vld [vmem:[%s1262_s28 + $0x3e0] sm:$0xff]  ;;  %v396_v21 = vld [vmem:[%s1262_s28 + $0x3d8] sm:$0xff] }
  0x2e   : > { %1008 = vmatprep.subr.mxu1 %v324_v51  ;;  %965 = vmatpush3.msra.mxu0 %v276_v52  ;;  %v382_v15 = vld [vmem:[%s1262_s28 + $0x368] sm:$0xff]  ;;  %v349_v18 = vld [vmem:[%s1262_s28 + $0x260] sm:$0xff]  ;;  %v348_v22 = vld [vmem:[%s1262_s28 + $0x258] sm:$0xff] }
  0x2f   : > { %1009 = vmatpush3.msra.mxu1 %v308_v53  ;;  %966 = vmatprep.subr.mxu0 %v291_v54  ;;  %v381_v19 = vld [vmem:[%s1262_s28 + $0x360] sm:$0xff]  ;;  %v380_v23 = vld [vmem:[%s1262_s28 + $0x358] sm:$0xff]  ;;  %v363_v24 = vld [vmem:[%s1262_s28 + $0x2d0] sm:$0xff] }
  0x30   : > { %1010 = vmatprep.subr.mxu1 %v323_v55  ;;  %967 = vmatpush3.msra.mxu0 %v275_v56  ;;  %v395_v25 = vld [vmem:[%s1262_s28 + $0x3d0] sm:$0xff]  ;;  %v362_v28 = vld [vmem:[%s1262_s28 + $0x2c8] sm:$0xff]  ;;  %v361_v32 = vld [vmem:[%s1262_s28 + $0x2c0] sm:$0xff] }
  0x31   : > { %1011 = vmatpush3.msra.mxu1 %v307_v57  ;;  %968 = vmatprep.subr.mxu0 %v290_v58  ;;  %v347_v26 = vld [vmem:[%s1262_s28 + $0x250] sm:$0xff]  ;;  %v394_v29 = vld [vmem:[%s1262_s28 + $0x3c8] sm:$0xff]  ;;  %v393_v33 = vld [vmem:[%s1262_s28 + $0x3c0] sm:$0xff] }
  0x32   : > { %1012 = vmatprep.subr.mxu1 %v322_v59  ;;  %969 = vmatpush3.msra.mxu0 %v274_v60  ;;  %v379_v27 = vld [vmem:[%s1262_s28 + $0x350] sm:$0xff]  ;;  %v346_v30 = vld [vmem:[%s1262_s28 + $0x248] sm:$0xff]  ;;  %v345_v34 = vld [vmem:[%s1262_s28 + $0x240] sm:$0xff] }
  0x33   : > { %1013 = vmatpush3.msra.mxu1 %v306_v61  ;;  %970 = vmatprep.subr.mxu0 %v289_v62  ;;  %v378_v31 = vld [vmem:[%s1262_s28 + $0x348] sm:$0xff]  ;;  %v377_v35 = vld [vmem:[%s1262_s28 + $0x340] sm:$0xff]  ;;  %v360_v36 = vld [vmem:[%s1262_s28 + $0x2b8] sm:$0xff] }
  0x34   : > { %1014 = vmatprep.subr.mxu1 %v321_v63  ;;  %971 = vmatpush3.msra.mxu0 %v273_v0  ;;  %v392_v37 = vld [vmem:[%s1262_s28 + $0x3b8] sm:$0xff]  ;;  %v410_v38 = vld [vmem:[%s1255_s23 + $0x48] sm:$0xff]  ;;  %v409_v41 = vld [vmem:[%s1255_s23 + $0x40] sm:$0xff] }
  0x35   : > { %1015 = vmatpush3.msra.mxu1 %v305_v1  ;;  %502 = vmatmul.mubr.f32.vlgmr.msra.gmra.mxu0 %v401_v2  ;;  %v344_v39 = vld [vmem:[%s1262_s28 + $0x238] sm:$0xff]  ;;  %v359_v42 = vld [vmem:[%s1262_s28 + $0x2b0] sm:$0xff]  ;;  %v358_v47 = vld [vmem:[%s1262_s28 + $0x2a8] sm:$0xff] }
  0x36   : > { %1028 = vmatprep.subr.mxu0 %v368_v3  ;;  %1072 = vmatprep.subr.mxu1 %v400_v4  ;;  %v376_v40 = vld [vmem:[%s1262_s28 + $0x338] sm:$0xff]  ;;  %v391_v43 = vld [vmem:[%s1262_s28 + $0x3b0] sm:$0xff]  ;;  %v390_v49 = vld [vmem:[%s1262_s28 + $0x3a8] sm:$0xff] }
  0x37   : > { %587 = vmatmul.mubr.f32.vlgmr.msra.gmra.mxu1 %v403_v5  ;;  %1029 = vmatpush3.msra.mxu0 %v352_v6  ;;  %v412_v44 = vld [vmem:[%s1255_s23 + $0x58] sm:$0xff]  ;;  %v343_v45 = vld [vmem:[%s1262_s28 + $0x230] sm:$0xff]  ;;  %v418_v50 = vld [vmem:[%s1255_s23 + $0x88] sm:$0xff] }
  0x38   : > { %1073 = vmatpush3.msra.mxu1 %v384_v7  ;;  %1030 = vmatprep.subr.mxu0 %v367_v8  ;;  %v375_v46 = vld [vmem:[%s1262_s28 + $0x330] sm:$0xff]  ;;  %v342_v51 = vld [vmem:[%s1262_s28 + $0x228] sm:$0xff]  ;;  %v417_v53 = vld [vmem:[%s1255_s23 + $0x80] sm:$0xff] }
  0x39   : > { %1074 = vmatprep.subr.mxu1 %v399_v9  ;;  %1031 = vmatpush3.msra.mxu0 %v351_v10  ;;  %v411_v48 = vld [vmem:[%s1255_s23 + $0x50] sm:$0xff]  ;;  %v374_v52 = vld [vmem:[%s1262_s28 + $0x328] sm:$0xff]  ;;  %v357_v54 = vld [vmem:[%s1262_s28 + $0x2a0] sm:$0xff] }
  0x3a   : > { %1075 = vmatpush3.msra.mxu1 %v383_v11  ;;  %1032 = vmatprep.subr.mxu0 %v366_v12  ;;  %v389_v55 = vld [vmem:[%s1262_s28 + $0x3a0] sm:$0xff]  ;;  %v420_v56 = vld [vmem:[%s1255_s23 + $0x98] sm:$0xff]  ;;  %v419_v60 = vld [vmem:[%s1255_s23 + $0x90] sm:$0xff] }
  0x3b   : > { %1076 = vmatprep.subr.mxu1 %v398_v13  ;;  %1033 = vmatpush3.msra.mxu0 %v350_v14  ;;  %v341_v57 = vld [vmem:[%s1262_s28 + $0x220] sm:$0xff]  ;;  %v356_v59 = vld [vmem:[%s1262_s28 + $0x298] sm:$0xff]  ;;  %v426_v62 = vld [vmem:[%s1255_s23 + $0xc8] sm:$0xff] }
  0x3c   : > { %1077 = vmatpush3.msra.mxu1 %v382_v15  ;;  %1034 = vmatprep.subr.mxu0 %v365_v16  ;;  %v373_v58 = vld [vmem:[%s1262_s28 + $0x320] sm:$0xff]  ;;  %v388_v61 = vld [vmem:[%s1262_s28 + $0x398] sm:$0xff]  ;;  %v355_v2 = vld [vmem:[%s1262_s28 + $0x290] sm:$0xff] }
  0x3d   : > { %1078 = vmatprep.subr.mxu1 %v397_v17  ;;  %1035 = vmatpush3.msra.mxu0 %v349_v18  ;;  %v340_v63 = vld [vmem:[%s1262_s28 + $0x218] sm:$0xff]  ;;  %v425_v1 = vld [vmem:[%s1255_s23 + $0xc0] sm:$0xff]  ;;  %v387_v3 = vld [vmem:[%s1262_s28 + $0x390] sm:$0xff] }
  0x3e   : > { %1079 = vmatpush3.msra.mxu1 %v381_v19  ;;  %1036 = vmatprep.subr.mxu0 %v364_v20  ;;  %v372_v0 = vld [vmem:[%s1262_s28 + $0x318] sm:$0xff]  ;;  %v339_v5 = vld [vmem:[%s1262_s28 + $0x210] sm:$0xff]  ;;  %v354_v7 = vld [vmem:[%s1262_s28 + $0x288] sm:$0xff] }
  0x3f   : > { %1080 = vmatprep.subr.mxu1 %v396_v21  ;;  %1037 = vmatpush3.msra.mxu0 %v348_v22  ;;  %v428_v4 = vld [vmem:[%s1255_s23 + $0xd8] sm:$0xff]  ;;  %v371_v6 = vld [vmem:[%s1262_s28 + $0x310] sm:$0xff]  ;;  %v386_v9 = vld [vmem:[%s1262_s28 + $0x388] sm:$0xff] }
  0x40   : > { %1081 = vmatpush3.msra.mxu1 %v380_v23  ;;  %1038 = vmatprep.subr.mxu0 %v363_v24  ;;  %v427_v8 = vld [vmem:[%s1255_s23 + $0xd0] sm:$0xff]  ;;  %v338_v10 = vld [vmem:[%s1262_s28 + $0x208] sm:$0xff]  ;;  %v353_v12 = vld [vmem:[%s1262_s28 + $0x280] sm:$0xff] }
  0x41   : > { %1082 = vmatprep.subr.mxu1 %v395_v25  ;;  %1039 = vmatpush3.msra.mxu0 %v347_v26  ;;  %v370_v11 = vld [vmem:[%s1262_s28 + $0x308] sm:$0xff]  ;;  %v385_v13 = vld [vmem:[%s1262_s28 + $0x380] sm:$0xff]  ;;  %v408_v17 = vld [vmem:[%s1255_s23 + $0x38] sm:$0xff] }
  0x42   : > { %1083 = vmatpush3.msra.mxu1 %v379_v27  ;;  %1040 = vmatprep.subr.mxu0 %v362_v28  ;;  %v337_v14 = vld [vmem:[%s1262_s28 + $0x200] sm:$0xff]  ;;  %v406_v15 = vld [vmem:[%s1255_s23 + $0x28] sm:$0xff]  ;;  %v407_v19 = vld [vmem:[%s1255_s23 + $0x30] sm:$0xff] }
  0x43   : > { %1084 = vmatprep.subr.mxu1 %v394_v29  ;;  %1041 = vmatpush3.msra.mxu0 %v346_v30  ;;  %v369_v16 = vld [vmem:[%s1262_s28 + $0x300] sm:$0xff]  ;;  %v414_v20 = vld [vmem:[%s1255_s23 + $0x68] sm:$0xff]  ;;  %v416_v21 = vld [vmem:[%s1255_s23 + $0x78] sm:$0xff] }
  0x44   : > { %1085 = vmatpush3.msra.mxu1 %v378_v31  ;;  %1042 = vmatprep.subr.mxu0 %v361_v32  ;;  %v405_v18 = vld [vmem:[%s1255_s23 + $0x20] sm:$0xff]  ;;  %v415_v23 = vld [vmem:[%s1255_s23 + $0x70] sm:$0xff]  ;;  %v422_v24 = vld [vmem:[%s1255_s23 + $0xa8] sm:$0xff] }
  0x45   : > { %1086 = vmatprep.subr.mxu1 %v393_v33  ;;  %1043 = vmatpush3.msra.mxu0 %v345_v34  ;;  %v413_v22 = vld [vmem:[%s1255_s23 + $0x60] sm:$0xff]  ;;  %v424_v25 = vld [vmem:[%s1255_s23 + $0xb8] sm:$0xff]  ;;  %v423_v27 = vld [vmem:[%s1255_s23 + $0xb0] sm:$0xff] }
  0x46   : > { %1087 = vmatpush3.msra.mxu1 %v377_v35  ;;  %1044 = vmatprep.subr.mxu0 %v360_v36  ;;  %v421_v26 = vld [vmem:[%s1255_s23 + $0xa0] sm:$0xff]  ;;  %v430_v28 = vld [vmem:[%s1255_s23 + $0xe8] sm:$0xff]  ;;  %v432_v29 = vld [vmem:[%s1255_s23 + $0xf8] sm:$0xff] }
  0x47   : > { %1088 = vmatprep.subr.mxu1 %v392_v37  ;;  %506 = vmatprep.mubr.f32.mxu0 %v410_v38  ;;  %v429_v30 = vld [vmem:[%s1255_s23 + $0xe0] sm:$0xff]  ;;  %v431_v31 = vld [vmem:[%s1255_s23 + $0xf0] sm:$0xff] }
  0x48   : > { %1045 = vmatpush3.msra.mxu0 %v344_v39  ;;  %1089 = vmatpush3.msra.mxu1 %v376_v40 }
  0x49   : > { %507 = vmatmul.mubr.f32.gmra.mxu0 %v409_v41  ;;  %1046 = vmatprep.subr.mxu0 %v359_v42 }
  0x4a   : > { %1090 = vmatprep.subr.mxu1 %v391_v43  ;;  %591 = vmatprep.mubr.f32.mxu1 %v412_v44 }
  0x4b   : > { %1047 = vmatpush3.msra.mxu0 %v343_v45  ;;  %1091 = vmatpush3.msra.mxu1 %v375_v46 }
  0x4c   : > { %1048 = vmatprep.subr.mxu0 %v358_v47  ;;  %592 = vmatmul.mubr.f32.gmra.mxu1 %v411_v48  ;;  %v433_v47 = vld [vmem:[%s1426_s5] sm:$0xff] }
  0x4d   : > { %1092 = vmatprep.subr.mxu1 %v390_v49  ;;  %511 = vmatprep.mubr.f32.mxu0 %v418_v50 }
  0x4e   : > { %1049 = vmatpush3.msra.mxu0 %v342_v51  ;;  %1093 = vmatpush3.msra.mxu1 %v374_v52 }
  0x4f   : > { %512 = vmatmul.mubr.f32.gmra.mxu0 %v417_v53  ;;  %1050 = vmatprep.subr.mxu0 %v357_v54  ;;  %v434_v53 = vld [vmem:[%s1426_s5 + $0x8] sm:$0xff] }
  0x50   : > { %1094 = vmatprep.subr.mxu1 %v389_v55  ;;  %596 = vmatprep.mubr.f32.mxu1 %v420_v56 }
  0x51   : > { %1051 = vmatpush3.msra.mxu0 %v341_v57  ;;  %1095 = vmatpush3.msra.mxu1 %v373_v58 }
  0x52   : > { %1052 = vmatprep.subr.mxu0 %v356_v59  ;;  %597 = vmatmul.mubr.f32.gmra.mxu1 %v419_v60 }
  0x53   : > { %1096 = vmatprep.subr.mxu1 %v388_v61  ;;  %516 = vmatprep.mubr.f32.mxu0 %v426_v62  ;;  %v435_v62 = vld [vmem:[%s1426_s5 + $0x10] sm:$0xff] }
  0x54   : > { %1053 = vmatpush3.msra.mxu0 %v340_v63  ;;  %1097 = vmatpush3.msra.mxu1 %v372_v0 }
  0x55   : > { %517 = vmatmul.mubr.f32.gmra.mxu0 %v425_v1  ;;  %1054 = vmatprep.subr.mxu0 %v355_v2 }
  0x56   : > { %1098 = vmatprep.subr.mxu1 %v387_v3  ;;  %601 = vmatprep.mubr.f32.mxu1 %v428_v4 }
  0x57   : > { %1055 = vmatpush3.msra.mxu0 %v339_v5  ;;  %1099 = vmatpush3.msra.mxu1 %v371_v6 }
  0x58   : > { %1056 = vmatprep.subr.mxu0 %v354_v7  ;;  %602 = vmatmul.mubr.f32.gmra.mxu1 %v427_v8 }
  0x59   : > { %1100 = vmatprep.subr.mxu1 %v386_v9  ;;  %1057 = vmatpush3.msra.mxu0 %v338_v10 }
  0x5a   : > { %1101 = vmatpush3.msra.mxu1 %v370_v11  ;;  %1058 = vmatprep.subr.mxu0 %v353_v12  ;;  %v436_v12 = vld [vmem:[%s1426_s5 + $0x18] sm:$0xff] }
  0x5b   : > { %1102 = vmatprep.subr.mxu1 %v385_v13  ;;  %1059 = vmatpush3.msra.mxu0 %v337_v14 }
  0x5c   : > { %671 = vmatprep.mubr.f32.mxu0 %v406_v15  ;;  %1103 = vmatpush3.msra.mxu1 %v369_v16 }
  0x5d   : > { %756 = vmatprep.mubr.f32.mxu1 %v408_v17  ;;  %672 = vmatmul.mubr.f32.vlgmr.msra.gmra.mxu0 %v405_v18 }
  0x5e   : > { %757 = vmatmul.mubr.f32.vlgmr.msra.gmra.mxu1 %v407_v19  ;;  %676 = vmatprep.mubr.f32.mxu0 %v414_v20 }
  0x5f   : > { %761 = vmatprep.mubr.f32.mxu1 %v416_v21 }
  0x61   : > { %677 = vmatmul.mubr.f32.gmra.mxu0 %v413_v22 }
  0x62   : > { %762 = vmatmul.mubr.f32.gmra.mxu1 %v415_v23  ;;  %681 = vmatprep.mubr.f32.mxu0 %v422_v24 }
  0x63   : > { %766 = vmatprep.mubr.f32.mxu1 %v424_v25 }
  0x65   : > { %682 = vmatmul.mubr.f32.gmra.mxu0 %v421_v26 }
  0x66   : > { %767 = vmatmul.mubr.f32.gmra.mxu1 %v423_v27  ;;  %686 = vmatprep.mubr.f32.mxu0 %v430_v28 }
  0x67   : > { %771 = vmatprep.mubr.f32.mxu1 %v432_v29 }
  0x69   : > { %687 = vmatmul.mubr.f32.gmra.mxu0 %v429_v30 }
  0x6a   : > { %772 = vmatmul.mubr.f32.gmra.mxu1 %v431_v31 }
  0xf5   : > { %v972_v32 = vpop.f32.mrf.mxu0 }
  0xf7   : > { %v1016_v33 = vpop.f32.mrf.mxu1  ;;  %v973_v34 = vpop.f32.mrf.mxu0 }
  0xf8   : > { %v974_v45 = vadd.f32 %v973_v34, %v972_v32 }
  0xf9   : > { %v1017_v36 = vpop.f32.mrf.mxu1 }
  0xfa   : > { %v504_v50 = vadd.f32 %v974_v45, %v433_v47  ;;  %v1018_v51 = vadd.f32 %v1017_v36, %v1016_v33 }
  0xfc   : > { %v589_v59 = vadd.f32 %v1018_v51, %v504_v50 }
 0x109   : > { %v975_v35 = vpop.f32.mrf.mxu0 }
 0x10b   : > { %v976_v37 = vpop.f32.mrf.mxu0 }
 0x10c   : > { %v1019_v38 = vpop.f32.mrf.mxu1  ;;  %v977_v52 = vadd.f32 %v976_v37, %v975_v35 }
 0x10e   : > { %v1020_v39 = vpop.f32.mrf.mxu1  ;;  %v509_v60 = vadd.f32 %v977_v52, %v434_v53 }
 0x10f   : > { %v978_v40 = vpop.f32.mrf.mxu0  ;;  %v1021_v61 = vadd.f32 %v1020_v39, %v1019_v38 }
 0x111   : > { %v979_v42 = vpop.f32.mrf.mxu0  ;;  %v594_v8 = vadd.f32 %v1021_v61, %v509_v60 }
 0x112   : > { %v1022_v41 = vpop.f32.mrf.mxu1  ;;  %v980_v56 = vadd.f32 %v979_v42, %v978_v40 }
 0x114   : > { %v1023_v43 = vpop.f32.mrf.mxu1  ;;  %v514_v4 = vadd.f32 %v980_v56, %v435_v62 }
 0x115   : > { %v981_v44 = vpop.f32.mrf.mxu0  ;;  %v1024_v5 = vadd.f32 %v1023_v43, %v1022_v41 }
 0x117   : > { %v982_v49 = vpop.f32.mrf.mxu0  ;;  %v599_v18 = vadd.f32 %v1024_v5, %v514_v4 }
 0x118   : > { %v1025_v46 = vpop.f32.mrf.mxu1  ;;  %v983_v9 = vadd.f32 %v982_v49, %v981_v44 }
 0x11a   : > { %v1026_v48 = vpop.f32.mrf.mxu1  ;;  %v519_v21 = vadd.f32 %v983_v9, %v436_v12 }
 0x11b   : > { %v1027_v22 = vadd.f32 %v1026_v48, %v1025_v46 }
 0x11d   : > { %v1060_v54 = vpop.f32.mrf.mxu0  ;;  %v604_v32 = vadd.f32 %v1027_v22, %v519_v21 }
 0x11e   : > { %v1104_v55 = vpop.f32.mrf.mxu1 }
 0x11f   : > { %v1061_v57 = vpop.f32.mrf.mxu0 }
 0x120   : > { %v1105_v58 = vpop.f32.mrf.mxu1  ;;  %v1062_v63 = vadd.f32 %v1061_v57, %v1060_v54 }
 0x121   : > { %v1063_v0 = vpop.f32.mrf.mxu0  ;;  %v1106_v3 = vadd.f32 %v1105_v58, %v1104_v55 }
 0x122   : > { %v1107_v1 = vpop.f32.mrf.mxu1  ;;  %v674_v2 = vadd.f32 %v1062_v63, %v589_v59 }
 0x123   : > { %v1064_v6 = vpop.f32.mrf.mxu0 }
 0x124   : > { %v1108_v7 = vpop.f32.mrf.mxu1  ;;  %v759_v10 = vadd.f32 %v1106_v3, %v674_v2  ;;  %v1065_v11 = vadd.f32 %v1064_v6, %v1063_v0 }
 0x125   : > { %v1066_v13 = vpop.f32.mrf.mxu0  ;;  %v1109_v17 = vadd.f32 %v1108_v7, %v1107_v1 }
 0x126   : > { %v1110_v14 = vpop.f32.mrf.mxu1  ;;  %v777_v15 = vmax.f32 %v759_v10, 0.0  ;;  %v679_v16 = vadd.f32 %v1065_v11, %v594_v8 }
 0x127   : > { %v1067_v19 = vpop.f32.mrf.mxu0 }
 0x128   : > { %v1111_v20 = vpop.f32.mrf.mxu1  ;;  %782 = vst.msk [vmem:[%s1437_s12] sm:$0xff] %vm781_vm0, %v777_v15  ;;  %v764_v23 = vadd.f32 %v1109_v17, %v679_v16  ;;  %v1068_v24 = vadd.f32 %v1067_v19, %v1066_v13 }
 0x129   : > { %v1069_v25 = vpop.f32.mrf.mxu0  ;;  %v1112_v29 = vadd.f32 %v1111_v20, %v1110_v14 }
 0x12a   : > { %v1113_v26 = vpop.f32.mrf.mxu1  ;;  %v778_v27 = vmax.f32 %v764_v23, 0.0  ;;  %v684_v28 = vadd.f32 %v1068_v24, %v599_v18 }
 0x12b   : > { %v1070_v30 = vpop.f32.mrf.mxu0 }
 0x12c   : > { %v1114_v31 = vpop.f32.mrf.mxu1  ;;  %783 = vst.msk [vmem:[%s1437_s12 + $0x8] sm:$0xff] %vm781_vm0, %v778_v27  ;;  %v769_v33 = vadd.f32 %v1112_v29, %v684_v28  ;;  %v1071_v34 = vadd.f32 %v1070_v30, %v1069_v25 }
 0x12d   : > { %v1115_v37 = vadd.f32 %v1114_v31, %v1113_v26 }
 0x12e   : > { %v779_v35 = vmax.f32 %v769_v33, 0.0  ;;  %v689_v36 = vadd.f32 %v1071_v34, %v604_v32 }
 0x130   : > { %784 = vst.msk [vmem:[%s1437_s12 + $0x10] sm:$0xff] %vm781_vm0, %v779_v35  ;;  %v774_v38 = vadd.f32 %v1115_v37, %v689_v36 }
 0x132   : > { %v780_v39 = vmax.f32 %v774_v38, 0.0 }
 0x134   : > { %785 = vst.msk [vmem:[%s1437_s12 + $0x18] sm:$0xff] %vm781_vm0, %v780_v39 }
 0x135 PF: > { %s13_s16 = sadd.s32 1, %s1194_s16   ;;  %s1466_s12 = smov %s1186_s14 }
 0x136   : > { %p10_p7 = scmp.ge.s32.totalorder %s13_s16, 8   ;;  %s1467_s13 = smov %s1190_s15 }
 0x137   : > { %s1468_s14 = smov %s1471_s17  ;;  %s1469_s15 = smov %s1475_s18 }
 0x138   :  { %12 = sbr.rel (!%p10_p7) target bundleno = 3 (0x3), region = 68 }

// kernel: rmasknet_forward.13
= control target key start
LH: loop header
LB: loop body
LE: loop exit
PB: predicated region body
PF: predicated region fallthrough
CT: control target
= control target key end

     0   :  { %s1739_s12 = smov 0   ;;  %s1741_s13 = smov 0   ;;  %s2102_s0 = inlined_call_operand.vmem [shape: f32[3,2,2048,8], index: 0, kind: input, shape index: {}]   ;;  %s2103_s1 = inlined_call_operand.vmem [shape: f32[3,16,2048], index: 1, kind: input, shape index: {}]   ;;  %s2104_s2 = inlined_call_operand.vmem [shape: f32[3,16,1], index: 2, kind: input, shape index: {}]   ;;  %s2105_s3 = inlined_call_operand.vmem [shape: f32[3,2,16,8], index: 3, kind: output, shape index: {}]  }
   0x1   :  { %s1743_s14 = smov 0   ;;  %s1745_s15 = smov 0  }
   0x2   :  { %s1747_s16 = smov 0  }
   0x3 LB: > { %s28_s17 = sadd.s32 1, %s1708_s14  ;;  %s32_s18 = sadd.s32 1, %s1712_s15  ;;  %s1716_s16 = sphi %s1747_s16, %s13_s16   ;;  %s1712_s15 = sphi %s1745_s15, %s2109_s15   ;;  %s1708_s14 = sphi %s1743_s14, %s2108_s14   ;;  %s1704_s13 = sphi %s1741_s13, %s2107_s13   ;;  %s1700_s12 = sphi %s1739_s12, %s2106_s12  }
   0x4   : > { %p30_p0 = scmp.ge.s32.totalorder %s28_s17, 2  ;;  %p1317_p1 = scmp.ge.s32.totalorder %s1716_s16, 1 }
   0x5   : > { %p191_p2 = scmp.lt.s32.totalorder %s1716_s16, 7 }
   0x6   : > { %s2111_s17 = smov (%p30_p0, %s28_s17), 0  ;;  %s2113_s18 = smov (!%p30_p0, %s32_s18), %s1712_s15 }
   0x7   : > { %p192_p3 = pnand %p1317_p1, %p191_p2  ;;  %p34_p4 = scmp.ge.s32.totalorder %s2113_s18, 3 }
   0x8   : > { %p239_p5 = scmp.lt.s32.totalorder (!%p192_p3), %s1704_s13, 2  ;;  %p241_p6 = scmp.lt.s32.totalorder (!%p192_p3), %s1700_s12, 1 }
   0x9   : > { %s2115_s18 = smov (%p34_p4, %s2113_s18), 0  ;;  %195 = sbr.rel (%p192_p3) target bundleno = 371 (0x173), region = 32 }
   0xe   : > { %v1718_v0 = vmov 0   ;;  %s2117_s13 = smov (!%p239_p5, %s1704_s13), 2  ;;  %s2119_s12 = smov (!%p241_p6, %s1700_s12), 1  ;;  %vm1175_vm0 = vcmask 64512  }
   0xf   : > { %1677 = vset.pattern.permute.xlu0 %v1718_v0  ;;  %s1319_s19 = sshll.u32 %s2117_s13, 9  ;;  %s1330_s20 = sshll.u32 %s2117_s13, 8 }
  0x10   : > { %s1318_s21 = sshll.u32 %s2119_s12, 8  ;;  %s1779_s24 = scalar_lea.vmem %s2103_s1, %s1330_s20 }
  0x11   : > { %s248_s25 = sadd.s32 %s1319_s19, %s1318_s21  ;;  %v530_v1 = vld [vmem:[%s1779_s24 + $0x8] sm:$0xff]  ;;  %v532_v2 = vld [vmem:[%s1779_s24 + $0x18] sm:$0xff]  ;;  %s1331_s30 = sshll.u32 %s2117_s13, 4 }
  0x12   : > { %s1320_s26 = sshll.u32 %s248_s25, 3  ;;  %637 = vmatprep.mubr.f32.mxu0 %v530_v1  ;;  %712 = vmatprep.mubr.f32.mxu1 %v532_v2  ;;  %s2020_s6 = scalar_lea.vmem %s2104_s2, %s1331_s30 }
  0x13   : > { %s1786_s29 = scalar_lea.vmem %s2102_s0, %s1320_s26  ;;  %s1325_s7 = sshll.u32 %s2119_s12, 1 }
  0x14   : > { %v304_v3 = vld [vmem:[%s1786_s29 + $0xf8] sm:$0xff]  ;;  %v303_v7 = vld [vmem:[%s1786_s29 + $0xf0] sm:$0xff]  ;;  %v302_v11 = vld [vmem:[%s1786_s29 + $0xe8] sm:$0xff]  ;;  %s1326_s8 = sshll.u32 %s2117_s13, 2 }
  0x15   : > { %v336_v4 = vld [vmem:[%s1786_s29 + $0x1f8] sm:$0xff]  ;;  %1332 = vmatprep.subr.mxu0 %v304_v3  ;;  %v335_v8 = vld [vmem:[%s1786_s29 + $0x1f0] sm:$0xff]  ;;  %v334_v12 = vld [vmem:[%s1786_s29 + $0x1e8] sm:$0xff]  ;;  %s270_s9 = sadd.s32 %s1326_s8, %s1325_s7 }
  0x16   : > { %v288_v5 = vld [vmem:[%s1786_s29 + $0x78] sm:$0xff]  ;;  %1370 = vmatprep.subr.mxu1 %v336_v4  ;;  %v287_v9 = vld [vmem:[%s1786_s29 + $0x70] sm:$0xff]  ;;  %v286_v13 = vld [vmem:[%s1786_s29 + $0x68] sm:$0xff]  ;;  %s1327_s10 = sshll.u32 %s270_s9, 3 }
  0x17   : > { %v320_v6 = vld [vmem:[%s1786_s29 + $0x178] sm:$0xff]  ;;  %1333 = vmatpush3.msra.mxu0 %v288_v5  ;;  %v319_v10 = vld [vmem:[%s1786_s29 + $0x170] sm:$0xff]  ;;  %v318_v14 = vld [vmem:[%s1786_s29 + $0x168] sm:$0xff]  ;;  %s272_s13 = scalar_lea.vmem %s2105_s3, %s1327_s10 }
  0x18   : > { %1371 = vmatpush3.msra.mxu1 %v320_v6  ;;  %1334 = vmatprep.subr.mxu0 %v303_v7  ;;  %v301_v15 = vld [vmem:[%s1786_s29 + $0xe0] sm:$0xff]  ;;  %v300_v19 = vld [vmem:[%s1786_s29 + $0xd8] sm:$0xff]  ;;  %v299_v23 = vld [vmem:[%s1786_s29 + $0xd0] sm:$0xff] }
  0x19   : > { %1372 = vmatprep.subr.mxu1 %v335_v8  ;;  %1335 = vmatpush3.msra.mxu0 %v287_v9  ;;  %v333_v16 = vld [vmem:[%s1786_s29 + $0x1e0] sm:$0xff]  ;;  %v332_v20 = vld [vmem:[%s1786_s29 + $0x1d8] sm:$0xff]  ;;  %v331_v24 = vld [vmem:[%s1786_s29 + $0x1d0] sm:$0xff] }
  0x1a   : > { %1373 = vmatpush3.msra.mxu1 %v319_v10  ;;  %1336 = vmatprep.subr.mxu0 %v302_v11  ;;  %v285_v17 = vld [vmem:[%s1786_s29 + $0x60] sm:$0xff]  ;;  %v284_v21 = vld [vmem:[%s1786_s29 + $0x58] sm:$0xff]  ;;  %v283_v25 = vld [vmem:[%s1786_s29 + $0x50] sm:$0xff] }
  0x1b   : > { %1374 = vmatprep.subr.mxu1 %v334_v12  ;;  %v317_v18 = vld [vmem:[%s1786_s29 + $0x160] sm:$0xff]  ;;  %1337 = vmatpush3.msra.mxu0 %v286_v13  ;;  %v316_v22 = vld [vmem:[%s1786_s29 + $0x158] sm:$0xff]  ;;  %v315_v26 = vld [vmem:[%s1786_s29 + $0x150] sm:$0xff] }
  0x1c   : > { %1375 = vmatpush3.msra.mxu1 %v318_v14  ;;  %1338 = vmatprep.subr.mxu0 %v301_v15  ;;  %v298_v27 = vld [vmem:[%s1786_s29 + $0xc8] sm:$0xff]  ;;  %v297_v31 = vld [vmem:[%s1786_s29 + $0xc0] sm:$0xff]  ;;  %v296_v35 = vld [vmem:[%s1786_s29 + $0xb8] sm:$0xff] }
  0x1d   : > { %1376 = vmatprep.subr.mxu1 %v333_v16  ;;  %1339 = vmatpush3.msra.mxu0 %v285_v17  ;;  %v330_v28 = vld [vmem:[%s1786_s29 + $0x1c8] sm:$0xff]  ;;  %v329_v32 = vld [vmem:[%s1786_s29 + $0x1c0] sm:$0xff]  ;;  %v328_v36 = vld [vmem:[%s1786_s29 + $0x1b8] sm:$0xff] }
  0x1e   : > { %1377 = vmatpush3.msra.mxu1 %v317_v18  ;;  %1340 = vmatprep.subr.mxu0 %v300_v19  ;;  %v282_v29 = vld [vmem:[%s1786_s29 + $0x48] sm:$0xff]  ;;  %v281_v33 = vld [vmem:[%s1786_s29 + $0x40] sm:$0xff]  ;;  %v280_v37 = vld [vmem:[%s1786_s29 + $0x38] sm:$0xff] }
  0x1f   : > { %1378 = vmatprep.subr.mxu1 %v332_v20  ;;  %1341 = vmatpush3.msra.mxu0 %v284_v21  ;;  %v314_v30 = vld [vmem:[%s1786_s29 + $0x148] sm:$0xff]  ;;  %v313_v34 = vld [vmem:[%s1786_s29 + $0x140] sm:$0xff]  ;;  %v312_v38 = vld [vmem:[%s1786_s29 + $0x138] sm:$0xff] }
  0x20   : > { %1379 = vmatpush3.msra.mxu1 %v316_v22  ;;  %1342 = vmatprep.subr.mxu0 %v299_v23  ;;  %v295_v39 = vld [vmem:[%s1786_s29 + $0xb0] sm:$0xff]  ;;  %v294_v43 = vld [vmem:[%s1786_s29 + $0xa8] sm:$0xff]  ;;  %v293_v47 = vld [vmem:[%s1786_s29 + $0xa0] sm:$0xff] }
  0x21   : > { %1380 = vmatprep.subr.mxu1 %v331_v24  ;;  %1343 = vmatpush3.msra.mxu0 %v283_v25  ;;  %v327_v40 = vld [vmem:[%s1786_s29 + $0x1b0] sm:$0xff]  ;;  %v326_v44 = vld [vmem:[%s1786_s29 + $0x1a8] sm:$0xff]  ;;  %v325_v48 = vld [vmem:[%s1786_s29 + $0x1a0] sm:$0xff] }
  0x22   : > { %1381 = vmatpush3.msra.mxu1 %v315_v26  ;;  %1344 = vmatprep.subr.mxu0 %v298_v27  ;;  %v279_v41 = vld [vmem:[%s1786_s29 + $0x30] sm:$0xff]  ;;  %v278_v45 = vld [vmem:[%s1786_s29 + $0x28] sm:$0xff]  ;;  %v277_v49 = vld [vmem:[%s1786_s29 + $0x20] sm:$0xff] }
  0x23   : > { %1382 = vmatprep.subr.mxu1 %v330_v28  ;;  %1345 = vmatpush3.msra.mxu0 %v282_v29  ;;  %v311_v42 = vld [vmem:[%s1786_s29 + $0x130] sm:$0xff]  ;;  %v310_v46 = vld [vmem:[%s1786_s29 + $0x128] sm:$0xff]  ;;  %v309_v50 = vld [vmem:[%s1786_s29 + $0x120] sm:$0xff] }
  0x24   : > { %1383 = vmatpush3.msra.mxu1 %v314_v30  ;;  %1346 = vmatprep.subr.mxu0 %v297_v31  ;;  %v292_v51 = vld [vmem:[%s1786_s29 + $0x98] sm:$0xff]  ;;  %v291_v55 = vld [vmem:[%s1786_s29 + $0x90] sm:$0xff]  ;;  %v290_v59 = vld [vmem:[%s1786_s29 + $0x88] sm:$0xff] }
  0x25   : > { %1384 = vmatprep.subr.mxu1 %v329_v32  ;;  %1347 = vmatpush3.msra.mxu0 %v281_v33  ;;  %v324_v52 = vld [vmem:[%s1786_s29 + $0x198] sm:$0xff]  ;;  %v323_v56 = vld [vmem:[%s1786_s29 + $0x190] sm:$0xff]  ;;  %v322_v60 = vld [vmem:[%s1786_s29 + $0x188] sm:$0xff] }
  0x26   : > { %1385 = vmatpush3.msra.mxu1 %v313_v34  ;;  %1348 = vmatprep.subr.mxu0 %v296_v35  ;;  %v276_v53 = vld [vmem:[%s1786_s29 + $0x18] sm:$0xff]  ;;  %v275_v57 = vld [vmem:[%s1786_s29 + $0x10] sm:$0xff]  ;;  %v274_v61 = vld [vmem:[%s1786_s29 + $0x8] sm:$0xff] }
  0x27   : > { %1386 = vmatprep.subr.mxu1 %v328_v36  ;;  %1349 = vmatpush3.msra.mxu0 %v280_v37  ;;  %v308_v54 = vld [vmem:[%s1786_s29 + $0x118] sm:$0xff]  ;;  %v307_v58 = vld [vmem:[%s1786_s29 + $0x110] sm:$0xff]  ;;  %v306_v62 = vld [vmem:[%s1786_s29 + $0x108] sm:$0xff] }
  0x28   : > { %1387 = vmatpush3.msra.mxu1 %v312_v38  ;;  %1350 = vmatprep.subr.mxu0 %v295_v39  ;;  %v289_v63 = vld [vmem:[%s1786_s29 + $0x80] sm:$0xff]  ;;  %v368_v4 = vld [vmem:[%s1786_s29 + $0x2f8] sm:$0xff]  ;;  %v531_v6 = vld [vmem:[%s1779_s24 + $0x10] sm:$0xff] }
  0x29   : > { %1388 = vmatprep.subr.mxu1 %v327_v40  ;;  %1351 = vmatpush3.msra.mxu0 %v279_v41  ;;  %v321_v0 = vld [vmem:[%s1786_s29 + $0x180] sm:$0xff]  ;;  %v400_v5 = vld [vmem:[%s1786_s29 + $0x3f8] sm:$0xff]  ;;  %v367_v9 = vld [vmem:[%s1786_s29 + $0x2f0] sm:$0xff] }
  0x2a   : > { %1389 = vmatpush3.msra.mxu1 %v311_v42  ;;  %1352 = vmatprep.subr.mxu0 %v294_v43  ;;  %v273_v1 = vld [vmem:[%s1786_s29] sm:$0xff]  ;;  %v352_v7 = vld [vmem:[%s1786_s29 + $0x278] sm:$0xff]  ;;  %v399_v10 = vld [vmem:[%s1786_s29 + $0x3f0] sm:$0xff] }
  0x2b   : > { %1390 = vmatprep.subr.mxu1 %v326_v44  ;;  %1353 = vmatpush3.msra.mxu0 %v278_v45  ;;  %v305_v2 = vld [vmem:[%s1786_s29 + $0x100] sm:$0xff]  ;;  %v384_v8 = vld [vmem:[%s1786_s29 + $0x378] sm:$0xff]  ;;  %v351_v11 = vld [vmem:[%s1786_s29 + $0x270] sm:$0xff] }
  0x2c   : > { %1391 = vmatpush3.msra.mxu1 %v310_v46  ;;  %1354 = vmatprep.subr.mxu0 %v293_v47  ;;  %v529_v3 = vld [vmem:[%s1779_s24] sm:$0xff]  ;;  %v383_v12 = vld [vmem:[%s1786_s29 + $0x370] sm:$0xff]  ;;  %v366_v13 = vld [vmem:[%s1786_s29 + $0x2e8] sm:$0xff] }
  0x2d   : > { %1392 = vmatprep.subr.mxu1 %v325_v48  ;;  %1355 = vmatpush3.msra.mxu0 %v277_v49  ;;  %v398_v14 = vld [vmem:[%s1786_s29 + $0x3e8] sm:$0xff]  ;;  %v365_v17 = vld [vmem:[%s1786_s29 + $0x2e0] sm:$0xff]  ;;  %v364_v21 = vld [vmem:[%s1786_s29 + $0x2d8] sm:$0xff] }
  0x2e   : > { %1393 = vmatpush3.msra.mxu1 %v309_v50  ;;  %1356 = vmatprep.subr.mxu0 %v292_v51  ;;  %v350_v15 = vld [vmem:[%s1786_s29 + $0x268] sm:$0xff]  ;;  %v397_v18 = vld [vmem:[%s1786_s29 + $0x3e0] sm:$0xff]  ;;  %v396_v22 = vld [vmem:[%s1786_s29 + $0x3d8] sm:$0xff] }
  0x2f   : > { %1394 = vmatprep.subr.mxu1 %v324_v52  ;;  %1357 = vmatpush3.msra.mxu0 %v276_v53  ;;  %v382_v16 = vld [vmem:[%s1786_s29 + $0x368] sm:$0xff]  ;;  %v349_v19 = vld [vmem:[%s1786_s29 + $0x260] sm:$0xff]  ;;  %v348_v23 = vld [vmem:[%s1786_s29 + $0x258] sm:$0xff] }
  0x30   : > { %1395 = vmatpush3.msra.mxu1 %v308_v54  ;;  %1358 = vmatprep.subr.mxu0 %v291_v55  ;;  %v381_v20 = vld [vmem:[%s1786_s29 + $0x360] sm:$0xff]  ;;  %v380_v24 = vld [vmem:[%s1786_s29 + $0x358] sm:$0xff]  ;;  %v363_v25 = vld [vmem:[%s1786_s29 + $0x2d0] sm:$0xff] }
  0x31   : > { %1396 = vmatprep.subr.mxu1 %v323_v56  ;;  %1359 = vmatpush3.msra.mxu0 %v275_v57  ;;  %v395_v26 = vld [vmem:[%s1786_s29 + $0x3d0] sm:$0xff]  ;;  %v362_v29 = vld [vmem:[%s1786_s29 + $0x2c8] sm:$0xff]  ;;  %v361_v33 = vld [vmem:[%s1786_s29 + $0x2c0] sm:$0xff] }
  0x32   : > { %1397 = vmatpush3.msra.mxu1 %v307_v58  ;;  %1360 = vmatprep.subr.mxu0 %v290_v59  ;;  %v347_v27 = vld [vmem:[%s1786_s29 + $0x250] sm:$0xff]  ;;  %v394_v30 = vld [vmem:[%s1786_s29 + $0x3c8] sm:$0xff]  ;;  %v393_v34 = vld [vmem:[%s1786_s29 + $0x3c0] sm:$0xff] }
  0x33   : > { %1398 = vmatprep.subr.mxu1 %v322_v60  ;;  %1361 = vmatpush3.msra.mxu0 %v274_v61  ;;  %v379_v28 = vld [vmem:[%s1786_s29 + $0x350] sm:$0xff]  ;;  %v346_v31 = vld [vmem:[%s1786_s29 + $0x248] sm:$0xff]  ;;  %v345_v35 = vld [vmem:[%s1786_s29 + $0x240] sm:$0xff] }
  0x34   : > { %1399 = vmatpush3.msra.mxu1 %v306_v62  ;;  %1362 = vmatprep.subr.mxu0 %v289_v63  ;;  %v378_v32 = vld [vmem:[%s1786_s29 + $0x348] sm:$0xff]  ;;  %v377_v36 = vld [vmem:[%s1786_s29 + $0x340] sm:$0xff]  ;;  %v360_v37 = vld [vmem:[%s1786_s29 + $0x2b8] sm:$0xff] }
  0x35   : > { %1400 = vmatprep.subr.mxu1 %v321_v0  ;;  %1363 = vmatpush3.msra.mxu0 %v273_v1  ;;  %v392_v38 = vld [vmem:[%s1786_s29 + $0x3b8] sm:$0xff]  ;;  %v359_v41 = vld [vmem:[%s1786_s29 + $0x2b0] sm:$0xff]  ;;  %v358_v45 = vld [vmem:[%s1786_s29 + $0x2a8] sm:$0xff] }
  0x36   : > { %1401 = vmatpush3.msra.mxu1 %v305_v2  ;;  %638 = vmatmul.mubr.f32.vlgmr.msra.gmra.mxu0 %v529_v3  ;;  %v344_v39 = vld [vmem:[%s1786_s29 + $0x238] sm:$0xff]  ;;  %v391_v42 = vld [vmem:[%s1786_s29 + $0x3b0] sm:$0xff]  ;;  %v390_v46 = vld [vmem:[%s1786_s29 + $0x3a8] sm:$0xff] }
  0x37   : > { %1408 = vmatprep.subr.mxu0 %v368_v4  ;;  %1446 = vmatprep.subr.mxu1 %v400_v5  ;;  %v376_v40 = vld [vmem:[%s1786_s29 + $0x338] sm:$0xff]  ;;  %v343_v43 = vld [vmem:[%s1786_s29 + $0x230] sm:$0xff]  ;;  %v342_v47 = vld [vmem:[%s1786_s29 + $0x228] sm:$0xff] }
  0x38   : > { %713 = vmatmul.mubr.f32.vlgmr.msra.gmra.mxu1 %v531_v6  ;;  %1409 = vmatpush3.msra.mxu0 %v352_v7  ;;  %v375_v44 = vld [vmem:[%s1786_s29 + $0x330] sm:$0xff]  ;;  %v374_v48 = vld [vmem:[%s1786_s29 + $0x328] sm:$0xff]  ;;  %v357_v49 = vld [vmem:[%s1786_s29 + $0x2a0] sm:$0xff] }
  0x39   : > { %1447 = vmatpush3.msra.mxu1 %v384_v8  ;;  %1410 = vmatprep.subr.mxu0 %v367_v9  ;;  %v389_v50 = vld [vmem:[%s1786_s29 + $0x3a0] sm:$0xff]  ;;  %v356_v53 = vld [vmem:[%s1786_s29 + $0x298] sm:$0xff]  ;;  %v546_v57 = vld [vmem:[%s1779_s24 + $0x88] sm:$0xff] }
  0x3a   : > { %1448 = vmatprep.subr.mxu1 %v399_v10  ;;  %1411 = vmatpush3.msra.mxu0 %v351_v11  ;;  %v341_v51 = vld [vmem:[%s1786_s29 + $0x220] sm:$0xff]  ;;  %v388_v54 = vld [vmem:[%s1786_s29 + $0x398] sm:$0xff]  ;;  %v355_v58 = vld [vmem:[%s1786_s29 + $0x290] sm:$0xff] }
  0x3b   : > { %1449 = vmatpush3.msra.mxu1 %v383_v12  ;;  %1412 = vmatprep.subr.mxu0 %v366_v13  ;;  %v373_v52 = vld [vmem:[%s1786_s29 + $0x320] sm:$0xff]  ;;  %v340_v55 = vld [vmem:[%s1786_s29 + $0x218] sm:$0xff]  ;;  %v387_v59 = vld [vmem:[%s1786_s29 + $0x390] sm:$0xff] }
  0x3c   : > { %1450 = vmatprep.subr.mxu1 %v398_v14  ;;  %1413 = vmatpush3.msra.mxu0 %v350_v15  ;;  %v372_v56 = vld [vmem:[%s1786_s29 + $0x318] sm:$0xff]  ;;  %v545_v60 = vld [vmem:[%s1779_s24 + $0x80] sm:$0xff]  ;;  %v339_v61 = vld [vmem:[%s1786_s29 + $0x210] sm:$0xff] }
  0x3d   : > { %1451 = vmatpush3.msra.mxu1 %v382_v16  ;;  %1414 = vmatprep.subr.mxu0 %v365_v17  ;;  %v371_v62 = vld [vmem:[%s1786_s29 + $0x310] sm:$0xff]  ;;  %v548_v63 = vld [vmem:[%s1779_s24 + $0x98] sm:$0xff]  ;;  %v354_v0 = vld [vmem:[%s1786_s29 + $0x288] sm:$0xff] }
  0x3e   : > { %1452 = vmatprep.subr.mxu1 %v397_v18  ;;  %1415 = vmatpush3.msra.mxu0 %v349_v19  ;;  %v386_v1 = vld [vmem:[%s1786_s29 + $0x388] sm:$0xff]  ;;  %v547_v2 = vld [vmem:[%s1779_s24 + $0x90] sm:$0xff]  ;;  %v353_v5 = vld [vmem:[%s1786_s29 + $0x280] sm:$0xff] }
  0x3f   : > { %1453 = vmatpush3.msra.mxu1 %v381_v20  ;;  %1416 = vmatprep.subr.mxu0 %v364_v21  ;;  %v338_v3 = vld [vmem:[%s1786_s29 + $0x208] sm:$0xff]  ;;  %v385_v6 = vld [vmem:[%s1786_s29 + $0x380] sm:$0xff]  ;;  %v536_v11 = vld [vmem:[%s1779_s24 + $0x38] sm:$0xff] }
  0x40   : > { %1454 = vmatprep.subr.mxu1 %v396_v22  ;;  %1417 = vmatpush3.msra.mxu0 %v348_v23  ;;  %v370_v4 = vld [vmem:[%s1786_s29 + $0x308] sm:$0xff]  ;;  %v337_v7 = vld [vmem:[%s1786_s29 + $0x200] sm:$0xff]  ;;  %v432_v12 = vld [vmem:[%s1786_s29 + $0x4f8] sm:$0xff] }
  0x41   : > { %1455 = vmatpush3.msra.mxu1 %v380_v24  ;;  %1418 = vmatprep.subr.mxu0 %v363_v25  ;;  %v534_v8 = vld [vmem:[%s1779_s24 + $0x28] sm:$0xff]  ;;  %v369_v9 = vld [vmem:[%s1786_s29 + $0x300] sm:$0xff]  ;;  %v464_v13 = vld [vmem:[%s1786_s29 + $0x5f8] sm:$0xff] }
  0x42   : > { %1456 = vmatprep.subr.mxu1 %v395_v26  ;;  %1419 = vmatpush3.msra.mxu0 %v347_v27  ;;  %v533_v10 = vld [vmem:[%s1779_s24 + $0x20] sm:$0xff]  ;;  %v535_v14 = vld [vmem:[%s1779_s24 + $0x30] sm:$0xff]  ;;  %v416_v15 = vld [vmem:[%s1786_s29 + $0x478] sm:$0xff] }
  0x43   : > { %1457 = vmatpush3.msra.mxu1 %v379_v28  ;;  %1420 = vmatprep.subr.mxu0 %v362_v29  ;;  %v448_v16 = vld [vmem:[%s1786_s29 + $0x578] sm:$0xff]  ;;  %v431_v17 = vld [vmem:[%s1786_s29 + $0x4f0] sm:$0xff]  ;;  %v550_v19 = vld [vmem:[%s1779_s24 + $0xa8] sm:$0xff] }
  0x44   : > { %1458 = vmatprep.subr.mxu1 %v394_v30  ;;  %1421 = vmatpush3.msra.mxu0 %v346_v31  ;;  %v463_v18 = vld [vmem:[%s1786_s29 + $0x5f0] sm:$0xff]  ;;  %v549_v22 = vld [vmem:[%s1779_s24 + $0xa0] sm:$0xff]  ;;  %v430_v23 = vld [vmem:[%s1786_s29 + $0x4e8] sm:$0xff] }
  0x45   : > { %1459 = vmatpush3.msra.mxu1 %v378_v32  ;;  %1422 = vmatprep.subr.mxu0 %v361_v33  ;;  %v415_v20 = vld [vmem:[%s1786_s29 + $0x470] sm:$0xff]  ;;  %v462_v24 = vld [vmem:[%s1786_s29 + $0x5e8] sm:$0xff]  ;;  %v552_v25 = vld [vmem:[%s1779_s24 + $0xb8] sm:$0xff] }
  0x46   : > { %1460 = vmatprep.subr.mxu1 %v393_v34  ;;  %1423 = vmatpush3.msra.mxu0 %v345_v35  ;;  %v447_v21 = vld [vmem:[%s1786_s29 + $0x570] sm:$0xff]  ;;  %v414_v26 = vld [vmem:[%s1786_s29 + $0x468] sm:$0xff]  ;;  %v429_v28 = vld [vmem:[%s1786_s29 + $0x4e0] sm:$0xff] }
  0x47   : > { %1461 = vmatpush3.msra.mxu1 %v377_v36  ;;  %1424 = vmatprep.subr.mxu0 %v360_v37  ;;  %v446_v27 = vld [vmem:[%s1786_s29 + $0x568] sm:$0xff]  ;;  %v551_v29 = vld [vmem:[%s1779_s24 + $0xb0] sm:$0xff]  ;;  %v461_v30 = vld [vmem:[%s1786_s29 + $0x5e0] sm:$0xff] }
  0x48   : > { %1462 = vmatprep.subr.mxu1 %v392_v38  ;;  %1425 = vmatpush3.msra.mxu0 %v344_v39  ;;  %v413_v31 = vld [vmem:[%s1786_s29 + $0x460] sm:$0xff]  ;;  %v428_v33 = vld [vmem:[%s1786_s29 + $0x4d8] sm:$0xff]  ;;  %v427_v37 = vld [vmem:[%s1786_s29 + $0x4d0] sm:$0xff] }
  0x49   : > { %1463 = vmatpush3.msra.mxu1 %v376_v40  ;;  %1426 = vmatprep.subr.mxu0 %v359_v41  ;;  %v445_v32 = vld [vmem:[%s1786_s29 + $0x560] sm:$0xff]  ;;  %v460_v34 = vld [vmem:[%s1786_s29 + $0x5d8] sm:$0xff]  ;;  %v459_v38 = vld [vmem:[%s1786_s29 + $0x5d0] sm:$0xff] }
  0x4a   : > { %1464 = vmatprep.subr.mxu1 %v391_v42  ;;  %1427 = vmatpush3.msra.mxu0 %v343_v43  ;;  %v412_v35 = vld [vmem:[%s1786_s29 + $0x458] sm:$0xff]  ;;  %v411_v39 = vld [vmem:[%s1786_s29 + $0x450] sm:$0xff]  ;;  %v426_v41 = vld [vmem:[%s1786_s29 + $0x4c8] sm:$0xff] }
  0x4b   : > { %1465 = vmatpush3.msra.mxu1 %v375_v44  ;;  %1428 = vmatprep.subr.mxu0 %v358_v45  ;;  %v444_v36 = vld [vmem:[%s1786_s29 + $0x558] sm:$0xff]  ;;  %v443_v40 = vld [vmem:[%s1786_s29 + $0x550] sm:$0xff]  ;;  %v458_v42 = vld [vmem:[%s1786_s29 + $0x5c8] sm:$0xff] }
  0x4c   : > { %1466 = vmatprep.subr.mxu1 %v390_v46  ;;  %1429 = vmatpush3.msra.mxu0 %v342_v47  ;;  %v410_v43 = vld [vmem:[%s1786_s29 + $0x448] sm:$0xff]  ;;  %v425_v45 = vld [vmem:[%s1786_s29 + $0x4c0] sm:$0xff] }
  0x4d   : > { %1467 = vmatpush3.msra.mxu1 %v374_v48  ;;  %1430 = vmatprep.subr.mxu0 %v357_v49  ;;  %v442_v44 = vld [vmem:[%s1786_s29 + $0x548] sm:$0xff]  ;;  %v457_v46 = vld [vmem:[%s1786_s29 + $0x5c0] sm:$0xff]  ;;  %v424_v49 = vld [vmem:[%s1786_s29 + $0x4b8] sm:$0xff] }
  0x4e   : > { %1468 = vmatprep.subr.mxu1 %v389_v50  ;;  %1431 = vmatpush3.msra.mxu0 %v341_v51  ;;  %v409_v47 = vld [vmem:[%s1786_s29 + $0x440] sm:$0xff]  ;;  %v456_v50 = vld [vmem:[%s1786_s29 + $0x5b8] sm:$0xff] }
  0x4f   : > { %1469 = vmatpush3.msra.mxu1 %v373_v52  ;;  %1432 = vmatprep.subr.mxu0 %v356_v53  ;;  %v441_v48 = vld [vmem:[%s1786_s29 + $0x540] sm:$0xff]  ;;  %v408_v51 = vld [vmem:[%s1786_s29 + $0x438] sm:$0xff]  ;;  %v423_v53 = vld [vmem:[%s1786_s29 + $0x4b0] sm:$0xff] }
  0x50   : > { %1470 = vmatprep.subr.mxu1 %v388_v54  ;;  %1433 = vmatpush3.msra.mxu0 %v340_v55  ;;  %v440_v52 = vld [vmem:[%s1786_s29 + $0x538] sm:$0xff]  ;;  %v455_v54 = vld [vmem:[%s1786_s29 + $0x5b0] sm:$0xff] }
  0x51   : > { %1471 = vmatpush3.msra.mxu1 %v372_v56  ;;  %642 = vmatprep.mubr.f32.mxu0 %v546_v57  ;;  %v407_v55 = vld [vmem:[%s1786_s29 + $0x430] sm:$0xff]  ;;  %v422_v57 = vld [vmem:[%s1786_s29 + $0x4a8] sm:$0xff] }
  0x52   : > { %1434 = vmatprep.subr.mxu0 %v355_v58  ;;  %1472 = vmatprep.subr.mxu1 %v387_v59  ;;  %v439_v56 = vld [vmem:[%s1786_s29 + $0x530] sm:$0xff]  ;;  %v454_v58 = vld [vmem:[%s1786_s29 + $0x5a8] sm:$0xff] }
  0x53   : > { %643 = vmatmul.mubr.f32.gmra.mxu0 %v545_v60  ;;  %1473 = vmatpush3.msra.mxu1 %v371_v62  ;;  %v406_v59 = vld [vmem:[%s1786_s29 + $0x428] sm:$0xff]  ;;  %v453_v62 = vld [vmem:[%s1786_s29 + $0x5a0] sm:$0xff] }
  0x54   : > { %1435 = vmatpush3.msra.mxu0 %v339_v61  ;;  %717 = vmatprep.mubr.f32.mxu1 %v548_v63  ;;  %v438_v60 = vld [vmem:[%s1786_s29 + $0x528] sm:$0xff]  ;;  %v421_v61 = vld [vmem:[%s1786_s29 + $0x4a0] sm:$0xff] }
  0x55   : > { %1436 = vmatprep.subr.mxu0 %v354_v0  ;;  %1474 = vmatprep.subr.mxu1 %v386_v1  ;;  %v405_v63 = vld [vmem:[%s1786_s29 + $0x420] sm:$0xff]  ;;  %v420_v1 = vld [vmem:[%s1786_s29 + $0x498] sm:$0xff] }
  0x56   : > { %718 = vmatmul.mubr.f32.gmra.mxu1 %v547_v2  ;;  %1437 = vmatpush3.msra.mxu0 %v338_v3  ;;  %v437_v0 = vld [vmem:[%s1786_s29 + $0x520] sm:$0xff]  ;;  %v452_v2 = vld [vmem:[%s1786_s29 + $0x598] sm:$0xff] }
  0x57   : > { %1475 = vmatpush3.msra.mxu1 %v370_v4  ;;  %1438 = vmatprep.subr.mxu0 %v353_v5  ;;  %v404_v3 = vld [vmem:[%s1786_s29 + $0x418] sm:$0xff]  ;;  %v419_v5 = vld [vmem:[%s1786_s29 + $0x490] sm:$0xff] }
  0x58   : > { %1476 = vmatprep.subr.mxu1 %v385_v6  ;;  %1439 = vmatpush3.msra.mxu0 %v337_v7  ;;  %v436_v4 = vld [vmem:[%s1786_s29 + $0x518] sm:$0xff]  ;;  %v451_v6 = vld [vmem:[%s1786_s29 + $0x590] sm:$0xff] }
  0x59   : > { %787 = vmatprep.mubr.f32.mxu0 %v534_v8  ;;  %1477 = vmatpush3.msra.mxu1 %v369_v9  ;;  %v403_v7 = vld [vmem:[%s1786_s29 + $0x410] sm:$0xff]  ;;  %v418_v9 = vld [vmem:[%s1786_s29 + $0x488] sm:$0xff] }
  0x5a   : > { %788 = vmatmul.mubr.f32.vlgmr.msra.gmra.mxu0 %v533_v10  ;;  %862 = vmatprep.mubr.f32.mxu1 %v536_v11  ;;  %v435_v8 = vld [vmem:[%s1786_s29 + $0x510] sm:$0xff]  ;;  %v450_v10 = vld [vmem:[%s1786_s29 + $0x588] sm:$0xff] }
  0x5b   : > { %1484 = vmatprep.subr.mxu0 %v432_v12  ;;  %1522 = vmatprep.subr.mxu1 %v464_v13  ;;  %v402_v11 = vld [vmem:[%s1786_s29 + $0x408] sm:$0xff]  ;;  %v417_v13 = vld [vmem:[%s1786_s29 + $0x480] sm:$0xff] }
  0x5c   : > { %863 = vmatmul.mubr.f32.vlgmr.msra.gmra.mxu1 %v535_v14  ;;  %1485 = vmatpush3.msra.mxu0 %v416_v15  ;;  %v434_v12 = vld [vmem:[%s1786_s29 + $0x508] sm:$0xff]  ;;  %v449_v14 = vld [vmem:[%s1786_s29 + $0x580] sm:$0xff] }
  0x5d   : > { %1523 = vmatpush3.msra.mxu1 %v448_v16  ;;  %1486 = vmatprep.subr.mxu0 %v431_v17  ;;  %v401_v15 = vld [vmem:[%s1786_s29 + $0x400] sm:$0xff]  ;;  %v538_v16 = vld [vmem:[%s1779_s24 + $0x48] sm:$0xff] }
  0x5e   : > { %1524 = vmatprep.subr.mxu1 %v463_v18  ;;  %792 = vmatprep.mubr.f32.mxu0 %v550_v19  ;;  %v433_v17 = vld [vmem:[%s1786_s29 + $0x500] sm:$0xff]  ;;  %v540_v19 = vld [vmem:[%s1779_s24 + $0x58] sm:$0xff] }
  0x5f   : > { %1487 = vmatpush3.msra.mxu0 %v415_v20  ;;  %1525 = vmatpush3.msra.mxu1 %v447_v21  ;;  %v537_v18 = vld [vmem:[%s1779_s24 + $0x40] sm:$0xff]  ;;  %v496_v20 = vld [vmem:[%s1786_s29 + $0x6f8] sm:$0xff] }
  0x60   : > { %793 = vmatmul.mubr.f32.gmra.mxu0 %v549_v22  ;;  %1488 = vmatprep.subr.mxu0 %v430_v23  ;;  %v528_v21 = vld [vmem:[%s1786_s29 + $0x7f8] sm:$0xff]  ;;  %v539_v22 = vld [vmem:[%s1779_s24 + $0x50] sm:$0xff] }
  0x61   : > { %1526 = vmatprep.subr.mxu1 %v462_v24  ;;  %867 = vmatprep.mubr.f32.mxu1 %v552_v25  ;;  %v480_v23 = vld [vmem:[%s1786_s29 + $0x678] sm:$0xff]  ;;  %v495_v25 = vld [vmem:[%s1786_s29 + $0x6f0] sm:$0xff] }
  0x62   : > { %1489 = vmatpush3.msra.mxu0 %v414_v26  ;;  %1527 = vmatpush3.msra.mxu1 %v446_v27  ;;  %v512_v24 = vld [vmem:[%s1786_s29 + $0x778] sm:$0xff]  ;;  %v527_v26 = vld [vmem:[%s1786_s29 + $0x7f0] sm:$0xff]  ;;  %v554_v27 = vld [vmem:[%s1779_s24 + $0xc8] sm:$0xff] }
  0x63   : > { %1490 = vmatprep.subr.mxu0 %v429_v28  ;;  %868 = vmatmul.mubr.f32.gmra.mxu1 %v551_v29  ;;  %v479_v28 = vld [vmem:[%s1786_s29 + $0x670] sm:$0xff] }
  0x64   : > { %1528 = vmatprep.subr.mxu1 %v461_v30  ;;  %1491 = vmatpush3.msra.mxu0 %v413_v31  ;;  %v511_v29 = vld [vmem:[%s1786_s29 + $0x770] sm:$0xff]  ;;  %v553_v30 = vld [vmem:[%s1779_s24 + $0xc0] sm:$0xff]  ;;  %v494_v31 = vld [vmem:[%s1786_s29 + $0x6e8] sm:$0xff] }
  0x65   : > { %1529 = vmatpush3.msra.mxu1 %v445_v32  ;;  %1492 = vmatprep.subr.mxu0 %v428_v33  ;;  %v526_v32 = vld [vmem:[%s1786_s29 + $0x7e8] sm:$0xff]  ;;  %v556_v33 = vld [vmem:[%s1779_s24 + $0xd8] sm:$0xff] }
  0x66   : > { %1530 = vmatprep.subr.mxu1 %v460_v34  ;;  %1493 = vmatpush3.msra.mxu0 %v412_v35  ;;  %v478_v34 = vld [vmem:[%s1786_s29 + $0x668] sm:$0xff] }
  0x67   : > { %1531 = vmatpush3.msra.mxu1 %v444_v36  ;;  %1494 = vmatprep.subr.mxu0 %v427_v37  ;;  %v510_v35 = vld [vmem:[%s1786_s29 + $0x768] sm:$0xff]  ;;  %v493_v36 = vld [vmem:[%s1786_s29 + $0x6e0] sm:$0xff]  ;;  %v555_v37 = vld [vmem:[%s1779_s24 + $0xd0] sm:$0xff] }
  0x68   : > { %1532 = vmatprep.subr.mxu1 %v459_v38  ;;  %1495 = vmatpush3.msra.mxu0 %v411_v39  ;;  %v525_v38 = vld [vmem:[%s1786_s29 + $0x7e0] sm:$0xff] }
  0x69   : > { %1533 = vmatpush3.msra.mxu1 %v443_v40  ;;  %1496 = vmatprep.subr.mxu0 %v426_v41  ;;  %v477_v39 = vld [vmem:[%s1786_s29 + $0x660] sm:$0xff]  ;;  %v492_v41 = vld [vmem:[%s1786_s29 + $0x6d8] sm:$0xff] }
  0x6a   : > { %1534 = vmatprep.subr.mxu1 %v458_v42  ;;  %1497 = vmatpush3.msra.mxu0 %v410_v43  ;;  %v509_v40 = vld [vmem:[%s1786_s29 + $0x760] sm:$0xff]  ;;  %v524_v42 = vld [vmem:[%s1786_s29 + $0x7d8] sm:$0xff] }
  0x6b   : > { %1535 = vmatpush3.msra.mxu1 %v442_v44  ;;  %1498 = vmatprep.subr.mxu0 %v425_v45  ;;  %v561_v43 = vld [vmem:[%s2020_s6] sm:$0xff]  ;;  %v476_v44 = vld [vmem:[%s1786_s29 + $0x658] sm:$0xff] }
  0x6c   : > { %1536 = vmatprep.subr.mxu1 %v457_v46  ;;  %1499 = vmatpush3.msra.mxu0 %v409_v47  ;;  %v508_v45 = vld [vmem:[%s1786_s29 + $0x758] sm:$0xff]  ;;  %v491_v46 = vld [vmem:[%s1786_s29 + $0x6d0] sm:$0xff] }
  0x6d   : > { %1537 = vmatpush3.msra.mxu1 %v441_v48  ;;  %1500 = vmatprep.subr.mxu0 %v424_v49  ;;  %v523_v47 = vld [vmem:[%s1786_s29 + $0x7d0] sm:$0xff] }
  0x6e   : > { %1538 = vmatprep.subr.mxu1 %v456_v50  ;;  %1501 = vmatpush3.msra.mxu0 %v408_v51  ;;  %v475_v48 = vld [vmem:[%s1786_s29 + $0x650] sm:$0xff]  ;;  %v490_v50 = vld [vmem:[%s1786_s29 + $0x6c8] sm:$0xff] }
  0x6f   : > { %1539 = vmatpush3.msra.mxu1 %v440_v52  ;;  %1502 = vmatprep.subr.mxu0 %v423_v53  ;;  %v507_v49 = vld [vmem:[%s1786_s29 + $0x750] sm:$0xff]  ;;  %v522_v51 = vld [vmem:[%s1786_s29 + $0x7c8] sm:$0xff] }
  0x70   : > { %1540 = vmatprep.subr.mxu1 %v455_v54  ;;  %1503 = vmatpush3.msra.mxu0 %v407_v55  ;;  %v474_v52 = vld [vmem:[%s1786_s29 + $0x648] sm:$0xff]  ;;  %v489_v54 = vld [vmem:[%s1786_s29 + $0x6c0] sm:$0xff] }
  0x71   : > { %1541 = vmatpush3.msra.mxu1 %v439_v56  ;;  %1504 = vmatprep.subr.mxu0 %v422_v57  ;;  %v506_v53 = vld [vmem:[%s1786_s29 + $0x748] sm:$0xff]  ;;  %v521_v55 = vld [vmem:[%s1786_s29 + $0x7c0] sm:$0xff] }
  0x72   : > { %1542 = vmatprep.subr.mxu1 %v454_v58  ;;  %1505 = vmatpush3.msra.mxu0 %v406_v59  ;;  %v473_v56 = vld [vmem:[%s1786_s29 + $0x640] sm:$0xff]  ;;  %v488_v58 = vld [vmem:[%s1786_s29 + $0x6b8] sm:$0xff] }
  0x73   : > { %1543 = vmatpush3.msra.mxu1 %v438_v60  ;;  %1506 = vmatprep.subr.mxu0 %v421_v61  ;;  %v505_v57 = vld [vmem:[%s1786_s29 + $0x740] sm:$0xff]  ;;  %v520_v59 = vld [vmem:[%s1786_s29 + $0x7b8] sm:$0xff] }
  0x74   : > { %1544 = vmatprep.subr.mxu1 %v453_v62  ;;  %1507 = vmatpush3.msra.mxu0 %v405_v63  ;;  %v472_v60 = vld [vmem:[%s1786_s29 + $0x638] sm:$0xff]  ;;  %v487_v62 = vld [vmem:[%s1786_s29 + $0x6b0] sm:$0xff] }
  0x75   : > { %1545 = vmatpush3.msra.mxu1 %v437_v0  ;;  %1508 = vmatprep.subr.mxu0 %v420_v1  ;;  %v504_v61 = vld [vmem:[%s1786_s29 + $0x738] sm:$0xff]  ;;  %v519_v63 = vld [vmem:[%s1786_s29 + $0x7b0] sm:$0xff] }
  0x76   : > { %1546 = vmatprep.subr.mxu1 %v452_v2  ;;  %1509 = vmatpush3.msra.mxu0 %v404_v3  ;;  %v471_v0 = vld [vmem:[%s1786_s29 + $0x630] sm:$0xff]  ;;  %v486_v2 = vld [vmem:[%s1786_s29 + $0x6a8] sm:$0xff] }
  0x77   : > { %1547 = vmatpush3.msra.mxu1 %v436_v4  ;;  %1510 = vmatprep.subr.mxu0 %v419_v5  ;;  %v503_v1 = vld [vmem:[%s1786_s29 + $0x730] sm:$0xff]  ;;  %v518_v3 = vld [vmem:[%s1786_s29 + $0x7a8] sm:$0xff] }
  0x78   : > { %1548 = vmatprep.subr.mxu1 %v451_v6  ;;  %1511 = vmatpush3.msra.mxu0 %v403_v7  ;;  %v470_v4 = vld [vmem:[%s1786_s29 + $0x628] sm:$0xff]  ;;  %v485_v6 = vld [vmem:[%s1786_s29 + $0x6a0] sm:$0xff] }
  0x79   : > { %1549 = vmatpush3.msra.mxu1 %v435_v8  ;;  %1512 = vmatprep.subr.mxu0 %v418_v9  ;;  %v502_v5 = vld [vmem:[%s1786_s29 + $0x728] sm:$0xff]  ;;  %v517_v7 = vld [vmem:[%s1786_s29 + $0x7a0] sm:$0xff] }
  0x7a   : > { %1550 = vmatprep.subr.mxu1 %v450_v10  ;;  %1513 = vmatpush3.msra.mxu0 %v402_v11  ;;  %v469_v8 = vld [vmem:[%s1786_s29 + $0x620] sm:$0xff]  ;;  %v484_v10 = vld [vmem:[%s1786_s29 + $0x698] sm:$0xff] }
  0x7b   : > { %1551 = vmatpush3.msra.mxu1 %v434_v12  ;;  %1514 = vmatprep.subr.mxu0 %v417_v13  ;;  %v501_v9 = vld [vmem:[%s1786_s29 + $0x720] sm:$0xff]  ;;  %v516_v11 = vld [vmem:[%s1786_s29 + $0x798] sm:$0xff] }
  0x7c   : > { %1552 = vmatprep.subr.mxu1 %v449_v14  ;;  %1515 = vmatpush3.msra.mxu0 %v401_v15  ;;  %v468_v12 = vld [vmem:[%s1786_s29 + $0x618] sm:$0xff]  ;;  %v483_v14 = vld [vmem:[%s1786_s29 + $0x690] sm:$0xff] }
  0x7d   : > { %937 = vmatprep.mubr.f32.mxu0 %v538_v16  ;;  %1553 = vmatpush3.msra.mxu1 %v433_v17  ;;  %v500_v13 = vld [vmem:[%s1786_s29 + $0x718] sm:$0xff]  ;;  %v515_v15 = vld [vmem:[%s1786_s29 + $0x790] sm:$0xff] }
  0x7e   : > { %938 = vmatmul.mubr.f32.vlgmr.msra.gmra.mxu0 %v537_v18  ;;  %1012 = vmatprep.mubr.f32.mxu1 %v540_v19  ;;  %v467_v16 = vld [vmem:[%s1786_s29 + $0x610] sm:$0xff]  ;;  %v482_v18 = vld [vmem:[%s1786_s29 + $0x688] sm:$0xff] }
  0x7f   : > { %1560 = vmatprep.subr.mxu0 %v496_v20  ;;  %1598 = vmatprep.subr.mxu1 %v528_v21  ;;  %v499_v17 = vld [vmem:[%s1786_s29 + $0x710] sm:$0xff]  ;;  %v514_v19 = vld [vmem:[%s1786_s29 + $0x788] sm:$0xff] }
  0x80   : > { %1013 = vmatmul.mubr.f32.vlgmr.msra.gmra.mxu1 %v539_v22  ;;  %1561 = vmatpush3.msra.mxu0 %v480_v23  ;;  %v466_v20 = vld [vmem:[%s1786_s29 + $0x608] sm:$0xff]  ;;  %v481_v22 = vld [vmem:[%s1786_s29 + $0x680] sm:$0xff] }
  0x81   : > { %1599 = vmatpush3.msra.mxu1 %v512_v24  ;;  %1562 = vmatprep.subr.mxu0 %v495_v25  ;;  %v498_v21 = vld [vmem:[%s1786_s29 + $0x708] sm:$0xff]  ;;  %v513_v23 = vld [vmem:[%s1786_s29 + $0x780] sm:$0xff] }
  0x82   : > { %1600 = vmatprep.subr.mxu1 %v527_v26  ;;  %942 = vmatprep.mubr.f32.mxu0 %v554_v27  ;;  %v465_v24 = vld [vmem:[%s1786_s29 + $0x600] sm:$0xff]  ;;  %v542_v25 = vld [vmem:[%s1779_s24 + $0x68] sm:$0xff]  ;;  %v544_v27 = vld [vmem:[%s1779_s24 + $0x78] sm:$0xff] }
  0x83   : > { %1563 = vmatpush3.msra.mxu0 %v479_v28  ;;  %1601 = vmatpush3.msra.mxu1 %v511_v29  ;;  %v497_v26 = vld [vmem:[%s1786_s29 + $0x700] sm:$0xff]  ;;  %v543_v29 = vld [vmem:[%s1779_s24 + $0x70] sm:$0xff] }
  0x84   : > { %943 = vmatmul.mubr.f32.gmra.mxu0 %v553_v30  ;;  %1564 = vmatprep.subr.mxu0 %v494_v31  ;;  %v541_v28 = vld [vmem:[%s1779_s24 + $0x60] sm:$0xff]  ;;  %v558_v30 = vld [vmem:[%s1779_s24 + $0xe8] sm:$0xff]  ;;  %v560_v31 = vld [vmem:[%s1779_s24 + $0xf8] sm:$0xff] }
  0x85   : > { %1602 = vmatprep.subr.mxu1 %v526_v32  ;;  %1017 = vmatprep.mubr.f32.mxu1 %v556_v33  ;;  %v562_v32 = vld [vmem:[%s2020_s6 + $0x8] sm:$0xff]  ;;  %v557_v33 = vld [vmem:[%s1779_s24 + $0xe0] sm:$0xff] }
  0x86   : > { %1565 = vmatpush3.msra.mxu0 %v478_v34  ;;  %1603 = vmatpush3.msra.mxu1 %v510_v35  ;;  %v559_v34 = vld [vmem:[%s1779_s24 + $0xf0] sm:$0xff] }
  0x87   : > { %1566 = vmatprep.subr.mxu0 %v493_v36  ;;  %1018 = vmatmul.mubr.f32.gmra.mxu1 %v555_v37 }
  0x88   : > { %1604 = vmatprep.subr.mxu1 %v525_v38  ;;  %1567 = vmatpush3.msra.mxu0 %v477_v39 }
  0x89   : > { %1605 = vmatpush3.msra.mxu1 %v509_v40  ;;  %1568 = vmatprep.subr.mxu0 %v492_v41 }
  0x8a   : > { %1606 = vmatprep.subr.mxu1 %v524_v42  ;;  %565 = vperm.xlu0 %1677, %v561_v43  }
  0x8b   : > { %1569 = vmatpush3.msra.mxu0 %v476_v44  ;;  %1607 = vmatpush3.msra.mxu1 %v508_v45 }
  0x8c   : > { %1570 = vmatprep.subr.mxu0 %v491_v46  ;;  %1608 = vmatprep.subr.mxu1 %v523_v47 }
  0x8d   : > { %1571 = vmatpush3.msra.mxu0 %v475_v48  ;;  %1609 = vmatpush3.msra.mxu1 %v507_v49 }
  0x8e   : > { %1572 = vmatprep.subr.mxu0 %v490_v50  ;;  %1610 = vmatprep.subr.mxu1 %v522_v51 }
  0x8f   : > { %1573 = vmatpush3.msra.mxu0 %v474_v52  ;;  %1611 = vmatpush3.msra.mxu1 %v506_v53 }
  0x90   : > { %1574 = vmatprep.subr.mxu0 %v489_v54  ;;  %1612 = vmatprep.subr.mxu1 %v521_v55 }
  0x91   : > { %1575 = vmatpush3.msra.mxu0 %v473_v56  ;;  %1613 = vmatpush3.msra.mxu1 %v505_v57 }
  0x92   : > { %1576 = vmatprep.subr.mxu0 %v488_v58  ;;  %1614 = vmatprep.subr.mxu1 %v520_v59 }
  0x93   : > { %1577 = vmatpush3.msra.mxu0 %v472_v60  ;;  %1615 = vmatpush3.msra.mxu1 %v504_v61 }
  0x94   : > { %1578 = vmatprep.subr.mxu0 %v487_v62  ;;  %1616 = vmatprep.subr.mxu1 %v519_v63 }
  0x95   : > { %1579 = vmatpush3.msra.mxu0 %v471_v0  ;;  %1617 = vmatpush3.msra.mxu1 %v503_v1 }
  0x96   : > { %1580 = vmatprep.subr.mxu0 %v486_v2  ;;  %1618 = vmatprep.subr.mxu1 %v518_v3 }
  0x97   : > { %1581 = vmatpush3.msra.mxu0 %v470_v4  ;;  %1619 = vmatpush3.msra.mxu1 %v502_v5 }
  0x98   : > { %1582 = vmatprep.subr.mxu0 %v485_v6  ;;  %1620 = vmatprep.subr.mxu1 %v517_v7 }
  0x99   : > { %1583 = vmatpush3.msra.mxu0 %v469_v8  ;;  %1621 = vmatpush3.msra.mxu1 %v501_v9 }
  0x9a   : > { %1584 = vmatprep.subr.mxu0 %v484_v10  ;;  %1622 = vmatprep.subr.mxu1 %v516_v11 }
  0x9b   : > { %1585 = vmatpush3.msra.mxu0 %v468_v12  ;;  %1623 = vmatpush3.msra.mxu1 %v500_v13 }
  0x9c   : > { %1586 = vmatprep.subr.mxu0 %v483_v14  ;;  %1624 = vmatprep.subr.mxu1 %v515_v15 }
  0x9d   : > { %1587 = vmatpush3.msra.mxu0 %v467_v16  ;;  %1625 = vmatpush3.msra.mxu1 %v499_v17 }
  0x9e   : > { %1588 = vmatprep.subr.mxu0 %v482_v18  ;;  %1626 = vmatprep.subr.mxu1 %v514_v19 }
  0x9f   : > { %1589 = vmatpush3.msra.mxu0 %v466_v20  ;;  %1627 = vmatpush3.msra.mxu1 %v498_v21 }
  0xa0   : > { %1590 = vmatprep.subr.mxu0 %v481_v22  ;;  %1628 = vmatprep.subr.mxu1 %v513_v23 }
  0xa1   : > { %1591 = vmatpush3.msra.mxu0 %v465_v24  ;;  %1087 = vmatprep.mubr.f32.mxu0 %v542_v25 }
  0xa2   : > { %1629 = vmatpush3.msra.mxu1 %v497_v26  ;;  %1162 = vmatprep.mubr.f32.mxu1 %v544_v27 }
  0xa3   : > { %1088 = vmatmul.mubr.f32.vlgmr.msra.gmra.mxu0 %v541_v28  ;;  %1163 = vmatmul.mubr.f32.vlgmr.msra.gmra.mxu1 %v543_v29 }
  0xa4   : > { %1092 = vmatprep.mubr.f32.mxu0 %v558_v30  ;;  %1167 = vmatprep.mubr.f32.mxu1 %v560_v31 }
  0xa5   : > { %570 = vperm.xlu0 %1677, %v562_v32  }
  0xa7   : > { %1093 = vmatmul.mubr.f32.gmra.mxu0 %v557_v33  ;;  %1168 = vmatmul.mubr.f32.gmra.mxu1 %v559_v34 }
  0xf6   : > { %v1364_v35 = vpop.f32.mrf.mxu0 }
  0xf8   : > { %v1402_v36 = vpop.f32.mrf.mxu1  ;;  %v1365_v37 = vpop.f32.mrf.mxu0 }
  0xf9   : > { %v1366_v50 = vadd.f32 %v1365_v37, %v1364_v35 }
  0xfa   : > { %v1403_v39 = vpop.f32.mrf.mxu1 }
  0xfb   : > { %v1404_v54 = vadd.f32 %v1403_v39, %v1402_v36 }
 0x105   : > { %v566_v51 = vpop.permute.xlu0 %565 }
 0x106   : > { %v640_v55 = vadd.f32 %v1366_v50, %v566_v51 }
 0x108   : > { %v715_v61 = vadd.f32 %v1404_v54, %v640_v55 }
 0x113   : > { %v1367_v38 = vpop.f32.mrf.mxu0 }
 0x115   : > { %v1368_v41 = vpop.f32.mrf.mxu0 }
 0x116   : > { %v1405_v40 = vpop.f32.mrf.mxu1  ;;  %v1369_v56 = vadd.f32 %v1368_v41, %v1367_v38 }
 0x118   : > { %v1406_v42 = vpop.f32.mrf.mxu1 }
 0x119   : > { %v1407_v63 = vadd.f32 %v1406_v42, %v1405_v40 }
 0x11a   : > { %v1440_v43 = vpop.f32.mrf.mxu0 }
 0x11c   : > { %v1478_v44 = vpop.f32.mrf.mxu1  ;;  %v1441_v45 = vpop.f32.mrf.mxu0 }
 0x11d   : > { %v1442_v60 = vadd.f32 %v1441_v45, %v1440_v43 }
 0x11e   : > { %v1479_v46 = vpop.f32.mrf.mxu1 }
 0x11f   : > { %v790_v2 = vadd.f32 %v1442_v60, %v715_v61  ;;  %v1480_v3 = vadd.f32 %v1479_v46, %v1478_v44 }
 0x120   : > { %v1443_v47 = vpop.f32.mrf.mxu0  ;;  %v571_v58 = vpop.permute.xlu0 %570 }
 0x121   : > { %v645_v62 = vadd.f32 %v1369_v56, %v571_v58  ;;  %v865_v9 = vadd.f32 %v1480_v3, %v790_v2 }
 0x122   : > { %v1444_v49 = vpop.f32.mrf.mxu0 }
 0x123   : > { %v1481_v48 = vpop.f32.mrf.mxu1  ;;  %v1445_v4 = vadd.f32 %v1444_v49, %v1443_v47  ;;  %v720_v5 = vadd.f32 %v1407_v63, %v645_v62 }
 0x125   : > { %v1482_v53 = vpop.f32.mrf.mxu1  ;;  %v795_v10 = vadd.f32 %v1445_v4, %v720_v5 }
 0x126   : > { %v1483_v11 = vadd.f32 %v1482_v53, %v1481_v48 }
 0x128   : > { %v870_v17 = vadd.f32 %v1483_v11, %v795_v10 }
 0x13e   : > { %v1516_v52 = vpop.f32.mrf.mxu0 }
 0x140   : > { %v1554_v57 = vpop.f32.mrf.mxu1  ;;  %v1517_v59 = vpop.f32.mrf.mxu0 }
 0x141   : > { %v1518_v6 = vadd.f32 %v1517_v59, %v1516_v52 }
 0x142   : > { %v1555_v0 = vpop.f32.mrf.mxu1 }
 0x143   : > { %v940_v12 = vadd.f32 %v1518_v6, %v865_v9  ;;  %v1556_v13 = vadd.f32 %v1555_v0, %v1554_v57 }
 0x144   : > { %v1519_v1 = vpop.f32.mrf.mxu0 }
 0x145   : > { %v1015_v20 = vadd.f32 %v1556_v13, %v940_v12 }
 0x146   : > { %v1520_v8 = vpop.f32.mrf.mxu0 }
 0x147   : > { %v1557_v7 = vpop.f32.mrf.mxu1  ;;  %v1521_v14 = vadd.f32 %v1520_v8, %v1519_v1 }
 0x149   : > { %v1558_v15 = vpop.f32.mrf.mxu1  ;;  %v945_v21 = vadd.f32 %v1521_v14, %v870_v17 }
 0x14a   : > { %v1559_v22 = vadd.f32 %v1558_v15, %v1557_v7 }
 0x14c   : > { %v1020_v30 = vadd.f32 %v1559_v22, %v945_v21 }
 0x163   : > { %v1592_v16 = vpop.f32.mrf.mxu0  ;;  %v1630_v18 = vpop.f32.mrf.mxu1 }
 0x165   : > { %v1593_v19 = vpop.f32.mrf.mxu0  ;;  %v1631_v24 = vpop.f32.mrf.mxu1 }
 0x166   : > { %v1594_v23 = vadd.f32 %v1593_v19, %v1592_v16  ;;  %v1632_v27 = vadd.f32 %v1631_v24, %v1630_v18 }
 0x167   : > { %v1595_v25 = vpop.f32.mrf.mxu0  ;;  %v1633_v28 = vpop.f32.mrf.mxu1 }
 0x168   : > { %v1090_v26 = vadd.f32 %v1594_v23, %v1015_v20 }
 0x169   : > { %v1596_v29 = vpop.f32.mrf.mxu0  ;;  %v1634_v33 = vpop.f32.mrf.mxu1 }
 0x16a   : > { %v1165_v31 = vadd.f32 %v1632_v27, %v1090_v26  ;;  %v1597_v32 = vadd.f32 %v1596_v29, %v1595_v25  ;;  %v1635_v36 = vadd.f32 %v1634_v33, %v1633_v28 }
 0x16c   : > { %v1173_v34 = vmax.f32 %v1165_v31, 0.0  ;;  %v1095_v35 = vadd.f32 %v1597_v32, %v1020_v30 }
 0x16e   : > { %1176 = vst.msk [vmem:[%s272_s13] sm:$0xff] %vm1175_vm0, %v1173_v34  ;;  %v1170_v37 = vadd.f32 %v1635_v36, %v1095_v35 }
 0x170   : > { %v1174_v38 = vmax.f32 %v1170_v37, 0.0 }
 0x172   : > { %1177 = vst.msk [vmem:[%s272_s13 + $0x8] sm:$0xff] %vm1175_vm0, %v1174_v38 }
 0x173 PF: > { %s13_s16 = sadd.s32 1, %s1716_s16   ;;  %s2106_s12 = smov %s1708_s14 }
 0x174   : > { %p10_p7 = scmp.ge.s32.totalorder %s13_s16, 8   ;;  %s2107_s13 = smov %s1712_s15 }
 0x175   : > { %s2108_s14 = smov %s2111_s17  ;;  %s2109_s15 = smov %s2115_s18 }
 0x176   :  { %12 = sbr.rel (!%p10_p7) target bundleno = 3 (0x3), region = 68 }

// kernel: rmasknet_forward.14
= control target key start
LH: loop header
LB: loop body
LE: loop exit
PB: predicated region body
PF: predicated region fallthrough
CT: control target
= control target key end

     0   :  { %s1081_s12 = smov 0   ;;  %s1083_s13 = smov 0   ;;  %s1288_s0 = inlined_call_operand.vmem [shape: f32[3,2,1024,64], index: 0, kind: input, shape index: {}]   ;;  %s1289_s1 = inlined_call_operand.vmem [shape: f32[3,8,1024], index: 1, kind: input, shape index: {}]   ;;  %s1290_s2 = inlined_call_operand.vmem [shape: f32[3,8,1], index: 2, kind: input, shape index: {}]   ;;  %s1291_s3 = inlined_call_operand.vmem [shape: f32[3,2,8,64], index: 3, kind: output, shape index: {}]  }
   0x1   :  { %s1085_s14 = smov 0   ;;  %s1087_s15 = smov 0  }
   0x2   :  { %s1089_s16 = smov 0  }
   0x3 LB: > { %s28_s17 = sadd.s32 1, %s1050_s14  ;;  %s32_s18 = sadd.s32 1, %s1054_s15  ;;  %s1058_s16 = sphi %s1089_s16, %s13_s16   ;;  %s1054_s15 = sphi %s1087_s15, %s1295_s15   ;;  %s1050_s14 = sphi %s1085_s14, %s1294_s14   ;;  %s1046_s13 = sphi %s1083_s13, %s1293_s13   ;;  %s1042_s12 = sphi %s1081_s12, %s1292_s12  }
   0x4   : > { %p30_p0 = scmp.ge.s32.totalorder %s28_s17, 2  ;;  %p826_p1 = scmp.ge.s32.totalorder %s1058_s16, 1 }
   0x5   : > { %p190_p2 = scmp.lt.s32.totalorder %s1058_s16, 7 }
   0x6   : > { %s1297_s17 = smov (%p30_p0, %s28_s17), 0  ;;  %s1299_s18 = smov (!%p30_p0, %s32_s18), %s1054_s15 }
   0x7   : > { %p191_p3 = pnand %p826_p1, %p190_p2  ;;  %p34_p4 = scmp.ge.s32.totalorder %s1299_s18, 3 }
   0x8   : > { %p236_p5 = scmp.lt.s32.totalorder (!%p191_p3), %s1046_s13, 2  ;;  %p238_p6 = scmp.lt.s32.totalorder (!%p191_p3), %s1042_s12, 1 }
   0x9   : > { %s1301_s18 = smov (%p34_p4, %s1299_s18), 0  ;;  %194 = sbr.rel (%p191_p3) target bundleno = 292 (0x124), region = 32 }
   0xe   : > { %v1060_v0 = vmov 0   ;;  %s1303_s13 = smov (!%p236_p5, %s1046_s13), 2  ;;  %s1305_s12 = smov (!%p238_p6, %s1042_s12), 1  ;;  %vm691_vm0 = vcmask 523264  }
   0xf   : > { %1019 = vset.pattern.permute.xlu0 %v1060_v0  ;;  %s828_s19 = sshll.u32 %s1303_s13, 8  ;;  %s837_s20 = sshll.u32 %s1303_s13, 6 }
  0x10   : > { %s827_s21 = sshll.u32 %s1305_s12, 7  ;;  %s1121_s24 = scalar_lea.vmem %s1289_s1, %s837_s20 }
  0x11   : > { %s245_s25 = sadd.s32 %s828_s19, %s827_s21  ;;  %v397_v1 = vld [vmem:[%s1121_s24 + $0x8] sm:$0xff]  ;;  %v399_v2 = vld [vmem:[%s1121_s24 + $0x18] sm:$0xff]  ;;  %s832_s26 = sshll.u32 %s1303_s13, 3 }
  0x12   : > { %s829_s27 = sshll.u32 %s245_s25, 3  ;;  %474 = vmatprep.mubr.f32.mxu0 %v397_v1  ;;  %544 = vmatprep.mubr.f32.mxu1 %v399_v2  ;;  %s256_s30 = scalar_lea.vmem %s1290_s2, %s832_s26 }
  0x13   : > { %s1132_s6 = scalar_lea.vmem %s1288_s0, %s829_s27  ;;  %v404_v3 = vld [vmem:[%s256_s30] sm:$0xff]  ;;  %s833_s7 = sshll.u32 %s1303_s13, 1 }
  0x14   : > { %v299_v4 = vld [vmem:[%s1132_s6 + $0xf8] sm:$0xff]  ;;  %407 = vperm.xlu0 %1019, %v404_v3   ;;  %v298_v8 = vld [vmem:[%s1132_s6 + $0xf0] sm:$0xff]  ;;  %v297_v12 = vld [vmem:[%s1132_s6 + $0xe8] sm:$0xff]  ;;  %s265_s8 = sadd.s32 %s833_s7, %s1305_s12 }
  0x15   : > { %v331_v5 = vld [vmem:[%s1132_s6 + $0x1f8] sm:$0xff]  ;;  %838 = vmatprep.subr.mxu0 %v299_v4  ;;  %v330_v9 = vld [vmem:[%s1132_s6 + $0x1f0] sm:$0xff]  ;;  %v329_v13 = vld [vmem:[%s1132_s6 + $0x1e8] sm:$0xff]  ;;  %s834_s9 = sshll.u32 %s265_s8, 3 }
  0x16   : > { %v283_v6 = vld [vmem:[%s1132_s6 + $0x78] sm:$0xff]  ;;  %873 = vmatprep.subr.mxu1 %v331_v5  ;;  %v282_v10 = vld [vmem:[%s1132_s6 + $0x70] sm:$0xff]  ;;  %v281_v14 = vld [vmem:[%s1132_s6 + $0x68] sm:$0xff]  ;;  %s267_s19 = scalar_lea.vmem %s1291_s3, %s834_s9 }
  0x17   : > { %v315_v7 = vld [vmem:[%s1132_s6 + $0x178] sm:$0xff]  ;;  %839 = vmatpush3.msra.mxu0 %v283_v6  ;;  %v314_v11 = vld [vmem:[%s1132_s6 + $0x170] sm:$0xff]  ;;  %v313_v15 = vld [vmem:[%s1132_s6 + $0x168] sm:$0xff] }
  0x18   : > { %874 = vmatpush3.msra.mxu1 %v315_v7  ;;  %840 = vmatprep.subr.mxu0 %v298_v8  ;;  %v296_v16 = vld [vmem:[%s1132_s6 + $0xe0] sm:$0xff]  ;;  %v295_v20 = vld [vmem:[%s1132_s6 + $0xd8] sm:$0xff]  ;;  %v294_v24 = vld [vmem:[%s1132_s6 + $0xd0] sm:$0xff] }
  0x19   : > { %875 = vmatprep.subr.mxu1 %v330_v9  ;;  %841 = vmatpush3.msra.mxu0 %v282_v10  ;;  %v328_v17 = vld [vmem:[%s1132_s6 + $0x1e0] sm:$0xff]  ;;  %v327_v21 = vld [vmem:[%s1132_s6 + $0x1d8] sm:$0xff]  ;;  %v326_v25 = vld [vmem:[%s1132_s6 + $0x1d0] sm:$0xff] }
  0x1a   : > { %876 = vmatpush3.msra.mxu1 %v314_v11  ;;  %842 = vmatprep.subr.mxu0 %v297_v12  ;;  %v280_v18 = vld [vmem:[%s1132_s6 + $0x60] sm:$0xff]  ;;  %v279_v22 = vld [vmem:[%s1132_s6 + $0x58] sm:$0xff]  ;;  %v278_v26 = vld [vmem:[%s1132_s6 + $0x50] sm:$0xff] }
  0x1b   : > { %877 = vmatprep.subr.mxu1 %v329_v13  ;;  %v312_v19 = vld [vmem:[%s1132_s6 + $0x160] sm:$0xff]  ;;  %843 = vmatpush3.msra.mxu0 %v281_v14  ;;  %v311_v23 = vld [vmem:[%s1132_s6 + $0x158] sm:$0xff]  ;;  %v310_v27 = vld [vmem:[%s1132_s6 + $0x150] sm:$0xff] }
  0x1c   : > { %878 = vmatpush3.msra.mxu1 %v313_v15  ;;  %844 = vmatprep.subr.mxu0 %v296_v16  ;;  %v293_v28 = vld [vmem:[%s1132_s6 + $0xc8] sm:$0xff]  ;;  %v292_v32 = vld [vmem:[%s1132_s6 + $0xc0] sm:$0xff]  ;;  %v291_v36 = vld [vmem:[%s1132_s6 + $0xb8] sm:$0xff] }
  0x1d   : > { %879 = vmatprep.subr.mxu1 %v328_v17  ;;  %845 = vmatpush3.msra.mxu0 %v280_v18  ;;  %v325_v29 = vld [vmem:[%s1132_s6 + $0x1c8] sm:$0xff]  ;;  %v324_v33 = vld [vmem:[%s1132_s6 + $0x1c0] sm:$0xff]  ;;  %v323_v37 = vld [vmem:[%s1132_s6 + $0x1b8] sm:$0xff] }
  0x1e   : > { %880 = vmatpush3.msra.mxu1 %v312_v19  ;;  %846 = vmatprep.subr.mxu0 %v295_v20  ;;  %v277_v30 = vld [vmem:[%s1132_s6 + $0x48] sm:$0xff]  ;;  %v276_v34 = vld [vmem:[%s1132_s6 + $0x40] sm:$0xff]  ;;  %v275_v38 = vld [vmem:[%s1132_s6 + $0x38] sm:$0xff] }
  0x1f   : > { %881 = vmatprep.subr.mxu1 %v327_v21  ;;  %847 = vmatpush3.msra.mxu0 %v279_v22  ;;  %v309_v31 = vld [vmem:[%s1132_s6 + $0x148] sm:$0xff]  ;;  %v308_v35 = vld [vmem:[%s1132_s6 + $0x140] sm:$0xff]  ;;  %v307_v39 = vld [vmem:[%s1132_s6 + $0x138] sm:$0xff] }
  0x20   : > { %882 = vmatpush3.msra.mxu1 %v311_v23  ;;  %848 = vmatprep.subr.mxu0 %v294_v24  ;;  %v290_v40 = vld [vmem:[%s1132_s6 + $0xb0] sm:$0xff]  ;;  %v289_v44 = vld [vmem:[%s1132_s6 + $0xa8] sm:$0xff]  ;;  %v288_v48 = vld [vmem:[%s1132_s6 + $0xa0] sm:$0xff] }
  0x21   : > { %883 = vmatprep.subr.mxu1 %v326_v25  ;;  %849 = vmatpush3.msra.mxu0 %v278_v26  ;;  %v322_v41 = vld [vmem:[%s1132_s6 + $0x1b0] sm:$0xff]  ;;  %v321_v45 = vld [vmem:[%s1132_s6 + $0x1a8] sm:$0xff]  ;;  %v320_v49 = vld [vmem:[%s1132_s6 + $0x1a0] sm:$0xff] }
  0x22   : > { %884 = vmatpush3.msra.mxu1 %v310_v27  ;;  %850 = vmatprep.subr.mxu0 %v293_v28  ;;  %v274_v42 = vld [vmem:[%s1132_s6 + $0x30] sm:$0xff]  ;;  %v273_v46 = vld [vmem:[%s1132_s6 + $0x28] sm:$0xff]  ;;  %v272_v50 = vld [vmem:[%s1132_s6 + $0x20] sm:$0xff] }
  0x23   : > { %885 = vmatprep.subr.mxu1 %v325_v29  ;;  %851 = vmatpush3.msra.mxu0 %v277_v30  ;;  %v306_v43 = vld [vmem:[%s1132_s6 + $0x130] sm:$0xff]  ;;  %v305_v47 = vld [vmem:[%s1132_s6 + $0x128] sm:$0xff]  ;;  %v304_v51 = vld [vmem:[%s1132_s6 + $0x120] sm:$0xff] }
  0x24   : > { %886 = vmatpush3.msra.mxu1 %v309_v31  ;;  %852 = vmatprep.subr.mxu0 %v292_v32  ;;  %v287_v52 = vld [vmem:[%s1132_s6 + $0x98] sm:$0xff]  ;;  %v286_v56 = vld [vmem:[%s1132_s6 + $0x90] sm:$0xff]  ;;  %v285_v60 = vld [vmem:[%s1132_s6 + $0x88] sm:$0xff] }
  0x25   : > { %887 = vmatprep.subr.mxu1 %v324_v33  ;;  %853 = vmatpush3.msra.mxu0 %v276_v34  ;;  %v319_v53 = vld [vmem:[%s1132_s6 + $0x198] sm:$0xff]  ;;  %v318_v57 = vld [vmem:[%s1132_s6 + $0x190] sm:$0xff]  ;;  %v317_v61 = vld [vmem:[%s1132_s6 + $0x188] sm:$0xff] }
  0x26   : > { %888 = vmatpush3.msra.mxu1 %v308_v35  ;;  %854 = vmatprep.subr.mxu0 %v291_v36  ;;  %v271_v54 = vld [vmem:[%s1132_s6 + $0x18] sm:$0xff]  ;;  %v270_v58 = vld [vmem:[%s1132_s6 + $0x10] sm:$0xff]  ;;  %v269_v62 = vld [vmem:[%s1132_s6 + $0x8] sm:$0xff] }
  0x27   : > { %889 = vmatprep.subr.mxu1 %v323_v37  ;;  %855 = vmatpush3.msra.mxu0 %v275_v38  ;;  %v303_v55 = vld [vmem:[%s1132_s6 + $0x118] sm:$0xff]  ;;  %v302_v59 = vld [vmem:[%s1132_s6 + $0x110] sm:$0xff]  ;;  %v301_v63 = vld [vmem:[%s1132_s6 + $0x108] sm:$0xff] }
  0x28   : > { %890 = vmatpush3.msra.mxu1 %v307_v39  ;;  %856 = vmatprep.subr.mxu0 %v290_v40  ;;  %v284_v0 = vld [vmem:[%s1132_s6 + $0x80] sm:$0xff]  ;;  %v363_v5 = vld [vmem:[%s1132_s6 + $0x2f8] sm:$0xff]  ;;  %v398_v7 = vld [vmem:[%s1121_s24 + $0x10] sm:$0xff] }
  0x29   : > { %891 = vmatprep.subr.mxu1 %v322_v41  ;;  %857 = vmatpush3.msra.mxu0 %v274_v42  ;;  %v316_v1 = vld [vmem:[%s1132_s6 + $0x180] sm:$0xff]  ;;  %v395_v6 = vld [vmem:[%s1132_s6 + $0x3f8] sm:$0xff]  ;;  %v362_v10 = vld [vmem:[%s1132_s6 + $0x2f0] sm:$0xff] }
  0x2a   : > { %892 = vmatpush3.msra.mxu1 %v306_v43  ;;  %858 = vmatprep.subr.mxu0 %v289_v44  ;;  %v268_v2 = vld [vmem:[%s1132_s6] sm:$0xff]  ;;  %v347_v8 = vld [vmem:[%s1132_s6 + $0x278] sm:$0xff]  ;;  %v394_v11 = vld [vmem:[%s1132_s6 + $0x3f0] sm:$0xff] }
  0x2b   : > { %893 = vmatprep.subr.mxu1 %v321_v45  ;;  %859 = vmatpush3.msra.mxu0 %v273_v46  ;;  %v300_v3 = vld [vmem:[%s1132_s6 + $0x100] sm:$0xff]  ;;  %v379_v9 = vld [vmem:[%s1132_s6 + $0x378] sm:$0xff]  ;;  %v346_v12 = vld [vmem:[%s1132_s6 + $0x270] sm:$0xff] }
  0x2c   : > { %894 = vmatpush3.msra.mxu1 %v305_v47  ;;  %860 = vmatprep.subr.mxu0 %v288_v48  ;;  %v396_v4 = vld [vmem:[%s1121_s24] sm:$0xff]  ;;  %v378_v13 = vld [vmem:[%s1132_s6 + $0x370] sm:$0xff]  ;;  %v361_v14 = vld [vmem:[%s1132_s6 + $0x2e8] sm:$0xff] }
  0x2d   : > { %895 = vmatprep.subr.mxu1 %v320_v49  ;;  %861 = vmatpush3.msra.mxu0 %v272_v50  ;;  %v393_v15 = vld [vmem:[%s1132_s6 + $0x3e8] sm:$0xff]  ;;  %v360_v18 = vld [vmem:[%s1132_s6 + $0x2e0] sm:$0xff]  ;;  %v359_v22 = vld [vmem:[%s1132_s6 + $0x2d8] sm:$0xff] }
  0x2e   : > { %896 = vmatpush3.msra.mxu1 %v304_v51  ;;  %862 = vmatprep.subr.mxu0 %v287_v52  ;;  %v345_v16 = vld [vmem:[%s1132_s6 + $0x268] sm:$0xff]  ;;  %v392_v19 = vld [vmem:[%s1132_s6 + $0x3e0] sm:$0xff]  ;;  %v391_v23 = vld [vmem:[%s1132_s6 + $0x3d8] sm:$0xff] }
  0x2f   : > { %897 = vmatprep.subr.mxu1 %v319_v53  ;;  %863 = vmatpush3.msra.mxu0 %v271_v54  ;;  %v377_v17 = vld [vmem:[%s1132_s6 + $0x368] sm:$0xff]  ;;  %v344_v20 = vld [vmem:[%s1132_s6 + $0x260] sm:$0xff]  ;;  %v343_v24 = vld [vmem:[%s1132_s6 + $0x258] sm:$0xff] }
  0x30   : > { %898 = vmatpush3.msra.mxu1 %v303_v55  ;;  %864 = vmatprep.subr.mxu0 %v286_v56  ;;  %v376_v21 = vld [vmem:[%s1132_s6 + $0x360] sm:$0xff]  ;;  %v375_v25 = vld [vmem:[%s1132_s6 + $0x358] sm:$0xff]  ;;  %v358_v26 = vld [vmem:[%s1132_s6 + $0x2d0] sm:$0xff] }
  0x31   : > { %899 = vmatprep.subr.mxu1 %v318_v57  ;;  %865 = vmatpush3.msra.mxu0 %v270_v58  ;;  %v390_v27 = vld [vmem:[%s1132_s6 + $0x3d0] sm:$0xff]  ;;  %v357_v30 = vld [vmem:[%s1132_s6 + $0x2c8] sm:$0xff]  ;;  %v356_v34 = vld [vmem:[%s1132_s6 + $0x2c0] sm:$0xff] }
  0x32   : > { %900 = vmatpush3.msra.mxu1 %v302_v59  ;;  %866 = vmatprep.subr.mxu0 %v285_v60  ;;  %v342_v28 = vld [vmem:[%s1132_s6 + $0x250] sm:$0xff]  ;;  %v389_v31 = vld [vmem:[%s1132_s6 + $0x3c8] sm:$0xff]  ;;  %v388_v35 = vld [vmem:[%s1132_s6 + $0x3c0] sm:$0xff] }
  0x33   : > { %901 = vmatprep.subr.mxu1 %v317_v61  ;;  %867 = vmatpush3.msra.mxu0 %v269_v62  ;;  %v374_v29 = vld [vmem:[%s1132_s6 + $0x350] sm:$0xff]  ;;  %v341_v32 = vld [vmem:[%s1132_s6 + $0x248] sm:$0xff]  ;;  %v340_v36 = vld [vmem:[%s1132_s6 + $0x240] sm:$0xff] }
  0x34   : > { %902 = vmatpush3.msra.mxu1 %v301_v63  ;;  %868 = vmatprep.subr.mxu0 %v284_v0  ;;  %v373_v33 = vld [vmem:[%s1132_s6 + $0x348] sm:$0xff]  ;;  %v372_v37 = vld [vmem:[%s1132_s6 + $0x340] sm:$0xff]  ;;  %v355_v38 = vld [vmem:[%s1132_s6 + $0x2b8] sm:$0xff] }
  0x35   : > { %903 = vmatprep.subr.mxu1 %v316_v1  ;;  %869 = vmatpush3.msra.mxu0 %v268_v2  ;;  %v387_v39 = vld [vmem:[%s1132_s6 + $0x3b8] sm:$0xff]  ;;  %v354_v42 = vld [vmem:[%s1132_s6 + $0x2b0] sm:$0xff]  ;;  %v353_v46 = vld [vmem:[%s1132_s6 + $0x2a8] sm:$0xff] }
  0x36   : > { %904 = vmatpush3.msra.mxu1 %v300_v3  ;;  %475 = vmatmul.mubr.f32.vlgmr.msra.gmra.mxu0 %v396_v4  ;;  %v339_v40 = vld [vmem:[%s1132_s6 + $0x238] sm:$0xff]  ;;  %v386_v43 = vld [vmem:[%s1132_s6 + $0x3b0] sm:$0xff]  ;;  %v385_v47 = vld [vmem:[%s1132_s6 + $0x3a8] sm:$0xff] }
  0x37   : > { %908 = vmatprep.subr.mxu0 %v363_v5  ;;  %943 = vmatprep.subr.mxu1 %v395_v6  ;;  %v371_v41 = vld [vmem:[%s1132_s6 + $0x338] sm:$0xff]  ;;  %v338_v44 = vld [vmem:[%s1132_s6 + $0x230] sm:$0xff]  ;;  %v337_v48 = vld [vmem:[%s1132_s6 + $0x228] sm:$0xff] }
  0x38   : > { %545 = vmatmul.mubr.f32.vlgmr.msra.gmra.mxu1 %v398_v7  ;;  %909 = vmatpush3.msra.mxu0 %v347_v8  ;;  %v370_v45 = vld [vmem:[%s1132_s6 + $0x330] sm:$0xff]  ;;  %v369_v49 = vld [vmem:[%s1132_s6 + $0x328] sm:$0xff]  ;;  %v352_v50 = vld [vmem:[%s1132_s6 + $0x2a0] sm:$0xff] }
  0x39   : > { %944 = vmatpush3.msra.mxu1 %v379_v9  ;;  %910 = vmatprep.subr.mxu0 %v362_v10  ;;  %v384_v51 = vld [vmem:[%s1132_s6 + $0x3a0] sm:$0xff]  ;;  %v351_v54 = vld [vmem:[%s1132_s6 + $0x298] sm:$0xff]  ;;  %v350_v58 = vld [vmem:[%s1132_s6 + $0x290] sm:$0xff] }
  0x3a   : > { %945 = vmatprep.subr.mxu1 %v394_v11  ;;  %911 = vmatpush3.msra.mxu0 %v346_v12  ;;  %v336_v52 = vld [vmem:[%s1132_s6 + $0x220] sm:$0xff]  ;;  %v383_v55 = vld [vmem:[%s1132_s6 + $0x398] sm:$0xff]  ;;  %v382_v59 = vld [vmem:[%s1132_s6 + $0x390] sm:$0xff] }
  0x3b   : > { %946 = vmatpush3.msra.mxu1 %v378_v13  ;;  %912 = vmatprep.subr.mxu0 %v361_v14  ;;  %v368_v53 = vld [vmem:[%s1132_s6 + $0x320] sm:$0xff]  ;;  %v335_v56 = vld [vmem:[%s1132_s6 + $0x218] sm:$0xff]  ;;  %v334_v60 = vld [vmem:[%s1132_s6 + $0x210] sm:$0xff] }
  0x3c   : > { %947 = vmatprep.subr.mxu1 %v393_v15  ;;  %913 = vmatpush3.msra.mxu0 %v345_v16  ;;  %v367_v57 = vld [vmem:[%s1132_s6 + $0x318] sm:$0xff]  ;;  %v366_v61 = vld [vmem:[%s1132_s6 + $0x310] sm:$0xff]  ;;  %v349_v62 = vld [vmem:[%s1132_s6 + $0x288] sm:$0xff] }
  0x3d   : > { %948 = vmatpush3.msra.mxu1 %v377_v17  ;;  %914 = vmatprep.subr.mxu0 %v360_v18  ;;  %v381_v63 = vld [vmem:[%s1132_s6 + $0x388] sm:$0xff]  ;;  %v348_v2 = vld [vmem:[%s1132_s6 + $0x280] sm:$0xff]  ;;  %v403_v7 = vld [vmem:[%s1121_s24 + $0x38] sm:$0xff] }
  0x3e   : > { %949 = vmatprep.subr.mxu1 %v392_v19  ;;  %915 = vmatpush3.msra.mxu0 %v344_v20  ;;  %v333_v0 = vld [vmem:[%s1132_s6 + $0x208] sm:$0xff]  ;;  %v380_v3 = vld [vmem:[%s1132_s6 + $0x380] sm:$0xff]  ;;  %v402_v9 = vld [vmem:[%s1121_s24 + $0x30] sm:$0xff] }
  0x3f   : > { %950 = vmatpush3.msra.mxu1 %v376_v21  ;;  %916 = vmatprep.subr.mxu0 %v359_v22  ;;  %v365_v1 = vld [vmem:[%s1132_s6 + $0x308] sm:$0xff]  ;;  %v332_v4 = vld [vmem:[%s1132_s6 + $0x200] sm:$0xff] }
  0x40   : > { %951 = vmatprep.subr.mxu1 %v391_v23  ;;  %917 = vmatpush3.msra.mxu0 %v343_v24  ;;  %v401_v5 = vld [vmem:[%s1121_s24 + $0x28] sm:$0xff]  ;;  %v364_v6 = vld [vmem:[%s1132_s6 + $0x300] sm:$0xff] }
  0x41   : > { %952 = vmatpush3.msra.mxu1 %v375_v25  ;;  %918 = vmatprep.subr.mxu0 %v358_v26  ;;  %v400_v8 = vld [vmem:[%s1121_s24 + $0x20] sm:$0xff] }
  0x42   : > { %953 = vmatprep.subr.mxu1 %v390_v27  ;;  %919 = vmatpush3.msra.mxu0 %v342_v28 }
  0x43   : > { %954 = vmatpush3.msra.mxu1 %v374_v29  ;;  %920 = vmatprep.subr.mxu0 %v357_v30 }
  0x44   : > { %955 = vmatprep.subr.mxu1 %v389_v31  ;;  %921 = vmatpush3.msra.mxu0 %v341_v32 }
  0x45   : > { %956 = vmatpush3.msra.mxu1 %v373_v33  ;;  %922 = vmatprep.subr.mxu0 %v356_v34 }
  0x46   : > { %957 = vmatprep.subr.mxu1 %v388_v35  ;;  %923 = vmatpush3.msra.mxu0 %v340_v36 }
  0x47   : > { %958 = vmatpush3.msra.mxu1 %v372_v37  ;;  %924 = vmatprep.subr.mxu0 %v355_v38 }
  0x48   : > { %959 = vmatprep.subr.mxu1 %v387_v39  ;;  %925 = vmatpush3.msra.mxu0 %v339_v40 }
  0x49   : > { %960 = vmatpush3.msra.mxu1 %v371_v41  ;;  %926 = vmatprep.subr.mxu0 %v354_v42 }
  0x4a   : > { %961 = vmatprep.subr.mxu1 %v386_v43  ;;  %927 = vmatpush3.msra.mxu0 %v338_v44 }
  0x4b   : > { %962 = vmatpush3.msra.mxu1 %v370_v45  ;;  %928 = vmatprep.subr.mxu0 %v353_v46 }
  0x4c   : > { %963 = vmatprep.subr.mxu1 %v385_v47  ;;  %929 = vmatpush3.msra.mxu0 %v337_v48 }
  0x4d   : > { %964 = vmatpush3.msra.mxu1 %v369_v49  ;;  %930 = vmatprep.subr.mxu0 %v352_v50 }
  0x4e   : > { %965 = vmatprep.subr.mxu1 %v384_v51  ;;  %931 = vmatpush3.msra.mxu0 %v336_v52 }
  0x4f   : > { %966 = vmatpush3.msra.mxu1 %v368_v53  ;;  %932 = vmatprep.subr.mxu0 %v351_v54 }
  0x50   : > { %967 = vmatprep.subr.mxu1 %v383_v55  ;;  %933 = vmatpush3.msra.mxu0 %v335_v56 }
  0x51   : > { %968 = vmatpush3.msra.mxu1 %v367_v57  ;;  %934 = vmatprep.subr.mxu0 %v350_v58 }
  0x52   : > { %969 = vmatprep.subr.mxu1 %v382_v59  ;;  %935 = vmatpush3.msra.mxu0 %v334_v60 }
  0x53   : > { %970 = vmatpush3.msra.mxu1 %v366_v61  ;;  %936 = vmatprep.subr.mxu0 %v349_v62 }
  0x54   : > { %971 = vmatprep.subr.mxu1 %v381_v63  ;;  %937 = vmatpush3.msra.mxu0 %v333_v0 }
  0x55   : > { %972 = vmatpush3.msra.mxu1 %v365_v1  ;;  %938 = vmatprep.subr.mxu0 %v348_v2 }
  0x56   : > { %973 = vmatprep.subr.mxu1 %v380_v3  ;;  %939 = vmatpush3.msra.mxu0 %v332_v4 }
  0x57   : > { %614 = vmatprep.mubr.f32.mxu0 %v401_v5  ;;  %974 = vmatpush3.msra.mxu1 %v364_v6 }
  0x58   : > { %684 = vmatprep.mubr.f32.mxu1 %v403_v7  ;;  %615 = vmatmul.mubr.f32.vlgmr.msra.gmra.mxu0 %v400_v8 }
  0x59   : > { %685 = vmatmul.mubr.f32.vlgmr.msra.gmra.mxu1 %v402_v9 }
  0x8f   : > { %v408_v15 = vpop.permute.xlu0 %407 }
  0xf6   : > { %v870_v10 = vpop.f32.mrf.mxu0 }
  0xf8   : > { %v905_v11 = vpop.f32.mrf.mxu1  ;;  %v871_v12 = vpop.f32.mrf.mxu0 }
  0xf9   : > { %v872_v13 = vadd.f32 %v871_v12, %v870_v10 }
  0xfa   : > { %v906_v14 = vpop.f32.mrf.mxu1 }
  0xfb   : > { %v907_v16 = vadd.f32 %v906_v14, %v905_v11  ;;  %v477_v17 = vadd.f32 %v872_v13, %v408_v15 }
  0xfd   : > { %v547_v22 = vadd.f32 %v907_v16, %v477_v17 }
 0x118   : > { %v940_v18 = vpop.f32.mrf.mxu0 }
 0x119   : > { %v975_v19 = vpop.f32.mrf.mxu1 }
 0x11a   : > { %v941_v20 = vpop.f32.mrf.mxu0 }
 0x11b   : > { %v976_v21 = vpop.f32.mrf.mxu1  ;;  %v942_v23 = vadd.f32 %v941_v20, %v940_v18 }
 0x11c   : > { %v977_v25 = vadd.f32 %v976_v21, %v975_v19 }
 0x11d   : > { %v617_v24 = vadd.f32 %v942_v23, %v547_v22 }
 0x11f   : > { %v687_v26 = vadd.f32 %v977_v25, %v617_v24 }
 0x121   : > { %v690_v27 = vmax.f32 %v687_v26, 0.0 }
 0x123   : > { %692 = vst.msk [vmem:[%s267_s19] sm:$0xff] %vm691_vm0, %v690_v27 }
 0x124 PF: > { %s13_s16 = sadd.s32 1, %s1058_s16   ;;  %s1292_s12 = smov %s1050_s14 }
 0x125   : > { %p10_p7 = scmp.ge.s32.totalorder %s13_s16, 8   ;;  %s1293_s13 = smov %s1054_s15 }
 0x126   : > { %s1294_s14 = smov %s1297_s17  ;;  %s1295_s15 = smov %s1301_s18 }
 0x127   :  { %12 = sbr.rel (!%p10_p7) target bundleno = 3 (0x3), region = 68 }

// kernel: rmasknet_forward.15
= control target key start
LH: loop header
LB: loop body
LE: loop exit
PB: predicated region body
PF: predicated region fallthrough
CT: control target
= control target key end

     0   :  { %s1109_s12 = smov 0   ;;  %s1111_s13 = smov 0   ;;  %s1458_s0 = inlined_call_operand.vmem [shape: f32[3,2,512,512], index: 0, kind: input, shape index: {}]   ;;  %s1459_s1 = inlined_call_operand.vmem [shape: f32[3,4,512], index: 1, kind: input, shape index: {}]   ;;  %s1460_s2 = inlined_call_operand.vmem [shape: f32[3,4,1], index: 2, kind: input, shape index: {}]   ;;  %s1461_s3 = inlined_call_operand.vmem [shape: f32[3,2,4,512], index: 3, kind: output, shape index: {}]  }
   0x1   :  { %s1113_s14 = smov 0   ;;  %s1115_s15 = smov 0  }
   0x2   :  { %s1117_s16 = smov 0  }
   0x3 LB: > { %s28_s17 = sadd.s32 1, %s1078_s14  ;;  %s32_s18 = sadd.s32 1, %s1082_s15  ;;  %s1086_s16 = sphi %s1117_s16, %s13_s16   ;;  %s1082_s15 = sphi %s1115_s15, %s1465_s15   ;;  %s1078_s14 = sphi %s1113_s14, %s1464_s14   ;;  %s1074_s13 = sphi %s1111_s13, %s1463_s13   ;;  %s1070_s12 = sphi %s1109_s12, %s1462_s12  }
   0x4   : > { %p30_p0 = scmp.ge.s32.totalorder %s28_s17, 2  ;;  %p989_p1 = scmp.ge.s32.totalorder %s1086_s16, 1 }
   0x5   : > { %p192_p2 = scmp.lt.s32.totalorder %s1086_s16, 7 }
   0x6   : > { %s1467_s17 = smov (%p30_p0, %s28_s17), 0  ;;  %s1469_s18 = smov (!%p30_p0, %s32_s18), %s1082_s15 }
   0x7   : > { %p193_p3 = pnand %p989_p1, %p192_p2  ;;  %p34_p4 = scmp.ge.s32.totalorder %s1469_s18, 3 }
   0x8   : > { %p242_p5 = scmp.lt.s32.totalorder (!%p193_p3), %s1074_s13, 2  ;;  %p244_p6 = scmp.lt.s32.totalorder (!%p193_p3), %s1070_s12, 1 }
   0x9   : > { %s1471_s18 = smov (%p34_p4, %s1469_s18), 0  ;;  %196 = sbr.rel (%p193_p3) target bundleno = 355 (0x163), region = 32 }
   0xe   : > { %s1473_s13 = smov (!%p242_p5, %s1074_s13), 2  ;;  %s1475_s12 = smov (!%p244_p6, %s1070_s12), 1 }
   0xf   : > { %s991_s19 = sshll.u32 %s1473_s13, 9  ;;  %s1001_s20 = sshll.u32 %s1473_s13, 4 }
  0x10   : > { %s990_s21 = sshll.u32 %s1475_s12, 8  ;;  %s1149_s24 = scalar_lea.vmem %s1459_s1, %s1001_s20 }
  0x11   : > { %s251_s25 = sadd.s32 %s991_s19, %s990_s21  ;;  %v1152_v0 = vld [vmem:[%s1149_s24] sm:$0xff]  ;;  %v1155_v1 = vld [vmem:[%s1149_s24 + $0x8] sm:$0xff]  ;;  %s995_s30 = sshll.u32 %s1473_s13, 2 }
  0x12   : > { %s992_s26 = sshll.u32 %s251_s25, 3  ;;  %v1159_v2 = vcombine.high %v1152_v0, %v1152_v0  ;;  %v1163_v3 = vcombine.high %v1155_v1, %v1155_v1  ;;  %s263_s6 = scalar_lea.vmem %s1460_s2, %s995_s30 }
  0x13   : > { %s1168_s29 = scalar_lea.vmem %s1458_s0, %s992_s26  ;;  %s996_s7 = sshll.u32 %s1475_s12, 2 }
  0x14   : > { %v339_v4 = vld [vmem:[%s1168_s29 + $0x1e8] sm:$0xff]  ;;  %v338_v6 = vld [vmem:[%s1168_s29 + $0x1e0] sm:$0xff]  ;;  %612 = vmatprep.mubr.f32.mxu0 %v1159_v2  ;;  %683 = vmatprep.mubr.f32.mxu1 %v1163_v3  ;;  %s997_s8 = sshll.u32 %s1473_s13, 3 }
  0x15   : > { %v467_v5 = vld [vmem:[%s1168_s29 + $0x5e8] sm:$0xff]  ;;  %548 = vmatprep.subr.mxu0 %v339_v4  ;;  %v466_v7 = vld [vmem:[%s1168_s29 + $0x5e0] sm:$0xff]  ;;  %s274_s9 = sadd.s32 %s997_s8, %s996_s7 }
  0x16   : > { %619 = vmatprep.subr.mxu1 %v467_v5  ;;  %v335_v8 = vld [vmem:[%s1168_s29 + $0x1c8] sm:$0xff]  ;;  %549 = vmatpush1.msra.mxu0 %v338_v6  ;;  %v334_v10 = vld [vmem:[%s1168_s29 + $0x1c0] sm:$0xff]  ;;  %s998_s10 = sshll.u32 %s274_s9, 2 }
  0x17   : > { %v463_v9 = vld [vmem:[%s1168_s29 + $0x5c8] sm:$0xff]  ;;  %620 = vmatpush1.msra.mxu1 %v466_v7  ;;  %v462_v11 = vld [vmem:[%s1168_s29 + $0x5c0] sm:$0xff]  ;;  %550 = vmatprep.subr.mxu0 %v335_v8  ;;  %s276_s20 = scalar_lea.vmem %s1461_s3, %s998_s10 }
  0x18   : > { %v331_v12 = vld [vmem:[%s1168_s29 + $0x1a8] sm:$0xff]  ;;  %621 = vmatprep.subr.mxu1 %v463_v9  ;;  %v330_v14 = vld [vmem:[%s1168_s29 + $0x1a0] sm:$0xff]  ;;  %551 = vmatpush1.msra.mxu0 %v334_v10 }
  0x19   : > { %v459_v13 = vld [vmem:[%s1168_s29 + $0x5a8] sm:$0xff]  ;;  %v458_v15 = vld [vmem:[%s1168_s29 + $0x5a0] sm:$0xff]  ;;  %622 = vmatpush1.msra.mxu1 %v462_v11  ;;  %552 = vmatprep.subr.mxu0 %v331_v12 }
  0x1a   : > { %v327_v16 = vld [vmem:[%s1168_s29 + $0x188] sm:$0xff]  ;;  %623 = vmatprep.subr.mxu1 %v459_v13  ;;  %v326_v18 = vld [vmem:[%s1168_s29 + $0x180] sm:$0xff]  ;;  %553 = vmatpush1.msra.mxu0 %v330_v14 }
  0x1b   : > { %v455_v17 = vld [vmem:[%s1168_s29 + $0x588] sm:$0xff]  ;;  %v454_v19 = vld [vmem:[%s1168_s29 + $0x580] sm:$0xff]  ;;  %624 = vmatpush1.msra.mxu1 %v458_v15  ;;  %554 = vmatprep.subr.mxu0 %v327_v16 }
  0x1c   : > { %v323_v20 = vld [vmem:[%s1168_s29 + $0x168] sm:$0xff]  ;;  %625 = vmatprep.subr.mxu1 %v455_v17  ;;  %v322_v22 = vld [vmem:[%s1168_s29 + $0x160] sm:$0xff]  ;;  %555 = vmatpush1.msra.mxu0 %v326_v18 }
  0x1d   : > { %v451_v21 = vld [vmem:[%s1168_s29 + $0x568] sm:$0xff]  ;;  %v450_v23 = vld [vmem:[%s1168_s29 + $0x560] sm:$0xff]  ;;  %626 = vmatpush1.msra.mxu1 %v454_v19  ;;  %556 = vmatprep.subr.mxu0 %v323_v20 }
  0x1e   : > { %v319_v24 = vld [vmem:[%s1168_s29 + $0x148] sm:$0xff]  ;;  %627 = vmatprep.subr.mxu1 %v451_v21  ;;  %v318_v26 = vld [vmem:[%s1168_s29 + $0x140] sm:$0xff]  ;;  %557 = vmatpush1.msra.mxu0 %v322_v22 }
  0x1f   : > { %v447_v25 = vld [vmem:[%s1168_s29 + $0x548] sm:$0xff]  ;;  %v446_v27 = vld [vmem:[%s1168_s29 + $0x540] sm:$0xff]  ;;  %628 = vmatpush1.msra.mxu1 %v450_v23  ;;  %558 = vmatprep.subr.mxu0 %v319_v24 }
  0x20   : > { %v315_v28 = vld [vmem:[%s1168_s29 + $0x128] sm:$0xff]  ;;  %629 = vmatprep.subr.mxu1 %v447_v25  ;;  %v314_v30 = vld [vmem:[%s1168_s29 + $0x120] sm:$0xff]  ;;  %559 = vmatpush1.msra.mxu0 %v318_v26 }
  0x21   : > { %v443_v29 = vld [vmem:[%s1168_s29 + $0x528] sm:$0xff]  ;;  %v442_v31 = vld [vmem:[%s1168_s29 + $0x520] sm:$0xff]  ;;  %630 = vmatpush1.msra.mxu1 %v446_v27  ;;  %560 = vmatprep.subr.mxu0 %v315_v28 }
  0x22   : > { %v311_v32 = vld [vmem:[%s1168_s29 + $0x108] sm:$0xff]  ;;  %631 = vmatprep.subr.mxu1 %v443_v29  ;;  %v310_v34 = vld [vmem:[%s1168_s29 + $0x100] sm:$0xff]  ;;  %561 = vmatpush1.msra.mxu0 %v314_v30 }
  0x23   : > { %v439_v33 = vld [vmem:[%s1168_s29 + $0x508] sm:$0xff]  ;;  %v438_v35 = vld [vmem:[%s1168_s29 + $0x500] sm:$0xff]  ;;  %632 = vmatpush1.msra.mxu1 %v442_v31  ;;  %562 = vmatprep.subr.mxu0 %v311_v32 }
  0x24   : > { %v307_v36 = vld [vmem:[%s1168_s29 + $0xe8] sm:$0xff]  ;;  %633 = vmatprep.subr.mxu1 %v439_v33  ;;  %v306_v38 = vld [vmem:[%s1168_s29 + $0xe0] sm:$0xff]  ;;  %563 = vmatpush1.msra.mxu0 %v310_v34 }
  0x25   : > { %v435_v37 = vld [vmem:[%s1168_s29 + $0x4e8] sm:$0xff]  ;;  %v434_v39 = vld [vmem:[%s1168_s29 + $0x4e0] sm:$0xff]  ;;  %634 = vmatpush1.msra.mxu1 %v438_v35  ;;  %564 = vmatprep.subr.mxu0 %v307_v36 }
  0x26   : > { %v303_v40 = vld [vmem:[%s1168_s29 + $0xc8] sm:$0xff]  ;;  %635 = vmatprep.subr.mxu1 %v435_v37  ;;  %v302_v42 = vld [vmem:[%s1168_s29 + $0xc0] sm:$0xff]  ;;  %565 = vmatpush1.msra.mxu0 %v306_v38 }
  0x27   : > { %v431_v41 = vld [vmem:[%s1168_s29 + $0x4c8] sm:$0xff]  ;;  %v430_v43 = vld [vmem:[%s1168_s29 + $0x4c0] sm:$0xff]  ;;  %636 = vmatpush1.msra.mxu1 %v434_v39  ;;  %566 = vmatprep.subr.mxu0 %v303_v40 }
  0x28   : > { %v299_v44 = vld [vmem:[%s1168_s29 + $0xa8] sm:$0xff]  ;;  %637 = vmatprep.subr.mxu1 %v431_v41  ;;  %v298_v46 = vld [vmem:[%s1168_s29 + $0xa0] sm:$0xff]  ;;  %567 = vmatpush1.msra.mxu0 %v302_v42 }
  0x29   : > { %v427_v45 = vld [vmem:[%s1168_s29 + $0x4a8] sm:$0xff]  ;;  %v426_v47 = vld [vmem:[%s1168_s29 + $0x4a0] sm:$0xff]  ;;  %638 = vmatpush1.msra.mxu1 %v430_v43  ;;  %568 = vmatprep.subr.mxu0 %v299_v44 }
  0x2a   : > { %v295_v48 = vld [vmem:[%s1168_s29 + $0x88] sm:$0xff]  ;;  %639 = vmatprep.subr.mxu1 %v427_v45  ;;  %v294_v50 = vld [vmem:[%s1168_s29 + $0x80] sm:$0xff]  ;;  %569 = vmatpush1.msra.mxu0 %v298_v46 }
  0x2b   : > { %v423_v49 = vld [vmem:[%s1168_s29 + $0x488] sm:$0xff]  ;;  %v422_v51 = vld [vmem:[%s1168_s29 + $0x480] sm:$0xff]  ;;  %640 = vmatpush1.msra.mxu1 %v426_v47  ;;  %570 = vmatprep.subr.mxu0 %v295_v48 }
  0x2c   : > { %v291_v52 = vld [vmem:[%s1168_s29 + $0x68] sm:$0xff]  ;;  %641 = vmatprep.subr.mxu1 %v423_v49  ;;  %v290_v54 = vld [vmem:[%s1168_s29 + $0x60] sm:$0xff]  ;;  %571 = vmatpush1.msra.mxu0 %v294_v50 }
  0x2d   : > { %v419_v53 = vld [vmem:[%s1168_s29 + $0x468] sm:$0xff]  ;;  %v418_v55 = vld [vmem:[%s1168_s29 + $0x460] sm:$0xff]  ;;  %642 = vmatpush1.msra.mxu1 %v422_v51  ;;  %572 = vmatprep.subr.mxu0 %v291_v52 }
  0x2e   : > { %v287_v56 = vld [vmem:[%s1168_s29 + $0x48] sm:$0xff]  ;;  %643 = vmatprep.subr.mxu1 %v419_v53  ;;  %v286_v58 = vld [vmem:[%s1168_s29 + $0x40] sm:$0xff]  ;;  %573 = vmatpush1.msra.mxu0 %v290_v54 }
  0x2f   : > { %v415_v57 = vld [vmem:[%s1168_s29 + $0x448] sm:$0xff]  ;;  %v414_v59 = vld [vmem:[%s1168_s29 + $0x440] sm:$0xff]  ;;  %644 = vmatpush1.msra.mxu1 %v418_v55  ;;  %574 = vmatprep.subr.mxu0 %v287_v56 }
  0x30   : > { %v283_v60 = vld [vmem:[%s1168_s29 + $0x28] sm:$0xff]  ;;  %645 = vmatprep.subr.mxu1 %v415_v57  ;;  %v282_v62 = vld [vmem:[%s1168_s29 + $0x20] sm:$0xff]  ;;  %575 = vmatpush1.msra.mxu0 %v286_v58 }
  0x31   : > { %v411_v61 = vld [vmem:[%s1168_s29 + $0x428] sm:$0xff]  ;;  %v410_v63 = vld [vmem:[%s1168_s29 + $0x420] sm:$0xff]  ;;  %646 = vmatpush1.msra.mxu1 %v414_v59  ;;  %576 = vmatprep.subr.mxu0 %v283_v60 }
  0x32   : > { %v279_v4 = vld [vmem:[%s1168_s29 + $0x8] sm:$0xff]  ;;  %647 = vmatprep.subr.mxu1 %v411_v61  ;;  %v278_v6 = vld [vmem:[%s1168_s29] sm:$0xff]  ;;  %577 = vmatpush1.msra.mxu0 %v282_v62 }
  0x33   : > { %v407_v5 = vld [vmem:[%s1168_s29 + $0x408] sm:$0xff]  ;;  %v406_v7 = vld [vmem:[%s1168_s29 + $0x400] sm:$0xff]  ;;  %648 = vmatpush1.msra.mxu1 %v410_v63  ;;  %578 = vmatprep.subr.mxu0 %v279_v4 }
  0x34   : > { %v403_v8 = vld [vmem:[%s1168_s29 + $0x3e8] sm:$0xff]  ;;  %649 = vmatprep.subr.mxu1 %v407_v5  ;;  %v402_v10 = vld [vmem:[%s1168_s29 + $0x3e0] sm:$0xff]  ;;  %579 = vmatpush1.msra.mxu0 %v278_v6 }
  0x35   : > { %v531_v9 = vld [vmem:[%s1168_s29 + $0x7e8] sm:$0xff]  ;;  %v530_v11 = vld [vmem:[%s1168_s29 + $0x7e0] sm:$0xff]  ;;  %650 = vmatpush1.msra.mxu1 %v406_v7  ;;  %580 = vmatprep.subr.mxu0 %v403_v8 }
  0x36   : > { %v399_v12 = vld [vmem:[%s1168_s29 + $0x3c8] sm:$0xff]  ;;  %651 = vmatprep.subr.mxu1 %v531_v9  ;;  %v398_v14 = vld [vmem:[%s1168_s29 + $0x3c0] sm:$0xff]  ;;  %581 = vmatpush2.msra.mxu0 %v402_v10 }
  0x37   : > { %v527_v13 = vld [vmem:[%s1168_s29 + $0x7c8] sm:$0xff]  ;;  %v526_v15 = vld [vmem:[%s1168_s29 + $0x7c0] sm:$0xff]  ;;  %652 = vmatpush2.msra.mxu1 %v530_v11  ;;  %582 = vmatprep.subr.mxu0 %v399_v12  ;;  %v341_v12 = vld [vmem:[%s1168_s29 + $0x1f8] sm:$0xff] }
  0x38   : > { %v395_v16 = vld [vmem:[%s1168_s29 + $0x3a8] sm:$0xff]  ;;  %653 = vmatprep.subr.mxu1 %v527_v13  ;;  %v394_v18 = vld [vmem:[%s1168_s29 + $0x3a0] sm:$0xff]  ;;  %583 = vmatpush2.msra.mxu0 %v398_v14  ;;  %v469_v13 = vld [vmem:[%s1168_s29 + $0x5f8] sm:$0xff] }
  0x39   : > { %v523_v17 = vld [vmem:[%s1168_s29 + $0x7a8] sm:$0xff]  ;;  %v522_v19 = vld [vmem:[%s1168_s29 + $0x7a0] sm:$0xff]  ;;  %654 = vmatpush2.msra.mxu1 %v526_v15  ;;  %584 = vmatprep.subr.mxu0 %v395_v16  ;;  %v340_v14 = vld [vmem:[%s1168_s29 + $0x1f0] sm:$0xff] }
  0x3a   : > { %v391_v20 = vld [vmem:[%s1168_s29 + $0x388] sm:$0xff]  ;;  %655 = vmatprep.subr.mxu1 %v523_v17  ;;  %v390_v22 = vld [vmem:[%s1168_s29 + $0x380] sm:$0xff]  ;;  %585 = vmatpush2.msra.mxu0 %v394_v18  ;;  %v468_v15 = vld [vmem:[%s1168_s29 + $0x5f0] sm:$0xff] }
  0x3b   : > { %v519_v21 = vld [vmem:[%s1168_s29 + $0x788] sm:$0xff]  ;;  %v518_v23 = vld [vmem:[%s1168_s29 + $0x780] sm:$0xff]  ;;  %656 = vmatpush2.msra.mxu1 %v522_v19  ;;  %586 = vmatprep.subr.mxu0 %v391_v20  ;;  %v337_v16 = vld [vmem:[%s1168_s29 + $0x1d8] sm:$0xff] }
  0x3c   : > { %v387_v24 = vld [vmem:[%s1168_s29 + $0x368] sm:$0xff]  ;;  %657 = vmatprep.subr.mxu1 %v519_v21  ;;  %v386_v26 = vld [vmem:[%s1168_s29 + $0x360] sm:$0xff]  ;;  %587 = vmatpush2.msra.mxu0 %v390_v22  ;;  %v465_v17 = vld [vmem:[%s1168_s29 + $0x5d8] sm:$0xff] }
  0x3d   : > { %v515_v25 = vld [vmem:[%s1168_s29 + $0x768] sm:$0xff]  ;;  %v514_v27 = vld [vmem:[%s1168_s29 + $0x760] sm:$0xff]  ;;  %658 = vmatpush2.msra.mxu1 %v518_v23  ;;  %588 = vmatprep.subr.mxu0 %v387_v24  ;;  %v336_v18 = vld [vmem:[%s1168_s29 + $0x1d0] sm:$0xff] }
  0x3e   : > { %v383_v28 = vld [vmem:[%s1168_s29 + $0x348] sm:$0xff]  ;;  %659 = vmatprep.subr.mxu1 %v515_v25  ;;  %v382_v30 = vld [vmem:[%s1168_s29 + $0x340] sm:$0xff]  ;;  %589 = vmatpush2.msra.mxu0 %v386_v26  ;;  %v464_v19 = vld [vmem:[%s1168_s29 + $0x5d0] sm:$0xff] }
  0x3f   : > { %v511_v29 = vld [vmem:[%s1168_s29 + $0x748] sm:$0xff]  ;;  %v510_v31 = vld [vmem:[%s1168_s29 + $0x740] sm:$0xff]  ;;  %660 = vmatpush2.msra.mxu1 %v514_v27  ;;  %590 = vmatprep.subr.mxu0 %v383_v28  ;;  %v333_v20 = vld [vmem:[%s1168_s29 + $0x1b8] sm:$0xff] }
  0x40   : > { %v379_v32 = vld [vmem:[%s1168_s29 + $0x328] sm:$0xff]  ;;  %661 = vmatprep.subr.mxu1 %v511_v29  ;;  %v378_v34 = vld [vmem:[%s1168_s29 + $0x320] sm:$0xff]  ;;  %591 = vmatpush2.msra.mxu0 %v382_v30  ;;  %v461_v21 = vld [vmem:[%s1168_s29 + $0x5b8] sm:$0xff] }
  0x41   : > { %v507_v33 = vld [vmem:[%s1168_s29 + $0x728] sm:$0xff]  ;;  %v506_v35 = vld [vmem:[%s1168_s29 + $0x720] sm:$0xff]  ;;  %662 = vmatpush2.msra.mxu1 %v510_v31  ;;  %592 = vmatprep.subr.mxu0 %v379_v32  ;;  %v460_v22 = vld [vmem:[%s1168_s29 + $0x5b0] sm:$0xff] }
  0x42   : > { %v375_v36 = vld [vmem:[%s1168_s29 + $0x308] sm:$0xff]  ;;  %663 = vmatprep.subr.mxu1 %v507_v33  ;;  %v374_v38 = vld [vmem:[%s1168_s29 + $0x300] sm:$0xff]  ;;  %593 = vmatpush2.msra.mxu0 %v378_v34  ;;  %v329_v23 = vld [vmem:[%s1168_s29 + $0x198] sm:$0xff] }
  0x43   : > { %v503_v37 = vld [vmem:[%s1168_s29 + $0x708] sm:$0xff]  ;;  %v502_v39 = vld [vmem:[%s1168_s29 + $0x700] sm:$0xff]  ;;  %664 = vmatpush2.msra.mxu1 %v506_v35  ;;  %594 = vmatprep.subr.mxu0 %v375_v36  ;;  %v328_v24 = vld [vmem:[%s1168_s29 + $0x190] sm:$0xff] }
  0x44   : > { %v371_v40 = vld [vmem:[%s1168_s29 + $0x2e8] sm:$0xff]  ;;  %665 = vmatprep.subr.mxu1 %v503_v37  ;;  %v370_v42 = vld [vmem:[%s1168_s29 + $0x2e0] sm:$0xff]  ;;  %595 = vmatpush2.msra.mxu0 %v374_v38  ;;  %v456_v25 = vld [vmem:[%s1168_s29 + $0x590] sm:$0xff] }
  0x45   : > { %v499_v41 = vld [vmem:[%s1168_s29 + $0x6e8] sm:$0xff]  ;;  %v498_v43 = vld [vmem:[%s1168_s29 + $0x6e0] sm:$0xff]  ;;  %666 = vmatpush2.msra.mxu1 %v502_v39  ;;  %596 = vmatprep.subr.mxu0 %v371_v40  ;;  %v325_v26 = vld [vmem:[%s1168_s29 + $0x178] sm:$0xff] }
  0x46   : > { %v367_v44 = vld [vmem:[%s1168_s29 + $0x2c8] sm:$0xff]  ;;  %667 = vmatprep.subr.mxu1 %v499_v41  ;;  %v366_v46 = vld [vmem:[%s1168_s29 + $0x2c0] sm:$0xff]  ;;  %597 = vmatpush2.msra.mxu0 %v370_v42  ;;  %v453_v27 = vld [vmem:[%s1168_s29 + $0x578] sm:$0xff] }
  0x47   : > { %v495_v45 = vld [vmem:[%s1168_s29 + $0x6c8] sm:$0xff]  ;;  %v494_v47 = vld [vmem:[%s1168_s29 + $0x6c0] sm:$0xff]  ;;  %668 = vmatpush2.msra.mxu1 %v498_v43  ;;  %598 = vmatprep.subr.mxu0 %v367_v44  ;;  %v324_v28 = vld [vmem:[%s1168_s29 + $0x170] sm:$0xff] }
  0x48   : > { %v363_v48 = vld [vmem:[%s1168_s29 + $0x2a8] sm:$0xff]  ;;  %669 = vmatprep.subr.mxu1 %v495_v45  ;;  %v362_v50 = vld [vmem:[%s1168_s29 + $0x2a0] sm:$0xff]  ;;  %599 = vmatpush2.msra.mxu0 %v366_v46  ;;  %v452_v29 = vld [vmem:[%s1168_s29 + $0x570] sm:$0xff] }
  0x49   : > { %v491_v49 = vld [vmem:[%s1168_s29 + $0x6a8] sm:$0xff]  ;;  %v490_v51 = vld [vmem:[%s1168_s29 + $0x6a0] sm:$0xff]  ;;  %670 = vmatpush2.msra.mxu1 %v494_v47  ;;  %600 = vmatprep.subr.mxu0 %v363_v48  ;;  %v321_v30 = vld [vmem:[%s1168_s29 + $0x158] sm:$0xff] }
  0x4a   : > { %v359_v52 = vld [vmem:[%s1168_s29 + $0x288] sm:$0xff]  ;;  %671 = vmatprep.subr.mxu1 %v491_v49  ;;  %v358_v54 = vld [vmem:[%s1168_s29 + $0x280] sm:$0xff]  ;;  %601 = vmatpush2.msra.mxu0 %v362_v50  ;;  %v449_v31 = vld [vmem:[%s1168_s29 + $0x558] sm:$0xff] }
  0x4b   : > { %v487_v53 = vld [vmem:[%s1168_s29 + $0x688] sm:$0xff]  ;;  %v486_v55 = vld [vmem:[%s1168_s29 + $0x680] sm:$0xff]  ;;  %672 = vmatpush2.msra.mxu1 %v490_v51  ;;  %602 = vmatprep.subr.mxu0 %v359_v52  ;;  %v320_v32 = vld [vmem:[%s1168_s29 + $0x150] sm:$0xff] }
  0x4c   : > { %v355_v56 = vld [vmem:[%s1168_s29 + $0x268] sm:$0xff]  ;;  %673 = vmatprep.subr.mxu1 %v487_v53  ;;  %v354_v58 = vld [vmem:[%s1168_s29 + $0x260] sm:$0xff]  ;;  %603 = vmatpush2.msra.mxu0 %v358_v54  ;;  %v448_v33 = vld [vmem:[%s1168_s29 + $0x550] sm:$0xff] }
  0x4d   : > { %v483_v57 = vld [vmem:[%s1168_s29 + $0x668] sm:$0xff]  ;;  %v482_v59 = vld [vmem:[%s1168_s29 + $0x660] sm:$0xff]  ;;  %674 = vmatpush2.msra.mxu1 %v486_v55  ;;  %604 = vmatprep.subr.mxu0 %v355_v56  ;;  %v317_v34 = vld [vmem:[%s1168_s29 + $0x138] sm:$0xff] }
  0x4e   : > { %v351_v60 = vld [vmem:[%s1168_s29 + $0x248] sm:$0xff]  ;;  %675 = vmatprep.subr.mxu1 %v483_v57  ;;  %v350_v62 = vld [vmem:[%s1168_s29 + $0x240] sm:$0xff]  ;;  %605 = vmatpush2.msra.mxu0 %v354_v58  ;;  %v445_v35 = vld [vmem:[%s1168_s29 + $0x538] sm:$0xff] }
  0x4f   : > { %v479_v61 = vld [vmem:[%s1168_s29 + $0x648] sm:$0xff]  ;;  %v478_v63 = vld [vmem:[%s1168_s29 + $0x640] sm:$0xff]  ;;  %676 = vmatpush2.msra.mxu1 %v482_v59  ;;  %606 = vmatprep.subr.mxu0 %v351_v60  ;;  %v316_v36 = vld [vmem:[%s1168_s29 + $0x130] sm:$0xff] }
  0x50   : > { %v347_v4 = vld [vmem:[%s1168_s29 + $0x228] sm:$0xff]  ;;  %677 = vmatprep.subr.mxu1 %v479_v61  ;;  %v346_v6 = vld [vmem:[%s1168_s29 + $0x220] sm:$0xff]  ;;  %607 = vmatpush2.msra.mxu0 %v350_v62  ;;  %v444_v37 = vld [vmem:[%s1168_s29 + $0x530] sm:$0xff] }
  0x51   : > { %v475_v5 = vld [vmem:[%s1168_s29 + $0x628] sm:$0xff]  ;;  %v474_v7 = vld [vmem:[%s1168_s29 + $0x620] sm:$0xff]  ;;  %678 = vmatpush2.msra.mxu1 %v478_v63  ;;  %608 = vmatprep.subr.mxu0 %v347_v4  ;;  %v313_v38 = vld [vmem:[%s1168_s29 + $0x118] sm:$0xff] }
  0x52   : > { %v343_v8 = vld [vmem:[%s1168_s29 + $0x208] sm:$0xff]  ;;  %679 = vmatprep.subr.mxu1 %v475_v5  ;;  %v342_v10 = vld [vmem:[%s1168_s29 + $0x200] sm:$0xff]  ;;  %609 = vmatpush2.msra.mxu0 %v346_v6  ;;  %v441_v39 = vld [vmem:[%s1168_s29 + $0x518] sm:$0xff] }
  0x53   : > { %v471_v9 = vld [vmem:[%s1168_s29 + $0x608] sm:$0xff]  ;;  %v470_v11 = vld [vmem:[%s1168_s29 + $0x600] sm:$0xff]  ;;  %680 = vmatpush2.msra.mxu1 %v474_v7  ;;  %610 = vmatprep.subr.mxu0 %v343_v8  ;;  %v312_v40 = vld [vmem:[%s1168_s29 + $0x110] sm:$0xff] }
  0x54   : > { %681 = vmatprep.subr.mxu1 %v471_v9  ;;  %611 = vmatpush2.msra.mxu0 %v342_v10  ;;  %v440_v41 = vld [vmem:[%s1168_s29 + $0x510] sm:$0xff]  ;;  %v309_v42 = vld [vmem:[%s1168_s29 + $0xf8] sm:$0xff] }
  0x55   : > { %682 = vmatpush2.msra.mxu1 %v470_v11  ;;  %613 = vmatmul.mubr.f32.vlgmr.msra.gmra.mxu0 %v1152_v0  ;;  %v332_v0 = vld [vmem:[%s1168_s29 + $0x1b0] sm:$0xff]  ;;  %v437_v43 = vld [vmem:[%s1168_s29 + $0x4f8] sm:$0xff] }
  0x56   : > { %690 = vmatprep.subr.mxu0 %v341_v12  ;;  %761 = vmatprep.subr.mxu1 %v469_v13  ;;  %v308_v44 = vld [vmem:[%s1168_s29 + $0xf0] sm:$0xff]  ;;  %v305_v46 = vld [vmem:[%s1168_s29 + $0xd8] sm:$0xff] }
  0x57   : > { %684 = vmatmul.mubr.f32.vlgmr.msra.gmra.mxu1 %v1155_v1  ;;  %691 = vmatpush1.msra.mxu0 %v340_v14  ;;  %v457_v1 = vld [vmem:[%s1168_s29 + $0x598] sm:$0xff]  ;;  %v436_v45 = vld [vmem:[%s1168_s29 + $0x4f0] sm:$0xff] }
  0x58   : > { %762 = vmatpush1.msra.mxu1 %v468_v15  ;;  %692 = vmatprep.subr.mxu0 %v337_v16  ;;  %v433_v47 = vld [vmem:[%s1168_s29 + $0x4d8] sm:$0xff]  ;;  %v304_v48 = vld [vmem:[%s1168_s29 + $0xd0] sm:$0xff] }
  0x59   : > { %763 = vmatprep.subr.mxu1 %v465_v17  ;;  %693 = vmatpush1.msra.mxu0 %v336_v18  ;;  %v432_v49 = vld [vmem:[%s1168_s29 + $0x4d0] sm:$0xff]  ;;  %v301_v50 = vld [vmem:[%s1168_s29 + $0xb8] sm:$0xff] }
  0x5a   : > { %764 = vmatpush1.msra.mxu1 %v464_v19  ;;  %694 = vmatprep.subr.mxu0 %v333_v20  ;;  %v429_v51 = vld [vmem:[%s1168_s29 + $0x4b8] sm:$0xff]  ;;  %v300_v52 = vld [vmem:[%s1168_s29 + $0xb0] sm:$0xff] }
  0x5b   : > { %765 = vmatprep.subr.mxu1 %v461_v21  ;;  %695 = vmatpush1.msra.mxu0 %v332_v0  ;;  %v428_v53 = vld [vmem:[%s1168_s29 + $0x4b0] sm:$0xff]  ;;  %v297_v54 = vld [vmem:[%s1168_s29 + $0x98] sm:$0xff] }
  0x5c   : > { %766 = vmatpush1.msra.mxu1 %v460_v22  ;;  %696 = vmatprep.subr.mxu0 %v329_v23  ;;  %v425_v55 = vld [vmem:[%s1168_s29 + $0x498] sm:$0xff]  ;;  %v296_v56 = vld [vmem:[%s1168_s29 + $0x90] sm:$0xff] }
  0x5d   : > { %767 = vmatprep.subr.mxu1 %v457_v1  ;;  %697 = vmatpush1.msra.mxu0 %v328_v24  ;;  %v424_v57 = vld [vmem:[%s1168_s29 + $0x490] sm:$0xff]  ;;  %v293_v58 = vld [vmem:[%s1168_s29 + $0x78] sm:$0xff] }
  0x5e   : > { %768 = vmatpush1.msra.mxu1 %v456_v25  ;;  %698 = vmatprep.subr.mxu0 %v325_v26  ;;  %v421_v59 = vld [vmem:[%s1168_s29 + $0x478] sm:$0xff]  ;;  %v292_v60 = vld [vmem:[%s1168_s29 + $0x70] sm:$0xff] }
  0x5f   : > { %769 = vmatprep.subr.mxu1 %v453_v27  ;;  %699 = vmatpush1.msra.mxu0 %v324_v28  ;;  %v420_v61 = vld [vmem:[%s1168_s29 + $0x470] sm:$0xff]  ;;  %v289_v62 = vld [vmem:[%s1168_s29 + $0x58] sm:$0xff] }
  0x60   : > { %770 = vmatpush1.msra.mxu1 %v452_v29  ;;  %700 = vmatprep.subr.mxu0 %v321_v30  ;;  %v417_v63 = vld [vmem:[%s1168_s29 + $0x458] sm:$0xff]  ;;  %v288_v4 = vld [vmem:[%s1168_s29 + $0x50] sm:$0xff] }
  0x61   : > { %771 = vmatprep.subr.mxu1 %v449_v31  ;;  %701 = vmatpush1.msra.mxu0 %v320_v32  ;;  %v416_v5 = vld [vmem:[%s1168_s29 + $0x450] sm:$0xff]  ;;  %v285_v6 = vld [vmem:[%s1168_s29 + $0x38] sm:$0xff] }
  0x62   : > { %772 = vmatpush1.msra.mxu1 %v448_v33  ;;  %702 = vmatprep.subr.mxu0 %v317_v34  ;;  %v413_v7 = vld [vmem:[%s1168_s29 + $0x438] sm:$0xff]  ;;  %v284_v8 = vld [vmem:[%s1168_s29 + $0x30] sm:$0xff] }
  0x63   : > { %773 = vmatprep.subr.mxu1 %v445_v35  ;;  %703 = vmatpush1.msra.mxu0 %v316_v36  ;;  %v412_v9 = vld [vmem:[%s1168_s29 + $0x430] sm:$0xff]  ;;  %v281_v10 = vld [vmem:[%s1168_s29 + $0x18] sm:$0xff] }
  0x64   : > { %774 = vmatpush1.msra.mxu1 %v444_v37  ;;  %704 = vmatprep.subr.mxu0 %v313_v38  ;;  %v409_v11 = vld [vmem:[%s1168_s29 + $0x418] sm:$0xff]  ;;  %v280_v12 = vld [vmem:[%s1168_s29 + $0x10] sm:$0xff] }
  0x65   : > { %775 = vmatprep.subr.mxu1 %v441_v39  ;;  %705 = vmatpush1.msra.mxu0 %v312_v40  ;;  %v408_v13 = vld [vmem:[%s1168_s29 + $0x410] sm:$0xff]  ;;  %v405_v14 = vld [vmem:[%s1168_s29 + $0x3f8] sm:$0xff] }
  0x66   : > { %776 = vmatpush1.msra.mxu1 %v440_v41  ;;  %706 = vmatprep.subr.mxu0 %v309_v42  ;;  %v533_v15 = vld [vmem:[%s1168_s29 + $0x7f8] sm:$0xff]  ;;  %v404_v16 = vld [vmem:[%s1168_s29 + $0x3f0] sm:$0xff] }
  0x67   : > { %777 = vmatprep.subr.mxu1 %v437_v43  ;;  %707 = vmatpush1.msra.mxu0 %v308_v44  ;;  %v532_v17 = vld [vmem:[%s1168_s29 + $0x7f0] sm:$0xff]  ;;  %v401_v18 = vld [vmem:[%s1168_s29 + $0x3d8] sm:$0xff] }
  0x68   : > { %778 = vmatpush1.msra.mxu1 %v436_v45  ;;  %708 = vmatprep.subr.mxu0 %v305_v46  ;;  %v529_v19 = vld [vmem:[%s1168_s29 + $0x7d8] sm:$0xff]  ;;  %v400_v20 = vld [vmem:[%s1168_s29 + $0x3d0] sm:$0xff] }
  0x69   : > { %779 = vmatprep.subr.mxu1 %v433_v47  ;;  %709 = vmatpush1.msra.mxu0 %v304_v48  ;;  %v528_v21 = vld [vmem:[%s1168_s29 + $0x7d0] sm:$0xff]  ;;  %v397_v0 = vld [vmem:[%s1168_s29 + $0x3b8] sm:$0xff] }
  0x6a   : > { %780 = vmatpush1.msra.mxu1 %v432_v49  ;;  %710 = vmatprep.subr.mxu0 %v301_v50  ;;  %v525_v22 = vld [vmem:[%s1168_s29 + $0x7b8] sm:$0xff]  ;;  %v396_v23 = vld [vmem:[%s1168_s29 + $0x3b0] sm:$0xff] }
  0x6b   : > { %781 = vmatprep.subr.mxu1 %v429_v51  ;;  %711 = vmatpush1.msra.mxu0 %v300_v52  ;;  %v524_v1 = vld [vmem:[%s1168_s29 + $0x7b0] sm:$0xff]  ;;  %v393_v24 = vld [vmem:[%s1168_s29 + $0x398] sm:$0xff] }
  0x6c   : > { %782 = vmatpush1.msra.mxu1 %v428_v53  ;;  %712 = vmatprep.subr.mxu0 %v297_v54  ;;  %v521_v25 = vld [vmem:[%s1168_s29 + $0x798] sm:$0xff]  ;;  %v392_v26 = vld [vmem:[%s1168_s29 + $0x390] sm:$0xff] }
  0x6d   : > { %783 = vmatprep.subr.mxu1 %v425_v55  ;;  %713 = vmatpush1.msra.mxu0 %v296_v56  ;;  %v520_v27 = vld [vmem:[%s1168_s29 + $0x790] sm:$0xff]  ;;  %v389_v28 = vld [vmem:[%s1168_s29 + $0x378] sm:$0xff] }
  0x6e   : > { %784 = vmatpush1.msra.mxu1 %v424_v57  ;;  %714 = vmatprep.subr.mxu0 %v293_v58  ;;  %v517_v29 = vld [vmem:[%s1168_s29 + $0x778] sm:$0xff]  ;;  %v388_v30 = vld [vmem:[%s1168_s29 + $0x370] sm:$0xff] }
  0x6f   : > { %785 = vmatprep.subr.mxu1 %v421_v59  ;;  %715 = vmatpush1.msra.mxu0 %v292_v60  ;;  %v516_v31 = vld [vmem:[%s1168_s29 + $0x770] sm:$0xff]  ;;  %v385_v32 = vld [vmem:[%s1168_s29 + $0x358] sm:$0xff] }
  0x70   : > { %786 = vmatpush1.msra.mxu1 %v420_v61  ;;  %716 = vmatprep.subr.mxu0 %v289_v62  ;;  %v513_v33 = vld [vmem:[%s1168_s29 + $0x758] sm:$0xff]  ;;  %v384_v34 = vld [vmem:[%s1168_s29 + $0x350] sm:$0xff] }
  0x71   : > { %787 = vmatprep.subr.mxu1 %v417_v63  ;;  %717 = vmatpush1.msra.mxu0 %v288_v4  ;;  %v512_v35 = vld [vmem:[%s1168_s29 + $0x750] sm:$0xff]  ;;  %v381_v36 = vld [vmem:[%s1168_s29 + $0x338] sm:$0xff] }
  0x72   : > { %788 = vmatpush1.msra.mxu1 %v416_v5  ;;  %718 = vmatprep.subr.mxu0 %v285_v6  ;;  %v509_v37 = vld [vmem:[%s1168_s29 + $0x738] sm:$0xff]  ;;  %v380_v38 = vld [vmem:[%s1168_s29 + $0x330] sm:$0xff] }
  0x73   : > { %789 = vmatprep.subr.mxu1 %v413_v7  ;;  %719 = vmatpush1.msra.mxu0 %v284_v8  ;;  %v508_v39 = vld [vmem:[%s1168_s29 + $0x730] sm:$0xff]  ;;  %v377_v40 = vld [vmem:[%s1168_s29 + $0x318] sm:$0xff] }
  0x74   : > { %790 = vmatpush1.msra.mxu1 %v412_v9  ;;  %720 = vmatprep.subr.mxu0 %v281_v10  ;;  %v505_v41 = vld [vmem:[%s1168_s29 + $0x718] sm:$0xff]  ;;  %v376_v42 = vld [vmem:[%s1168_s29 + $0x310] sm:$0xff] }
  0x75   : > { %791 = vmatprep.subr.mxu1 %v409_v11  ;;  %721 = vmatpush1.msra.mxu0 %v280_v12  ;;  %v504_v43 = vld [vmem:[%s1168_s29 + $0x710] sm:$0xff]  ;;  %v373_v44 = vld [vmem:[%s1168_s29 + $0x2f8] sm:$0xff] }
  0x76   : > { %792 = vmatpush1.msra.mxu1 %v408_v13  ;;  %722 = vmatprep.subr.mxu0 %v405_v14  ;;  %v501_v45 = vld [vmem:[%s1168_s29 + $0x6f8] sm:$0xff]  ;;  %v372_v46 = vld [vmem:[%s1168_s29 + $0x2f0] sm:$0xff] }
  0x77   : > { %793 = vmatprep.subr.mxu1 %v533_v15  ;;  %723 = vmatpush2.msra.mxu0 %v404_v16  ;;  %v500_v47 = vld [vmem:[%s1168_s29 + $0x6f0] sm:$0xff]  ;;  %v369_v48 = vld [vmem:[%s1168_s29 + $0x2d8] sm:$0xff]  ;;  %v536_v16 = vld [vmem:[%s263_s6] sm:$0xf] }
  0x78   : > { %794 = vmatpush2.msra.mxu1 %v532_v17  ;;  %724 = vmatprep.subr.mxu0 %v401_v18  ;;  %v497_v49 = vld [vmem:[%s1168_s29 + $0x6d8] sm:$0xff]  ;;  %v368_v50 = vld [vmem:[%s1168_s29 + $0x2d0] sm:$0xff]  ;;  %v1046_v17 = vld [vmem:[%s1149_s24] sm:$0xff] }
  0x79   : > { %795 = vmatprep.subr.mxu1 %v529_v19  ;;  %725 = vmatpush2.msra.mxu0 %v400_v20  ;;  %v496_v51 = vld [vmem:[%s1168_s29 + $0x6d0] sm:$0xff]  ;;  %v365_v52 = vld [vmem:[%s1168_s29 + $0x2b8] sm:$0xff]  ;;  %v1047_v18 = vld [vmem:[%s1149_s24 + $0x8] sm:$0xff]  ;;  %v1088_v19 = vmov 0  }
  0x7a   : > { %796 = vmatpush2.msra.mxu1 %v528_v21  ;;  %726 = vmatprep.subr.mxu0 %v397_v0  ;;  %v493_v53 = vld [vmem:[%s1168_s29 + $0x6b8] sm:$0xff]  ;;  %v364_v54 = vld [vmem:[%s1168_s29 + $0x2b0] sm:$0xff] }
  0x7b   : > { %797 = vmatprep.subr.mxu1 %v525_v22  ;;  %727 = vmatpush2.msra.mxu0 %v396_v23  ;;  %v492_v55 = vld [vmem:[%s1168_s29 + $0x6b0] sm:$0xff]  ;;  %v361_v56 = vld [vmem:[%s1168_s29 + $0x298] sm:$0xff] }
  0x7c   : > { %798 = vmatpush2.msra.mxu1 %v524_v1  ;;  %728 = vmatprep.subr.mxu0 %v393_v24  ;;  %v489_v57 = vld [vmem:[%s1168_s29 + $0x698] sm:$0xff]  ;;  %v360_v58 = vld [vmem:[%s1168_s29 + $0x290] sm:$0xff] }
  0x7d   : > { %799 = vmatprep.subr.mxu1 %v521_v25  ;;  %729 = vmatpush2.msra.mxu0 %v392_v26  ;;  %v488_v59 = vld [vmem:[%s1168_s29 + $0x690] sm:$0xff]  ;;  %v357_v60 = vld [vmem:[%s1168_s29 + $0x278] sm:$0xff] }
  0x7e   : > { %800 = vmatpush2.msra.mxu1 %v520_v27  ;;  %730 = vmatprep.subr.mxu0 %v389_v28  ;;  %v485_v61 = vld [vmem:[%s1168_s29 + $0x678] sm:$0xff]  ;;  %v356_v62 = vld [vmem:[%s1168_s29 + $0x270] sm:$0xff] }
  0x7f   : > { %801 = vmatprep.subr.mxu1 %v517_v29  ;;  %731 = vmatpush2.msra.mxu0 %v388_v30  ;;  %v484_v63 = vld [vmem:[%s1168_s29 + $0x670] sm:$0xff]  ;;  %v353_v4 = vld [vmem:[%s1168_s29 + $0x258] sm:$0xff] }
  0x80   : > { %802 = vmatpush2.msra.mxu1 %v516_v31  ;;  %732 = vmatprep.subr.mxu0 %v385_v32  ;;  %v481_v5 = vld [vmem:[%s1168_s29 + $0x658] sm:$0xff]  ;;  %v352_v6 = vld [vmem:[%s1168_s29 + $0x250] sm:$0xff] }
  0x81   : > { %803 = vmatprep.subr.mxu1 %v513_v33  ;;  %733 = vmatpush2.msra.mxu0 %v384_v34  ;;  %v480_v7 = vld [vmem:[%s1168_s29 + $0x650] sm:$0xff]  ;;  %v349_v8 = vld [vmem:[%s1168_s29 + $0x238] sm:$0xff] }
  0x82   : > { %804 = vmatpush2.msra.mxu1 %v512_v35  ;;  %734 = vmatprep.subr.mxu0 %v381_v36  ;;  %v477_v9 = vld [vmem:[%s1168_s29 + $0x638] sm:$0xff]  ;;  %v348_v10 = vld [vmem:[%s1168_s29 + $0x230] sm:$0xff] }
  0x83   : > { %805 = vmatprep.subr.mxu1 %v509_v37  ;;  %735 = vmatpush2.msra.mxu0 %v380_v38  ;;  %v476_v11 = vld [vmem:[%s1168_s29 + $0x630] sm:$0xff]  ;;  %v345_v12 = vld [vmem:[%s1168_s29 + $0x218] sm:$0xff] }
  0x84   : > { %806 = vmatpush2.msra.mxu1 %v508_v39  ;;  %736 = vmatprep.subr.mxu0 %v377_v40  ;;  %v473_v13 = vld [vmem:[%s1168_s29 + $0x618] sm:$0xff]  ;;  %v344_v14 = vld [vmem:[%s1168_s29 + $0x210] sm:$0xff] }
  0x85   : > { %807 = vmatprep.subr.mxu1 %v505_v41  ;;  %737 = vmatpush2.msra.mxu0 %v376_v42  ;;  %v472_v15 = vld [vmem:[%s1168_s29 + $0x610] sm:$0xff] }
  0x86   : > { %808 = vmatpush2.msra.mxu1 %v504_v43  ;;  %738 = vmatprep.subr.mxu0 %v373_v44 }
  0x87   : > { %809 = vmatprep.subr.mxu1 %v501_v45  ;;  %739 = vmatpush2.msra.mxu0 %v372_v46 }
  0x88   : > { %810 = vmatpush2.msra.mxu1 %v500_v47  ;;  %740 = vmatprep.subr.mxu0 %v369_v48 }
  0x89   : > { %811 = vmatprep.subr.mxu1 %v497_v49  ;;  %741 = vmatpush2.msra.mxu0 %v368_v50 }
  0x8a   : > { %812 = vmatpush2.msra.mxu1 %v496_v51  ;;  %742 = vmatprep.subr.mxu0 %v365_v52 }
  0x8b   : > { %813 = vmatprep.subr.mxu1 %v493_v53  ;;  %743 = vmatpush2.msra.mxu0 %v364_v54 }
  0x8c   : > { %814 = vmatpush2.msra.mxu1 %v492_v55  ;;  %744 = vmatprep.subr.mxu0 %v361_v56 }
  0x8d   : > { %815 = vmatprep.subr.mxu1 %v489_v57  ;;  %745 = vmatpush2.msra.mxu0 %v360_v58 }
  0x8e   : > { %816 = vmatpush2.msra.mxu1 %v488_v59  ;;  %746 = vmatprep.subr.mxu0 %v357_v60 }
  0x8f   : > { %817 = vmatprep.subr.mxu1 %v485_v61  ;;  %747 = vmatpush2.msra.mxu0 %v356_v62 }
  0x90   : > { %818 = vmatpush2.msra.mxu1 %v484_v63  ;;  %748 = vmatprep.subr.mxu0 %v353_v4 }
  0x91   : > { %819 = vmatprep.subr.mxu1 %v481_v5  ;;  %749 = vmatpush2.msra.mxu0 %v352_v6 }
  0x92   : > { %820 = vmatpush2.msra.mxu1 %v480_v7  ;;  %750 = vmatprep.subr.mxu0 %v349_v8 }
  0x93   : > { %821 = vmatprep.subr.mxu1 %v477_v9  ;;  %751 = vmatpush2.msra.mxu0 %v348_v10 }
  0x94   : > { %822 = vmatpush2.msra.mxu1 %v476_v11  ;;  %752 = vmatprep.subr.mxu0 %v345_v12 }
  0x95   : > { %823 = vmatprep.subr.mxu1 %v473_v13  ;;  %753 = vmatpush2.msra.mxu0 %v344_v14 }
  0x96   : > { %754 = vmatprep.mubr.f32.mxu0 %v1159_v2  ;;  %824 = vmatpush2.msra.mxu1 %v472_v15 }
  0x97   : > { %825 = vmatprep.mubr.f32.mxu1 %v1163_v3  ;;  %755 = vmatmul.mubr.f32.vlgmr.msra.gmra.mxu0 %v1046_v17 }
  0x98   : > { %826 = vmatmul.mubr.f32.vlgmr.msra.gmra.mxu1 %v1047_v18  ;;  %1043 = vset.pattern.permute.xlu0 %v1088_v19 }
  0x99   : > { %539 = vperm.xlu0 %1043, %v536_v16  }
 0x114   : > { %v540_v20 = vpop.permute.xlu0 %539 }
 0x115   : > { %v614_v21 = vpop.f32.mrf.mxu0 }
 0x116   : > { %v615_v0 = vadd.f32 %v614_v21, %v540_v20 }
 0x117   : > { %v685_v22 = vpop.f32.mrf.mxu1  ;;  %v616_v23 = vpop.f32.mrf.mxu0 }
 0x118   : > { %v686_v2 = vadd.f32 %v685_v22, %v615_v0  ;;  %v617_v1 = vadd.f32 %v616_v23, %v540_v20 }
 0x119   : > { %v687_v24 = vpop.f32.mrf.mxu1 }
 0x11a   : > { %v832_v3 = vmax.f32 %v686_v2, 0.0  ;;  %v688_v25 = vadd.f32 %v687_v24, %v617_v1 }
 0x11c   : > { %v833_v26 = vmax.f32 %v688_v25, 0.0 }
 0x11e   : > { %v840_v27 = vcombine.low %v832_v3, %v833_v26 }
 0x120   : > { %844 = vst [vmem:[%s276_s20] sm:$0xff] %v840_v27 }
 0x157   : > { %v756_v28 = vpop.f32.mrf.mxu0 }
 0x158   : > { %v827_v29 = vpop.f32.mrf.mxu1  ;;  %v757_v30 = vadd.f32 %v756_v28, %v540_v20 }
 0x159   : > { %v758_v31 = vpop.f32.mrf.mxu0 }
 0x15a   : > { %v828_v32 = vadd.f32 %v827_v29, %v757_v30  ;;  %v759_v33 = vadd.f32 %v758_v31, %v540_v20  ;;  %v829_v34 = vpop.f32.mrf.mxu1 }
 0x15c   : > { %v830_v35 = vadd.f32 %v829_v34, %v759_v33  ;;  %v834_v36 = vmax.f32 %v828_v32, 0.0 }
 0x15e   : > { %v835_v37 = vmax.f32 %v830_v35, 0.0 }
 0x160   : > { %v841_v38 = vcombine.low %v834_v36, %v835_v37 }
 0x162   : > { %845 = vst [vmem:[%s276_s20 + $0x8] sm:$0xff] %v841_v38 }
 0x163 PF: > { %s13_s16 = sadd.s32 1, %s1086_s16   ;;  %s1462_s12 = smov %s1078_s14 }
 0x164   : > { %p10_p7 = scmp.ge.s32.totalorder %s13_s16, 8   ;;  %s1463_s13 = smov %s1082_s15 }
 0x165   : > { %s1464_s14 = smov %s1467_s17  ;;  %s1465_s15 = smov %s1471_s18 }
 0x166   :  { %12 = sbr.rel (!%p10_p7) target bundleno = 3 (0x3), region = 68 }

// kernel: rmasknet_forward.16
= control target key start
LH: loop header
LB: loop body
LE: loop exit
PB: predicated region body
PF: predicated region fallthrough
CT: control target
= control target key end

     0   :  { %s2838_s12 = smov 0   ;;  %s2840_s13 = smov 0   ;;  %s4591_s0 = inlined_call_operand.vmem [shape: f32[3,2,256,4096], index: 0, kind: input, shape index: {}]   ;;  %s4592_s1 = inlined_call_operand.vmem [shape: f32[3,2,256], index: 1, kind: input, shape index: {}]   ;;  %s4593_s2 = inlined_call_operand.vmem [shape: f32[3,2,1], index: 2, kind: input, shape index: {}]   ;;  %s4594_s3 = inlined_call_operand.vmem [shape: f32[3,2,2,4096], index: 3, kind: output, shape index: {}]  }
   0x1   :  { %s2842_s14 = smov 0   ;;  %s2844_s15 = smov 0  }
   0x2   :  { %s2846_s16 = smov 0   ;;  %s2848_s17 = smov 0  }
   0x3   :  { %s2850_s18 = smov 0   ;;  %s2852_s19 = smov 0  }
   0x4   :  { %s2854_s20 = smov 0  }
   0x5 LB: > { %s25_s21 = sadd.s32 1, %s2802_s17  ;;  %s28_s22 = sadd.s32 1, %s2806_s18  ;;  %s2814_s20 = sphi %s2854_s20, %s13_s20   ;;  %s2810_s19 = sphi %s2852_s19, %s4604_s19   ;;  %s2806_s18 = sphi %s2850_s18, %s4603_s18   ;;  %s2802_s17 = sphi %s2848_s17, %s4602_s17   ;;  %s2798_s16 = sphi %s2846_s16, %s4601_s16   ;;  %s2794_s15 = sphi %s2844_s15, %s4600_s15   ;;  %s2790_s14 = sphi %s2842_s14, %s4599_s14   ;;  %s2786_s13 = sphi %s2840_s13, %s4598_s13   ;;  %s2782_s12 = sphi %s2838_s12, %s4597_s12  }
   0x6   : > { %p26_p0 = scmp.ge.s32.totalorder %s25_s21, 2  ;;  %p50_p1 = scmp.ne.s32.totalorder %s2786_s13, %s2782_s12 }
   0x7   : > { %p51_p2 = scmp.eq.s32.totalorder %s2814_s20, 0  ;;  %s32_s23 = sadd.s32 1, %s2810_s19 }
   0x8   : > { %s4606_s22 = smov (!%p26_p0, %s28_s22), %s2806_s18  ;;  %s4612_s21 = smov (%p26_p0, %s25_s21), 0 }
   0x9   : > { %p30_p3 = scmp.ge.s32.totalorder %s4606_s22, 2  ;;  %p2890_p4 = por %p51_p2, %p50_p1 }
   0xa   : > { %s39_s26 = ssub.s32 %s2802_s17, %s4612_s21  ;;  %s43_s30 = sadd.s32 1, %s2786_s13 }
   0xb   : > { %s4608_s22 = smov (%p30_p3, %s4606_s22), 0  ;;  %s4610_s23 = smov (!%p30_p3, %s32_s23), %s2810_s19 }
   0xc   : > { %p34_p5 = scmp.ge.s32.totalorder %s4610_s23, 3  ;;  %s37_s25 = ssub.s32 %s2806_s18, %s4608_s22 }
   0xd   : > { %p2649_p7 = scmp.ge.s32.totalorder %s2814_s20, 12 }
   0xe   : > { %s4614_s23 = smov (%p34_p5, %s4610_s23), 0 }
   0xf   : > { %s36_s27 = ssub.s32 %s2810_s19, %s4614_s23 }
  0x10   : > { %s38_s28 = sor.u32 %s37_s25, %s36_s27  ;;  %158 = sbr.rel (%p2649_p7) target bundleno = 285 (0x11d), region = 16 }
  0x11   : > { %s40_s29 = sor.u32 %s39_s26, %s38_s28 }
  0x12   : > { %p41_p6 = scmp.eq.s32.totalorder %s40_s29, 0 }
  0x14   : > { %s2909_s4 = scalar_select %p41_p6, %s2786_s13, %s43_s30  }
  0x15   : > { %161 = sbr.rel (!%p2890_p4) target bundleno = 285 (0x11d), region = 20  ;;  %s163_s5 = sand.u32 (%p2890_p4), 1, %s2786_s13  }
  0x16   : > { %s2651_s6 = sshll.u32 (%p2890_p4), %s2802_s17, 4  ;;  %s2652_s7 = sshll.u32 (%p2890_p4), %s2806_s18, 10 }
  0x17   : > { %s2650_s8 = sshll.u32 (%p2890_p4), %s163_s5, 12  ;;  %s168_s9 = sadd.s32 (%p2890_p4), %s2652_s7, %s2651_s6 }
  0x18   : > { %s2653_s10 = sshll.u32 (%p2890_p4), %s2810_s19, 11  ;;  %s2926_s24 = scalar_lea.vmem (%p2890_p4), [#allocation2], %s2650_s8 }
  0x19   : > { %s170_s11 = sadd.s32 (%p2890_p4), %s2653_s10, %s168_s9 }
  0x1a   : > { %s2654_s25 = sshll.u32 %s170_s11, 3 }
  0x1b   : > { %s2921_s28 = scalar_lea.vmem %s4591_s0, %s2654_s25 }
  0x1c   : > { %v185_v0 = vld [vmem:[%s2921_s28] sm:$0xff]  ;;  %v187_v1 = vld [vmem:[%s2921_s28 + $0x8] sm:$0xff]  ;;  %v189_v2 = vld [vmem:[%s2921_s28 + $0x10] sm:$0xff] }
  0x1d   : > { %186 = vst [vmem:[%s2926_s24] sm:$0xff] %v185_v0  ;;  %188 = vst [vmem:[%s2926_s24 + $0x8] sm:$0xff] %v187_v1  ;;  %v191_v3 = vld [vmem:[%s2921_s28 + $0x18] sm:$0xff]  ;;  %v193_v4 = vld [vmem:[%s2921_s28 + $0x20] sm:$0xff] }
  0x1e   : > { %190 = vst [vmem:[%s2926_s24 + $0x10] sm:$0xff] %v189_v2  ;;  %v195_v5 = vld [vmem:[%s2921_s28 + $0x28] sm:$0xff]  ;;  %192 = vst [vmem:[%s2926_s24 + $0x18] sm:$0xff] %v191_v3  ;;  %v197_v6 = vld [vmem:[%s2921_s28 + $0x30] sm:$0xff] }
  0x1f   : > { %194 = vst [vmem:[%s2926_s24 + $0x20] sm:$0xff] %v193_v4  ;;  %196 = vst [vmem:[%s2926_s24 + $0x28] sm:$0xff] %v195_v5  ;;  %v199_v7 = vld [vmem:[%s2921_s28 + $0x38] sm:$0xff]  ;;  %v201_v8 = vld [vmem:[%s2921_s28 + $0x40] sm:$0xff] }
  0x20   : > { %198 = vst [vmem:[%s2926_s24 + $0x30] sm:$0xff] %v197_v6  ;;  %200 = vst [vmem:[%s2926_s24 + $0x38] sm:$0xff] %v199_v7  ;;  %v203_v9 = vld [vmem:[%s2921_s28 + $0x48] sm:$0xff]  ;;  %v205_v10 = vld [vmem:[%s2921_s28 + $0x50] sm:$0xff] }
  0x21   : > { %202 = vst [vmem:[%s2926_s24 + $0x40] sm:$0xff] %v201_v8  ;;  %v207_v11 = vld [vmem:[%s2921_s28 + $0x58] sm:$0xff]  ;;  %204 = vst [vmem:[%s2926_s24 + $0x48] sm:$0xff] %v203_v9  ;;  %v209_v12 = vld [vmem:[%s2921_s28 + $0x60] sm:$0xff] }
  0x22   : > { %206 = vst [vmem:[%s2926_s24 + $0x50] sm:$0xff] %v205_v10  ;;  %208 = vst [vmem:[%s2926_s24 + $0x58] sm:$0xff] %v207_v11  ;;  %v211_v13 = vld [vmem:[%s2921_s28 + $0x68] sm:$0xff]  ;;  %v213_v14 = vld [vmem:[%s2921_s28 + $0x70] sm:$0xff] }
  0x23   : > { %210 = vst [vmem:[%s2926_s24 + $0x60] sm:$0xff] %v209_v12  ;;  %212 = vst [vmem:[%s2926_s24 + $0x68] sm:$0xff] %v211_v13  ;;  %v215_v15 = vld [vmem:[%s2921_s28 + $0x78] sm:$0xff]  ;;  %v217_v16 = vld [vmem:[%s2921_s28 + $0x100] sm:$0xff] }
  0x24   : > { %214 = vst [vmem:[%s2926_s24 + $0x70] sm:$0xff] %v213_v14  ;;  %v219_v17 = vld [vmem:[%s2921_s28 + $0x108] sm:$0xff]  ;;  %216 = vst [vmem:[%s2926_s24 + $0x78] sm:$0xff] %v215_v15  ;;  %v221_v18 = vld [vmem:[%s2921_s28 + $0x110] sm:$0xff] }
  0x25   : > { %218 = vst [vmem:[%s2926_s24 + $0x80] sm:$0xff] %v217_v16  ;;  %220 = vst [vmem:[%s2926_s24 + $0x88] sm:$0xff] %v219_v17  ;;  %v223_v19 = vld [vmem:[%s2921_s28 + $0x118] sm:$0xff]  ;;  %v225_v20 = vld [vmem:[%s2921_s28 + $0x120] sm:$0xff] }
  0x26   : > { %222 = vst [vmem:[%s2926_s24 + $0x90] sm:$0xff] %v221_v18  ;;  %224 = vst [vmem:[%s2926_s24 + $0x98] sm:$0xff] %v223_v19  ;;  %v227_v21 = vld [vmem:[%s2921_s28 + $0x128] sm:$0xff]  ;;  %v229_v22 = vld [vmem:[%s2921_s28 + $0x130] sm:$0xff] }
  0x27   : > { %226 = vst [vmem:[%s2926_s24 + $0xa0] sm:$0xff] %v225_v20  ;;  %v231_v23 = vld [vmem:[%s2921_s28 + $0x138] sm:$0xff]  ;;  %228 = vst [vmem:[%s2926_s24 + $0xa8] sm:$0xff] %v227_v21  ;;  %v233_v24 = vld [vmem:[%s2921_s28 + $0x140] sm:$0xff] }
  0x28   : > { %230 = vst [vmem:[%s2926_s24 + $0xb0] sm:$0xff] %v229_v22  ;;  %232 = vst [vmem:[%s2926_s24 + $0xb8] sm:$0xff] %v231_v23  ;;  %v235_v25 = vld [vmem:[%s2921_s28 + $0x148] sm:$0xff]  ;;  %v237_v26 = vld [vmem:[%s2921_s28 + $0x150] sm:$0xff] }
  0x29   : > { %234 = vst [vmem:[%s2926_s24 + $0xc0] sm:$0xff] %v233_v24  ;;  %236 = vst [vmem:[%s2926_s24 + $0xc8] sm:$0xff] %v235_v25  ;;  %v239_v27 = vld [vmem:[%s2921_s28 + $0x158] sm:$0xff]  ;;  %v241_v28 = vld [vmem:[%s2921_s28 + $0x160] sm:$0xff] }
  0x2a   : > { %238 = vst [vmem:[%s2926_s24 + $0xd0] sm:$0xff] %v237_v26  ;;  %v243_v29 = vld [vmem:[%s2921_s28 + $0x168] sm:$0xff]  ;;  %240 = vst [vmem:[%s2926_s24 + $0xd8] sm:$0xff] %v239_v27  ;;  %v245_v30 = vld [vmem:[%s2921_s28 + $0x170] sm:$0xff] }
  0x2b   : > { %242 = vst [vmem:[%s2926_s24 + $0xe0] sm:$0xff] %v241_v28  ;;  %244 = vst [vmem:[%s2926_s24 + $0xe8] sm:$0xff] %v243_v29  ;;  %v247_v31 = vld [vmem:[%s2921_s28 + $0x178] sm:$0xff]  ;;  %v249_v32 = vld [vmem:[%s2921_s28 + $0x200] sm:$0xff] }
  0x2c   : > { %246 = vst [vmem:[%s2926_s24 + $0xf0] sm:$0xff] %v245_v30  ;;  %248 = vst [vmem:[%s2926_s24 + $0xf8] sm:$0xff] %v247_v31  ;;  %v251_v33 = vld [vmem:[%s2921_s28 + $0x208] sm:$0xff]  ;;  %v253_v34 = vld [vmem:[%s2921_s28 + $0x210] sm:$0xff] }
  0x2d   : > { %250 = vst [vmem:[%s2926_s24 + $0x100] sm:$0xff] %v249_v32  ;;  %v255_v35 = vld [vmem:[%s2921_s28 + $0x218] sm:$0xff]  ;;  %252 = vst [vmem:[%s2926_s24 + $0x108] sm:$0xff] %v251_v33  ;;  %v257_v36 = vld [vmem:[%s2921_s28 + $0x220] sm:$0xff] }
  0x2e   : > { %254 = vst [vmem:[%s2926_s24 + $0x110] sm:$0xff] %v253_v34  ;;  %256 = vst [vmem:[%s2926_s24 + $0x118] sm:$0xff] %v255_v35  ;;  %v259_v37 = vld [vmem:[%s2921_s28 + $0x228] sm:$0xff]  ;;  %v261_v38 = vld [vmem:[%s2921_s28 + $0x230] sm:$0xff] }
  0x2f   : > { %258 = vst [vmem:[%s2926_s24 + $0x120] sm:$0xff] %v257_v36  ;;  %260 = vst [vmem:[%s2926_s24 + $0x128] sm:$0xff] %v259_v37  ;;  %v263_v39 = vld [vmem:[%s2921_s28 + $0x238] sm:$0xff]  ;;  %v265_v40 = vld [vmem:[%s2921_s28 + $0x240] sm:$0xff] }
  0x30   : > { %262 = vst [vmem:[%s2926_s24 + $0x130] sm:$0xff] %v261_v38  ;;  %v267_v41 = vld [vmem:[%s2921_s28 + $0x248] sm:$0xff]  ;;  %264 = vst [vmem:[%s2926_s24 + $0x138] sm:$0xff] %v263_v39  ;;  %v269_v42 = vld [vmem:[%s2921_s28 + $0x250] sm:$0xff] }
  0x31   : > { %266 = vst [vmem:[%s2926_s24 + $0x140] sm:$0xff] %v265_v40  ;;  %268 = vst [vmem:[%s2926_s24 + $0x148] sm:$0xff] %v267_v41  ;;  %v271_v43 = vld [vmem:[%s2921_s28 + $0x258] sm:$0xff]  ;;  %v273_v44 = vld [vmem:[%s2921_s28 + $0x260] sm:$0xff] }
  0x32   : > { %270 = vst [vmem:[%s2926_s24 + $0x150] sm:$0xff] %v269_v42  ;;  %272 = vst [vmem:[%s2926_s24 + $0x158] sm:$0xff] %v271_v43  ;;  %v275_v45 = vld [vmem:[%s2921_s28 + $0x268] sm:$0xff]  ;;  %v277_v46 = vld [vmem:[%s2921_s28 + $0x270] sm:$0xff] }
  0x33   : > { %274 = vst [vmem:[%s2926_s24 + $0x160] sm:$0xff] %v273_v44  ;;  %v279_v47 = vld [vmem:[%s2921_s28 + $0x278] sm:$0xff]  ;;  %276 = vst [vmem:[%s2926_s24 + $0x168] sm:$0xff] %v275_v45  ;;  %v281_v48 = vld [vmem:[%s2921_s28 + $0x300] sm:$0xff] }
  0x34   : > { %278 = vst [vmem:[%s2926_s24 + $0x170] sm:$0xff] %v277_v46  ;;  %280 = vst [vmem:[%s2926_s24 + $0x178] sm:$0xff] %v279_v47  ;;  %v283_v49 = vld [vmem:[%s2921_s28 + $0x308] sm:$0xff]  ;;  %v285_v50 = vld [vmem:[%s2921_s28 + $0x310] sm:$0xff] }
  0x35   : > { %282 = vst [vmem:[%s2926_s24 + $0x180] sm:$0xff] %v281_v48  ;;  %284 = vst [vmem:[%s2926_s24 + $0x188] sm:$0xff] %v283_v49  ;;  %v287_v51 = vld [vmem:[%s2921_s28 + $0x318] sm:$0xff]  ;;  %v289_v52 = vld [vmem:[%s2921_s28 + $0x320] sm:$0xff] }
  0x36   : > { %286 = vst [vmem:[%s2926_s24 + $0x190] sm:$0xff] %v285_v50  ;;  %v291_v53 = vld [vmem:[%s2921_s28 + $0x328] sm:$0xff]  ;;  %288 = vst [vmem:[%s2926_s24 + $0x198] sm:$0xff] %v287_v51  ;;  %v293_v54 = vld [vmem:[%s2921_s28 + $0x330] sm:$0xff] }
  0x37   : > { %290 = vst [vmem:[%s2926_s24 + $0x1a0] sm:$0xff] %v289_v52  ;;  %292 = vst [vmem:[%s2926_s24 + $0x1a8] sm:$0xff] %v291_v53  ;;  %v295_v55 = vld [vmem:[%s2921_s28 + $0x338] sm:$0xff]  ;;  %v297_v56 = vld [vmem:[%s2921_s28 + $0x340] sm:$0xff] }
  0x38   : > { %294 = vst [vmem:[%s2926_s24 + $0x1b0] sm:$0xff] %v293_v54  ;;  %296 = vst [vmem:[%s2926_s24 + $0x1b8] sm:$0xff] %v295_v55  ;;  %v299_v57 = vld [vmem:[%s2921_s28 + $0x348] sm:$0xff]  ;;  %v301_v58 = vld [vmem:[%s2921_s28 + $0x350] sm:$0xff] }
  0x39   : > { %298 = vst [vmem:[%s2926_s24 + $0x1c0] sm:$0xff] %v297_v56  ;;  %v303_v59 = vld [vmem:[%s2921_s28 + $0x358] sm:$0xff]  ;;  %300 = vst [vmem:[%s2926_s24 + $0x1c8] sm:$0xff] %v299_v57  ;;  %v305_v60 = vld [vmem:[%s2921_s28 + $0x360] sm:$0xff] }
  0x3a   : > { %302 = vst [vmem:[%s2926_s24 + $0x1d0] sm:$0xff] %v301_v58  ;;  %304 = vst [vmem:[%s2926_s24 + $0x1d8] sm:$0xff] %v303_v59  ;;  %v307_v61 = vld [vmem:[%s2921_s28 + $0x368] sm:$0xff]  ;;  %v309_v62 = vld [vmem:[%s2921_s28 + $0x370] sm:$0xff] }
  0x3b   : > { %306 = vst [vmem:[%s2926_s24 + $0x1e0] sm:$0xff] %v305_v60  ;;  %308 = vst [vmem:[%s2926_s24 + $0x1e8] sm:$0xff] %v307_v61  ;;  %v311_v63 = vld [vmem:[%s2921_s28 + $0x378] sm:$0xff]  ;;  %v313_v0 = vld [vmem:[%s2921_s28 + $0x400] sm:$0xff] }
  0x3c   : > { %310 = vst [vmem:[%s2926_s24 + $0x1f0] sm:$0xff] %v309_v62  ;;  %v315_v1 = vld [vmem:[%s2921_s28 + $0x408] sm:$0xff]  ;;  %312 = vst [vmem:[%s2926_s24 + $0x1f8] sm:$0xff] %v311_v63  ;;  %v317_v2 = vld [vmem:[%s2921_s28 + $0x410] sm:$0xff] }
  0x3d   : > { %314 = vst [vmem:[%s2926_s24 + $0x200] sm:$0xff] %v313_v0  ;;  %316 = vst [vmem:[%s2926_s24 + $0x208] sm:$0xff] %v315_v1  ;;  %v319_v3 = vld [vmem:[%s2921_s28 + $0x418] sm:$0xff]  ;;  %v321_v4 = vld [vmem:[%s2921_s28 + $0x420] sm:$0xff] }
  0x3e   : > { %318 = vst [vmem:[%s2926_s24 + $0x210] sm:$0xff] %v317_v2  ;;  %320 = vst [vmem:[%s2926_s24 + $0x218] sm:$0xff] %v319_v3  ;;  %v323_v5 = vld [vmem:[%s2921_s28 + $0x428] sm:$0xff]  ;;  %v325_v6 = vld [vmem:[%s2921_s28 + $0x430] sm:$0xff] }
  0x3f   : > { %322 = vst [vmem:[%s2926_s24 + $0x220] sm:$0xff] %v321_v4  ;;  %v327_v7 = vld [vmem:[%s2921_s28 + $0x438] sm:$0xff]  ;;  %324 = vst [vmem:[%s2926_s24 + $0x228] sm:$0xff] %v323_v5  ;;  %v329_v8 = vld [vmem:[%s2921_s28 + $0x440] sm:$0xff] }
  0x40   : > { %326 = vst [vmem:[%s2926_s24 + $0x230] sm:$0xff] %v325_v6  ;;  %328 = vst [vmem:[%s2926_s24 + $0x238] sm:$0xff] %v327_v7  ;;  %v331_v9 = vld [vmem:[%s2921_s28 + $0x448] sm:$0xff]  ;;  %v333_v10 = vld [vmem:[%s2921_s28 + $0x450] sm:$0xff] }
  0x41   : > { %330 = vst [vmem:[%s2926_s24 + $0x240] sm:$0xff] %v329_v8  ;;  %332 = vst [vmem:[%s2926_s24 + $0x248] sm:$0xff] %v331_v9  ;;  %v335_v11 = vld [vmem:[%s2921_s28 + $0x458] sm:$0xff]  ;;  %v337_v12 = vld [vmem:[%s2921_s28 + $0x460] sm:$0xff] }
  0x42   : > { %334 = vst [vmem:[%s2926_s24 + $0x250] sm:$0xff] %v333_v10  ;;  %v339_v13 = vld [vmem:[%s2921_s28 + $0x468] sm:$0xff]  ;;  %336 = vst [vmem:[%s2926_s24 + $0x258] sm:$0xff] %v335_v11  ;;  %v341_v14 = vld [vmem:[%s2921_s28 + $0x470] sm:$0xff] }
  0x43   : > { %338 = vst [vmem:[%s2926_s24 + $0x260] sm:$0xff] %v337_v12  ;;  %340 = vst [vmem:[%s2926_s24 + $0x268] sm:$0xff] %v339_v13  ;;  %v343_v15 = vld [vmem:[%s2921_s28 + $0x478] sm:$0xff]  ;;  %v345_v16 = vld [vmem:[%s2921_s28 + $0x500] sm:$0xff] }
  0x44   : > { %342 = vst [vmem:[%s2926_s24 + $0x270] sm:$0xff] %v341_v14  ;;  %344 = vst [vmem:[%s2926_s24 + $0x278] sm:$0xff] %v343_v15  ;;  %v347_v17 = vld [vmem:[%s2921_s28 + $0x508] sm:$0xff]  ;;  %v349_v18 = vld [vmem:[%s2921_s28 + $0x510] sm:$0xff] }
  0x45   : > { %346 = vst [vmem:[%s2926_s24 + $0x280] sm:$0xff] %v345_v16  ;;  %v351_v19 = vld [vmem:[%s2921_s28 + $0x518] sm:$0xff]  ;;  %348 = vst [vmem:[%s2926_s24 + $0x288] sm:$0xff] %v347_v17  ;;  %v353_v20 = vld [vmem:[%s2921_s28 + $0x520] sm:$0xff] }
  0x46   : > { %350 = vst [vmem:[%s2926_s24 + $0x290] sm:$0xff] %v349_v18  ;;  %352 = vst [vmem:[%s2926_s24 + $0x298] sm:$0xff] %v351_v19  ;;  %v355_v21 = vld [vmem:[%s2921_s28 + $0x528] sm:$0xff]  ;;  %v357_v22 = vld [vmem:[%s2921_s28 + $0x530] sm:$0xff] }
  0x47   : > { %354 = vst [vmem:[%s2926_s24 + $0x2a0] sm:$0xff] %v353_v20  ;;  %356 = vst [vmem:[%s2926_s24 + $0x2a8] sm:$0xff] %v355_v21  ;;  %v359_v23 = vld [vmem:[%s2921_s28 + $0x538] sm:$0xff]  ;;  %v361_v24 = vld [vmem:[%s2921_s28 + $0x540] sm:$0xff] }
  0x48   : > { %358 = vst [vmem:[%s2926_s24 + $0x2b0] sm:$0xff] %v357_v22  ;;  %v363_v25 = vld [vmem:[%s2921_s28 + $0x548] sm:$0xff]  ;;  %360 = vst [vmem:[%s2926_s24 + $0x2b8] sm:$0xff] %v359_v23  ;;  %v365_v26 = vld [vmem:[%s2921_s28 + $0x550] sm:$0xff] }
  0x49   : > { %362 = vst [vmem:[%s2926_s24 + $0x2c0] sm:$0xff] %v361_v24  ;;  %364 = vst [vmem:[%s2926_s24 + $0x2c8] sm:$0xff] %v363_v25  ;;  %v367_v27 = vld [vmem:[%s2921_s28 + $0x558] sm:$0xff]  ;;  %v369_v28 = vld [vmem:[%s2921_s28 + $0x560] sm:$0xff] }
  0x4a   : > { %366 = vst [vmem:[%s2926_s24 + $0x2d0] sm:$0xff] %v365_v26  ;;  %368 = vst [vmem:[%s2926_s24 + $0x2d8] sm:$0xff] %v367_v27  ;;  %v371_v29 = vld [vmem:[%s2921_s28 + $0x568] sm:$0xff]  ;;  %v373_v30 = vld [vmem:[%s2921_s28 + $0x570] sm:$0xff] }
  0x4b   : > { %370 = vst [vmem:[%s2926_s24 + $0x2e0] sm:$0xff] %v369_v28  ;;  %v375_v31 = vld [vmem:[%s2921_s28 + $0x578] sm:$0xff]  ;;  %372 = vst [vmem:[%s2926_s24 + $0x2e8] sm:$0xff] %v371_v29  ;;  %v377_v32 = vld [vmem:[%s2921_s28 + $0x600] sm:$0xff] }
  0x4c   : > { %374 = vst [vmem:[%s2926_s24 + $0x2f0] sm:$0xff] %v373_v30  ;;  %376 = vst [vmem:[%s2926_s24 + $0x2f8] sm:$0xff] %v375_v31  ;;  %v379_v33 = vld [vmem:[%s2921_s28 + $0x608] sm:$0xff]  ;;  %v381_v34 = vld [vmem:[%s2921_s28 + $0x610] sm:$0xff] }
  0x4d   : > { %378 = vst [vmem:[%s2926_s24 + $0x300] sm:$0xff] %v377_v32  ;;  %380 = vst [vmem:[%s2926_s24 + $0x308] sm:$0xff] %v379_v33  ;;  %v383_v35 = vld [vmem:[%s2921_s28 + $0x618] sm:$0xff]  ;;  %v385_v36 = vld [vmem:[%s2921_s28 + $0x620] sm:$0xff] }
  0x4e   : > { %382 = vst [vmem:[%s2926_s24 + $0x310] sm:$0xff] %v381_v34  ;;  %v387_v37 = vld [vmem:[%s2921_s28 + $0x628] sm:$0xff]  ;;  %384 = vst [vmem:[%s2926_s24 + $0x318] sm:$0xff] %v383_v35  ;;  %v389_v38 = vld [vmem:[%s2921_s28 + $0x630] sm:$0xff] }
  0x4f   : > { %386 = vst [vmem:[%s2926_s24 + $0x320] sm:$0xff] %v385_v36  ;;  %388 = vst [vmem:[%s2926_s24 + $0x328] sm:$0xff] %v387_v37  ;;  %v391_v39 = vld [vmem:[%s2921_s28 + $0x638] sm:$0xff]  ;;  %v393_v40 = vld [vmem:[%s2921_s28 + $0x640] sm:$0xff] }
  0x50   : > { %390 = vst [vmem:[%s2926_s24 + $0x330] sm:$0xff] %v389_v38  ;;  %392 = vst [vmem:[%s2926_s24 + $0x338] sm:$0xff] %v391_v39  ;;  %v395_v41 = vld [vmem:[%s2921_s28 + $0x648] sm:$0xff]  ;;  %v397_v42 = vld [vmem:[%s2921_s28 + $0x650] sm:$0xff] }
  0x51   : > { %394 = vst [vmem:[%s2926_s24 + $0x340] sm:$0xff] %v393_v40  ;;  %v399_v43 = vld [vmem:[%s2921_s28 + $0x658] sm:$0xff]  ;;  %396 = vst [vmem:[%s2926_s24 + $0x348] sm:$0xff] %v395_v41  ;;  %v401_v44 = vld [vmem:[%s2921_s28 + $0x660] sm:$0xff] }
  0x52   : > { %398 = vst [vmem:[%s2926_s24 + $0x350] sm:$0xff] %v397_v42  ;;  %400 = vst [vmem:[%s2926_s24 + $0x358] sm:$0xff] %v399_v43  ;;  %v403_v45 = vld [vmem:[%s2921_s28 + $0x668] sm:$0xff]  ;;  %v405_v46 = vld [vmem:[%s2921_s28 + $0x670] sm:$0xff] }
  0x53   : > { %402 = vst [vmem:[%s2926_s24 + $0x360] sm:$0xff] %v401_v44  ;;  %404 = vst [vmem:[%s2926_s24 + $0x368] sm:$0xff] %v403_v45  ;;  %v407_v47 = vld [vmem:[%s2921_s28 + $0x678] sm:$0xff]  ;;  %v409_v48 = vld [vmem:[%s2921_s28 + $0x700] sm:$0xff] }
  0x54   : > { %406 = vst [vmem:[%s2926_s24 + $0x370] sm:$0xff] %v405_v46  ;;  %v411_v49 = vld [vmem:[%s2921_s28 + $0x708] sm:$0xff]  ;;  %408 = vst [vmem:[%s2926_s24 + $0x378] sm:$0xff] %v407_v47  ;;  %v413_v50 = vld [vmem:[%s2921_s28 + $0x710] sm:$0xff] }
  0x55   : > { %410 = vst [vmem:[%s2926_s24 + $0x380] sm:$0xff] %v409_v48  ;;  %412 = vst [vmem:[%s2926_s24 + $0x388] sm:$0xff] %v411_v49  ;;  %v415_v51 = vld [vmem:[%s2921_s28 + $0x718] sm:$0xff]  ;;  %v417_v52 = vld [vmem:[%s2921_s28 + $0x720] sm:$0xff] }
  0x56   : > { %414 = vst [vmem:[%s2926_s24 + $0x390] sm:$0xff] %v413_v50  ;;  %416 = vst [vmem:[%s2926_s24 + $0x398] sm:$0xff] %v415_v51  ;;  %v419_v53 = vld [vmem:[%s2921_s28 + $0x728] sm:$0xff]  ;;  %v421_v54 = vld [vmem:[%s2921_s28 + $0x730] sm:$0xff] }
  0x57   : > { %418 = vst [vmem:[%s2926_s24 + $0x3a0] sm:$0xff] %v417_v52  ;;  %v423_v55 = vld [vmem:[%s2921_s28 + $0x738] sm:$0xff]  ;;  %420 = vst [vmem:[%s2926_s24 + $0x3a8] sm:$0xff] %v419_v53  ;;  %v425_v56 = vld [vmem:[%s2921_s28 + $0x740] sm:$0xff] }
  0x58   : > { %422 = vst [vmem:[%s2926_s24 + $0x3b0] sm:$0xff] %v421_v54  ;;  %424 = vst [vmem:[%s2926_s24 + $0x3b8] sm:$0xff] %v423_v55  ;;  %v427_v57 = vld [vmem:[%s2921_s28 + $0x748] sm:$0xff]  ;;  %v429_v58 = vld [vmem:[%s2921_s28 + $0x750] sm:$0xff] }
  0x59   : > { %426 = vst [vmem:[%s2926_s24 + $0x3c0] sm:$0xff] %v425_v56  ;;  %428 = vst [vmem:[%s2926_s24 + $0x3c8] sm:$0xff] %v427_v57  ;;  %v431_v59 = vld [vmem:[%s2921_s28 + $0x758] sm:$0xff]  ;;  %v433_v60 = vld [vmem:[%s2921_s28 + $0x760] sm:$0xff] }
  0x5a   : > { %430 = vst [vmem:[%s2926_s24 + $0x3d0] sm:$0xff] %v429_v58  ;;  %v435_v61 = vld [vmem:[%s2921_s28 + $0x768] sm:$0xff]  ;;  %432 = vst [vmem:[%s2926_s24 + $0x3d8] sm:$0xff] %v431_v59  ;;  %v437_v62 = vld [vmem:[%s2921_s28 + $0x770] sm:$0xff] }
  0x5b   : > { %434 = vst [vmem:[%s2926_s24 + $0x3e0] sm:$0xff] %v433_v60  ;;  %436 = vst [vmem:[%s2926_s24 + $0x3e8] sm:$0xff] %v435_v61  ;;  %v439_v63 = vld [vmem:[%s2921_s28 + $0x778] sm:$0xff]  ;;  %v441_v0 = vld [vmem:[%s2921_s28 + $0x800] sm:$0xff] }
  0x5c   : > { %438 = vst [vmem:[%s2926_s24 + $0x3f0] sm:$0xff] %v437_v62  ;;  %440 = vst [vmem:[%s2926_s24 + $0x3f8] sm:$0xff] %v439_v63  ;;  %v443_v1 = vld [vmem:[%s2921_s28 + $0x808] sm:$0xff]  ;;  %v445_v2 = vld [vmem:[%s2921_s28 + $0x810] sm:$0xff] }
  0x5d   : > { %442 = vst [vmem:[%s2926_s24 + $0x400] sm:$0xff] %v441_v0  ;;  %v447_v3 = vld [vmem:[%s2921_s28 + $0x818] sm:$0xff]  ;;  %444 = vst [vmem:[%s2926_s24 + $0x408] sm:$0xff] %v443_v1  ;;  %v449_v4 = vld [vmem:[%s2921_s28 + $0x820] sm:$0xff] }
  0x5e   : > { %446 = vst [vmem:[%s2926_s24 + $0x410] sm:$0xff] %v445_v2  ;;  %448 = vst [vmem:[%s2926_s24 + $0x418] sm:$0xff] %v447_v3  ;;  %v451_v5 = vld [vmem:[%s2921_s28 + $0x828] sm:$0xff]  ;;  %v453_v6 = vld [vmem:[%s2921_s28 + $0x830] sm:$0xff] }
  0x5f   : > { %450 = vst [vmem:[%s2926_s24 + $0x420] sm:$0xff] %v449_v4  ;;  %452 = vst [vmem:[%s2926_s24 + $0x428] sm:$0xff] %v451_v5  ;;  %v455_v7 = vld [vmem:[%s2921_s28 + $0x838] sm:$0xff]  ;;  %v457_v8 = vld [vmem:[%s2921_s28 + $0x840] sm:$0xff] }
  0x60   : > { %454 = vst [vmem:[%s2926_s24 + $0x430] sm:$0xff] %v453_v6  ;;  %v459_v9 = vld [vmem:[%s2921_s28 + $0x848] sm:$0xff]  ;;  %456 = vst [vmem:[%s2926_s24 + $0x438] sm:$0xff] %v455_v7  ;;  %v461_v10 = vld [vmem:[%s2921_s28 + $0x850] sm:$0xff] }
  0x61   : > { %458 = vst [vmem:[%s2926_s24 + $0x440] sm:$0xff] %v457_v8  ;;  %460 = vst [vmem:[%s2926_s24 + $0x448] sm:$0xff] %v459_v9  ;;  %v463_v11 = vld [vmem:[%s2921_s28 + $0x858] sm:$0xff]  ;;  %v465_v12 = vld [vmem:[%s2921_s28 + $0x860] sm:$0xff] }
  0x62   : > { %462 = vst [vmem:[%s2926_s24 + $0x450] sm:$0xff] %v461_v10  ;;  %464 = vst [vmem:[%s2926_s24 + $0x458] sm:$0xff] %v463_v11  ;;  %v467_v13 = vld [vmem:[%s2921_s28 + $0x868] sm:$0xff]  ;;  %v469_v14 = vld [vmem:[%s2921_s28 + $0x870] sm:$0xff] }
  0x63   : > { %466 = vst [vmem:[%s2926_s24 + $0x460] sm:$0xff] %v465_v12  ;;  %v471_v15 = vld [vmem:[%s2921_s28 + $0x878] sm:$0xff]  ;;  %468 = vst [vmem:[%s2926_s24 + $0x468] sm:$0xff] %v467_v13  ;;  %v473_v16 = vld [vmem:[%s2921_s28 + $0x900] sm:$0xff] }
  0x64   : > { %470 = vst [vmem:[%s2926_s24 + $0x470] sm:$0xff] %v469_v14  ;;  %472 = vst [vmem:[%s2926_s24 + $0x478] sm:$0xff] %v471_v15  ;;  %v475_v17 = vld [vmem:[%s2921_s28 + $0x908] sm:$0xff]  ;;  %v477_v18 = vld [vmem:[%s2921_s28 + $0x910] sm:$0xff] }
  0x65   : > { %474 = vst [vmem:[%s2926_s24 + $0x480] sm:$0xff] %v473_v16  ;;  %476 = vst [vmem:[%s2926_s24 + $0x488] sm:$0xff] %v475_v17  ;;  %v479_v19 = vld [vmem:[%s2921_s28 + $0x918] sm:$0xff]  ;;  %v481_v20 = vld [vmem:[%s2921_s28 + $0x920] sm:$0xff] }
  0x66   : > { %478 = vst [vmem:[%s2926_s24 + $0x490] sm:$0xff] %v477_v18  ;;  %v483_v21 = vld [vmem:[%s2921_s28 + $0x928] sm:$0xff]  ;;  %480 = vst [vmem:[%s2926_s24 + $0x498] sm:$0xff] %v479_v19  ;;  %v485_v22 = vld [vmem:[%s2921_s28 + $0x930] sm:$0xff] }
  0x67   : > { %482 = vst [vmem:[%s2926_s24 + $0x4a0] sm:$0xff] %v481_v20  ;;  %484 = vst [vmem:[%s2926_s24 + $0x4a8] sm:$0xff] %v483_v21  ;;  %v487_v23 = vld [vmem:[%s2921_s28 + $0x938] sm:$0xff]  ;;  %v489_v24 = vld [vmem:[%s2921_s28 + $0x940] sm:$0xff] }
  0x68   : > { %486 = vst [vmem:[%s2926_s24 + $0x4b0] sm:$0xff] %v485_v22  ;;  %488 = vst [vmem:[%s2926_s24 + $0x4b8] sm:$0xff] %v487_v23  ;;  %v491_v25 = vld [vmem:[%s2921_s28 + $0x948] sm:$0xff]  ;;  %v493_v26 = vld [vmem:[%s2921_s28 + $0x950] sm:$0xff] }
  0x69   : > { %490 = vst [vmem:[%s2926_s24 + $0x4c0] sm:$0xff] %v489_v24  ;;  %v495_v27 = vld [vmem:[%s2921_s28 + $0x958] sm:$0xff]  ;;  %492 = vst [vmem:[%s2926_s24 + $0x4c8] sm:$0xff] %v491_v25  ;;  %v497_v28 = vld [vmem:[%s2921_s28 + $0x960] sm:$0xff] }
  0x6a   : > { %494 = vst [vmem:[%s2926_s24 + $0x4d0] sm:$0xff] %v493_v26  ;;  %496 = vst [vmem:[%s2926_s24 + $0x4d8] sm:$0xff] %v495_v27  ;;  %v499_v29 = vld [vmem:[%s2921_s28 + $0x968] sm:$0xff]  ;;  %v501_v30 = vld [vmem:[%s2921_s28 + $0x970] sm:$0xff] }
  0x6b   : > { %498 = vst [vmem:[%s2926_s24 + $0x4e0] sm:$0xff] %v497_v28  ;;  %500 = vst [vmem:[%s2926_s24 + $0x4e8] sm:$0xff] %v499_v29  ;;  %v503_v31 = vld [vmem:[%s2921_s28 + $0x978] sm:$0xff]  ;;  %v505_v32 = vld [vmem:[%s2921_s28 + $0xa00] sm:$0xff] }
  0x6c   : > { %502 = vst [vmem:[%s2926_s24 + $0x4f0] sm:$0xff] %v501_v30  ;;  %v507_v33 = vld [vmem:[%s2921_s28 + $0xa08] sm:$0xff]  ;;  %504 = vst [vmem:[%s2926_s24 + $0x4f8] sm:$0xff] %v503_v31  ;;  %v509_v34 = vld [vmem:[%s2921_s28 + $0xa10] sm:$0xff] }
  0x6d   : > { %506 = vst [vmem:[%s2926_s24 + $0x500] sm:$0xff] %v505_v32  ;;  %508 = vst [vmem:[%s2926_s24 + $0x508] sm:$0xff] %v507_v33  ;;  %v511_v35 = vld [vmem:[%s2921_s28 + $0xa18] sm:$0xff]  ;;  %v513_v36 = vld [vmem:[%s2921_s28 + $0xa20] sm:$0xff] }
  0x6e   : > { %510 = vst [vmem:[%s2926_s24 + $0x510] sm:$0xff] %v509_v34  ;;  %512 = vst [vmem:[%s2926_s24 + $0x518] sm:$0xff] %v511_v35  ;;  %v515_v37 = vld [vmem:[%s2921_s28 + $0xa28] sm:$0xff]  ;;  %v517_v38 = vld [vmem:[%s2921_s28 + $0xa30] sm:$0xff] }
  0x6f   : > { %514 = vst [vmem:[%s2926_s24 + $0x520] sm:$0xff] %v513_v36  ;;  %v519_v39 = vld [vmem:[%s2921_s28 + $0xa38] sm:$0xff]  ;;  %516 = vst [vmem:[%s2926_s24 + $0x528] sm:$0xff] %v515_v37  ;;  %v521_v40 = vld [vmem:[%s2921_s28 + $0xa40] sm:$0xff] }
  0x70   : > { %518 = vst [vmem:[%s2926_s24 + $0x530] sm:$0xff] %v517_v38  ;;  %520 = vst [vmem:[%s2926_s24 + $0x538] sm:$0xff] %v519_v39  ;;  %v523_v41 = vld [vmem:[%s2921_s28 + $0xa48] sm:$0xff]  ;;  %v525_v42 = vld [vmem:[%s2921_s28 + $0xa50] sm:$0xff] }
  0x71   : > { %522 = vst [vmem:[%s2926_s24 + $0x540] sm:$0xff] %v521_v40  ;;  %524 = vst [vmem:[%s2926_s24 + $0x548] sm:$0xff] %v523_v41  ;;  %v527_v43 = vld [vmem:[%s2921_s28 + $0xa58] sm:$0xff]  ;;  %v529_v44 = vld [vmem:[%s2921_s28 + $0xa60] sm:$0xff] }
  0x72   : > { %526 = vst [vmem:[%s2926_s24 + $0x550] sm:$0xff] %v525_v42  ;;  %v531_v45 = vld [vmem:[%s2921_s28 + $0xa68] sm:$0xff]  ;;  %528 = vst [vmem:[%s2926_s24 + $0x558] sm:$0xff] %v527_v43  ;;  %v533_v46 = vld [vmem:[%s2921_s28 + $0xa70] sm:$0xff] }
  0x73   : > { %530 = vst [vmem:[%s2926_s24 + $0x560] sm:$0xff] %v529_v44  ;;  %532 = vst [vmem:[%s2926_s24 + $0x568] sm:$0xff] %v531_v45  ;;  %v535_v47 = vld [vmem:[%s2921_s28 + $0xa78] sm:$0xff]  ;;  %v537_v48 = vld [vmem:[%s2921_s28 + $0xb00] sm:$0xff] }
  0x74   : > { %534 = vst [vmem:[%s2926_s24 + $0x570] sm:$0xff] %v533_v46  ;;  %536 = vst [vmem:[%s2926_s24 + $0x578] sm:$0xff] %v535_v47  ;;  %v539_v49 = vld [vmem:[%s2921_s28 + $0xb08] sm:$0xff]  ;;  %v541_v50 = vld [vmem:[%s2921_s28 + $0xb10] sm:$0xff] }
  0x75   : > { %538 = vst [vmem:[%s2926_s24 + $0x580] sm:$0xff] %v537_v48  ;;  %v543_v51 = vld [vmem:[%s2921_s28 + $0xb18] sm:$0xff]  ;;  %540 = vst [vmem:[%s2926_s24 + $0x588] sm:$0xff] %v539_v49  ;;  %v545_v52 = vld [vmem:[%s2921_s28 + $0xb20] sm:$0xff] }
  0x76   : > { %542 = vst [vmem:[%s2926_s24 + $0x590] sm:$0xff] %v541_v50  ;;  %544 = vst [vmem:[%s2926_s24 + $0x598] sm:$0xff] %v543_v51  ;;  %v547_v53 = vld [vmem:[%s2921_s28 + $0xb28] sm:$0xff]  ;;  %v549_v54 = vld [vmem:[%s2921_s28 + $0xb30] sm:$0xff] }
  0x77   : > { %546 = vst [vmem:[%s2926_s24 + $0x5a0] sm:$0xff] %v545_v52  ;;  %548 = vst [vmem:[%s2926_s24 + $0x5a8] sm:$0xff] %v547_v53  ;;  %v551_v55 = vld [vmem:[%s2921_s28 + $0xb38] sm:$0xff]  ;;  %v553_v56 = vld [vmem:[%s2921_s28 + $0xb40] sm:$0xff] }
  0x78   : > { %550 = vst [vmem:[%s2926_s24 + $0x5b0] sm:$0xff] %v549_v54  ;;  %v555_v57 = vld [vmem:[%s2921_s28 + $0xb48] sm:$0xff]  ;;  %552 = vst [vmem:[%s2926_s24 + $0x5b8] sm:$0xff] %v551_v55  ;;  %v557_v58 = vld [vmem:[%s2921_s28 + $0xb50] sm:$0xff] }
  0x79   : > { %554 = vst [vmem:[%s2926_s24 + $0x5c0] sm:$0xff] %v553_v56  ;;  %556 = vst [vmem:[%s2926_s24 + $0x5c8] sm:$0xff] %v555_v57  ;;  %v559_v59 = vld [vmem:[%s2921_s28 + $0xb58] sm:$0xff]  ;;  %v561_v60 = vld [vmem:[%s2921_s28 + $0xb60] sm:$0xff] }
  0x7a   : > { %558 = vst [vmem:[%s2926_s24 + $0x5d0] sm:$0xff] %v557_v58  ;;  %560 = vst [vmem:[%s2926_s24 + $0x5d8] sm:$0xff] %v559_v59  ;;  %v563_v61 = vld [vmem:[%s2921_s28 + $0xb68] sm:$0xff]  ;;  %v565_v62 = vld [vmem:[%s2921_s28 + $0xb70] sm:$0xff] }
  0x7b   : > { %562 = vst [vmem:[%s2926_s24 + $0x5e0] sm:$0xff] %v561_v60  ;;  %v567_v63 = vld [vmem:[%s2921_s28 + $0xb78] sm:$0xff]  ;;  %564 = vst [vmem:[%s2926_s24 + $0x5e8] sm:$0xff] %v563_v61  ;;  %v569_v0 = vld [vmem:[%s2921_s28 + $0xc00] sm:$0xff] }
  0x7c   : > { %566 = vst [vmem:[%s2926_s24 + $0x5f0] sm:$0xff] %v565_v62  ;;  %568 = vst [vmem:[%s2926_s24 + $0x5f8] sm:$0xff] %v567_v63  ;;  %v571_v1 = vld [vmem:[%s2921_s28 + $0xc08] sm:$0xff]  ;;  %v573_v2 = vld [vmem:[%s2921_s28 + $0xc10] sm:$0xff] }
  0x7d   : > { %570 = vst [vmem:[%s2926_s24 + $0x600] sm:$0xff] %v569_v0  ;;  %572 = vst [vmem:[%s2926_s24 + $0x608] sm:$0xff] %v571_v1  ;;  %v575_v3 = vld [vmem:[%s2921_s28 + $0xc18] sm:$0xff]  ;;  %v577_v4 = vld [vmem:[%s2921_s28 + $0xc20] sm:$0xff] }
  0x7e   : > { %574 = vst [vmem:[%s2926_s24 + $0x610] sm:$0xff] %v573_v2  ;;  %v579_v5 = vld [vmem:[%s2921_s28 + $0xc28] sm:$0xff]  ;;  %576 = vst [vmem:[%s2926_s24 + $0x618] sm:$0xff] %v575_v3  ;;  %v581_v6 = vld [vmem:[%s2921_s28 + $0xc30] sm:$0xff] }
  0x7f   : > { %578 = vst [vmem:[%s2926_s24 + $0x620] sm:$0xff] %v577_v4  ;;  %580 = vst [vmem:[%s2926_s24 + $0x628] sm:$0xff] %v579_v5  ;;  %v583_v7 = vld [vmem:[%s2921_s28 + $0xc38] sm:$0xff]  ;;  %v585_v8 = vld [vmem:[%s2921_s28 + $0xc40] sm:$0xff] }
  0x80   : > { %582 = vst [vmem:[%s2926_s24 + $0x630] sm:$0xff] %v581_v6  ;;  %584 = vst [vmem:[%s2926_s24 + $0x638] sm:$0xff] %v583_v7  ;;  %v587_v9 = vld [vmem:[%s2921_s28 + $0xc48] sm:$0xff]  ;;  %v589_v10 = vld [vmem:[%s2921_s28 + $0xc50] sm:$0xff] }
  0x81   : > { %586 = vst [vmem:[%s2926_s24 + $0x640] sm:$0xff] %v585_v8  ;;  %v591_v11 = vld [vmem:[%s2921_s28 + $0xc58] sm:$0xff]  ;;  %588 = vst [vmem:[%s2926_s24 + $0x648] sm:$0xff] %v587_v9  ;;  %v593_v12 = vld [vmem:[%s2921_s28 + $0xc60] sm:$0xff] }
  0x82   : > { %590 = vst [vmem:[%s2926_s24 + $0x650] sm:$0xff] %v589_v10  ;;  %592 = vst [vmem:[%s2926_s24 + $0x658] sm:$0xff] %v591_v11  ;;  %v595_v13 = vld [vmem:[%s2921_s28 + $0xc68] sm:$0xff]  ;;  %v597_v14 = vld [vmem:[%s2921_s28 + $0xc70] sm:$0xff] }
  0x83   : > { %594 = vst [vmem:[%s2926_s24 + $0x660] sm:$0xff] %v593_v12  ;;  %596 = vst [vmem:[%s2926_s24 + $0x668] sm:$0xff] %v595_v13  ;;  %v599_v15 = vld [vmem:[%s2921_s28 + $0xc78] sm:$0xff]  ;;  %v601_v16 = vld [vmem:[%s2921_s28 + $0xd00] sm:$0xff] }
  0x84   : > { %598 = vst [vmem:[%s2926_s24 + $0x670] sm:$0xff] %v597_v14  ;;  %v603_v17 = vld [vmem:[%s2921_s28 + $0xd08] sm:$0xff]  ;;  %600 = vst [vmem:[%s2926_s24 + $0x678] sm:$0xff] %v599_v15  ;;  %v605_v18 = vld [vmem:[%s2921_s28 + $0xd10] sm:$0xff] }
  0x85   : > { %602 = vst [vmem:[%s2926_s24 + $0x680] sm:$0xff] %v601_v16  ;;  %604 = vst [vmem:[%s2926_s24 + $0x688] sm:$0xff] %v603_v17  ;;  %v607_v19 = vld [vmem:[%s2921_s28 + $0xd18] sm:$0xff]  ;;  %v609_v20 = vld [vmem:[%s2921_s28 + $0xd20] sm:$0xff] }
  0x86   : > { %606 = vst [vmem:[%s2926_s24 + $0x690] sm:$0xff] %v605_v18  ;;  %608 = vst [vmem:[%s2926_s24 + $0x698] sm:$0xff] %v607_v19  ;;  %v611_v21 = vld [vmem:[%s2921_s28 + $0xd28] sm:$0xff]  ;;  %v613_v22 = vld [vmem:[%s2921_s28 + $0xd30] sm:$0xff] }
  0x87   : > { %610 = vst [vmem:[%s2926_s24 + $0x6a0] sm:$0xff] %v609_v20  ;;  %v615_v23 = vld [vmem:[%s2921_s28 + $0xd38] sm:$0xff]  ;;  %612 = vst [vmem:[%s2926_s24 + $0x6a8] sm:$0xff] %v611_v21  ;;  %v617_v24 = vld [vmem:[%s2921_s28 + $0xd40] sm:$0xff] }
  0x88   : > { %614 = vst [vmem:[%s2926_s24 + $0x6b0] sm:$0xff] %v613_v22  ;;  %616 = vst [vmem:[%s2926_s24 + $0x6b8] sm:$0xff] %v615_v23  ;;  %v619_v25 = vld [vmem:[%s2921_s28 + $0xd48] sm:$0xff]  ;;  %v621_v26 = vld [vmem:[%s2921_s28 + $0xd50] sm:$0xff] }
  0x89   : > { %618 = vst [vmem:[%s2926_s24 + $0x6c0] sm:$0xff] %v617_v24  ;;  %620 = vst [vmem:[%s2926_s24 + $0x6c8] sm:$0xff] %v619_v25  ;;  %v623_v27 = vld [vmem:[%s2921_s28 + $0xd58] sm:$0xff]  ;;  %v625_v28 = vld [vmem:[%s2921_s28 + $0xd60] sm:$0xff] }
  0x8a   : > { %622 = vst [vmem:[%s2926_s24 + $0x6d0] sm:$0xff] %v621_v26  ;;  %v627_v29 = vld [vmem:[%s2921_s28 + $0xd68] sm:$0xff]  ;;  %624 = vst [vmem:[%s2926_s24 + $0x6d8] sm:$0xff] %v623_v27  ;;  %v629_v30 = vld [vmem:[%s2921_s28 + $0xd70] sm:$0xff] }
  0x8b   : > { %626 = vst [vmem:[%s2926_s24 + $0x6e0] sm:$0xff] %v625_v28  ;;  %628 = vst [vmem:[%s2926_s24 + $0x6e8] sm:$0xff] %v627_v29  ;;  %v631_v31 = vld [vmem:[%s2921_s28 + $0xd78] sm:$0xff]  ;;  %v633_v32 = vld [vmem:[%s2921_s28 + $0xe00] sm:$0xff] }
  0x8c   : > { %630 = vst [vmem:[%s2926_s24 + $0x6f0] sm:$0xff] %v629_v30  ;;  %632 = vst [vmem:[%s2926_s24 + $0x6f8] sm:$0xff] %v631_v31  ;;  %v635_v33 = vld [vmem:[%s2921_s28 + $0xe08] sm:$0xff]  ;;  %v637_v34 = vld [vmem:[%s2921_s28 + $0xe10] sm:$0xff] }
  0x8d   : > { %634 = vst [vmem:[%s2926_s24 + $0x700] sm:$0xff] %v633_v32  ;;  %v639_v35 = vld [vmem:[%s2921_s28 + $0xe18] sm:$0xff]  ;;  %636 = vst [vmem:[%s2926_s24 + $0x708] sm:$0xff] %v635_v33  ;;  %v641_v36 = vld [vmem:[%s2921_s28 + $0xe20] sm:$0xff] }
  0x8e   : > { %638 = vst [vmem:[%s2926_s24 + $0x710] sm:$0xff] %v637_v34  ;;  %640 = vst [vmem:[%s2926_s24 + $0x718] sm:$0xff] %v639_v35  ;;  %v643_v37 = vld [vmem:[%s2921_s28 + $0xe28] sm:$0xff]  ;;  %v645_v38 = vld [vmem:[%s2921_s28 + $0xe30] sm:$0xff] }
  0x8f   : > { %642 = vst [vmem:[%s2926_s24 + $0x720] sm:$0xff] %v641_v36  ;;  %644 = vst [vmem:[%s2926_s24 + $0x728] sm:$0xff] %v643_v37  ;;  %v647_v39 = vld [vmem:[%s2921_s28 + $0xe38] sm:$0xff]  ;;  %v649_v40 = vld [vmem:[%s2921_s28 + $0xe40] sm:$0xff] }
  0x90   : > { %646 = vst [vmem:[%s2926_s24 + $0x730] sm:$0xff] %v645_v38  ;;  %v651_v41 = vld [vmem:[%s2921_s28 + $0xe48] sm:$0xff]  ;;  %648 = vst [vmem:[%s2926_s24 + $0x738] sm:$0xff] %v647_v39  ;;  %v653_v42 = vld [vmem:[%s2921_s28 + $0xe50] sm:$0xff] }
  0x91   : > { %650 = vst [vmem:[%s2926_s24 + $0x740] sm:$0xff] %v649_v40  ;;  %652 = vst [vmem:[%s2926_s24 + $0x748] sm:$0xff] %v651_v41  ;;  %v655_v43 = vld [vmem:[%s2921_s28 + $0xe58] sm:$0xff]  ;;  %v657_v44 = vld [vmem:[%s2921_s28 + $0xe60] sm:$0xff] }
  0x92   : > { %654 = vst [vmem:[%s2926_s24 + $0x750] sm:$0xff] %v653_v42  ;;  %656 = vst [vmem:[%s2926_s24 + $0x758] sm:$0xff] %v655_v43  ;;  %v659_v45 = vld [vmem:[%s2921_s28 + $0xe68] sm:$0xff]  ;;  %v661_v46 = vld [vmem:[%s2921_s28 + $0xe70] sm:$0xff] }
  0x93   : > { %658 = vst [vmem:[%s2926_s24 + $0x760] sm:$0xff] %v657_v44  ;;  %v663_v47 = vld [vmem:[%s2921_s28 + $0xe78] sm:$0xff]  ;;  %660 = vst [vmem:[%s2926_s24 + $0x768] sm:$0xff] %v659_v45  ;;  %v665_v48 = vld [vmem:[%s2921_s28 + $0xf00] sm:$0xff] }
  0x94   : > { %662 = vst [vmem:[%s2926_s24 + $0x770] sm:$0xff] %v661_v46  ;;  %664 = vst [vmem:[%s2926_s24 + $0x778] sm:$0xff] %v663_v47  ;;  %v667_v49 = vld [vmem:[%s2921_s28 + $0xf08] sm:$0xff]  ;;  %v669_v50 = vld [vmem:[%s2921_s28 + $0xf10] sm:$0xff] }
  0x95   : > { %666 = vst [vmem:[%s2926_s24 + $0x780] sm:$0xff] %v665_v48  ;;  %668 = vst [vmem:[%s2926_s24 + $0x788] sm:$0xff] %v667_v49  ;;  %v671_v51 = vld [vmem:[%s2921_s28 + $0xf18] sm:$0xff]  ;;  %v673_v52 = vld [vmem:[%s2921_s28 + $0xf20] sm:$0xff] }
  0x96   : > { %670 = vst [vmem:[%s2926_s24 + $0x790] sm:$0xff] %v669_v50  ;;  %v675_v53 = vld [vmem:[%s2921_s28 + $0xf28] sm:$0xff]  ;;  %672 = vst [vmem:[%s2926_s24 + $0x798] sm:$0xff] %v671_v51  ;;  %v677_v54 = vld [vmem:[%s2921_s28 + $0xf30] sm:$0xff] }
  0x97   : > { %674 = vst [vmem:[%s2926_s24 + $0x7a0] sm:$0xff] %v673_v52  ;;  %676 = vst [vmem:[%s2926_s24 + $0x7a8] sm:$0xff] %v675_v53  ;;  %v679_v55 = vld [vmem:[%s2921_s28 + $0xf38] sm:$0xff]  ;;  %v681_v56 = vld [vmem:[%s2921_s28 + $0xf40] sm:$0xff] }
  0x98   : > { %678 = vst [vmem:[%s2926_s24 + $0x7b0] sm:$0xff] %v677_v54  ;;  %680 = vst [vmem:[%s2926_s24 + $0x7b8] sm:$0xff] %v679_v55  ;;  %v683_v57 = vld [vmem:[%s2921_s28 + $0xf48] sm:$0xff]  ;;  %v685_v58 = vld [vmem:[%s2921_s28 + $0xf50] sm:$0xff] }
  0x99   : > { %682 = vst [vmem:[%s2926_s24 + $0x7c0] sm:$0xff] %v681_v56  ;;  %v687_v59 = vld [vmem:[%s2921_s28 + $0xf58] sm:$0xff]  ;;  %684 = vst [vmem:[%s2926_s24 + $0x7c8] sm:$0xff] %v683_v57  ;;  %v689_v60 = vld [vmem:[%s2921_s28 + $0xf60] sm:$0xff] }
  0x9a   : > { %686 = vst [vmem:[%s2926_s24 + $0x7d0] sm:$0xff] %v685_v58  ;;  %688 = vst [vmem:[%s2926_s24 + $0x7d8] sm:$0xff] %v687_v59  ;;  %v691_v61 = vld [vmem:[%s2921_s28 + $0xf68] sm:$0xff]  ;;  %v693_v62 = vld [vmem:[%s2921_s28 + $0xf70] sm:$0xff] }
  0x9b   : > { %690 = vst [vmem:[%s2926_s24 + $0x7e0] sm:$0xff] %v689_v60  ;;  %692 = vst [vmem:[%s2926_s24 + $0x7e8] sm:$0xff] %v691_v61  ;;  %v695_v63 = vld [vmem:[%s2921_s28 + $0xf78] sm:$0xff]  ;;  %v697_v0 = vld [vmem:[%s2921_s28 + $0x1000] sm:$0xff] }
  0x9c   : > { %694 = vst [vmem:[%s2926_s24 + $0x7f0] sm:$0xff] %v693_v62  ;;  %v699_v1 = vld [vmem:[%s2921_s28 + $0x1008] sm:$0xff]  ;;  %696 = vst [vmem:[%s2926_s24 + $0x7f8] sm:$0xff] %v695_v63  ;;  %v701_v2 = vld [vmem:[%s2921_s28 + $0x1010] sm:$0xff] }
  0x9d   : > { %698 = vst [vmem:[%s2926_s24 + $0x800] sm:$0xff] %v697_v0  ;;  %700 = vst [vmem:[%s2926_s24 + $0x808] sm:$0xff] %v699_v1  ;;  %v703_v3 = vld [vmem:[%s2921_s28 + $0x1018] sm:$0xff]  ;;  %v705_v4 = vld [vmem:[%s2921_s28 + $0x1020] sm:$0xff] }
  0x9e   : > { %702 = vst [vmem:[%s2926_s24 + $0x810] sm:$0xff] %v701_v2  ;;  %704 = vst [vmem:[%s2926_s24 + $0x818] sm:$0xff] %v703_v3  ;;  %v707_v5 = vld [vmem:[%s2921_s28 + $0x1028] sm:$0xff]  ;;  %v709_v6 = vld [vmem:[%s2921_s28 + $0x1030] sm:$0xff] }
  0x9f   : > { %706 = vst [vmem:[%s2926_s24 + $0x820] sm:$0xff] %v705_v4  ;;  %v711_v7 = vld [vmem:[%s2921_s28 + $0x1038] sm:$0xff]  ;;  %708 = vst [vmem:[%s2926_s24 + $0x828] sm:$0xff] %v707_v5  ;;  %v713_v8 = vld [vmem:[%s2921_s28 + $0x1040] sm:$0xff] }
  0xa0   : > { %710 = vst [vmem:[%s2926_s24 + $0x830] sm:$0xff] %v709_v6  ;;  %712 = vst [vmem:[%s2926_s24 + $0x838] sm:$0xff] %v711_v7  ;;  %v715_v9 = vld [vmem:[%s2921_s28 + $0x1048] sm:$0xff]  ;;  %v717_v10 = vld [vmem:[%s2921_s28 + $0x1050] sm:$0xff] }
  0xa1   : > { %714 = vst [vmem:[%s2926_s24 + $0x840] sm:$0xff] %v713_v8  ;;  %716 = vst [vmem:[%s2926_s24 + $0x848] sm:$0xff] %v715_v9  ;;  %v719_v11 = vld [vmem:[%s2921_s28 + $0x1058] sm:$0xff]  ;;  %v721_v12 = vld [vmem:[%s2921_s28 + $0x1060] sm:$0xff] }
  0xa2   : > { %718 = vst [vmem:[%s2926_s24 + $0x850] sm:$0xff] %v717_v10  ;;  %v723_v13 = vld [vmem:[%s2921_s28 + $0x1068] sm:$0xff]  ;;  %720 = vst [vmem:[%s2926_s24 + $0x858] sm:$0xff] %v719_v11  ;;  %v725_v14 = vld [vmem:[%s2921_s28 + $0x1070] sm:$0xff] }
  0xa3   : > { %722 = vst [vmem:[%s2926_s24 + $0x860] sm:$0xff] %v721_v12  ;;  %724 = vst [vmem:[%s2926_s24 + $0x868] sm:$0xff] %v723_v13  ;;  %v727_v15 = vld [vmem:[%s2921_s28 + $0x1078] sm:$0xff]  ;;  %v729_v16 = vld [vmem:[%s2921_s28 + $0x1100] sm:$0xff] }
  0xa4   : > { %726 = vst [vmem:[%s2926_s24 + $0x870] sm:$0xff] %v725_v14  ;;  %728 = vst [vmem:[%s2926_s24 + $0x878] sm:$0xff] %v727_v15  ;;  %v731_v17 = vld [vmem:[%s2921_s28 + $0x1108] sm:$0xff]  ;;  %v733_v18 = vld [vmem:[%s2921_s28 + $0x1110] sm:$0xff] }
  0xa5   : > { %730 = vst [vmem:[%s2926_s24 + $0x880] sm:$0xff] %v729_v16  ;;  %v735_v19 = vld [vmem:[%s2921_s28 + $0x1118] sm:$0xff]  ;;  %732 = vst [vmem:[%s2926_s24 + $0x888] sm:$0xff] %v731_v17  ;;  %v737_v20 = vld [vmem:[%s2921_s28 + $0x1120] sm:$0xff] }
  0xa6   : > { %734 = vst [vmem:[%s2926_s24 + $0x890] sm:$0xff] %v733_v18  ;;  %736 = vst [vmem:[%s2926_s24 + $0x898] sm:$0xff] %v735_v19  ;;  %v739_v21 = vld [vmem:[%s2921_s28 + $0x1128] sm:$0xff]  ;;  %v741_v22 = vld [vmem:[%s2921_s28 + $0x1130] sm:$0xff] }
  0xa7   : > { %738 = vst [vmem:[%s2926_s24 + $0x8a0] sm:$0xff] %v737_v20  ;;  %740 = vst [vmem:[%s2926_s24 + $0x8a8] sm:$0xff] %v739_v21  ;;  %v743_v23 = vld [vmem:[%s2921_s28 + $0x1138] sm:$0xff]  ;;  %v745_v24 = vld [vmem:[%s2921_s28 + $0x1140] sm:$0xff] }
  0xa8   : > { %742 = vst [vmem:[%s2926_s24 + $0x8b0] sm:$0xff] %v741_v22  ;;  %v747_v25 = vld [vmem:[%s2921_s28 + $0x1148] sm:$0xff]  ;;  %744 = vst [vmem:[%s2926_s24 + $0x8b8] sm:$0xff] %v743_v23  ;;  %v749_v26 = vld [vmem:[%s2921_s28 + $0x1150] sm:$0xff] }
  0xa9   : > { %746 = vst [vmem:[%s2926_s24 + $0x8c0] sm:$0xff] %v745_v24  ;;  %748 = vst [vmem:[%s2926_s24 + $0x8c8] sm:$0xff] %v747_v25  ;;  %v751_v27 = vld [vmem:[%s2921_s28 + $0x1158] sm:$0xff]  ;;  %v753_v28 = vld [vmem:[%s2921_s28 + $0x1160] sm:$0xff] }
  0xaa   : > { %750 = vst [vmem:[%s2926_s24 + $0x8d0] sm:$0xff] %v749_v26  ;;  %752 = vst [vmem:[%s2926_s24 + $0x8d8] sm:$0xff] %v751_v27  ;;  %v755_v29 = vld [vmem:[%s2921_s28 + $0x1168] sm:$0xff]  ;;  %v757_v30 = vld [vmem:[%s2921_s28 + $0x1170] sm:$0xff] }
  0xab   : > { %754 = vst [vmem:[%s2926_s24 + $0x8e0] sm:$0xff] %v753_v28  ;;  %v759_v31 = vld [vmem:[%s2921_s28 + $0x1178] sm:$0xff]  ;;  %756 = vst [vmem:[%s2926_s24 + $0x8e8] sm:$0xff] %v755_v29  ;;  %v761_v32 = vld [vmem:[%s2921_s28 + $0x1200] sm:$0xff] }
  0xac   : > { %758 = vst [vmem:[%s2926_s24 + $0x8f0] sm:$0xff] %v757_v30  ;;  %760 = vst [vmem:[%s2926_s24 + $0x8f8] sm:$0xff] %v759_v31  ;;  %v763_v33 = vld [vmem:[%s2921_s28 + $0x1208] sm:$0xff]  ;;  %v765_v34 = vld [vmem:[%s2921_s28 + $0x1210] sm:$0xff] }
  0xad   : > { %762 = vst [vmem:[%s2926_s24 + $0x900] sm:$0xff] %v761_v32  ;;  %764 = vst [vmem:[%s2926_s24 + $0x908] sm:$0xff] %v763_v33  ;;  %v767_v35 = vld [vmem:[%s2921_s28 + $0x1218] sm:$0xff]  ;;  %v769_v36 = vld [vmem:[%s2921_s28 + $0x1220] sm:$0xff] }
  0xae   : > { %766 = vst [vmem:[%s2926_s24 + $0x910] sm:$0xff] %v765_v34  ;;  %v771_v37 = vld [vmem:[%s2921_s28 + $0x1228] sm:$0xff]  ;;  %768 = vst [vmem:[%s2926_s24 + $0x918] sm:$0xff] %v767_v35  ;;  %v773_v38 = vld [vmem:[%s2921_s28 + $0x1230] sm:$0xff] }
  0xaf   : > { %770 = vst [vmem:[%s2926_s24 + $0x920] sm:$0xff] %v769_v36  ;;  %772 = vst [vmem:[%s2926_s24 + $0x928] sm:$0xff] %v771_v37  ;;  %v775_v39 = vld [vmem:[%s2921_s28 + $0x1238] sm:$0xff]  ;;  %v777_v40 = vld [vmem:[%s2921_s28 + $0x1240] sm:$0xff] }
  0xb0   : > { %774 = vst [vmem:[%s2926_s24 + $0x930] sm:$0xff] %v773_v38  ;;  %776 = vst [vmem:[%s2926_s24 + $0x938] sm:$0xff] %v775_v39  ;;  %v779_v41 = vld [vmem:[%s2921_s28 + $0x1248] sm:$0xff]  ;;  %v781_v42 = vld [vmem:[%s2921_s28 + $0x1250] sm:$0xff] }
  0xb1   : > { %778 = vst [vmem:[%s2926_s24 + $0x940] sm:$0xff] %v777_v40  ;;  %v783_v43 = vld [vmem:[%s2921_s28 + $0x1258] sm:$0xff]  ;;  %780 = vst [vmem:[%s2926_s24 + $0x948] sm:$0xff] %v779_v41  ;;  %v785_v44 = vld [vmem:[%s2921_s28 + $0x1260] sm:$0xff] }
  0xb2   : > { %782 = vst [vmem:[%s2926_s24 + $0x950] sm:$0xff] %v781_v42  ;;  %784 = vst [vmem:[%s2926_s24 + $0x958] sm:$0xff] %v783_v43  ;;  %v787_v45 = vld [vmem:[%s2921_s28 + $0x1268] sm:$0xff]  ;;  %v789_v46 = vld [vmem:[%s2921_s28 + $0x1270] sm:$0xff] }
  0xb3   : > { %786 = vst [vmem:[%s2926_s24 + $0x960] sm:$0xff] %v785_v44  ;;  %788 = vst [vmem:[%s2926_s24 + $0x968] sm:$0xff] %v787_v45  ;;  %v791_v47 = vld [vmem:[%s2921_s28 + $0x1278] sm:$0xff]  ;;  %v793_v48 = vld [vmem:[%s2921_s28 + $0x1300] sm:$0xff] }
  0xb4   : > { %790 = vst [vmem:[%s2926_s24 + $0x970] sm:$0xff] %v789_v46  ;;  %v795_v49 = vld [vmem:[%s2921_s28 + $0x1308] sm:$0xff]  ;;  %792 = vst [vmem:[%s2926_s24 + $0x978] sm:$0xff] %v791_v47  ;;  %v797_v50 = vld [vmem:[%s2921_s28 + $0x1310] sm:$0xff] }
  0xb5   : > { %794 = vst [vmem:[%s2926_s24 + $0x980] sm:$0xff] %v793_v48  ;;  %796 = vst [vmem:[%s2926_s24 + $0x988] sm:$0xff] %v795_v49  ;;  %v799_v51 = vld [vmem:[%s2921_s28 + $0x1318] sm:$0xff]  ;;  %v801_v52 = vld [vmem:[%s2921_s28 + $0x1320] sm:$0xff] }
  0xb6   : > { %798 = vst [vmem:[%s2926_s24 + $0x990] sm:$0xff] %v797_v50  ;;  %800 = vst [vmem:[%s2926_s24 + $0x998] sm:$0xff] %v799_v51  ;;  %v803_v53 = vld [vmem:[%s2921_s28 + $0x1328] sm:$0xff]  ;;  %v805_v54 = vld [vmem:[%s2921_s28 + $0x1330] sm:$0xff] }
  0xb7   : > { %802 = vst [vmem:[%s2926_s24 + $0x9a0] sm:$0xff] %v801_v52  ;;  %v807_v55 = vld [vmem:[%s2921_s28 + $0x1338] sm:$0xff]  ;;  %804 = vst [vmem:[%s2926_s24 + $0x9a8] sm:$0xff] %v803_v53  ;;  %v809_v56 = vld [vmem:[%s2921_s28 + $0x1340] sm:$0xff] }
  0xb8   : > { %806 = vst [vmem:[%s2926_s24 + $0x9b0] sm:$0xff] %v805_v54  ;;  %808 = vst [vmem:[%s2926_s24 + $0x9b8] sm:$0xff] %v807_v55  ;;  %v811_v57 = vld [vmem:[%s2921_s28 + $0x1348] sm:$0xff]  ;;  %v813_v58 = vld [vmem:[%s2921_s28 + $0x1350] sm:$0xff] }
  0xb9   : > { %810 = vst [vmem:[%s2926_s24 + $0x9c0] sm:$0xff] %v809_v56  ;;  %812 = vst [vmem:[%s2926_s24 + $0x9c8] sm:$0xff] %v811_v57  ;;  %v815_v59 = vld [vmem:[%s2921_s28 + $0x1358] sm:$0xff]  ;;  %v817_v60 = vld [vmem:[%s2921_s28 + $0x1360] sm:$0xff] }
  0xba   : > { %814 = vst [vmem:[%s2926_s24 + $0x9d0] sm:$0xff] %v813_v58  ;;  %v819_v61 = vld [vmem:[%s2921_s28 + $0x1368] sm:$0xff]  ;;  %816 = vst [vmem:[%s2926_s24 + $0x9d8] sm:$0xff] %v815_v59  ;;  %v821_v62 = vld [vmem:[%s2921_s28 + $0x1370] sm:$0xff] }
  0xbb   : > { %818 = vst [vmem:[%s2926_s24 + $0x9e0] sm:$0xff] %v817_v60  ;;  %820 = vst [vmem:[%s2926_s24 + $0x9e8] sm:$0xff] %v819_v61  ;;  %v823_v63 = vld [vmem:[%s2921_s28 + $0x1378] sm:$0xff]  ;;  %v825_v0 = vld [vmem:[%s2921_s28 + $0x1400] sm:$0xff] }
  0xbc   : > { %822 = vst [vmem:[%s2926_s24 + $0x9f0] sm:$0xff] %v821_v62  ;;  %824 = vst [vmem:[%s2926_s24 + $0x9f8] sm:$0xff] %v823_v63  ;;  %v827_v1 = vld [vmem:[%s2921_s28 + $0x1408] sm:$0xff]  ;;  %v829_v2 = vld [vmem:[%s2921_s28 + $0x1410] sm:$0xff] }
  0xbd   : > { %826 = vst [vmem:[%s2926_s24 + $0xa00] sm:$0xff] %v825_v0  ;;  %v831_v3 = vld [vmem:[%s2921_s28 + $0x1418] sm:$0xff]  ;;  %828 = vst [vmem:[%s2926_s24 + $0xa08] sm:$0xff] %v827_v1  ;;  %v833_v4 = vld [vmem:[%s2921_s28 + $0x1420] sm:$0xff] }
  0xbe   : > { %830 = vst [vmem:[%s2926_s24 + $0xa10] sm:$0xff] %v829_v2  ;;  %832 = vst [vmem:[%s2926_s24 + $0xa18] sm:$0xff] %v831_v3  ;;  %v835_v5 = vld [vmem:[%s2921_s28 + $0x1428] sm:$0xff]  ;;  %v837_v6 = vld [vmem:[%s2921_s28 + $0x1430] sm:$0xff] }
  0xbf   : > { %834 = vst [vmem:[%s2926_s24 + $0xa20] sm:$0xff] %v833_v4  ;;  %836 = vst [vmem:[%s2926_s24 + $0xa28] sm:$0xff] %v835_v5  ;;  %v839_v7 = vld [vmem:[%s2921_s28 + $0x1438] sm:$0xff]  ;;  %v841_v8 = vld [vmem:[%s2921_s28 + $0x1440] sm:$0xff] }
  0xc0   : > { %838 = vst [vmem:[%s2926_s24 + $0xa30] sm:$0xff] %v837_v6  ;;  %v843_v9 = vld [vmem:[%s2921_s28 + $0x1448] sm:$0xff]  ;;  %840 = vst [vmem:[%s2926_s24 + $0xa38] sm:$0xff] %v839_v7  ;;  %v845_v10 = vld [vmem:[%s2921_s28 + $0x1450] sm:$0xff] }
  0xc1   : > { %842 = vst [vmem:[%s2926_s24 + $0xa40] sm:$0xff] %v841_v8  ;;  %844 = vst [vmem:[%s2926_s24 + $0xa48] sm:$0xff] %v843_v9  ;;  %v847_v11 = vld [vmem:[%s2921_s28 + $0x1458] sm:$0xff]  ;;  %v849_v12 = vld [vmem:[%s2921_s28 + $0x1460] sm:$0xff] }
  0xc2   : > { %846 = vst [vmem:[%s2926_s24 + $0xa50] sm:$0xff] %v845_v10  ;;  %848 = vst [vmem:[%s2926_s24 + $0xa58] sm:$0xff] %v847_v11  ;;  %v851_v13 = vld [vmem:[%s2921_s28 + $0x1468] sm:$0xff]  ;;  %v853_v14 = vld [vmem:[%s2921_s28 + $0x1470] sm:$0xff] }
  0xc3   : > { %850 = vst [vmem:[%s2926_s24 + $0xa60] sm:$0xff] %v849_v12  ;;  %v855_v15 = vld [vmem:[%s2921_s28 + $0x1478] sm:$0xff]  ;;  %852 = vst [vmem:[%s2926_s24 + $0xa68] sm:$0xff] %v851_v13  ;;  %v857_v16 = vld [vmem:[%s2921_s28 + $0x1500] sm:$0xff] }
  0xc4   : > { %854 = vst [vmem:[%s2926_s24 + $0xa70] sm:$0xff] %v853_v14  ;;  %856 = vst [vmem:[%s2926_s24 + $0xa78] sm:$0xff] %v855_v15  ;;  %v859_v17 = vld [vmem:[%s2921_s28 + $0x1508] sm:$0xff]  ;;  %v861_v18 = vld [vmem:[%s2921_s28 + $0x1510] sm:$0xff] }
  0xc5   : > { %858 = vst [vmem:[%s2926_s24 + $0xa80] sm:$0xff] %v857_v16  ;;  %860 = vst [vmem:[%s2926_s24 + $0xa88] sm:$0xff] %v859_v17  ;;  %v863_v19 = vld [vmem:[%s2921_s28 + $0x1518] sm:$0xff]  ;;  %v865_v20 = vld [vmem:[%s2921_s28 + $0x1520] sm:$0xff] }
  0xc6   : > { %862 = vst [vmem:[%s2926_s24 + $0xa90] sm:$0xff] %v861_v18  ;;  %v867_v21 = vld [vmem:[%s2921_s28 + $0x1528] sm:$0xff]  ;;  %864 = vst [vmem:[%s2926_s24 + $0xa98] sm:$0xff] %v863_v19  ;;  %v869_v22 = vld [vmem:[%s2921_s28 + $0x1530] sm:$0xff] }
  0xc7   : > { %866 = vst [vmem:[%s2926_s24 + $0xaa0] sm:$0xff] %v865_v20  ;;  %868 = vst [vmem:[%s2926_s24 + $0xaa8] sm:$0xff] %v867_v21  ;;  %v871_v23 = vld [vmem:[%s2921_s28 + $0x1538] sm:$0xff]  ;;  %v873_v24 = vld [vmem:[%s2921_s28 + $0x1540] sm:$0xff] }
  0xc8   : > { %870 = vst [vmem:[%s2926_s24 + $0xab0] sm:$0xff] %v869_v22  ;;  %872 = vst [vmem:[%s2926_s24 + $0xab8] sm:$0xff] %v871_v23  ;;  %v875_v25 = vld [vmem:[%s2921_s28 + $0x1548] sm:$0xff]  ;;  %v877_v26 = vld [vmem:[%s2921_s28 + $0x1550] sm:$0xff] }
  0xc9   : > { %874 = vst [vmem:[%s2926_s24 + $0xac0] sm:$0xff] %v873_v24  ;;  %v879_v27 = vld [vmem:[%s2921_s28 + $0x1558] sm:$0xff]  ;;  %876 = vst [vmem:[%s2926_s24 + $0xac8] sm:$0xff] %v875_v25  ;;  %v881_v28 = vld [vmem:[%s2921_s28 + $0x1560] sm:$0xff] }
  0xca   : > { %878 = vst [vmem:[%s2926_s24 + $0xad0] sm:$0xff] %v877_v26  ;;  %880 = vst [vmem:[%s2926_s24 + $0xad8] sm:$0xff] %v879_v27  ;;  %v883_v29 = vld [vmem:[%s2921_s28 + $0x1568] sm:$0xff]  ;;  %v885_v30 = vld [vmem:[%s2921_s28 + $0x1570] sm:$0xff] }
  0xcb   : > { %882 = vst [vmem:[%s2926_s24 + $0xae0] sm:$0xff] %v881_v28  ;;  %884 = vst [vmem:[%s2926_s24 + $0xae8] sm:$0xff] %v883_v29  ;;  %v887_v31 = vld [vmem:[%s2921_s28 + $0x1578] sm:$0xff]  ;;  %v889_v32 = vld [vmem:[%s2921_s28 + $0x1600] sm:$0xff] }
  0xcc   : > { %886 = vst [vmem:[%s2926_s24 + $0xaf0] sm:$0xff] %v885_v30  ;;  %v891_v33 = vld [vmem:[%s2921_s28 + $0x1608] sm:$0xff]  ;;  %888 = vst [vmem:[%s2926_s24 + $0xaf8] sm:$0xff] %v887_v31  ;;  %v893_v34 = vld [vmem:[%s2921_s28 + $0x1610] sm:$0xff] }
  0xcd   : > { %890 = vst [vmem:[%s2926_s24 + $0xb00] sm:$0xff] %v889_v32  ;;  %892 = vst [vmem:[%s2926_s24 + $0xb08] sm:$0xff] %v891_v33  ;;  %v895_v35 = vld [vmem:[%s2921_s28 + $0x1618] sm:$0xff]  ;;  %v897_v36 = vld [vmem:[%s2921_s28 + $0x1620] sm:$0xff] }
  0xce   : > { %894 = vst [vmem:[%s2926_s24 + $0xb10] sm:$0xff] %v893_v34  ;;  %896 = vst [vmem:[%s2926_s24 + $0xb18] sm:$0xff] %v895_v35  ;;  %v899_v37 = vld [vmem:[%s2921_s28 + $0x1628] sm:$0xff]  ;;  %v901_v38 = vld [vmem:[%s2921_s28 + $0x1630] sm:$0xff] }
  0xcf   : > { %898 = vst [vmem:[%s2926_s24 + $0xb20] sm:$0xff] %v897_v36  ;;  %v903_v39 = vld [vmem:[%s2921_s28 + $0x1638] sm:$0xff]  ;;  %900 = vst [vmem:[%s2926_s24 + $0xb28] sm:$0xff] %v899_v37  ;;  %v905_v40 = vld [vmem:[%s2921_s28 + $0x1640] sm:$0xff] }
  0xd0   : > { %902 = vst [vmem:[%s2926_s24 + $0xb30] sm:$0xff] %v901_v38  ;;  %904 = vst [vmem:[%s2926_s24 + $0xb38] sm:$0xff] %v903_v39  ;;  %v907_v41 = vld [vmem:[%s2921_s28 + $0x1648] sm:$0xff]  ;;  %v909_v42 = vld [vmem:[%s2921_s28 + $0x1650] sm:$0xff] }
  0xd1   : > { %906 = vst [vmem:[%s2926_s24 + $0xb40] sm:$0xff] %v905_v40  ;;  %908 = vst [vmem:[%s2926_s24 + $0xb48] sm:$0xff] %v907_v41  ;;  %v911_v43 = vld [vmem:[%s2921_s28 + $0x1658] sm:$0xff]  ;;  %v913_v44 = vld [vmem:[%s2921_s28 + $0x1660] sm:$0xff] }
  0xd2   : > { %910 = vst [vmem:[%s2926_s24 + $0xb50] sm:$0xff] %v909_v42  ;;  %v915_v45 = vld [vmem:[%s2921_s28 + $0x1668] sm:$0xff]  ;;  %912 = vst [vmem:[%s2926_s24 + $0xb58] sm:$0xff] %v911_v43  ;;  %v917_v46 = vld [vmem:[%s2921_s28 + $0x1670] sm:$0xff] }
  0xd3   : > { %914 = vst [vmem:[%s2926_s24 + $0xb60] sm:$0xff] %v913_v44  ;;  %916 = vst [vmem:[%s2926_s24 + $0xb68] sm:$0xff] %v915_v45  ;;  %v919_v47 = vld [vmem:[%s2921_s28 + $0x1678] sm:$0xff]  ;;  %v921_v48 = vld [vmem:[%s2921_s28 + $0x1700] sm:$0xff] }
  0xd4   : > { %918 = vst [vmem:[%s2926_s24 + $0xb70] sm:$0xff] %v917_v46  ;;  %920 = vst [vmem:[%s2926_s24 + $0xb78] sm:$0xff] %v919_v47  ;;  %v923_v49 = vld [vmem:[%s2921_s28 + $0x1708] sm:$0xff]  ;;  %v925_v50 = vld [vmem:[%s2921_s28 + $0x1710] sm:$0xff] }
  0xd5   : > { %922 = vst [vmem:[%s2926_s24 + $0xb80] sm:$0xff] %v921_v48  ;;  %v927_v51 = vld [vmem:[%s2921_s28 + $0x1718] sm:$0xff]  ;;  %924 = vst [vmem:[%s2926_s24 + $0xb88] sm:$0xff] %v923_v49  ;;  %v929_v52 = vld [vmem:[%s2921_s28 + $0x1720] sm:$0xff] }
  0xd6   : > { %926 = vst [vmem:[%s2926_s24 + $0xb90] sm:$0xff] %v925_v50  ;;  %928 = vst [vmem:[%s2926_s24 + $0xb98] sm:$0xff] %v927_v51  ;;  %v931_v53 = vld [vmem:[%s2921_s28 + $0x1728] sm:$0xff]  ;;  %v933_v54 = vld [vmem:[%s2921_s28 + $0x1730] sm:$0xff] }
  0xd7   : > { %930 = vst [vmem:[%s2926_s24 + $0xba0] sm:$0xff] %v929_v52  ;;  %932 = vst [vmem:[%s2926_s24 + $0xba8] sm:$0xff] %v931_v53  ;;  %v935_v55 = vld [vmem:[%s2921_s28 + $0x1738] sm:$0xff]  ;;  %v937_v56 = vld [vmem:[%s2921_s28 + $0x1740] sm:$0xff] }
  0xd8   : > { %934 = vst [vmem:[%s2926_s24 + $0xbb0] sm:$0xff] %v933_v54  ;;  %v939_v57 = vld [vmem:[%s2921_s28 + $0x1748] sm:$0xff]  ;;  %936 = vst [vmem:[%s2926_s24 + $0xbb8] sm:$0xff] %v935_v55  ;;  %v941_v58 = vld [vmem:[%s2921_s28 + $0x1750] sm:$0xff] }
  0xd9   : > { %938 = vst [vmem:[%s2926_s24 + $0xbc0] sm:$0xff] %v937_v56  ;;  %940 = vst [vmem:[%s2926_s24 + $0xbc8] sm:$0xff] %v939_v57  ;;  %v943_v59 = vld [vmem:[%s2921_s28 + $0x1758] sm:$0xff]  ;;  %v945_v60 = vld [vmem:[%s2921_s28 + $0x1760] sm:$0xff] }
  0xda   : > { %942 = vst [vmem:[%s2926_s24 + $0xbd0] sm:$0xff] %v941_v58  ;;  %944 = vst [vmem:[%s2926_s24 + $0xbd8] sm:$0xff] %v943_v59  ;;  %v947_v61 = vld [vmem:[%s2921_s28 + $0x1768] sm:$0xff]  ;;  %v949_v62 = vld [vmem:[%s2921_s28 + $0x1770] sm:$0xff] }
  0xdb   : > { %946 = vst [vmem:[%s2926_s24 + $0xbe0] sm:$0xff] %v945_v60  ;;  %v951_v63 = vld [vmem:[%s2921_s28 + $0x1778] sm:$0xff]  ;;  %948 = vst [vmem:[%s2926_s24 + $0xbe8] sm:$0xff] %v947_v61  ;;  %v953_v0 = vld [vmem:[%s2921_s28 + $0x1800] sm:$0xff] }
  0xdc   : > { %950 = vst [vmem:[%s2926_s24 + $0xbf0] sm:$0xff] %v949_v62  ;;  %952 = vst [vmem:[%s2926_s24 + $0xbf8] sm:$0xff] %v951_v63  ;;  %v955_v1 = vld [vmem:[%s2921_s28 + $0x1808] sm:$0xff]  ;;  %v957_v2 = vld [vmem:[%s2921_s28 + $0x1810] sm:$0xff] }
  0xdd   : > { %954 = vst [vmem:[%s2926_s24 + $0xc00] sm:$0xff] %v953_v0  ;;  %956 = vst [vmem:[%s2926_s24 + $0xc08] sm:$0xff] %v955_v1  ;;  %v959_v3 = vld [vmem:[%s2921_s28 + $0x1818] sm:$0xff]  ;;  %v961_v4 = vld [vmem:[%s2921_s28 + $0x1820] sm:$0xff] }
  0xde   : > { %958 = vst [vmem:[%s2926_s24 + $0xc10] sm:$0xff] %v957_v2  ;;  %v963_v5 = vld [vmem:[%s2921_s28 + $0x1828] sm:$0xff]  ;;  %960 = vst [vmem:[%s2926_s24 + $0xc18] sm:$0xff] %v959_v3  ;;  %v965_v6 = vld [vmem:[%s2921_s28 + $0x1830] sm:$0xff] }
  0xdf   : > { %962 = vst [vmem:[%s2926_s24 + $0xc20] sm:$0xff] %v961_v4  ;;  %964 = vst [vmem:[%s2926_s24 + $0xc28] sm:$0xff] %v963_v5  ;;  %v967_v7 = vld [vmem:[%s2921_s28 + $0x1838] sm:$0xff]  ;;  %v969_v8 = vld [vmem:[%s2921_s28 + $0x1840] sm:$0xff] }
  0xe0   : > { %966 = vst [vmem:[%s2926_s24 + $0xc30] sm:$0xff] %v965_v6  ;;  %968 = vst [vmem:[%s2926_s24 + $0xc38] sm:$0xff] %v967_v7  ;;  %v971_v9 = vld [vmem:[%s2921_s28 + $0x1848] sm:$0xff]  ;;  %v973_v10 = vld [vmem:[%s2921_s28 + $0x1850] sm:$0xff] }
  0xe1   : > { %970 = vst [vmem:[%s2926_s24 + $0xc40] sm:$0xff] %v969_v8  ;;  %v975_v11 = vld [vmem:[%s2921_s28 + $0x1858] sm:$0xff]  ;;  %972 = vst [vmem:[%s2926_s24 + $0xc48] sm:$0xff] %v971_v9  ;;  %v977_v12 = vld [vmem:[%s2921_s28 + $0x1860] sm:$0xff] }
  0xe2   : > { %974 = vst [vmem:[%s2926_s24 + $0xc50] sm:$0xff] %v973_v10  ;;  %976 = vst [vmem:[%s2926_s24 + $0xc58] sm:$0xff] %v975_v11  ;;  %v979_v13 = vld [vmem:[%s2921_s28 + $0x1868] sm:$0xff]  ;;  %v981_v14 = vld [vmem:[%s2921_s28 + $0x1870] sm:$0xff] }
  0xe3   : > { %978 = vst [vmem:[%s2926_s24 + $0xc60] sm:$0xff] %v977_v12  ;;  %980 = vst [vmem:[%s2926_s24 + $0xc68] sm:$0xff] %v979_v13  ;;  %v983_v15 = vld [vmem:[%s2921_s28 + $0x1878] sm:$0xff]  ;;  %v985_v16 = vld [vmem:[%s2921_s28 + $0x1900] sm:$0xff] }
  0xe4   : > { %982 = vst [vmem:[%s2926_s24 + $0xc70] sm:$0xff] %v981_v14  ;;  %v987_v17 = vld [vmem:[%s2921_s28 + $0x1908] sm:$0xff]  ;;  %984 = vst [vmem:[%s2926_s24 + $0xc78] sm:$0xff] %v983_v15  ;;  %v989_v18 = vld [vmem:[%s2921_s28 + $0x1910] sm:$0xff] }
  0xe5   : > { %986 = vst [vmem:[%s2926_s24 + $0xc80] sm:$0xff] %v985_v16  ;;  %988 = vst [vmem:[%s2926_s24 + $0xc88] sm:$0xff] %v987_v17  ;;  %v991_v19 = vld [vmem:[%s2921_s28 + $0x1918] sm:$0xff]  ;;  %v993_v20 = vld [vmem:[%s2921_s28 + $0x1920] sm:$0xff] }
  0xe6   : > { %990 = vst [vmem:[%s2926_s24 + $0xc90] sm:$0xff] %v989_v18  ;;  %992 = vst [vmem:[%s2926_s24 + $0xc98] sm:$0xff] %v991_v19  ;;  %v995_v21 = vld [vmem:[%s2921_s28 + $0x1928] sm:$0xff]  ;;  %v997_v22 = vld [vmem:[%s2921_s28 + $0x1930] sm:$0xff] }
  0xe7   : > { %994 = vst [vmem:[%s2926_s24 + $0xca0] sm:$0xff] %v993_v20  ;;  %v999_v23 = vld [vmem:[%s2921_s28 + $0x1938] sm:$0xff]  ;;  %996 = vst [vmem:[%s2926_s24 + $0xca8] sm:$0xff] %v995_v21  ;;  %v1001_v24 = vld [vmem:[%s2921_s28 + $0x1940] sm:$0xff] }
  0xe8   : > { %998 = vst [vmem:[%s2926_s24 + $0xcb0] sm:$0xff] %v997_v22  ;;  %1000 = vst [vmem:[%s2926_s24 + $0xcb8] sm:$0xff] %v999_v23  ;;  %v1003_v25 = vld [vmem:[%s2921_s28 + $0x1948] sm:$0xff]  ;;  %v1005_v26 = vld [vmem:[%s2921_s28 + $0x1950] sm:$0xff] }
  0xe9   : > { %1002 = vst [vmem:[%s2926_s24 + $0xcc0] sm:$0xff] %v1001_v24  ;;  %1004 = vst [vmem:[%s2926_s24 + $0xcc8] sm:$0xff] %v1003_v25  ;;  %v1007_v27 = vld [vmem:[%s2921_s28 + $0x1958] sm:$0xff]  ;;  %v1009_v28 = vld [vmem:[%s2921_s28 + $0x1960] sm:$0xff] }
  0xea   : > { %1006 = vst [vmem:[%s2926_s24 + $0xcd0] sm:$0xff] %v1005_v26  ;;  %v1011_v29 = vld [vmem:[%s2921_s28 + $0x1968] sm:$0xff]  ;;  %1008 = vst [vmem:[%s2926_s24 + $0xcd8] sm:$0xff] %v1007_v27  ;;  %v1013_v30 = vld [vmem:[%s2921_s28 + $0x1970] sm:$0xff] }
  0xeb   : > { %1010 = vst [vmem:[%s2926_s24 + $0xce0] sm:$0xff] %v1009_v28  ;;  %1012 = vst [vmem:[%s2926_s24 + $0xce8] sm:$0xff] %v1011_v29  ;;  %v1015_v31 = vld [vmem:[%s2921_s28 + $0x1978] sm:$0xff]  ;;  %v1017_v32 = vld [vmem:[%s2921_s28 + $0x1a00] sm:$0xff] }
  0xec   : > { %1014 = vst [vmem:[%s2926_s24 + $0xcf0] sm:$0xff] %v1013_v30  ;;  %1016 = vst [vmem:[%s2926_s24 + $0xcf8] sm:$0xff] %v1015_v31  ;;  %v1019_v33 = vld [vmem:[%s2921_s28 + $0x1a08] sm:$0xff]  ;;  %v1021_v34 = vld [vmem:[%s2921_s28 + $0x1a10] sm:$0xff] }
  0xed   : > { %1018 = vst [vmem:[%s2926_s24 + $0xd00] sm:$0xff] %v1017_v32  ;;  %v1023_v35 = vld [vmem:[%s2921_s28 + $0x1a18] sm:$0xff]  ;;  %1020 = vst [vmem:[%s2926_s24 + $0xd08] sm:$0xff] %v1019_v33  ;;  %v1025_v36 = vld [vmem:[%s2921_s28 + $0x1a20] sm:$0xff] }
  0xee   : > { %1022 = vst [vmem:[%s2926_s24 + $0xd10] sm:$0xff] %v1021_v34  ;;  %1024 = vst [vmem:[%s2926_s24 + $0xd18] sm:$0xff] %v1023_v35  ;;  %v1027_v37 = vld [vmem:[%s2921_s28 + $0x1a28] sm:$0xff]  ;;  %v1029_v38 = vld [vmem:[%s2921_s28 + $0x1a30] sm:$0xff] }
  0xef   : > { %1026 = vst [vmem:[%s2926_s24 + $0xd20] sm:$0xff] %v1025_v36  ;;  %1028 = vst [vmem:[%s2926_s24 + $0xd28] sm:$0xff] %v1027_v37  ;;  %v1031_v39 = vld [vmem:[%s2921_s28 + $0x1a38] sm:$0xff]  ;;  %v1033_v40 = vld [vmem:[%s2921_s28 + $0x1a40] sm:$0xff] }
  0xf0   : > { %1030 = vst [vmem:[%s2926_s24 + $0xd30] sm:$0xff] %v1029_v38  ;;  %v1035_v41 = vld [vmem:[%s2921_s28 + $0x1a48] sm:$0xff]  ;;  %1032 = vst [vmem:[%s2926_s24 + $0xd38] sm:$0xff] %v1031_v39  ;;  %v1037_v42 = vld [vmem:[%s2921_s28 + $0x1a50] sm:$0xff] }
  0xf1   : > { %1034 = vst [vmem:[%s2926_s24 + $0xd40] sm:$0xff] %v1033_v40  ;;  %1036 = vst [vmem:[%s2926_s24 + $0xd48] sm:$0xff] %v1035_v41  ;;  %v1039_v43 = vld [vmem:[%s2921_s28 + $0x1a58] sm:$0xff]  ;;  %v1041_v44 = vld [vmem:[%s2921_s28 + $0x1a60] sm:$0xff] }
  0xf2   : > { %1038 = vst [vmem:[%s2926_s24 + $0xd50] sm:$0xff] %v1037_v42  ;;  %1040 = vst [vmem:[%s2926_s24 + $0xd58] sm:$0xff] %v1039_v43  ;;  %v1043_v45 = vld [vmem:[%s2921_s28 + $0x1a68] sm:$0xff]  ;;  %v1045_v46 = vld [vmem:[%s2921_s28 + $0x1a70] sm:$0xff] }
  0xf3   : > { %1042 = vst [vmem:[%s2926_s24 + $0xd60] sm:$0xff] %v1041_v44  ;;  %v1047_v47 = vld [vmem:[%s2921_s28 + $0x1a78] sm:$0xff]  ;;  %1044 = vst [vmem:[%s2926_s24 + $0xd68] sm:$0xff] %v1043_v45  ;;  %v1049_v48 = vld [vmem:[%s2921_s28 + $0x1b00] sm:$0xff] }
  0xf4   : > { %1046 = vst [vmem:[%s2926_s24 + $0xd70] sm:$0xff] %v1045_v46  ;;  %1048 = vst [vmem:[%s2926_s24 + $0xd78] sm:$0xff] %v1047_v47  ;;  %v1051_v49 = vld [vmem:[%s2921_s28 + $0x1b08] sm:$0xff]  ;;  %v1053_v50 = vld [vmem:[%s2921_s28 + $0x1b10] sm:$0xff] }
  0xf5   : > { %1050 = vst [vmem:[%s2926_s24 + $0xd80] sm:$0xff] %v1049_v48  ;;  %1052 = vst [vmem:[%s2926_s24 + $0xd88] sm:$0xff] %v1051_v49  ;;  %v1055_v51 = vld [vmem:[%s2921_s28 + $0x1b18] sm:$0xff]  ;;  %v1057_v52 = vld [vmem:[%s2921_s28 + $0x1b20] sm:$0xff] }
  0xf6   : > { %1054 = vst [vmem:[%s2926_s24 + $0xd90] sm:$0xff] %v1053_v50  ;;  %v1059_v53 = vld [vmem:[%s2921_s28 + $0x1b28] sm:$0xff]  ;;  %1056 = vst [vmem:[%s2926_s24 + $0xd98] sm:$0xff] %v1055_v51  ;;  %v1061_v54 = vld [vmem:[%s2921_s28 + $0x1b30] sm:$0xff] }
  0xf7   : > { %1058 = vst [vmem:[%s2926_s24 + $0xda0] sm:$0xff] %v1057_v52  ;;  %1060 = vst [vmem:[%s2926_s24 + $0xda8] sm:$0xff] %v1059_v53  ;;  %v1063_v55 = vld [vmem:[%s2921_s28 + $0x1b38] sm:$0xff]  ;;  %v1065_v56 = vld [vmem:[%s2921_s28 + $0x1b40] sm:$0xff] }
  0xf8   : > { %1062 = vst [vmem:[%s2926_s24 + $0xdb0] sm:$0xff] %v1061_v54  ;;  %1064 = vst [vmem:[%s2926_s24 + $0xdb8] sm:$0xff] %v1063_v55  ;;  %v1067_v57 = vld [vmem:[%s2921_s28 + $0x1b48] sm:$0xff]  ;;  %v1069_v58 = vld [vmem:[%s2921_s28 + $0x1b50] sm:$0xff] }
  0xf9   : > { %1066 = vst [vmem:[%s2926_s24 + $0xdc0] sm:$0xff] %v1065_v56  ;;  %v1071_v59 = vld [vmem:[%s2921_s28 + $0x1b58] sm:$0xff]  ;;  %1068 = vst [vmem:[%s2926_s24 + $0xdc8] sm:$0xff] %v1067_v57  ;;  %v1073_v60 = vld [vmem:[%s2921_s28 + $0x1b60] sm:$0xff] }
  0xfa   : > { %1070 = vst [vmem:[%s2926_s24 + $0xdd0] sm:$0xff] %v1069_v58  ;;  %1072 = vst [vmem:[%s2926_s24 + $0xdd8] sm:$0xff] %v1071_v59  ;;  %v1075_v61 = vld [vmem:[%s2921_s28 + $0x1b68] sm:$0xff]  ;;  %v1077_v62 = vld [vmem:[%s2921_s28 + $0x1b70] sm:$0xff] }
  0xfb   : > { %1074 = vst [vmem:[%s2926_s24 + $0xde0] sm:$0xff] %v1073_v60  ;;  %1076 = vst [vmem:[%s2926_s24 + $0xde8] sm:$0xff] %v1075_v61  ;;  %v1079_v63 = vld [vmem:[%s2921_s28 + $0x1b78] sm:$0xff]  ;;  %v1081_v0 = vld [vmem:[%s2921_s28 + $0x1c00] sm:$0xff] }
  0xfc   : > { %1078 = vst [vmem:[%s2926_s24 + $0xdf0] sm:$0xff] %v1077_v62  ;;  %v1083_v1 = vld [vmem:[%s2921_s28 + $0x1c08] sm:$0xff]  ;;  %1080 = vst [vmem:[%s2926_s24 + $0xdf8] sm:$0xff] %v1079_v63  ;;  %v1085_v2 = vld [vmem:[%s2921_s28 + $0x1c10] sm:$0xff] }
  0xfd   : > { %1082 = vst [vmem:[%s2926_s24 + $0xe00] sm:$0xff] %v1081_v0  ;;  %1084 = vst [vmem:[%s2926_s24 + $0xe08] sm:$0xff] %v1083_v1  ;;  %v1087_v3 = vld [vmem:[%s2921_s28 + $0x1c18] sm:$0xff]  ;;  %v1089_v4 = vld [vmem:[%s2921_s28 + $0x1c20] sm:$0xff] }
  0xfe   : > { %1086 = vst [vmem:[%s2926_s24 + $0xe10] sm:$0xff] %v1085_v2  ;;  %1088 = vst [vmem:[%s2926_s24 + $0xe18] sm:$0xff] %v1087_v3  ;;  %v1091_v5 = vld [vmem:[%s2921_s28 + $0x1c28] sm:$0xff]  ;;  %v1093_v6 = vld [vmem:[%s2921_s28 + $0x1c30] sm:$0xff] }
  0xff   : > { %1090 = vst [vmem:[%s2926_s24 + $0xe20] sm:$0xff] %v1089_v4  ;;  %v1095_v7 = vld [vmem:[%s2921_s28 + $0x1c38] sm:$0xff]  ;;  %1092 = vst [vmem:[%s2926_s24 + $0xe28] sm:$0xff] %v1091_v5  ;;  %v1097_v8 = vld [vmem:[%s2921_s28 + $0x1c40] sm:$0xff] }
 0x100   : > { %1094 = vst [vmem:[%s2926_s24 + $0xe30] sm:$0xff] %v1093_v6  ;;  %1096 = vst [vmem:[%s2926_s24 + $0xe38] sm:$0xff] %v1095_v7  ;;  %v1099_v9 = vld [vmem:[%s2921_s28 + $0x1c48] sm:$0xff]  ;;  %v1101_v10 = vld [vmem:[%s2921_s28 + $0x1c50] sm:$0xff] }
 0x101   : > { %1098 = vst [vmem:[%s2926_s24 + $0xe40] sm:$0xff] %v1097_v8  ;;  %1100 = vst [vmem:[%s2926_s24 + $0xe48] sm:$0xff] %v1099_v9  ;;  %v1103_v11 = vld [vmem:[%s2921_s28 + $0x1c58] sm:$0xff]  ;;  %v1105_v12 = vld [vmem:[%s2921_s28 + $0x1c60] sm:$0xff] }
 0x102   : > { %1102 = vst [vmem:[%s2926_s24 + $0xe50] sm:$0xff] %v1101_v10  ;;  %v1107_v13 = vld [vmem:[%s2921_s28 + $0x1c68] sm:$0xff]  ;;  %1104 = vst [vmem:[%s2926_s24 + $0xe58] sm:$0xff] %v1103_v11  ;;  %v1109_v14 = vld [vmem:[%s2921_s28 + $0x1c70] sm:$0xff] }
 0x103   : > { %1106 = vst [vmem:[%s2926_s24 + $0xe60] sm:$0xff] %v1105_v12  ;;  %1108 = vst [vmem:[%s2926_s24 + $0xe68] sm:$0xff] %v1107_v13  ;;  %v1111_v15 = vld [vmem:[%s2921_s28 + $0x1c78] sm:$0xff]  ;;  %v1113_v16 = vld [vmem:[%s2921_s28 + $0x1d00] sm:$0xff] }
 0x104   : > { %1110 = vst [vmem:[%s2926_s24 + $0xe70] sm:$0xff] %v1109_v14  ;;  %1112 = vst [vmem:[%s2926_s24 + $0xe78] sm:$0xff] %v1111_v15  ;;  %v1115_v17 = vld [vmem:[%s2921_s28 + $0x1d08] sm:$0xff]  ;;  %v1117_v18 = vld [vmem:[%s2921_s28 + $0x1d10] sm:$0xff] }
 0x105   : > { %1114 = vst [vmem:[%s2926_s24 + $0xe80] sm:$0xff] %v1113_v16  ;;  %v1119_v19 = vld [vmem:[%s2921_s28 + $0x1d18] sm:$0xff]  ;;  %1116 = vst [vmem:[%s2926_s24 + $0xe88] sm:$0xff] %v1115_v17  ;;  %v1121_v20 = vld [vmem:[%s2921_s28 + $0x1d20] sm:$0xff] }
 0x106   : > { %1118 = vst [vmem:[%s2926_s24 + $0xe90] sm:$0xff] %v1117_v18  ;;  %1120 = vst [vmem:[%s2926_s24 + $0xe98] sm:$0xff] %v1119_v19  ;;  %v1123_v21 = vld [vmem:[%s2921_s28 + $0x1d28] sm:$0xff]  ;;  %v1125_v22 = vld [vmem:[%s2921_s28 + $0x1d30] sm:$0xff] }
 0x107   : > { %1122 = vst [vmem:[%s2926_s24 + $0xea0] sm:$0xff] %v1121_v20  ;;  %1124 = vst [vmem:[%s2926_s24 + $0xea8] sm:$0xff] %v1123_v21  ;;  %v1127_v23 = vld [vmem:[%s2921_s28 + $0x1d38] sm:$0xff]  ;;  %v1129_v24 = vld [vmem:[%s2921_s28 + $0x1d40] sm:$0xff] }
 0x108   : > { %1126 = vst [vmem:[%s2926_s24 + $0xeb0] sm:$0xff] %v1125_v22  ;;  %v1131_v25 = vld [vmem:[%s2921_s28 + $0x1d48] sm:$0xff]  ;;  %1128 = vst [vmem:[%s2926_s24 + $0xeb8] sm:$0xff] %v1127_v23  ;;  %v1133_v26 = vld [vmem:[%s2921_s28 + $0x1d50] sm:$0xff] }
 0x109   : > { %1130 = vst [vmem:[%s2926_s24 + $0xec0] sm:$0xff] %v1129_v24  ;;  %1132 = vst [vmem:[%s2926_s24 + $0xec8] sm:$0xff] %v1131_v25  ;;  %v1135_v27 = vld [vmem:[%s2921_s28 + $0x1d58] sm:$0xff]  ;;  %v1137_v28 = vld [vmem:[%s2921_s28 + $0x1d60] sm:$0xff] }
 0x10a   : > { %1134 = vst [vmem:[%s2926_s24 + $0xed0] sm:$0xff] %v1133_v26  ;;  %1136 = vst [vmem:[%s2926_s24 + $0xed8] sm:$0xff] %v1135_v27  ;;  %v1139_v29 = vld [vmem:[%s2921_s28 + $0x1d68] sm:$0xff]  ;;  %v1141_v30 = vld [vmem:[%s2921_s28 + $0x1d70] sm:$0xff] }
 0x10b   : > { %1138 = vst [vmem:[%s2926_s24 + $0xee0] sm:$0xff] %v1137_v28  ;;  %v1143_v31 = vld [vmem:[%s2921_s28 + $0x1d78] sm:$0xff]  ;;  %1140 = vst [vmem:[%s2926_s24 + $0xee8] sm:$0xff] %v1139_v29  ;;  %v1145_v32 = vld [vmem:[%s2921_s28 + $0x1e00] sm:$0xff] }
 0x10c   : > { %1142 = vst [vmem:[%s2926_s24 + $0xef0] sm:$0xff] %v1141_v30  ;;  %1144 = vst [vmem:[%s2926_s24 + $0xef8] sm:$0xff] %v1143_v31  ;;  %v1147_v33 = vld [vmem:[%s2921_s28 + $0x1e08] sm:$0xff]  ;;  %v1149_v34 = vld [vmem:[%s2921_s28 + $0x1e10] sm:$0xff] }
 0x10d   : > { %1146 = vst [vmem:[%s2926_s24 + $0xf00] sm:$0xff] %v1145_v32  ;;  %1148 = vst [vmem:[%s2926_s24 + $0xf08] sm:$0xff] %v1147_v33  ;;  %v1151_v35 = vld [vmem:[%s2921_s28 + $0x1e18] sm:$0xff]  ;;  %v1153_v36 = vld [vmem:[%s2921_s28 + $0x1e20] sm:$0xff] }
 0x10e   : > { %1150 = vst [vmem:[%s2926_s24 + $0xf10] sm:$0xff] %v1149_v34  ;;  %v1155_v37 = vld [vmem:[%s2921_s28 + $0x1e28] sm:$0xff]  ;;  %1152 = vst [vmem:[%s2926_s24 + $0xf18] sm:$0xff] %v1151_v35  ;;  %v1157_v38 = vld [vmem:[%s2921_s28 + $0x1e30] sm:$0xff] }
 0x10f   : > { %1154 = vst [vmem:[%s2926_s24 + $0xf20] sm:$0xff] %v1153_v36  ;;  %1156 = vst [vmem:[%s2926_s24 + $0xf28] sm:$0xff] %v1155_v37  ;;  %v1159_v39 = vld [vmem:[%s2921_s28 + $0x1e38] sm:$0xff]  ;;  %v1161_v40 = vld [vmem:[%s2921_s28 + $0x1e40] sm:$0xff] }
 0x110   : > { %1158 = vst [vmem:[%s2926_s24 + $0xf30] sm:$0xff] %v1157_v38  ;;  %1160 = vst [vmem:[%s2926_s24 + $0xf38] sm:$0xff] %v1159_v39  ;;  %v1163_v41 = vld [vmem:[%s2921_s28 + $0x1e48] sm:$0xff]  ;;  %v1165_v42 = vld [vmem:[%s2921_s28 + $0x1e50] sm:$0xff] }
 0x111   : > { %1162 = vst [vmem:[%s2926_s24 + $0xf40] sm:$0xff] %v1161_v40  ;;  %v1167_v43 = vld [vmem:[%s2921_s28 + $0x1e58] sm:$0xff]  ;;  %1164 = vst [vmem:[%s2926_s24 + $0xf48] sm:$0xff] %v1163_v41  ;;  %v1169_v44 = vld [vmem:[%s2921_s28 + $0x1e60] sm:$0xff] }
 0x112   : > { %1166 = vst [vmem:[%s2926_s24 + $0xf50] sm:$0xff] %v1165_v42  ;;  %1168 = vst [vmem:[%s2926_s24 + $0xf58] sm:$0xff] %v1167_v43  ;;  %v1171_v45 = vld [vmem:[%s2921_s28 + $0x1e68] sm:$0xff]  ;;  %v1173_v46 = vld [vmem:[%s2921_s28 + $0x1e70] sm:$0xff] }
 0x113   : > { %1170 = vst [vmem:[%s2926_s24 + $0xf60] sm:$0xff] %v1169_v44  ;;  %1172 = vst [vmem:[%s2926_s24 + $0xf68] sm:$0xff] %v1171_v45  ;;  %v1175_v47 = vld [vmem:[%s2921_s28 + $0x1e78] sm:$0xff]  ;;  %v1177_v48 = vld [vmem:[%s2921_s28 + $0x1f00] sm:$0xff] }
 0x114   : > { %1174 = vst [vmem:[%s2926_s24 + $0xf70] sm:$0xff] %v1173_v46  ;;  %v1179_v49 = vld [vmem:[%s2921_s28 + $0x1f08] sm:$0xff]  ;;  %1176 = vst [vmem:[%s2926_s24 + $0xf78] sm:$0xff] %v1175_v47  ;;  %v1181_v50 = vld [vmem:[%s2921_s28 + $0x1f10] sm:$0xff] }
 0x115   : > { %1178 = vst [vmem:[%s2926_s24 + $0xf80] sm:$0xff] %v1177_v48  ;;  %1180 = vst [vmem:[%s2926_s24 + $0xf88] sm:$0xff] %v1179_v49  ;;  %v1183_v51 = vld [vmem:[%s2921_s28 + $0x1f18] sm:$0xff]  ;;  %v1185_v52 = vld [vmem:[%s2921_s28 + $0x1f20] sm:$0xff] }
 0x116   : > { %1182 = vst [vmem:[%s2926_s24 + $0xf90] sm:$0xff] %v1181_v50  ;;  %1184 = vst [vmem:[%s2926_s24 + $0xf98] sm:$0xff] %v1183_v51  ;;  %v1187_v53 = vld [vmem:[%s2921_s28 + $0x1f28] sm:$0xff]  ;;  %v1189_v54 = vld [vmem:[%s2921_s28 + $0x1f30] sm:$0xff] }
 0x117   : > { %1186 = vst [vmem:[%s2926_s24 + $0xfa0] sm:$0xff] %v1185_v52  ;;  %v1191_v55 = vld [vmem:[%s2921_s28 + $0x1f38] sm:$0xff]  ;;  %1188 = vst [vmem:[%s2926_s24 + $0xfa8] sm:$0xff] %v1187_v53  ;;  %v1193_v56 = vld [vmem:[%s2921_s28 + $0x1f40] sm:$0xff] }
 0x118   : > { %1190 = vst [vmem:[%s2926_s24 + $0xfb0] sm:$0xff] %v1189_v54  ;;  %1192 = vst [vmem:[%s2926_s24 + $0xfb8] sm:$0xff] %v1191_v55  ;;  %v1195_v57 = vld [vmem:[%s2921_s28 + $0x1f48] sm:$0xff]  ;;  %v1197_v58 = vld [vmem:[%s2921_s28 + $0x1f50] sm:$0xff] }
 0x119   : > { %1194 = vst [vmem:[%s2926_s24 + $0xfc0] sm:$0xff] %v1193_v56  ;;  %1196 = vst [vmem:[%s2926_s24 + $0xfc8] sm:$0xff] %v1195_v57  ;;  %v1199_v59 = vld [vmem:[%s2921_s28 + $0x1f58] sm:$0xff]  ;;  %v1201_v60 = vld [vmem:[%s2921_s28 + $0x1f60] sm:$0xff] }
 0x11a   : > { %1198 = vst [vmem:[%s2926_s24 + $0xfd0] sm:$0xff] %v1197_v58  ;;  %v1203_v61 = vld [vmem:[%s2921_s28 + $0x1f68] sm:$0xff]  ;;  %1200 = vst [vmem:[%s2926_s24 + $0xfd8] sm:$0xff] %v1199_v59  ;;  %v1205_v62 = vld [vmem:[%s2921_s28 + $0x1f70] sm:$0xff] }
 0x11b   : > { %1202 = vst [vmem:[%s2926_s24 + $0xfe0] sm:$0xff] %v1201_v60  ;;  %1204 = vst [vmem:[%s2926_s24 + $0xfe8] sm:$0xff] %v1203_v61  ;;  %v1207_v63 = vld [vmem:[%s2921_s28 + $0x1f78] sm:$0xff] }
 0x11c   : > { %1206 = vst [vmem:[%s2926_s24 + $0xff0] sm:$0xff] %v1205_v62  ;;  %1208 = vst [vmem:[%s2926_s24 + $0xff8] sm:$0xff] %v1207_v63 }
 0x11d PF: > { %p2655_p8 = scmp.ge.s32.totalorder %s2814_s20, 1  ;;  %p1228_p9 = scmp.lt.s32.totalorder %s2814_s20, 13 }
 0x11f   : > { %p1229_p10 = pnand %p2655_p8, %p1228_p9 }
 0x120   : > { %s1235_s29 = sand.u32 (!%p1229_p10), 1, %s2782_s12   ;;  %p1276_p11 = scmp.lt.s32.totalorder (!%p1229_p10), %s2798_s16, 2 }
 0x121   : > { %1232 = sbr.rel (%p1229_p10) target bundleno = 765 (0x2fd), region = 51  ;;  %s2656_s30 = sshll.u32 (!%p1229_p10), %s1235_s29, 12 }
 0x122   : > { %s3952_s5 = scalar_lea.vmem (!%p1229_p10), [#allocation2], %s2656_s30  ;;  %s2660_s26 = sshll.u32 (!%p1229_p10), %s2790_s14, 4 }
 0x123   : > { %p1288_p12 = scmp.lt.s32.totalorder (!%p1229_p10), %s2794_s15, 1  ;;  %p4496_p13 = scmp.lt.s32.totalorder (!%p1229_p10), %s2660_s26, 31 }
 0x126   : > { %v1540_v0 = vld [vmem:[%s3952_s5 + $0x788] sm:$0xff]  ;;  %v1542_v1 = vld [vmem:[%s3952_s5 + $0x798] sm:$0xff]  ;;  %v1539_v2 = vld [vmem:[%s3952_s5 + $0x780] sm:$0xff]  ;;  %s4616_s16 = smov (!%p1276_p11, %s2798_s16), 2  ;;  %s4618_s15 = smov (!%p1288_p12, %s2794_s15), 1 }
 0x127   : > { %1829 = vmatprep.subr.mxu0 %v1540_v0  ;;  %1900 = vmatprep.subr.mxu1 %v1542_v1  ;;  %v1541_v3 = vld [vmem:[%s3952_s5 + $0x790] sm:$0xff]  ;;  %v1524_v4 = vld [vmem:[%s3952_s5 + $0x708] sm:$0xff]  ;;  %v1526_v5 = vld [vmem:[%s3952_s5 + $0x718] sm:$0xff]  ;;  %s2667_s12 = sshll.u32 %s4616_s16, 2  ;;  %s2659_s9 = sshll.u32 %s4616_s16, 1 }
 0x128   : > { %1830 = vmatpush1.msra.mxu0 %v1539_v2  ;;  %1901 = vmatpush1.msra.mxu1 %v1541_v3  ;;  %v1523_v6 = vld [vmem:[%s3952_s5 + $0x700] sm:$0xff]  ;;  %v1525_v7 = vld [vmem:[%s3952_s5 + $0x710] sm:$0xff]  ;;  %v1508_v8 = vld [vmem:[%s3952_s5 + $0x688] sm:$0xff]  ;;  %s4078_s8 = scalar_lea.vmem %s4592_s1, %s2667_s12  ;;  %s1284_s25 = scalar_lea.vmem %s4593_s2, %s2659_s9 }
 0x129   : > { %1831 = vmatprep.subr.mxu0 %v1524_v4  ;;  %1902 = vmatprep.subr.mxu1 %v1526_v5  ;;  %v1510_v9 = vld [vmem:[%s3952_s5 + $0x698] sm:$0xff]  ;;  %v1507_v10 = vld [vmem:[%s3952_s5 + $0x680] sm:$0xff]  ;;  %v1509_v11 = vld [vmem:[%s3952_s5 + $0x690] sm:$0xff]  ;;  %s4620_s26 = smov (!%p4496_p13, %s2660_s26), 31  ;;  %s2661_s28 = sshll.u32 %s4618_s15, 5 }
 0x12a   : > { %1832 = vmatpush1.msra.mxu0 %v1523_v6  ;;  %1903 = vmatpush1.msra.mxu1 %v1525_v7  ;;  %v1492_v12 = vld [vmem:[%s3952_s5 + $0x608] sm:$0xff]  ;;  %v1494_v13 = vld [vmem:[%s3952_s5 + $0x618] sm:$0xff]  ;;  %v1491_v14 = vld [vmem:[%s3952_s5 + $0x600] sm:$0xff]  ;;  %s1293_s14 = sadd.s32 %s2661_s28, %s4620_s26  ;;  %s2662_s24 = sshll.u32 %s4616_s16, 6 }
 0x12b   : > { %1833 = vmatprep.subr.mxu0 %v1508_v8  ;;  %1904 = vmatprep.subr.mxu1 %v1510_v9  ;;  %v1493_v15 = vld [vmem:[%s3952_s5 + $0x610] sm:$0xff]  ;;  %v1476_v16 = vld [vmem:[%s3952_s5 + $0x588] sm:$0xff]  ;;  %v1478_v17 = vld [vmem:[%s3952_s5 + $0x598] sm:$0xff]  ;;  %s1295_s15 = sadd.s32 %s2662_s24, %s1293_s14 }
 0x12c   : > { %1834 = vmatpush1.msra.mxu0 %v1507_v10  ;;  %1905 = vmatpush1.msra.mxu1 %v1509_v11  ;;  %v1475_v18 = vld [vmem:[%s3952_s5 + $0x580] sm:$0xff]  ;;  %v1477_v19 = vld [vmem:[%s3952_s5 + $0x590] sm:$0xff]  ;;  %v1460_v20 = vld [vmem:[%s3952_s5 + $0x508] sm:$0xff]  ;;  %s2663_s16 = sshll.u32 %s1295_s15, 1 }
 0x12d   : > { %1835 = vmatprep.subr.mxu0 %v1492_v12  ;;  %1906 = vmatprep.subr.mxu1 %v1494_v13  ;;  %v1462_v21 = vld [vmem:[%s3952_s5 + $0x518] sm:$0xff]  ;;  %v1459_v22 = vld [vmem:[%s3952_s5 + $0x500] sm:$0xff]  ;;  %v1461_v23 = vld [vmem:[%s3952_s5 + $0x510] sm:$0xff] }
 0x12e   : > { %1836 = vmatpush1.msra.mxu0 %v1491_v14  ;;  %1907 = vmatpush1.msra.mxu1 %v1493_v15  ;;  %v1444_v24 = vld [vmem:[%s3952_s5 + $0x488] sm:$0xff]  ;;  %v1446_v25 = vld [vmem:[%s3952_s5 + $0x498] sm:$0xff]  ;;  %v1443_v26 = vld [vmem:[%s3952_s5 + $0x480] sm:$0xff] }
 0x12f   : > { %1837 = vmatprep.subr.mxu0 %v1476_v16  ;;  %1908 = vmatprep.subr.mxu1 %v1478_v17  ;;  %v1445_v27 = vld [vmem:[%s3952_s5 + $0x490] sm:$0xff]  ;;  %v1428_v28 = vld [vmem:[%s3952_s5 + $0x408] sm:$0xff]  ;;  %v1430_v29 = vld [vmem:[%s3952_s5 + $0x418] sm:$0xff] }
 0x130   : > { %1838 = vmatpush1.msra.mxu0 %v1475_v18  ;;  %1909 = vmatpush1.msra.mxu1 %v1477_v19  ;;  %v1427_v30 = vld [vmem:[%s3952_s5 + $0x400] sm:$0xff]  ;;  %v1429_v31 = vld [vmem:[%s3952_s5 + $0x410] sm:$0xff]  ;;  %v1412_v32 = vld [vmem:[%s3952_s5 + $0x388] sm:$0xff] }
 0x131   : > { %1839 = vmatprep.subr.mxu0 %v1460_v20  ;;  %1910 = vmatprep.subr.mxu1 %v1462_v21  ;;  %v1414_v33 = vld [vmem:[%s3952_s5 + $0x398] sm:$0xff]  ;;  %v1411_v34 = vld [vmem:[%s3952_s5 + $0x380] sm:$0xff]  ;;  %v1413_v35 = vld [vmem:[%s3952_s5 + $0x390] sm:$0xff] }
 0x132   : > { %1840 = vmatpush1.msra.mxu0 %v1459_v22  ;;  %1911 = vmatpush1.msra.mxu1 %v1461_v23  ;;  %v1396_v36 = vld [vmem:[%s3952_s5 + $0x308] sm:$0xff]  ;;  %v1398_v37 = vld [vmem:[%s3952_s5 + $0x318] sm:$0xff]  ;;  %v1395_v38 = vld [vmem:[%s3952_s5 + $0x300] sm:$0xff] }
 0x133   : > { %1841 = vmatprep.subr.mxu0 %v1444_v24  ;;  %1912 = vmatprep.subr.mxu1 %v1446_v25  ;;  %v1397_v39 = vld [vmem:[%s3952_s5 + $0x310] sm:$0xff]  ;;  %v1380_v40 = vld [vmem:[%s3952_s5 + $0x288] sm:$0xff]  ;;  %v1382_v41 = vld [vmem:[%s3952_s5 + $0x298] sm:$0xff] }
 0x134   : > { %1842 = vmatpush1.msra.mxu0 %v1443_v26  ;;  %1913 = vmatpush1.msra.mxu1 %v1445_v27  ;;  %v1379_v42 = vld [vmem:[%s3952_s5 + $0x280] sm:$0xff]  ;;  %v1381_v43 = vld [vmem:[%s3952_s5 + $0x290] sm:$0xff]  ;;  %v1364_v44 = vld [vmem:[%s3952_s5 + $0x208] sm:$0xff] }
 0x135   : > { %1843 = vmatprep.subr.mxu0 %v1428_v28  ;;  %1914 = vmatprep.subr.mxu1 %v1430_v29  ;;  %v1366_v45 = vld [vmem:[%s3952_s5 + $0x218] sm:$0xff]  ;;  %v1363_v46 = vld [vmem:[%s3952_s5 + $0x200] sm:$0xff]  ;;  %v1365_v47 = vld [vmem:[%s3952_s5 + $0x210] sm:$0xff] }
 0x136   : > { %1844 = vmatpush1.msra.mxu0 %v1427_v30  ;;  %1915 = vmatpush1.msra.mxu1 %v1429_v31  ;;  %v1348_v48 = vld [vmem:[%s3952_s5 + $0x188] sm:$0xff]  ;;  %v1350_v49 = vld [vmem:[%s3952_s5 + $0x198] sm:$0xff]  ;;  %v1347_v50 = vld [vmem:[%s3952_s5 + $0x180] sm:$0xff] }
 0x137   : > { %1845 = vmatprep.subr.mxu0 %v1412_v32  ;;  %1916 = vmatprep.subr.mxu1 %v1414_v33  ;;  %v1349_v51 = vld [vmem:[%s3952_s5 + $0x190] sm:$0xff]  ;;  %v1332_v52 = vld [vmem:[%s3952_s5 + $0x108] sm:$0xff]  ;;  %v1334_v53 = vld [vmem:[%s3952_s5 + $0x118] sm:$0xff] }
 0x138   : > { %1846 = vmatpush1.msra.mxu0 %v1411_v34  ;;  %1917 = vmatpush1.msra.mxu1 %v1413_v35  ;;  %v1331_v54 = vld [vmem:[%s3952_s5 + $0x100] sm:$0xff]  ;;  %v1333_v55 = vld [vmem:[%s3952_s5 + $0x110] sm:$0xff]  ;;  %v1316_v56 = vld [vmem:[%s3952_s5 + $0x88] sm:$0xff] }
 0x139   : > { %1847 = vmatprep.subr.mxu0 %v1396_v36  ;;  %1918 = vmatprep.subr.mxu1 %v1398_v37  ;;  %v1318_v57 = vld [vmem:[%s3952_s5 + $0x98] sm:$0xff]  ;;  %v1315_v58 = vld [vmem:[%s3952_s5 + $0x80] sm:$0xff]  ;;  %v1317_v59 = vld [vmem:[%s3952_s5 + $0x90] sm:$0xff] }
 0x13a   : > { %1848 = vmatpush1.msra.mxu0 %v1395_v38  ;;  %1919 = vmatpush1.msra.mxu1 %v1397_v39  ;;  %v1300_v60 = vld [vmem:[%s3952_s5 + $0x8] sm:$0xff]  ;;  %v1302_v61 = vld [vmem:[%s3952_s5 + $0x18] sm:$0xff]  ;;  %v1299_v62 = vld [vmem:[%s3952_s5] sm:$0xff] }
 0x13b   : > { %1849 = vmatprep.subr.mxu0 %v1380_v40  ;;  %1920 = vmatprep.subr.mxu1 %v1382_v41  ;;  %v1301_v63 = vld [vmem:[%s3952_s5 + $0x10] sm:$0xff]  ;;  %v1796_v0 = vld [vmem:[%s3952_s5 + $0xf88] sm:$0xff]  ;;  %v1798_v1 = vld [vmem:[%s3952_s5 + $0xf98] sm:$0xff] }
 0x13c   : > { %1850 = vmatpush1.msra.mxu0 %v1379_v42  ;;  %1921 = vmatpush1.msra.mxu1 %v1381_v43  ;;  %v1795_v2 = vld [vmem:[%s3952_s5 + $0xf80] sm:$0xff]  ;;  %v1797_v3 = vld [vmem:[%s3952_s5 + $0xf90] sm:$0xff]  ;;  %v1780_v4 = vld [vmem:[%s3952_s5 + $0xf08] sm:$0xff] }
 0x13d   : > { %1851 = vmatprep.subr.mxu0 %v1364_v44  ;;  %1922 = vmatprep.subr.mxu1 %v1366_v45  ;;  %v1782_v5 = vld [vmem:[%s3952_s5 + $0xf18] sm:$0xff]  ;;  %v1779_v6 = vld [vmem:[%s3952_s5 + $0xf00] sm:$0xff]  ;;  %v1781_v7 = vld [vmem:[%s3952_s5 + $0xf10] sm:$0xff] }
 0x13e   : > { %1852 = vmatpush1.msra.mxu0 %v1363_v46  ;;  %1923 = vmatpush1.msra.mxu1 %v1365_v47  ;;  %v1764_v8 = vld [vmem:[%s3952_s5 + $0xe88] sm:$0xff]  ;;  %v1766_v9 = vld [vmem:[%s3952_s5 + $0xe98] sm:$0xff]  ;;  %v1763_v10 = vld [vmem:[%s3952_s5 + $0xe80] sm:$0xff] }
 0x13f   : > { %1853 = vmatprep.subr.mxu0 %v1348_v48  ;;  %1924 = vmatprep.subr.mxu1 %v1350_v49  ;;  %v1765_v11 = vld [vmem:[%s3952_s5 + $0xe90] sm:$0xff]  ;;  %v1748_v12 = vld [vmem:[%s3952_s5 + $0xe08] sm:$0xff]  ;;  %v1750_v13 = vld [vmem:[%s3952_s5 + $0xe18] sm:$0xff] }
 0x140   : > { %1854 = vmatpush1.msra.mxu0 %v1347_v50  ;;  %1925 = vmatpush1.msra.mxu1 %v1349_v51  ;;  %v1747_v14 = vld [vmem:[%s3952_s5 + $0xe00] sm:$0xff]  ;;  %v1749_v15 = vld [vmem:[%s3952_s5 + $0xe10] sm:$0xff]  ;;  %v1732_v16 = vld [vmem:[%s3952_s5 + $0xd88] sm:$0xff] }
 0x141   : > { %1855 = vmatprep.subr.mxu0 %v1332_v52  ;;  %1926 = vmatprep.subr.mxu1 %v1334_v53  ;;  %v1734_v17 = vld [vmem:[%s3952_s5 + $0xd98] sm:$0xff]  ;;  %v1731_v18 = vld [vmem:[%s3952_s5 + $0xd80] sm:$0xff]  ;;  %v1733_v19 = vld [vmem:[%s3952_s5 + $0xd90] sm:$0xff] }
 0x142   : > { %1856 = vmatpush1.msra.mxu0 %v1331_v54  ;;  %1927 = vmatpush1.msra.mxu1 %v1333_v55  ;;  %v1716_v20 = vld [vmem:[%s3952_s5 + $0xd08] sm:$0xff]  ;;  %v1718_v21 = vld [vmem:[%s3952_s5 + $0xd18] sm:$0xff]  ;;  %v1715_v22 = vld [vmem:[%s3952_s5 + $0xd00] sm:$0xff] }
 0x143   : > { %1857 = vmatprep.subr.mxu0 %v1316_v56  ;;  %1928 = vmatprep.subr.mxu1 %v1318_v57  ;;  %v1717_v23 = vld [vmem:[%s3952_s5 + $0xd10] sm:$0xff]  ;;  %v1700_v24 = vld [vmem:[%s3952_s5 + $0xc88] sm:$0xff]  ;;  %v1702_v25 = vld [vmem:[%s3952_s5 + $0xc98] sm:$0xff] }
 0x144   : > { %1858 = vmatpush1.msra.mxu0 %v1315_v58  ;;  %1929 = vmatpush1.msra.mxu1 %v1317_v59  ;;  %v1699_v26 = vld [vmem:[%s3952_s5 + $0xc80] sm:$0xff]  ;;  %v1701_v27 = vld [vmem:[%s3952_s5 + $0xc90] sm:$0xff]  ;;  %v1684_v28 = vld [vmem:[%s3952_s5 + $0xc08] sm:$0xff] }
 0x145   : > { %1859 = vmatprep.subr.mxu0 %v1300_v60  ;;  %1930 = vmatprep.subr.mxu1 %v1302_v61  ;;  %v1686_v29 = vld [vmem:[%s3952_s5 + $0xc18] sm:$0xff]  ;;  %v1683_v30 = vld [vmem:[%s3952_s5 + $0xc00] sm:$0xff]  ;;  %v1685_v31 = vld [vmem:[%s3952_s5 + $0xc10] sm:$0xff] }
 0x146   : > { %1860 = vmatpush1.msra.mxu0 %v1299_v62  ;;  %1931 = vmatpush1.msra.mxu1 %v1301_v63  ;;  %v1668_v32 = vld [vmem:[%s3952_s5 + $0xb88] sm:$0xff]  ;;  %v1670_v33 = vld [vmem:[%s3952_s5 + $0xb98] sm:$0xff]  ;;  %v1667_v34 = vld [vmem:[%s3952_s5 + $0xb80] sm:$0xff] }
 0x147   : > { %1861 = vmatprep.subr.mxu0 %v1796_v0  ;;  %1932 = vmatprep.subr.mxu1 %v1798_v1  ;;  %v1669_v35 = vld [vmem:[%s3952_s5 + $0xb90] sm:$0xff]  ;;  %v1652_v36 = vld [vmem:[%s3952_s5 + $0xb08] sm:$0xff]  ;;  %v1654_v37 = vld [vmem:[%s3952_s5 + $0xb18] sm:$0xff] }
 0x148   : > { %1862 = vmatpush2.msra.mxu0 %v1795_v2  ;;  %1933 = vmatpush2.msra.mxu1 %v1797_v3  ;;  %v1651_v38 = vld [vmem:[%s3952_s5 + $0xb00] sm:$0xff]  ;;  %v1653_v39 = vld [vmem:[%s3952_s5 + $0xb10] sm:$0xff]  ;;  %v1636_v40 = vld [vmem:[%s3952_s5 + $0xa88] sm:$0xff] }
 0x149   : > { %1863 = vmatprep.subr.mxu0 %v1780_v4  ;;  %1934 = vmatprep.subr.mxu1 %v1782_v5  ;;  %v1638_v41 = vld [vmem:[%s3952_s5 + $0xa98] sm:$0xff]  ;;  %v1635_v42 = vld [vmem:[%s3952_s5 + $0xa80] sm:$0xff]  ;;  %v1637_v43 = vld [vmem:[%s3952_s5 + $0xa90] sm:$0xff] }
 0x14a   : > { %1864 = vmatpush2.msra.mxu0 %v1779_v6  ;;  %1935 = vmatpush2.msra.mxu1 %v1781_v7  ;;  %v1620_v44 = vld [vmem:[%s3952_s5 + $0xa08] sm:$0xff]  ;;  %v1622_v45 = vld [vmem:[%s3952_s5 + $0xa18] sm:$0xff]  ;;  %v1619_v46 = vld [vmem:[%s3952_s5 + $0xa00] sm:$0xff] }
 0x14b   : > { %1865 = vmatprep.subr.mxu0 %v1764_v8  ;;  %1936 = vmatprep.subr.mxu1 %v1766_v9  ;;  %v1621_v47 = vld [vmem:[%s3952_s5 + $0xa10] sm:$0xff]  ;;  %v1604_v48 = vld [vmem:[%s3952_s5 + $0x988] sm:$0xff]  ;;  %v1606_v49 = vld [vmem:[%s3952_s5 + $0x998] sm:$0xff] }
 0x14c   : > { %1866 = vmatpush2.msra.mxu0 %v1763_v10  ;;  %1937 = vmatpush2.msra.mxu1 %v1765_v11  ;;  %v1603_v50 = vld [vmem:[%s3952_s5 + $0x980] sm:$0xff]  ;;  %v1605_v51 = vld [vmem:[%s3952_s5 + $0x990] sm:$0xff]  ;;  %v1588_v52 = vld [vmem:[%s3952_s5 + $0x908] sm:$0xff] }
 0x14d   : > { %1867 = vmatprep.subr.mxu0 %v1748_v12  ;;  %1938 = vmatprep.subr.mxu1 %v1750_v13  ;;  %v1590_v53 = vld [vmem:[%s3952_s5 + $0x918] sm:$0xff]  ;;  %v1587_v54 = vld [vmem:[%s3952_s5 + $0x900] sm:$0xff]  ;;  %v1589_v55 = vld [vmem:[%s3952_s5 + $0x910] sm:$0xff] }
 0x14e   : > { %1868 = vmatpush2.msra.mxu0 %v1747_v14  ;;  %1939 = vmatpush2.msra.mxu1 %v1749_v15  ;;  %v4087_v56 = vld.sshfl [vmem:[%s4078_s8] sm:$0x33 pattern:$0x76325410]  ;;  %v1572_v57 = vld [vmem:[%s3952_s5 + $0x888] sm:$0xff]  ;;  %v1574_v58 = vld [vmem:[%s3952_s5 + $0x898] sm:$0xff] }
 0x14f   : > { %1869 = vmatprep.subr.mxu0 %v1732_v16  ;;  %1940 = vmatprep.subr.mxu1 %v1734_v17  ;;  %v1571_v59 = vld [vmem:[%s3952_s5 + $0x880] sm:$0xff]  ;;  %v1573_v60 = vld [vmem:[%s3952_s5 + $0x890] sm:$0xff]  ;;  %v1556_v61 = vld [vmem:[%s3952_s5 + $0x808] sm:$0xff]  ;;  %v4097_v63 = vcombine.high %v4087_v56, %v4087_v56 }
 0x150   : > { %1870 = vmatpush2.msra.mxu0 %v1731_v18  ;;  %1941 = vmatpush2.msra.mxu1 %v1733_v19  ;;  %v1558_v62 = vld [vmem:[%s3952_s5 + $0x818] sm:$0xff]  ;;  %v1555_v0 = vld [vmem:[%s3952_s5 + $0x800] sm:$0xff]  ;;  %v1557_v1 = vld [vmem:[%s3952_s5 + $0x810] sm:$0xff] }
 0x151   : > { %1871 = vmatprep.subr.mxu0 %v1716_v20  ;;  %1942 = vmatprep.subr.mxu1 %v1718_v21  ;;  %v1544_v2 = vld [vmem:[%s3952_s5 + $0x7a8] sm:$0xff]  ;;  %v1546_v3 = vld [vmem:[%s3952_s5 + $0x7b8] sm:$0xff]  ;;  %v1543_v4 = vld [vmem:[%s3952_s5 + $0x7a0] sm:$0xff] }
 0x152   : > { %1872 = vmatpush2.msra.mxu0 %v1715_v22  ;;  %1943 = vmatpush2.msra.mxu1 %v1717_v23  ;;  %v1545_v5 = vld [vmem:[%s3952_s5 + $0x7b0] sm:$0xff]  ;;  %v1528_v6 = vld [vmem:[%s3952_s5 + $0x728] sm:$0xff]  ;;  %v1530_v7 = vld [vmem:[%s3952_s5 + $0x738] sm:$0xff] }
 0x153   : > { %1873 = vmatprep.subr.mxu0 %v1700_v24  ;;  %1944 = vmatprep.subr.mxu1 %v1702_v25  ;;  %v1527_v8 = vld [vmem:[%s3952_s5 + $0x720] sm:$0xff]  ;;  %v1529_v9 = vld [vmem:[%s3952_s5 + $0x730] sm:$0xff]  ;;  %v1512_v10 = vld [vmem:[%s3952_s5 + $0x6a8] sm:$0xff] }
 0x154   : > { %1874 = vmatpush2.msra.mxu0 %v1699_v26  ;;  %1945 = vmatpush2.msra.mxu1 %v1701_v27  ;;  %v1514_v11 = vld [vmem:[%s3952_s5 + $0x6b8] sm:$0xff]  ;;  %v1511_v12 = vld [vmem:[%s3952_s5 + $0x6a0] sm:$0xff]  ;;  %v1513_v13 = vld [vmem:[%s3952_s5 + $0x6b0] sm:$0xff] }
 0x155   : > { %1875 = vmatprep.subr.mxu0 %v1684_v28  ;;  %1946 = vmatprep.subr.mxu1 %v1686_v29  ;;  %v1496_v14 = vld [vmem:[%s3952_s5 + $0x628] sm:$0xff]  ;;  %v1498_v15 = vld [vmem:[%s3952_s5 + $0x638] sm:$0xff]  ;;  %v1495_v16 = vld [vmem:[%s3952_s5 + $0x620] sm:$0xff] }
 0x156   : > { %1876 = vmatpush2.msra.mxu0 %v1683_v30  ;;  %1947 = vmatpush2.msra.mxu1 %v1685_v31  ;;  %v1497_v17 = vld [vmem:[%s3952_s5 + $0x630] sm:$0xff]  ;;  %v1480_v18 = vld [vmem:[%s3952_s5 + $0x5a8] sm:$0xff]  ;;  %v1482_v19 = vld [vmem:[%s3952_s5 + $0x5b8] sm:$0xff] }
 0x157   : > { %1877 = vmatprep.subr.mxu0 %v1668_v32  ;;  %1948 = vmatprep.subr.mxu1 %v1670_v33  ;;  %v1479_v20 = vld [vmem:[%s3952_s5 + $0x5a0] sm:$0xff]  ;;  %v1481_v21 = vld [vmem:[%s3952_s5 + $0x5b0] sm:$0xff]  ;;  %v1464_v22 = vld [vmem:[%s3952_s5 + $0x528] sm:$0xff] }
 0x158   : > { %1878 = vmatpush2.msra.mxu0 %v1667_v34  ;;  %1949 = vmatpush2.msra.mxu1 %v1669_v35  ;;  %v1466_v23 = vld [vmem:[%s3952_s5 + $0x538] sm:$0xff]  ;;  %v1463_v24 = vld [vmem:[%s3952_s5 + $0x520] sm:$0xff]  ;;  %v1465_v25 = vld [vmem:[%s3952_s5 + $0x530] sm:$0xff] }
 0x159   : > { %1879 = vmatprep.subr.mxu0 %v1652_v36  ;;  %1950 = vmatprep.subr.mxu1 %v1654_v37  ;;  %v1448_v26 = vld [vmem:[%s3952_s5 + $0x4a8] sm:$0xff]  ;;  %v1450_v27 = vld [vmem:[%s3952_s5 + $0x4b8] sm:$0xff]  ;;  %v1447_v28 = vld [vmem:[%s3952_s5 + $0x4a0] sm:$0xff] }
 0x15a   : > { %1880 = vmatpush2.msra.mxu0 %v1651_v38  ;;  %1951 = vmatpush2.msra.mxu1 %v1653_v39  ;;  %v1449_v29 = vld [vmem:[%s3952_s5 + $0x4b0] sm:$0xff]  ;;  %v1432_v30 = vld [vmem:[%s3952_s5 + $0x428] sm:$0xff]  ;;  %v1434_v31 = vld [vmem:[%s3952_s5 + $0x438] sm:$0xff] }
 0x15b   : > { %1881 = vmatprep.subr.mxu0 %v1636_v40  ;;  %1952 = vmatprep.subr.mxu1 %v1638_v41  ;;  %v1431_v32 = vld [vmem:[%s3952_s5 + $0x420] sm:$0xff]  ;;  %v1433_v33 = vld [vmem:[%s3952_s5 + $0x430] sm:$0xff]  ;;  %v1416_v34 = vld [vmem:[%s3952_s5 + $0x3a8] sm:$0xff] }
 0x15c   : > { %1882 = vmatpush2.msra.mxu0 %v1635_v42  ;;  %1953 = vmatpush2.msra.mxu1 %v1637_v43  ;;  %v1418_v35 = vld [vmem:[%s3952_s5 + $0x3b8] sm:$0xff]  ;;  %v1415_v36 = vld [vmem:[%s3952_s5 + $0x3a0] sm:$0xff]  ;;  %v1417_v37 = vld [vmem:[%s3952_s5 + $0x3b0] sm:$0xff] }
 0x15d   : > { %1883 = vmatprep.subr.mxu0 %v1620_v44  ;;  %1954 = vmatprep.subr.mxu1 %v1622_v45  ;;  %v1400_v38 = vld [vmem:[%s3952_s5 + $0x328] sm:$0xff]  ;;  %v1402_v39 = vld [vmem:[%s3952_s5 + $0x338] sm:$0xff]  ;;  %v1399_v40 = vld [vmem:[%s3952_s5 + $0x320] sm:$0xff] }
 0x15e   : > { %1884 = vmatpush2.msra.mxu0 %v1619_v46  ;;  %1955 = vmatpush2.msra.mxu1 %v1621_v47  ;;  %v1401_v41 = vld [vmem:[%s3952_s5 + $0x330] sm:$0xff]  ;;  %v1384_v42 = vld [vmem:[%s3952_s5 + $0x2a8] sm:$0xff]  ;;  %v1386_v43 = vld [vmem:[%s3952_s5 + $0x2b8] sm:$0xff] }
 0x15f   : > { %1885 = vmatprep.subr.mxu0 %v1604_v48  ;;  %1956 = vmatprep.subr.mxu1 %v1606_v49  ;;  %v1383_v44 = vld [vmem:[%s3952_s5 + $0x2a0] sm:$0xff]  ;;  %v1385_v45 = vld [vmem:[%s3952_s5 + $0x2b0] sm:$0xff]  ;;  %v1368_v46 = vld [vmem:[%s3952_s5 + $0x228] sm:$0xff] }
 0x160   : > { %1886 = vmatpush2.msra.mxu0 %v1603_v50  ;;  %1957 = vmatpush2.msra.mxu1 %v1605_v51  ;;  %v1370_v47 = vld [vmem:[%s3952_s5 + $0x238] sm:$0xff]  ;;  %v1367_v48 = vld [vmem:[%s3952_s5 + $0x220] sm:$0xff]  ;;  %v1369_v49 = vld [vmem:[%s3952_s5 + $0x230] sm:$0xff] }
 0x161   : > { %1887 = vmatprep.subr.mxu0 %v1588_v52  ;;  %1958 = vmatprep.subr.mxu1 %v1590_v53  ;;  %v1352_v50 = vld [vmem:[%s3952_s5 + $0x1a8] sm:$0xff]  ;;  %v1354_v51 = vld [vmem:[%s3952_s5 + $0x1b8] sm:$0xff]  ;;  %v1351_v52 = vld [vmem:[%s3952_s5 + $0x1a0] sm:$0xff] }
 0x162   : > { %1888 = vmatpush2.msra.mxu0 %v1587_v54  ;;  %1959 = vmatpush2.msra.mxu1 %v1589_v55  ;;  %v1353_v53 = vld [vmem:[%s3952_s5 + $0x1b0] sm:$0xff]  ;;  %v1336_v54 = vld [vmem:[%s3952_s5 + $0x128] sm:$0xff]  ;;  %v1338_v55 = vld [vmem:[%s3952_s5 + $0x138] sm:$0xff] }
 0x163   : > { %1889 = vmatprep.subr.mxu0 %v1572_v57  ;;  %1960 = vmatprep.subr.mxu1 %v1574_v58  ;;  %v1335_v57 = vld [vmem:[%s3952_s5 + $0x120] sm:$0xff]  ;;  %v1337_v58 = vld [vmem:[%s3952_s5 + $0x130] sm:$0xff] }
 0x164   : > { %1890 = vmatpush2.msra.mxu0 %v1571_v59  ;;  %1961 = vmatpush2.msra.mxu1 %v1573_v60  ;;  %v1320_v59 = vld [vmem:[%s3952_s5 + $0xa8] sm:$0xff]  ;;  %v1322_v60 = vld [vmem:[%s3952_s5 + $0xb8] sm:$0xff] }
 0x165   : > { %1891 = vmatprep.subr.mxu0 %v1556_v61  ;;  %1962 = vmatprep.subr.mxu1 %v1558_v62  ;;  %v1319_v61 = vld [vmem:[%s3952_s5 + $0xa0] sm:$0xff]  ;;  %v1321_v62 = vld [vmem:[%s3952_s5 + $0xb0] sm:$0xff] }
 0x166   : > { %1892 = vmatpush2.msra.mxu0 %v1555_v0  ;;  %1893 = vmatprep.mubr.f32.mxu0 %v4097_v63  ;;  %v1304_v0 = vld [vmem:[%s3952_s5 + $0x28] sm:$0xff] }
 0x167   : > { %1963 = vmatpush2.msra.mxu1 %v1557_v1  ;;  %1964 = vmatprep.mubr.f32.mxu1 %v4097_v63  ;;  %v1306_v1 = vld [vmem:[%s3952_s5 + $0x38] sm:$0xff] }
 0x168   : > { %1894 = vmatmul.mubr.f32.vlgmr.msra.gmra.mxu0 %v4087_v56  ;;  %1965 = vmatmul.mubr.f32.vlgmr.msra.gmra.mxu1 %v4087_v56 }
 0x169   : > { %1971 = vmatprep.subr.mxu0 %v1544_v2  ;;  %2042 = vmatprep.subr.mxu1 %v1546_v3  ;;  %v1303_v2 = vld [vmem:[%s3952_s5 + $0x20] sm:$0xff]  ;;  %v1305_v3 = vld [vmem:[%s3952_s5 + $0x30] sm:$0xff] }
 0x16a   : > { %1972 = vmatpush1.msra.mxu0 %v1543_v4  ;;  %2043 = vmatpush1.msra.mxu1 %v1545_v5  ;;  %v1800_v4 = vld [vmem:[%s3952_s5 + $0xfa8] sm:$0xff]  ;;  %v1802_v5 = vld [vmem:[%s3952_s5 + $0xfb8] sm:$0xff] }
 0x16b   : > { %1973 = vmatprep.subr.mxu0 %v1528_v6  ;;  %2044 = vmatprep.subr.mxu1 %v1530_v7  ;;  %v1799_v6 = vld [vmem:[%s3952_s5 + $0xfa0] sm:$0xff]  ;;  %v1801_v7 = vld [vmem:[%s3952_s5 + $0xfb0] sm:$0xff] }
 0x16c   : > { %1974 = vmatpush1.msra.mxu0 %v1527_v8  ;;  %2045 = vmatpush1.msra.mxu1 %v1529_v9  ;;  %v1784_v8 = vld [vmem:[%s3952_s5 + $0xf28] sm:$0xff]  ;;  %v1786_v9 = vld [vmem:[%s3952_s5 + $0xf38] sm:$0xff] }
 0x16d   : > { %1975 = vmatprep.subr.mxu0 %v1512_v10  ;;  %2046 = vmatprep.subr.mxu1 %v1514_v11  ;;  %v1783_v10 = vld [vmem:[%s3952_s5 + $0xf20] sm:$0xff]  ;;  %v1785_v11 = vld [vmem:[%s3952_s5 + $0xf30] sm:$0xff] }
 0x16e   : > { %1976 = vmatpush1.msra.mxu0 %v1511_v12  ;;  %2047 = vmatpush1.msra.mxu1 %v1513_v13  ;;  %v1768_v12 = vld [vmem:[%s3952_s5 + $0xea8] sm:$0xff]  ;;  %v1770_v13 = vld [vmem:[%s3952_s5 + $0xeb8] sm:$0xff] }
 0x16f   : > { %1977 = vmatprep.subr.mxu0 %v1496_v14  ;;  %2048 = vmatprep.subr.mxu1 %v1498_v15  ;;  %v1767_v14 = vld [vmem:[%s3952_s5 + $0xea0] sm:$0xff]  ;;  %v1769_v15 = vld [vmem:[%s3952_s5 + $0xeb0] sm:$0xff] }
 0x170   : > { %1978 = vmatpush1.msra.mxu0 %v1495_v16  ;;  %2049 = vmatpush1.msra.mxu1 %v1497_v17  ;;  %v1752_v16 = vld [vmem:[%s3952_s5 + $0xe28] sm:$0xff]  ;;  %v1754_v17 = vld [vmem:[%s3952_s5 + $0xe38] sm:$0xff] }
 0x171   : > { %1979 = vmatprep.subr.mxu0 %v1480_v18  ;;  %2050 = vmatprep.subr.mxu1 %v1482_v19  ;;  %v1751_v18 = vld [vmem:[%s3952_s5 + $0xe20] sm:$0xff]  ;;  %v1753_v19 = vld [vmem:[%s3952_s5 + $0xe30] sm:$0xff] }
 0x172   : > { %1980 = vmatpush1.msra.mxu0 %v1479_v20  ;;  %2051 = vmatpush1.msra.mxu1 %v1481_v21  ;;  %v1736_v20 = vld [vmem:[%s3952_s5 + $0xda8] sm:$0xff]  ;;  %v1738_v21 = vld [vmem:[%s3952_s5 + $0xdb8] sm:$0xff] }
 0x173   : > { %1981 = vmatprep.subr.mxu0 %v1464_v22  ;;  %2052 = vmatprep.subr.mxu1 %v1466_v23  ;;  %v1735_v22 = vld [vmem:[%s3952_s5 + $0xda0] sm:$0xff]  ;;  %v1737_v23 = vld [vmem:[%s3952_s5 + $0xdb0] sm:$0xff] }
 0x174   : > { %1982 = vmatpush1.msra.mxu0 %v1463_v24  ;;  %2053 = vmatpush1.msra.mxu1 %v1465_v25  ;;  %v1720_v24 = vld [vmem:[%s3952_s5 + $0xd28] sm:$0xff]  ;;  %v1722_v25 = vld [vmem:[%s3952_s5 + $0xd38] sm:$0xff] }
 0x175   : > { %1983 = vmatprep.subr.mxu0 %v1448_v26  ;;  %2054 = vmatprep.subr.mxu1 %v1450_v27  ;;  %v1719_v26 = vld [vmem:[%s3952_s5 + $0xd20] sm:$0xff]  ;;  %v1721_v27 = vld [vmem:[%s3952_s5 + $0xd30] sm:$0xff] }
 0x176   : > { %1984 = vmatpush1.msra.mxu0 %v1447_v28  ;;  %2055 = vmatpush1.msra.mxu1 %v1449_v29  ;;  %v1704_v28 = vld [vmem:[%s3952_s5 + $0xca8] sm:$0xff]  ;;  %v1706_v29 = vld [vmem:[%s3952_s5 + $0xcb8] sm:$0xff] }
 0x177   : > { %1985 = vmatprep.subr.mxu0 %v1432_v30  ;;  %2056 = vmatprep.subr.mxu1 %v1434_v31  ;;  %v1703_v30 = vld [vmem:[%s3952_s5 + $0xca0] sm:$0xff]  ;;  %v1705_v31 = vld [vmem:[%s3952_s5 + $0xcb0] sm:$0xff] }
 0x178   : > { %1986 = vmatpush1.msra.mxu0 %v1431_v32  ;;  %2057 = vmatpush1.msra.mxu1 %v1433_v33  ;;  %v1688_v32 = vld [vmem:[%s3952_s5 + $0xc28] sm:$0xff]  ;;  %v1690_v33 = vld [vmem:[%s3952_s5 + $0xc38] sm:$0xff] }
 0x179   : > { %1987 = vmatprep.subr.mxu0 %v1416_v34  ;;  %2058 = vmatprep.subr.mxu1 %v1418_v35  ;;  %v1687_v34 = vld [vmem:[%s3952_s5 + $0xc20] sm:$0xff]  ;;  %v1689_v35 = vld [vmem:[%s3952_s5 + $0xc30] sm:$0xff] }
 0x17a   : > { %1988 = vmatpush1.msra.mxu0 %v1415_v36  ;;  %2059 = vmatpush1.msra.mxu1 %v1417_v37  ;;  %v1672_v36 = vld [vmem:[%s3952_s5 + $0xba8] sm:$0xff]  ;;  %v1674_v37 = vld [vmem:[%s3952_s5 + $0xbb8] sm:$0xff] }
 0x17b   : > { %1989 = vmatprep.subr.mxu0 %v1400_v38  ;;  %2060 = vmatprep.subr.mxu1 %v1402_v39  ;;  %v1671_v38 = vld [vmem:[%s3952_s5 + $0xba0] sm:$0xff]  ;;  %v1673_v39 = vld [vmem:[%s3952_s5 + $0xbb0] sm:$0xff] }
 0x17c   : > { %1990 = vmatpush1.msra.mxu0 %v1399_v40  ;;  %2061 = vmatpush1.msra.mxu1 %v1401_v41  ;;  %v1656_v40 = vld [vmem:[%s3952_s5 + $0xb28] sm:$0xff]  ;;  %v1658_v41 = vld [vmem:[%s3952_s5 + $0xb38] sm:$0xff] }
 0x17d   : > { %1991 = vmatprep.subr.mxu0 %v1384_v42  ;;  %2062 = vmatprep.subr.mxu1 %v1386_v43  ;;  %v1655_v42 = vld [vmem:[%s3952_s5 + $0xb20] sm:$0xff]  ;;  %v1657_v43 = vld [vmem:[%s3952_s5 + $0xb30] sm:$0xff] }
 0x17e   : > { %1992 = vmatpush1.msra.mxu0 %v1383_v44  ;;  %2063 = vmatpush1.msra.mxu1 %v1385_v45  ;;  %v1640_v44 = vld [vmem:[%s3952_s5 + $0xaa8] sm:$0xff]  ;;  %v1642_v45 = vld [vmem:[%s3952_s5 + $0xab8] sm:$0xff] }
 0x17f   : > { %1993 = vmatprep.subr.mxu0 %v1368_v46  ;;  %2064 = vmatprep.subr.mxu1 %v1370_v47  ;;  %v1639_v46 = vld [vmem:[%s3952_s5 + $0xaa0] sm:$0xff]  ;;  %v1641_v47 = vld [vmem:[%s3952_s5 + $0xab0] sm:$0xff] }
 0x180   : > { %1994 = vmatpush1.msra.mxu0 %v1367_v48  ;;  %2065 = vmatpush1.msra.mxu1 %v1369_v49  ;;  %v1624_v48 = vld [vmem:[%s3952_s5 + $0xa28] sm:$0xff]  ;;  %v1626_v49 = vld [vmem:[%s3952_s5 + $0xa38] sm:$0xff] }
 0x181   : > { %1995 = vmatprep.subr.mxu0 %v1352_v50  ;;  %2066 = vmatprep.subr.mxu1 %v1354_v51  ;;  %v1623_v50 = vld [vmem:[%s3952_s5 + $0xa20] sm:$0xff]  ;;  %v1625_v51 = vld [vmem:[%s3952_s5 + $0xa30] sm:$0xff] }
 0x182   : > { %1996 = vmatpush1.msra.mxu0 %v1351_v52  ;;  %2067 = vmatpush1.msra.mxu1 %v1353_v53  ;;  %v1608_v52 = vld [vmem:[%s3952_s5 + $0x9a8] sm:$0xff]  ;;  %v1610_v53 = vld [vmem:[%s3952_s5 + $0x9b8] sm:$0xff] }
 0x183   : > { %1997 = vmatprep.subr.mxu0 %v1336_v54  ;;  %2068 = vmatprep.subr.mxu1 %v1338_v55  ;;  %v1607_v54 = vld [vmem:[%s3952_s5 + $0x9a0] sm:$0xff]  ;;  %v1609_v55 = vld [vmem:[%s3952_s5 + $0x9b0] sm:$0xff] }
 0x184   : > { %1998 = vmatpush1.msra.mxu0 %v1335_v57  ;;  %2069 = vmatpush1.msra.mxu1 %v1337_v58  ;;  %v1592_v57 = vld [vmem:[%s3952_s5 + $0x928] sm:$0xff]  ;;  %v1594_v58 = vld [vmem:[%s3952_s5 + $0x938] sm:$0xff] }
 0x185   : > { %1999 = vmatprep.subr.mxu0 %v1320_v59  ;;  %2070 = vmatprep.subr.mxu1 %v1322_v60  ;;  %v1591_v59 = vld [vmem:[%s3952_s5 + $0x920] sm:$0xff]  ;;  %v1593_v60 = vld [vmem:[%s3952_s5 + $0x930] sm:$0xff] }
 0x186   : > { %2000 = vmatpush1.msra.mxu0 %v1319_v61  ;;  %2071 = vmatpush1.msra.mxu1 %v1321_v62  ;;  %v1576_v61 = vld [vmem:[%s3952_s5 + $0x8a8] sm:$0xff]  ;;  %v1578_v62 = vld [vmem:[%s3952_s5 + $0x8b8] sm:$0xff] }
 0x187   : > { %2001 = vmatprep.subr.mxu0 %v1304_v0  ;;  %2072 = vmatprep.subr.mxu1 %v1306_v1  ;;  %v1575_v0 = vld [vmem:[%s3952_s5 + $0x8a0] sm:$0xff]  ;;  %v1577_v1 = vld [vmem:[%s3952_s5 + $0x8b0] sm:$0xff] }
 0x188   : > { %2002 = vmatpush1.msra.mxu0 %v1303_v2  ;;  %2073 = vmatpush1.msra.mxu1 %v1305_v3  ;;  %v1560_v2 = vld [vmem:[%s3952_s5 + $0x828] sm:$0xff]  ;;  %v1562_v3 = vld [vmem:[%s3952_s5 + $0x838] sm:$0xff] }
 0x189   : > { %2003 = vmatprep.subr.mxu0 %v1800_v4  ;;  %2074 = vmatprep.subr.mxu1 %v1802_v5  ;;  %v1559_v4 = vld [vmem:[%s3952_s5 + $0x820] sm:$0xff]  ;;  %v1561_v5 = vld [vmem:[%s3952_s5 + $0x830] sm:$0xff] }
 0x18a   : > { %2004 = vmatpush2.msra.mxu0 %v1799_v6  ;;  %2075 = vmatpush2.msra.mxu1 %v1801_v7  ;;  %v1548_v6 = vld [vmem:[%s3952_s5 + $0x7c8] sm:$0xff]  ;;  %v1550_v7 = vld [vmem:[%s3952_s5 + $0x7d8] sm:$0xff] }
 0x18b   : > { %2005 = vmatprep.subr.mxu0 %v1784_v8  ;;  %2076 = vmatprep.subr.mxu1 %v1786_v9  ;;  %v1547_v8 = vld [vmem:[%s3952_s5 + $0x7c0] sm:$0xff]  ;;  %v1549_v9 = vld [vmem:[%s3952_s5 + $0x7d0] sm:$0xff] }
 0x18c   : > { %2006 = vmatpush2.msra.mxu0 %v1783_v10  ;;  %2077 = vmatpush2.msra.mxu1 %v1785_v11  ;;  %v1532_v10 = vld [vmem:[%s3952_s5 + $0x748] sm:$0xff]  ;;  %v1534_v11 = vld [vmem:[%s3952_s5 + $0x758] sm:$0xff] }
 0x18d   : > { %2007 = vmatprep.subr.mxu0 %v1768_v12  ;;  %2078 = vmatprep.subr.mxu1 %v1770_v13  ;;  %v1531_v12 = vld [vmem:[%s3952_s5 + $0x740] sm:$0xff]  ;;  %v1533_v13 = vld [vmem:[%s3952_s5 + $0x750] sm:$0xff] }
 0x18e   : > { %2008 = vmatpush2.msra.mxu0 %v1767_v14  ;;  %2079 = vmatpush2.msra.mxu1 %v1769_v15  ;;  %v1516_v14 = vld [vmem:[%s3952_s5 + $0x6c8] sm:$0xff]  ;;  %v1518_v15 = vld [vmem:[%s3952_s5 + $0x6d8] sm:$0xff] }
 0x18f   : > { %2009 = vmatprep.subr.mxu0 %v1752_v16  ;;  %2080 = vmatprep.subr.mxu1 %v1754_v17  ;;  %v1517_v16 = vld [vmem:[%s3952_s5 + $0x6d0] sm:$0xff]  ;;  %v1812_v17 = vld [vmem:[%s1284_s25] sm:$0x3] }
 0x190   : > { %2010 = vmatpush2.msra.mxu0 %v1751_v18  ;;  %2081 = vmatpush2.msra.mxu1 %v1753_v19  ;;  %v1500_v18 = vld [vmem:[%s3952_s5 + $0x648] sm:$0xff]  ;;  %v1502_v19 = vld [vmem:[%s3952_s5 + $0x658] sm:$0xff] }
 0x191   : > { %2011 = vmatprep.subr.mxu0 %v1736_v20  ;;  %2082 = vmatprep.subr.mxu1 %v1738_v21  ;;  %v2816_v20 = vmov 0   ;;  %v1499_v21 = vld [vmem:[%s3952_s5 + $0x640] sm:$0xff] }
 0x192   : > { %2012 = vmatpush2.msra.mxu0 %v1735_v22  ;;  %2083 = vmatpush2.msra.mxu1 %v1737_v23  ;;  %v1501_v22 = vld [vmem:[%s3952_s5 + $0x650] sm:$0xff]  ;;  %v1484_v23 = vld [vmem:[%s3952_s5 + $0x5c8] sm:$0xff] }
 0x193   : > { %2013 = vmatprep.subr.mxu0 %v1720_v24  ;;  %2084 = vmatprep.subr.mxu1 %v1722_v25  ;;  %v1486_v24 = vld [vmem:[%s3952_s5 + $0x5d8] sm:$0xff]  ;;  %v1483_v25 = vld [vmem:[%s3952_s5 + $0x5c0] sm:$0xff] }
 0x194   : > { %2014 = vmatpush2.msra.mxu0 %v1719_v26  ;;  %2085 = vmatpush2.msra.mxu1 %v1721_v27  ;;  %v1485_v26 = vld [vmem:[%s3952_s5 + $0x5d0] sm:$0xff]  ;;  %v1468_v27 = vld [vmem:[%s3952_s5 + $0x548] sm:$0xff] }
 0x195   : > { %2015 = vmatprep.subr.mxu0 %v1704_v28  ;;  %2086 = vmatprep.subr.mxu1 %v1706_v29  ;;  %v1470_v28 = vld [vmem:[%s3952_s5 + $0x558] sm:$0xff]  ;;  %v1467_v29 = vld [vmem:[%s3952_s5 + $0x540] sm:$0xff] }
 0x196   : > { %2016 = vmatpush2.msra.mxu0 %v1703_v30  ;;  %2087 = vmatpush2.msra.mxu1 %v1705_v31  ;;  %v1469_v30 = vld [vmem:[%s3952_s5 + $0x550] sm:$0xff]  ;;  %v1452_v31 = vld [vmem:[%s3952_s5 + $0x4c8] sm:$0xff] }
 0x197   : > { %2017 = vmatprep.subr.mxu0 %v1688_v32  ;;  %2088 = vmatprep.subr.mxu1 %v1690_v33  ;;  %v1454_v32 = vld [vmem:[%s3952_s5 + $0x4d8] sm:$0xff]  ;;  %v1451_v33 = vld [vmem:[%s3952_s5 + $0x4c0] sm:$0xff] }
 0x198   : > { %2018 = vmatpush2.msra.mxu0 %v1687_v34  ;;  %2089 = vmatpush2.msra.mxu1 %v1689_v35  ;;  %v1453_v34 = vld [vmem:[%s3952_s5 + $0x4d0] sm:$0xff]  ;;  %v1436_v35 = vld [vmem:[%s3952_s5 + $0x448] sm:$0xff] }
 0x199   : > { %2019 = vmatprep.subr.mxu0 %v1672_v36  ;;  %2090 = vmatprep.subr.mxu1 %v1674_v37  ;;  %v1438_v36 = vld [vmem:[%s3952_s5 + $0x458] sm:$0xff]  ;;  %v1435_v37 = vld [vmem:[%s3952_s5 + $0x440] sm:$0xff] }
 0x19a   : > { %2020 = vmatpush2.msra.mxu0 %v1671_v38  ;;  %2091 = vmatpush2.msra.mxu1 %v1673_v39  ;;  %v1437_v38 = vld [vmem:[%s3952_s5 + $0x450] sm:$0xff]  ;;  %v1420_v39 = vld [vmem:[%s3952_s5 + $0x3c8] sm:$0xff] }
 0x19b   : > { %2021 = vmatprep.subr.mxu0 %v1656_v40  ;;  %2092 = vmatprep.subr.mxu1 %v1658_v41  ;;  %v1422_v40 = vld [vmem:[%s3952_s5 + $0x3d8] sm:$0xff]  ;;  %v1419_v41 = vld [vmem:[%s3952_s5 + $0x3c0] sm:$0xff] }
 0x19c   : > { %2022 = vmatpush2.msra.mxu0 %v1655_v42  ;;  %2093 = vmatpush2.msra.mxu1 %v1657_v43  ;;  %v1421_v42 = vld [vmem:[%s3952_s5 + $0x3d0] sm:$0xff]  ;;  %v1404_v43 = vld [vmem:[%s3952_s5 + $0x348] sm:$0xff] }
 0x19d   : > { %2023 = vmatprep.subr.mxu0 %v1640_v44  ;;  %2094 = vmatprep.subr.mxu1 %v1642_v45  ;;  %v1406_v44 = vld [vmem:[%s3952_s5 + $0x358] sm:$0xff]  ;;  %v1403_v45 = vld [vmem:[%s3952_s5 + $0x340] sm:$0xff] }
 0x19e   : > { %2024 = vmatpush2.msra.mxu0 %v1639_v46  ;;  %2095 = vmatpush2.msra.mxu1 %v1641_v47  ;;  %v1405_v46 = vld [vmem:[%s3952_s5 + $0x350] sm:$0xff]  ;;  %v1388_v47 = vld [vmem:[%s3952_s5 + $0x2c8] sm:$0xff] }
 0x19f   : > { %2025 = vmatprep.subr.mxu0 %v1624_v48  ;;  %2096 = vmatprep.subr.mxu1 %v1626_v49  ;;  %v1390_v48 = vld [vmem:[%s3952_s5 + $0x2d8] sm:$0xff]  ;;  %v1387_v49 = vld [vmem:[%s3952_s5 + $0x2c0] sm:$0xff] }
 0x1a0   : > { %2026 = vmatpush2.msra.mxu0 %v1623_v50  ;;  %2097 = vmatpush2.msra.mxu1 %v1625_v51  ;;  %v1389_v50 = vld [vmem:[%s3952_s5 + $0x2d0] sm:$0xff]  ;;  %v1372_v51 = vld [vmem:[%s3952_s5 + $0x248] sm:$0xff] }
 0x1a1   : > { %2027 = vmatprep.subr.mxu0 %v1608_v52  ;;  %2098 = vmatprep.subr.mxu1 %v1610_v53  ;;  %v1374_v52 = vld [vmem:[%s3952_s5 + $0x258] sm:$0xff]  ;;  %v1371_v53 = vld [vmem:[%s3952_s5 + $0x240] sm:$0xff] }
 0x1a2   : > { %2028 = vmatpush2.msra.mxu0 %v1607_v54  ;;  %2099 = vmatpush2.msra.mxu1 %v1609_v55  ;;  %v1373_v54 = vld [vmem:[%s3952_s5 + $0x250] sm:$0xff]  ;;  %v1356_v55 = vld [vmem:[%s3952_s5 + $0x1c8] sm:$0xff] }
 0x1a3   : > { %2029 = vmatprep.subr.mxu0 %v1592_v57  ;;  %2100 = vmatprep.subr.mxu1 %v1594_v58  ;;  %v1358_v57 = vld [vmem:[%s3952_s5 + $0x1d8] sm:$0xff]  ;;  %v1355_v58 = vld [vmem:[%s3952_s5 + $0x1c0] sm:$0xff] }
 0x1a4   : > { %2030 = vmatpush2.msra.mxu0 %v1591_v59  ;;  %2101 = vmatpush2.msra.mxu1 %v1593_v60  ;;  %v1357_v59 = vld [vmem:[%s3952_s5 + $0x1d0] sm:$0xff]  ;;  %v1340_v60 = vld [vmem:[%s3952_s5 + $0x148] sm:$0xff] }
 0x1a5   : > { %2031 = vmatprep.subr.mxu0 %v1576_v61  ;;  %2102 = vmatprep.subr.mxu1 %v1578_v62  ;;  %v1342_v61 = vld [vmem:[%s3952_s5 + $0x158] sm:$0xff]  ;;  %v1339_v62 = vld [vmem:[%s3952_s5 + $0x140] sm:$0xff] }
 0x1a6   : > { %2032 = vmatpush2.msra.mxu0 %v1575_v0  ;;  %2103 = vmatpush2.msra.mxu1 %v1577_v1  ;;  %v1341_v0 = vld [vmem:[%s3952_s5 + $0x150] sm:$0xff]  ;;  %v1324_v1 = vld [vmem:[%s3952_s5 + $0xc8] sm:$0xff] }
 0x1a7   : > { %2033 = vmatprep.subr.mxu0 %v1560_v2  ;;  %2104 = vmatprep.subr.mxu1 %v1562_v3  ;;  %v1326_v2 = vld [vmem:[%s3952_s5 + $0xd8] sm:$0xff]  ;;  %v1323_v3 = vld [vmem:[%s3952_s5 + $0xc0] sm:$0xff] }
 0x1a8   : > { %2034 = vmatpush2.msra.mxu0 %v1559_v4  ;;  %2035 = vmatprep.mubr.f32.mxu0 %v4097_v63  ;;  %v1325_v4 = vld [vmem:[%s3952_s5 + $0xd0] sm:$0xff] }
 0x1a9   : > { %2105 = vmatpush2.msra.mxu1 %v1561_v5  ;;  %2106 = vmatprep.mubr.f32.mxu1 %v4097_v63  ;;  %v1308_v5 = vld [vmem:[%s3952_s5 + $0x48] sm:$0xff] }
 0x1aa   : > { %2036 = vmatmul.mubr.f32.vlgmr.msra.gmra.mxu0 %v4087_v56  ;;  %2107 = vmatmul.mubr.f32.vlgmr.msra.gmra.mxu1 %v4087_v56  ;;  %v1515_v56 = vld [vmem:[%s3952_s5 + $0x6c0] sm:$0xff] }
 0x1ab   : > { %2113 = vmatprep.subr.mxu0 %v1548_v6  ;;  %2184 = vmatprep.subr.mxu1 %v1550_v7  ;;  %v1310_v6 = vld [vmem:[%s3952_s5 + $0x58] sm:$0xff]  ;;  %v1307_v7 = vld [vmem:[%s3952_s5 + $0x40] sm:$0xff] }
 0x1ac   : > { %2114 = vmatpush1.msra.mxu0 %v1547_v8  ;;  %2185 = vmatpush1.msra.mxu1 %v1549_v9  ;;  %v1309_v8 = vld [vmem:[%s3952_s5 + $0x50] sm:$0xff]  ;;  %v1804_v9 = vld [vmem:[%s3952_s5 + $0xfc8] sm:$0xff] }
 0x1ad   : > { %2115 = vmatprep.subr.mxu0 %v1532_v10  ;;  %2186 = vmatprep.subr.mxu1 %v1534_v11  ;;  %v1806_v10 = vld [vmem:[%s3952_s5 + $0xfd8] sm:$0xff]  ;;  %v1803_v11 = vld [vmem:[%s3952_s5 + $0xfc0] sm:$0xff] }
 0x1ae   : > { %2116 = vmatpush1.msra.mxu0 %v1531_v12  ;;  %2187 = vmatpush1.msra.mxu1 %v1533_v13  ;;  %v1805_v12 = vld [vmem:[%s3952_s5 + $0xfd0] sm:$0xff]  ;;  %v1788_v13 = vld [vmem:[%s3952_s5 + $0xf48] sm:$0xff] }
 0x1af   : > { %2117 = vmatprep.subr.mxu0 %v1516_v14  ;;  %2188 = vmatprep.subr.mxu1 %v1518_v15  ;;  %v1790_v14 = vld [vmem:[%s3952_s5 + $0xf58] sm:$0xff]  ;;  %v1787_v15 = vld [vmem:[%s3952_s5 + $0xf40] sm:$0xff] }
 0x1b0   : > { %2742 = vset.pattern.permute.xlu0 %v2816_v20  ;;  %2118 = vmatpush1.msra.mxu0 %v1515_v56  ;;  %v1789_v56 = vld [vmem:[%s3952_s5 + $0xf50] sm:$0xff]  ;;  %v1756_v20 = vld [vmem:[%s3952_s5 + $0xe48] sm:$0xff] }
 0x1b1   : > { %2189 = vmatpush1.msra.mxu1 %v1517_v16  ;;  %1815 = vperm.xlu0 %2742, %v1812_v17   ;;  %v1772_v16 = vld [vmem:[%s3952_s5 + $0xec8] sm:$0xff]  ;;  %v1774_v17 = vld [vmem:[%s3952_s5 + $0xed8] sm:$0xff] }
 0x1b2   : > { %2119 = vmatprep.subr.mxu0 %v1500_v18  ;;  %2190 = vmatprep.subr.mxu1 %v1502_v19  ;;  %v1771_v18 = vld [vmem:[%s3952_s5 + $0xec0] sm:$0xff]  ;;  %v1773_v19 = vld [vmem:[%s3952_s5 + $0xed0] sm:$0xff] }
 0x1b3   : > { %2120 = vmatpush1.msra.mxu0 %v1499_v21  ;;  %2191 = vmatpush1.msra.mxu1 %v1501_v22  ;;  %v1758_v21 = vld [vmem:[%s3952_s5 + $0xe58] sm:$0xff]  ;;  %v1755_v22 = vld [vmem:[%s3952_s5 + $0xe40] sm:$0xff] }
 0x1b4   : > { %2121 = vmatprep.subr.mxu0 %v1484_v23  ;;  %2192 = vmatprep.subr.mxu1 %v1486_v24  ;;  %v1757_v23 = vld [vmem:[%s3952_s5 + $0xe50] sm:$0xff]  ;;  %v1740_v24 = vld [vmem:[%s3952_s5 + $0xdc8] sm:$0xff] }
 0x1b5   : > { %2122 = vmatpush1.msra.mxu0 %v1483_v25  ;;  %2193 = vmatpush1.msra.mxu1 %v1485_v26  ;;  %v1742_v25 = vld [vmem:[%s3952_s5 + $0xdd8] sm:$0xff]  ;;  %v1739_v26 = vld [vmem:[%s3952_s5 + $0xdc0] sm:$0xff] }
 0x1b6   : > { %2123 = vmatprep.subr.mxu0 %v1468_v27  ;;  %2194 = vmatprep.subr.mxu1 %v1470_v28  ;;  %v1741_v27 = vld [vmem:[%s3952_s5 + $0xdd0] sm:$0xff]  ;;  %v1724_v28 = vld [vmem:[%s3952_s5 + $0xd48] sm:$0xff] }
 0x1b7   : > { %2124 = vmatpush1.msra.mxu0 %v1467_v29  ;;  %2195 = vmatpush1.msra.mxu1 %v1469_v30  ;;  %v1726_v29 = vld [vmem:[%s3952_s5 + $0xd58] sm:$0xff]  ;;  %v1723_v30 = vld [vmem:[%s3952_s5 + $0xd40] sm:$0xff] }
 0x1b8   : > { %2125 = vmatprep.subr.mxu0 %v1452_v31  ;;  %2196 = vmatprep.subr.mxu1 %v1454_v32  ;;  %v1725_v31 = vld [vmem:[%s3952_s5 + $0xd50] sm:$0xff]  ;;  %v1708_v32 = vld [vmem:[%s3952_s5 + $0xcc8] sm:$0xff] }
 0x1b9   : > { %2126 = vmatpush1.msra.mxu0 %v1451_v33  ;;  %2197 = vmatpush1.msra.mxu1 %v1453_v34  ;;  %v1710_v33 = vld [vmem:[%s3952_s5 + $0xcd8] sm:$0xff]  ;;  %v1707_v34 = vld [vmem:[%s3952_s5 + $0xcc0] sm:$0xff] }
 0x1ba   : > { %2127 = vmatprep.subr.mxu0 %v1436_v35  ;;  %2198 = vmatprep.subr.mxu1 %v1438_v36  ;;  %v1709_v35 = vld [vmem:[%s3952_s5 + $0xcd0] sm:$0xff]  ;;  %v1692_v36 = vld [vmem:[%s3952_s5 + $0xc48] sm:$0xff] }
 0x1bb   : > { %2128 = vmatpush1.msra.mxu0 %v1435_v37  ;;  %2199 = vmatpush1.msra.mxu1 %v1437_v38  ;;  %v1694_v37 = vld [vmem:[%s3952_s5 + $0xc58] sm:$0xff]  ;;  %v1691_v38 = vld [vmem:[%s3952_s5 + $0xc40] sm:$0xff] }
 0x1bc   : > { %2129 = vmatprep.subr.mxu0 %v1420_v39  ;;  %2200 = vmatprep.subr.mxu1 %v1422_v40  ;;  %v1693_v39 = vld [vmem:[%s3952_s5 + $0xc50] sm:$0xff]  ;;  %v1676_v40 = vld [vmem:[%s3952_s5 + $0xbc8] sm:$0xff] }
 0x1bd   : > { %2130 = vmatpush1.msra.mxu0 %v1419_v41  ;;  %2201 = vmatpush1.msra.mxu1 %v1421_v42  ;;  %v1678_v41 = vld [vmem:[%s3952_s5 + $0xbd8] sm:$0xff]  ;;  %v1675_v42 = vld [vmem:[%s3952_s5 + $0xbc0] sm:$0xff] }
 0x1be   : > { %2131 = vmatprep.subr.mxu0 %v1404_v43  ;;  %2202 = vmatprep.subr.mxu1 %v1406_v44  ;;  %v1677_v43 = vld [vmem:[%s3952_s5 + $0xbd0] sm:$0xff]  ;;  %v1660_v44 = vld [vmem:[%s3952_s5 + $0xb48] sm:$0xff] }
 0x1bf   : > { %2132 = vmatpush1.msra.mxu0 %v1403_v45  ;;  %2203 = vmatpush1.msra.mxu1 %v1405_v46  ;;  %v1662_v45 = vld [vmem:[%s3952_s5 + $0xb58] sm:$0xff]  ;;  %v1659_v46 = vld [vmem:[%s3952_s5 + $0xb40] sm:$0xff] }
 0x1c0   : > { %2133 = vmatprep.subr.mxu0 %v1388_v47  ;;  %2204 = vmatprep.subr.mxu1 %v1390_v48  ;;  %v1661_v47 = vld [vmem:[%s3952_s5 + $0xb50] sm:$0xff]  ;;  %v1644_v48 = vld [vmem:[%s3952_s5 + $0xac8] sm:$0xff] }
 0x1c1   : > { %2134 = vmatpush1.msra.mxu0 %v1387_v49  ;;  %2205 = vmatpush1.msra.mxu1 %v1389_v50  ;;  %v1646_v49 = vld [vmem:[%s3952_s5 + $0xad8] sm:$0xff]  ;;  %v1643_v50 = vld [vmem:[%s3952_s5 + $0xac0] sm:$0xff] }
 0x1c2   : > { %2135 = vmatprep.subr.mxu0 %v1372_v51  ;;  %2206 = vmatprep.subr.mxu1 %v1374_v52  ;;  %v1645_v51 = vld [vmem:[%s3952_s5 + $0xad0] sm:$0xff]  ;;  %v1628_v52 = vld [vmem:[%s3952_s5 + $0xa48] sm:$0xff] }
 0x1c3   : > { %2136 = vmatpush1.msra.mxu0 %v1371_v53  ;;  %2207 = vmatpush1.msra.mxu1 %v1373_v54  ;;  %v1630_v53 = vld [vmem:[%s3952_s5 + $0xa58] sm:$0xff]  ;;  %v1627_v54 = vld [vmem:[%s3952_s5 + $0xa40] sm:$0xff] }
 0x1c4   : > { %2137 = vmatprep.subr.mxu0 %v1356_v55  ;;  %2208 = vmatprep.subr.mxu1 %v1358_v57  ;;  %v1629_v55 = vld [vmem:[%s3952_s5 + $0xa50] sm:$0xff]  ;;  %v1612_v57 = vld [vmem:[%s3952_s5 + $0x9c8] sm:$0xff] }
 0x1c5   : > { %2138 = vmatpush1.msra.mxu0 %v1355_v58  ;;  %2209 = vmatpush1.msra.mxu1 %v1357_v59  ;;  %v1614_v58 = vld [vmem:[%s3952_s5 + $0x9d8] sm:$0xff]  ;;  %v1611_v59 = vld [vmem:[%s3952_s5 + $0x9c0] sm:$0xff] }
 0x1c6   : > { %2139 = vmatprep.subr.mxu0 %v1340_v60  ;;  %2210 = vmatprep.subr.mxu1 %v1342_v61  ;;  %v1613_v60 = vld [vmem:[%s3952_s5 + $0x9d0] sm:$0xff]  ;;  %v1596_v61 = vld [vmem:[%s3952_s5 + $0x948] sm:$0xff] }
 0x1c7   : > { %2140 = vmatpush1.msra.mxu0 %v1339_v62  ;;  %2211 = vmatpush1.msra.mxu1 %v1341_v0  ;;  %v1598_v62 = vld [vmem:[%s3952_s5 + $0x958] sm:$0xff]  ;;  %v1595_v0 = vld [vmem:[%s3952_s5 + $0x940] sm:$0xff] }
 0x1c8   : > { %2141 = vmatprep.subr.mxu0 %v1324_v1  ;;  %2212 = vmatprep.subr.mxu1 %v1326_v2  ;;  %v1597_v1 = vld [vmem:[%s3952_s5 + $0x950] sm:$0xff]  ;;  %v1580_v2 = vld [vmem:[%s3952_s5 + $0x8c8] sm:$0xff] }
 0x1c9   : > { %2142 = vmatpush1.msra.mxu0 %v1323_v3  ;;  %2213 = vmatpush1.msra.mxu1 %v1325_v4  ;;  %v1582_v3 = vld [vmem:[%s3952_s5 + $0x8d8] sm:$0xff]  ;;  %v1579_v4 = vld [vmem:[%s3952_s5 + $0x8c0] sm:$0xff] }
 0x1ca   : > { %2143 = vmatprep.subr.mxu0 %v1308_v5  ;;  %2214 = vmatprep.subr.mxu1 %v1310_v6  ;;  %v1581_v5 = vld [vmem:[%s3952_s5 + $0x8d0] sm:$0xff]  ;;  %v1564_v6 = vld [vmem:[%s3952_s5 + $0x848] sm:$0xff] }
 0x1cb   : > { %2144 = vmatpush1.msra.mxu0 %v1307_v7  ;;  %2215 = vmatpush1.msra.mxu1 %v1309_v8  ;;  %v1566_v7 = vld [vmem:[%s3952_s5 + $0x858] sm:$0xff]  ;;  %v1563_v8 = vld [vmem:[%s3952_s5 + $0x840] sm:$0xff] }
 0x1cc   : > { %2145 = vmatprep.subr.mxu0 %v1804_v9  ;;  %2216 = vmatprep.subr.mxu1 %v1806_v10  ;;  %v1565_v9 = vld [vmem:[%s3952_s5 + $0x850] sm:$0xff]  ;;  %v1552_v10 = vld [vmem:[%s3952_s5 + $0x7e8] sm:$0xff] }
 0x1cd   : > { %2146 = vmatpush2.msra.mxu0 %v1803_v11  ;;  %2217 = vmatpush2.msra.mxu1 %v1805_v12  ;;  %v1554_v11 = vld [vmem:[%s3952_s5 + $0x7f8] sm:$0xff]  ;;  %v1551_v12 = vld [vmem:[%s3952_s5 + $0x7e0] sm:$0xff] }
 0x1ce   : > { %2147 = vmatprep.subr.mxu0 %v1788_v13  ;;  %2218 = vmatprep.subr.mxu1 %v1790_v14  ;;  %v1553_v13 = vld [vmem:[%s3952_s5 + $0x7f0] sm:$0xff]  ;;  %v4376_v14 = vld.sshfl [vmem:[%s4078_s8] sm:$0x33 pattern:$0x76325410] }
 0x1cf   : > { %2148 = vmatpush2.msra.mxu0 %v1787_v15  ;;  %2219 = vmatpush2.msra.mxu1 %v1789_v56  ;;  %v1536_v15 = vld [vmem:[%s3952_s5 + $0x768] sm:$0xff]  ;;  %v1538_v56 = vld [vmem:[%s3952_s5 + $0x778] sm:$0xff] }
 0x1d0   : > { %2149 = vmatprep.subr.mxu0 %v1772_v16  ;;  %2220 = vmatprep.subr.mxu1 %v1774_v17  ;;  %v1535_v16 = vld [vmem:[%s3952_s5 + $0x760] sm:$0xff]  ;;  %v1537_v17 = vld [vmem:[%s3952_s5 + $0x770] sm:$0xff] }
 0x1d1   : > { %2150 = vmatpush2.msra.mxu0 %v1771_v18  ;;  %2221 = vmatpush2.msra.mxu1 %v1773_v19  ;;  %v1520_v18 = vld [vmem:[%s3952_s5 + $0x6e8] sm:$0xff]  ;;  %v1522_v19 = vld [vmem:[%s3952_s5 + $0x6f8] sm:$0xff] }
 0x1d2   : > { %2151 = vmatprep.subr.mxu0 %v1756_v20  ;;  %2222 = vmatprep.subr.mxu1 %v1758_v21  ;;  %v1519_v20 = vld [vmem:[%s3952_s5 + $0x6e0] sm:$0xff]  ;;  %v1521_v21 = vld [vmem:[%s3952_s5 + $0x6f0] sm:$0xff] }
 0x1d3   : > { %2152 = vmatpush2.msra.mxu0 %v1755_v22  ;;  %2223 = vmatpush2.msra.mxu1 %v1757_v23  ;;  %v1504_v22 = vld [vmem:[%s3952_s5 + $0x668] sm:$0xff]  ;;  %v1506_v23 = vld [vmem:[%s3952_s5 + $0x678] sm:$0xff] }
 0x1d4   : > { %2153 = vmatprep.subr.mxu0 %v1740_v24  ;;  %2224 = vmatprep.subr.mxu1 %v1742_v25  ;;  %v1503_v24 = vld [vmem:[%s3952_s5 + $0x660] sm:$0xff]  ;;  %v1505_v25 = vld [vmem:[%s3952_s5 + $0x670] sm:$0xff] }
 0x1d5   : > { %2154 = vmatpush2.msra.mxu0 %v1739_v26  ;;  %2225 = vmatpush2.msra.mxu1 %v1741_v27  ;;  %v1488_v26 = vld [vmem:[%s3952_s5 + $0x5e8] sm:$0xff]  ;;  %v1490_v27 = vld [vmem:[%s3952_s5 + $0x5f8] sm:$0xff] }
 0x1d6   : > { %2155 = vmatprep.subr.mxu0 %v1724_v28  ;;  %2226 = vmatprep.subr.mxu1 %v1726_v29  ;;  %v1487_v28 = vld [vmem:[%s3952_s5 + $0x5e0] sm:$0xff]  ;;  %v1489_v29 = vld [vmem:[%s3952_s5 + $0x5f0] sm:$0xff] }
 0x1d7   : > { %2156 = vmatpush2.msra.mxu0 %v1723_v30  ;;  %2227 = vmatpush2.msra.mxu1 %v1725_v31  ;;  %v1472_v30 = vld [vmem:[%s3952_s5 + $0x568] sm:$0xff]  ;;  %v1474_v31 = vld [vmem:[%s3952_s5 + $0x578] sm:$0xff] }
 0x1d8   : > { %2157 = vmatprep.subr.mxu0 %v1708_v32  ;;  %2228 = vmatprep.subr.mxu1 %v1710_v33  ;;  %v1471_v32 = vld [vmem:[%s3952_s5 + $0x560] sm:$0xff]  ;;  %v1473_v33 = vld [vmem:[%s3952_s5 + $0x570] sm:$0xff] }
 0x1d9   : > { %2158 = vmatpush2.msra.mxu0 %v1707_v34  ;;  %2229 = vmatpush2.msra.mxu1 %v1709_v35  ;;  %v1456_v34 = vld [vmem:[%s3952_s5 + $0x4e8] sm:$0xff]  ;;  %v1458_v35 = vld [vmem:[%s3952_s5 + $0x4f8] sm:$0xff] }
 0x1da   : > { %2159 = vmatprep.subr.mxu0 %v1692_v36  ;;  %2230 = vmatprep.subr.mxu1 %v1694_v37  ;;  %v1455_v36 = vld [vmem:[%s3952_s5 + $0x4e0] sm:$0xff]  ;;  %v1457_v37 = vld [vmem:[%s3952_s5 + $0x4f0] sm:$0xff] }
 0x1db   : > { %2160 = vmatpush2.msra.mxu0 %v1691_v38  ;;  %2231 = vmatpush2.msra.mxu1 %v1693_v39  ;;  %v1440_v38 = vld [vmem:[%s3952_s5 + $0x468] sm:$0xff]  ;;  %v1442_v39 = vld [vmem:[%s3952_s5 + $0x478] sm:$0xff] }
 0x1dc   : > { %2161 = vmatprep.subr.mxu0 %v1676_v40  ;;  %2232 = vmatprep.subr.mxu1 %v1678_v41  ;;  %v1439_v40 = vld [vmem:[%s3952_s5 + $0x460] sm:$0xff]  ;;  %v1441_v41 = vld [vmem:[%s3952_s5 + $0x470] sm:$0xff] }
 0x1dd   : > { %2162 = vmatpush2.msra.mxu0 %v1675_v42  ;;  %2233 = vmatpush2.msra.mxu1 %v1677_v43  ;;  %v1424_v42 = vld [vmem:[%s3952_s5 + $0x3e8] sm:$0xff]  ;;  %v1426_v43 = vld [vmem:[%s3952_s5 + $0x3f8] sm:$0xff] }
 0x1de   : > { %2163 = vmatprep.subr.mxu0 %v1660_v44  ;;  %2234 = vmatprep.subr.mxu1 %v1662_v45  ;;  %v1423_v44 = vld [vmem:[%s3952_s5 + $0x3e0] sm:$0xff]  ;;  %v1425_v45 = vld [vmem:[%s3952_s5 + $0x3f0] sm:$0xff] }
 0x1df   : > { %2164 = vmatpush2.msra.mxu0 %v1659_v46  ;;  %2235 = vmatpush2.msra.mxu1 %v1661_v47  ;;  %v1408_v46 = vld [vmem:[%s3952_s5 + $0x368] sm:$0xff]  ;;  %v1410_v47 = vld [vmem:[%s3952_s5 + $0x378] sm:$0xff] }
 0x1e0   : > { %2165 = vmatprep.subr.mxu0 %v1644_v48  ;;  %2236 = vmatprep.subr.mxu1 %v1646_v49  ;;  %v1407_v48 = vld [vmem:[%s3952_s5 + $0x360] sm:$0xff]  ;;  %v1409_v49 = vld [vmem:[%s3952_s5 + $0x370] sm:$0xff] }
 0x1e1   : > { %2166 = vmatpush2.msra.mxu0 %v1643_v50  ;;  %2237 = vmatpush2.msra.mxu1 %v1645_v51  ;;  %v1392_v50 = vld [vmem:[%s3952_s5 + $0x2e8] sm:$0xff]  ;;  %v1394_v51 = vld [vmem:[%s3952_s5 + $0x2f8] sm:$0xff] }
 0x1e2   : > { %2167 = vmatprep.subr.mxu0 %v1628_v52  ;;  %2238 = vmatprep.subr.mxu1 %v1630_v53  ;;  %v1391_v52 = vld [vmem:[%s3952_s5 + $0x2e0] sm:$0xff]  ;;  %v1393_v53 = vld [vmem:[%s3952_s5 + $0x2f0] sm:$0xff] }
 0x1e3   : > { %2168 = vmatpush2.msra.mxu0 %v1627_v54  ;;  %2239 = vmatpush2.msra.mxu1 %v1629_v55  ;;  %v1376_v54 = vld [vmem:[%s3952_s5 + $0x268] sm:$0xff]  ;;  %v1378_v55 = vld [vmem:[%s3952_s5 + $0x278] sm:$0xff] }
 0x1e4   : > { %2169 = vmatprep.subr.mxu0 %v1612_v57  ;;  %2240 = vmatprep.subr.mxu1 %v1614_v58  ;;  %v1375_v57 = vld [vmem:[%s3952_s5 + $0x260] sm:$0xff]  ;;  %v1377_v58 = vld [vmem:[%s3952_s5 + $0x270] sm:$0xff] }
 0x1e5   : > { %2170 = vmatpush2.msra.mxu0 %v1611_v59  ;;  %2241 = vmatpush2.msra.mxu1 %v1613_v60  ;;  %v1360_v59 = vld [vmem:[%s3952_s5 + $0x1e8] sm:$0xff]  ;;  %v1362_v60 = vld [vmem:[%s3952_s5 + $0x1f8] sm:$0xff] }
 0x1e6   : > { %2171 = vmatprep.subr.mxu0 %v1596_v61  ;;  %2242 = vmatprep.subr.mxu1 %v1598_v62  ;;  %v1359_v61 = vld [vmem:[%s3952_s5 + $0x1e0] sm:$0xff]  ;;  %v1361_v62 = vld [vmem:[%s3952_s5 + $0x1f0] sm:$0xff] }
 0x1e7   : > { %2172 = vmatpush2.msra.mxu0 %v1595_v0  ;;  %2243 = vmatpush2.msra.mxu1 %v1597_v1  ;;  %v1344_v0 = vld [vmem:[%s3952_s5 + $0x168] sm:$0xff]  ;;  %v1346_v1 = vld [vmem:[%s3952_s5 + $0x178] sm:$0xff] }
 0x1e8   : > { %2173 = vmatprep.subr.mxu0 %v1580_v2  ;;  %2244 = vmatprep.subr.mxu1 %v1582_v3  ;;  %v1343_v2 = vld [vmem:[%s3952_s5 + $0x160] sm:$0xff]  ;;  %v1345_v3 = vld [vmem:[%s3952_s5 + $0x170] sm:$0xff] }
 0x1e9   : > { %2174 = vmatpush2.msra.mxu0 %v1579_v4  ;;  %2245 = vmatpush2.msra.mxu1 %v1581_v5  ;;  %v1328_v4 = vld [vmem:[%s3952_s5 + $0xe8] sm:$0xff]  ;;  %v1330_v5 = vld [vmem:[%s3952_s5 + $0xf8] sm:$0xff] }
 0x1ea   : > { %2175 = vmatprep.subr.mxu0 %v1564_v6  ;;  %2246 = vmatprep.subr.mxu1 %v1566_v7  ;;  %v1327_v6 = vld [vmem:[%s3952_s5 + $0xe0] sm:$0xff]  ;;  %v1329_v7 = vld [vmem:[%s3952_s5 + $0xf0] sm:$0xff] }
 0x1eb   : > { %2176 = vmatpush2.msra.mxu0 %v1563_v8  ;;  %2177 = vmatprep.mubr.f32.mxu0 %v4097_v63  ;;  %v1312_v8 = vld [vmem:[%s3952_s5 + $0x68] sm:$0xff] }
 0x1ec   : > { %2247 = vmatpush2.msra.mxu1 %v1565_v9  ;;  %2248 = vmatprep.mubr.f32.mxu1 %v4097_v63  ;;  %v1314_v9 = vld [vmem:[%s3952_s5 + $0x78] sm:$0xff] }
 0x1ed   : > { %2178 = vmatmul.mubr.f32.vlgmr.msra.gmra.mxu0 %v4376_v14  ;;  %2249 = vmatmul.mubr.f32.vlgmr.msra.gmra.mxu1 %v4376_v14 }
 0x1ee   : > { %2255 = vmatprep.subr.mxu0 %v1552_v10  ;;  %2326 = vmatprep.subr.mxu1 %v1554_v11  ;;  %v1311_v10 = vld [vmem:[%s3952_s5 + $0x60] sm:$0xff]  ;;  %v1313_v11 = vld [vmem:[%s3952_s5 + $0x70] sm:$0xff] }
 0x1ef   : > { %2256 = vmatpush1.msra.mxu0 %v1551_v12  ;;  %2327 = vmatpush1.msra.mxu1 %v1553_v13  ;;  %v1808_v12 = vld [vmem:[%s3952_s5 + $0xfe8] sm:$0xff]  ;;  %v1810_v13 = vld [vmem:[%s3952_s5 + $0xff8] sm:$0xff] }
 0x1f0   : > { %2257 = vmatprep.subr.mxu0 %v1536_v15  ;;  %2328 = vmatprep.subr.mxu1 %v1538_v56  ;;  %v1807_v15 = vld [vmem:[%s3952_s5 + $0xfe0] sm:$0xff]  ;;  %v1809_v56 = vld [vmem:[%s3952_s5 + $0xff0] sm:$0xff] }
 0x1f1   : > { %2258 = vmatpush1.msra.mxu0 %v1535_v16  ;;  %2329 = vmatpush1.msra.mxu1 %v1537_v17  ;;  %v1792_v16 = vld [vmem:[%s3952_s5 + $0xf68] sm:$0xff]  ;;  %v1794_v17 = vld [vmem:[%s3952_s5 + $0xf78] sm:$0xff] }
 0x1f2   : > { %2259 = vmatprep.subr.mxu0 %v1520_v18  ;;  %2330 = vmatprep.subr.mxu1 %v1522_v19  ;;  %v1791_v18 = vld [vmem:[%s3952_s5 + $0xf60] sm:$0xff]  ;;  %v1793_v19 = vld [vmem:[%s3952_s5 + $0xf70] sm:$0xff] }
 0x1f3   : > { %2260 = vmatpush1.msra.mxu0 %v1519_v20  ;;  %2331 = vmatpush1.msra.mxu1 %v1521_v21  ;;  %v1776_v20 = vld [vmem:[%s3952_s5 + $0xee8] sm:$0xff]  ;;  %v1778_v21 = vld [vmem:[%s3952_s5 + $0xef8] sm:$0xff] }
 0x1f4   : > { %2261 = vmatprep.subr.mxu0 %v1504_v22  ;;  %2332 = vmatprep.subr.mxu1 %v1506_v23  ;;  %v1775_v22 = vld [vmem:[%s3952_s5 + $0xee0] sm:$0xff]  ;;  %v1777_v23 = vld [vmem:[%s3952_s5 + $0xef0] sm:$0xff] }
 0x1f5   : > { %2262 = vmatpush1.msra.mxu0 %v1503_v24  ;;  %2333 = vmatpush1.msra.mxu1 %v1505_v25  ;;  %v1760_v24 = vld [vmem:[%s3952_s5 + $0xe68] sm:$0xff]  ;;  %v1762_v25 = vld [vmem:[%s3952_s5 + $0xe78] sm:$0xff] }
 0x1f6   : > { %2263 = vmatprep.subr.mxu0 %v1488_v26  ;;  %2334 = vmatprep.subr.mxu1 %v1490_v27  ;;  %v1759_v26 = vld [vmem:[%s3952_s5 + $0xe60] sm:$0xff]  ;;  %v1761_v27 = vld [vmem:[%s3952_s5 + $0xe70] sm:$0xff] }
 0x1f7   : > { %2264 = vmatpush1.msra.mxu0 %v1487_v28  ;;  %2335 = vmatpush1.msra.mxu1 %v1489_v29  ;;  %v1744_v28 = vld [vmem:[%s3952_s5 + $0xde8] sm:$0xff]  ;;  %v1746_v29 = vld [vmem:[%s3952_s5 + $0xdf8] sm:$0xff] }
 0x1f8   : > { %2265 = vmatprep.subr.mxu0 %v1472_v30  ;;  %2336 = vmatprep.subr.mxu1 %v1474_v31  ;;  %v1743_v30 = vld [vmem:[%s3952_s5 + $0xde0] sm:$0xff]  ;;  %v1745_v31 = vld [vmem:[%s3952_s5 + $0xdf0] sm:$0xff] }
 0x1f9   : > { %2266 = vmatpush1.msra.mxu0 %v1471_v32  ;;  %2337 = vmatpush1.msra.mxu1 %v1473_v33  ;;  %v1728_v32 = vld [vmem:[%s3952_s5 + $0xd68] sm:$0xff]  ;;  %v1730_v33 = vld [vmem:[%s3952_s5 + $0xd78] sm:$0xff] }
 0x1fa   : > { %2267 = vmatprep.subr.mxu0 %v1456_v34  ;;  %2338 = vmatprep.subr.mxu1 %v1458_v35  ;;  %v1727_v34 = vld [vmem:[%s3952_s5 + $0xd60] sm:$0xff]  ;;  %v1729_v35 = vld [vmem:[%s3952_s5 + $0xd70] sm:$0xff] }
 0x1fb   : > { %2268 = vmatpush1.msra.mxu0 %v1455_v36  ;;  %2339 = vmatpush1.msra.mxu1 %v1457_v37  ;;  %v1712_v36 = vld [vmem:[%s3952_s5 + $0xce8] sm:$0xff]  ;;  %v1714_v37 = vld [vmem:[%s3952_s5 + $0xcf8] sm:$0xff] }
 0x1fc   : > { %2269 = vmatprep.subr.mxu0 %v1440_v38  ;;  %2340 = vmatprep.subr.mxu1 %v1442_v39  ;;  %v1711_v38 = vld [vmem:[%s3952_s5 + $0xce0] sm:$0xff]  ;;  %v1713_v39 = vld [vmem:[%s3952_s5 + $0xcf0] sm:$0xff] }
 0x1fd   : > { %2270 = vmatpush1.msra.mxu0 %v1439_v40  ;;  %2341 = vmatpush1.msra.mxu1 %v1441_v41  ;;  %v1696_v40 = vld [vmem:[%s3952_s5 + $0xc68] sm:$0xff]  ;;  %v1698_v41 = vld [vmem:[%s3952_s5 + $0xc78] sm:$0xff] }
 0x1fe   : > { %2271 = vmatprep.subr.mxu0 %v1424_v42  ;;  %2342 = vmatprep.subr.mxu1 %v1426_v43  ;;  %v1695_v42 = vld [vmem:[%s3952_s5 + $0xc60] sm:$0xff]  ;;  %v1697_v43 = vld [vmem:[%s3952_s5 + $0xc70] sm:$0xff] }
 0x1ff   : > { %2272 = vmatpush1.msra.mxu0 %v1423_v44  ;;  %2343 = vmatpush1.msra.mxu1 %v1425_v45  ;;  %v1680_v44 = vld [vmem:[%s3952_s5 + $0xbe8] sm:$0xff]  ;;  %v1682_v45 = vld [vmem:[%s3952_s5 + $0xbf8] sm:$0xff] }
 0x200   : > { %2273 = vmatprep.subr.mxu0 %v1408_v46  ;;  %2344 = vmatprep.subr.mxu1 %v1410_v47  ;;  %v1679_v46 = vld [vmem:[%s3952_s5 + $0xbe0] sm:$0xff]  ;;  %v1681_v47 = vld [vmem:[%s3952_s5 + $0xbf0] sm:$0xff] }
 0x201   : > { %2274 = vmatpush1.msra.mxu0 %v1407_v48  ;;  %2345 = vmatpush1.msra.mxu1 %v1409_v49  ;;  %v1664_v48 = vld [vmem:[%s3952_s5 + $0xb68] sm:$0xff]  ;;  %v1666_v49 = vld [vmem:[%s3952_s5 + $0xb78] sm:$0xff] }
 0x202   : > { %2275 = vmatprep.subr.mxu0 %v1392_v50  ;;  %2346 = vmatprep.subr.mxu1 %v1394_v51  ;;  %v1663_v50 = vld [vmem:[%s3952_s5 + $0xb60] sm:$0xff]  ;;  %v1665_v51 = vld [vmem:[%s3952_s5 + $0xb70] sm:$0xff] }
 0x203   : > { %2276 = vmatpush1.msra.mxu0 %v1391_v52  ;;  %2347 = vmatpush1.msra.mxu1 %v1393_v53  ;;  %v1648_v52 = vld [vmem:[%s3952_s5 + $0xae8] sm:$0xff]  ;;  %v1650_v53 = vld [vmem:[%s3952_s5 + $0xaf8] sm:$0xff] }
 0x204   : > { %2277 = vmatprep.subr.mxu0 %v1376_v54  ;;  %2348 = vmatprep.subr.mxu1 %v1378_v55  ;;  %v1647_v54 = vld [vmem:[%s3952_s5 + $0xae0] sm:$0xff]  ;;  %v1649_v55 = vld [vmem:[%s3952_s5 + $0xaf0] sm:$0xff] }
 0x205   : > { %2278 = vmatpush1.msra.mxu0 %v1375_v57  ;;  %2349 = vmatpush1.msra.mxu1 %v1377_v58  ;;  %v1632_v57 = vld [vmem:[%s3952_s5 + $0xa68] sm:$0xff]  ;;  %v1634_v58 = vld [vmem:[%s3952_s5 + $0xa78] sm:$0xff] }
 0x206   : > { %2279 = vmatprep.subr.mxu0 %v1360_v59  ;;  %2350 = vmatprep.subr.mxu1 %v1362_v60  ;;  %v1631_v59 = vld [vmem:[%s3952_s5 + $0xa60] sm:$0xff]  ;;  %v1633_v60 = vld [vmem:[%s3952_s5 + $0xa70] sm:$0xff] }
 0x207   : > { %2280 = vmatpush1.msra.mxu0 %v1359_v61  ;;  %2351 = vmatpush1.msra.mxu1 %v1361_v62  ;;  %v1616_v61 = vld [vmem:[%s3952_s5 + $0x9e8] sm:$0xff]  ;;  %v1618_v62 = vld [vmem:[%s3952_s5 + $0x9f8] sm:$0xff] }
 0x208   : > { %2281 = vmatprep.subr.mxu0 %v1344_v0  ;;  %2352 = vmatprep.subr.mxu1 %v1346_v1  ;;  %v1615_v0 = vld [vmem:[%s3952_s5 + $0x9e0] sm:$0xff]  ;;  %v1617_v1 = vld [vmem:[%s3952_s5 + $0x9f0] sm:$0xff] }
 0x209   : > { %2282 = vmatpush1.msra.mxu0 %v1343_v2  ;;  %2353 = vmatpush1.msra.mxu1 %v1345_v3  ;;  %v1600_v2 = vld [vmem:[%s3952_s5 + $0x968] sm:$0xff]  ;;  %v1602_v3 = vld [vmem:[%s3952_s5 + $0x978] sm:$0xff] }
 0x20a   : > { %2283 = vmatprep.subr.mxu0 %v1328_v4  ;;  %2354 = vmatprep.subr.mxu1 %v1330_v5  ;;  %v1599_v4 = vld [vmem:[%s3952_s5 + $0x960] sm:$0xff]  ;;  %v1601_v5 = vld [vmem:[%s3952_s5 + $0x970] sm:$0xff] }
 0x20b   : > { %2284 = vmatpush1.msra.mxu0 %v1327_v6  ;;  %2355 = vmatpush1.msra.mxu1 %v1329_v7  ;;  %v1584_v6 = vld [vmem:[%s3952_s5 + $0x8e8] sm:$0xff]  ;;  %v1586_v7 = vld [vmem:[%s3952_s5 + $0x8f8] sm:$0xff] }
 0x20c   : > { %2285 = vmatprep.subr.mxu0 %v1312_v8  ;;  %2356 = vmatprep.subr.mxu1 %v1314_v9  ;;  %v2817_v8 = vmov 1983009808  }
 0x20d   : > { %2286 = vmatpush1.msra.mxu0 %v1311_v10  ;;  %2357 = vmatpush1.msra.mxu1 %v1313_v11  ;;  %v2432_v9 = vunpack.c.l.s4 %v2817_v8  ;;  %v2434_v10 = vlaneseq  ;;  %v1583_v11 = vld [vmem:[%s3952_s5 + $0x8e0] sm:$0xff] }
 0x20e   : > { %2287 = vmatprep.subr.mxu0 %v1808_v12  ;;  %2358 = vmatprep.subr.mxu1 %v1810_v13  ;;  %v1585_v12 = vld [vmem:[%s3952_s5 + $0x8f0] sm:$0xff] }
 0x20f   : > { %2288 = vmatpush2.msra.mxu0 %v1807_v15  ;;  %2359 = vmatpush2.msra.mxu1 %v1809_v56  ;;  %v1568_v56 = vld [vmem:[%s3952_s5 + $0x868] sm:$0xff] }
 0x210   : > { %2289 = vmatprep.subr.mxu0 %v1792_v16  ;;  %2360 = vmatprep.subr.mxu1 %v1794_v17  ;;  %v1570_v16 = vld [vmem:[%s3952_s5 + $0x878] sm:$0xff]  ;;  %v1567_v17 = vld [vmem:[%s3952_s5 + $0x860] sm:$0xff] }
 0x211   : > { %2290 = vmatpush2.msra.mxu0 %v1791_v18  ;;  %2361 = vmatpush2.msra.mxu1 %v1793_v19  ;;  %v1569_v19 = vld [vmem:[%s3952_s5 + $0x870] sm:$0xff]  ;;  %s4540_s5 = scalar_lea.vmem %s4594_s3, %s2663_s16 }
 0x212   : > { %2291 = vmatprep.subr.mxu0 %v1776_v20  ;;  %2362 = vmatprep.subr.mxu1 %v1778_v21  ;;  %v2433_v20 = vunpack.c.0.s8 %v2432_v9  ;;  %v2435_v21 = vshrl.u32 %v2434_v10, 7 }
 0x213   : > { %2292 = vmatpush2.msra.mxu0 %v1775_v22  ;;  %2363 = vmatpush2.msra.mxu1 %v1777_v23 }
 0x214   : > { %2293 = vmatprep.subr.mxu0 %v1760_v24  ;;  %2364 = vmatprep.subr.mxu1 %v1762_v25 }
 0x215   : > { %2294 = vmatpush2.msra.mxu0 %v1759_v26  ;;  %2365 = vmatpush2.msra.mxu1 %v1761_v27 }
 0x216   : > { %2295 = vmatprep.subr.mxu0 %v1744_v28  ;;  %2366 = vmatprep.subr.mxu1 %v1746_v29 }
 0x217   : > { %2296 = vmatpush2.msra.mxu0 %v1743_v30  ;;  %2367 = vmatpush2.msra.mxu1 %v1745_v31  ;;  %v4533_v30 = vsub.s32 %v2433_v20, %v2435_v21 }
 0x218   : > { %2297 = vmatprep.subr.mxu0 %v1728_v32  ;;  %2368 = vmatprep.subr.mxu1 %v1730_v33 }
 0x219   : > { %2298 = vmatpush2.msra.mxu0 %v1727_v34  ;;  %2369 = vmatpush2.msra.mxu1 %v1729_v35 }
 0x21a   : > { %2299 = vmatprep.subr.mxu0 %v1712_v36  ;;  %2370 = vmatprep.subr.mxu1 %v1714_v37 }
 0x21b   : > { %2300 = vmatpush2.msra.mxu0 %v1711_v38  ;;  %2371 = vmatpush2.msra.mxu1 %v1713_v39 }
 0x21c   : > { %2301 = vmatprep.subr.mxu0 %v1696_v40  ;;  %2372 = vmatprep.subr.mxu1 %v1698_v41 }
 0x21d   : > { %2302 = vmatpush2.msra.mxu0 %v1695_v42  ;;  %2373 = vmatpush2.msra.mxu1 %v1697_v43 }
 0x21e   : > { %2303 = vmatprep.subr.mxu0 %v1680_v44  ;;  %2374 = vmatprep.subr.mxu1 %v1682_v45 }
 0x21f   : > { %2304 = vmatpush2.msra.mxu0 %v1679_v46  ;;  %2375 = vmatpush2.msra.mxu1 %v1681_v47 }
 0x220   : > { %2305 = vmatprep.subr.mxu0 %v1664_v48  ;;  %2376 = vmatprep.subr.mxu1 %v1666_v49 }
 0x221   : > { %2306 = vmatpush2.msra.mxu0 %v1663_v50  ;;  %2377 = vmatpush2.msra.mxu1 %v1665_v51 }
 0x222   : > { %2307 = vmatprep.subr.mxu0 %v1648_v52  ;;  %2378 = vmatprep.subr.mxu1 %v1650_v53 }
 0x223   : > { %2308 = vmatpush2.msra.mxu0 %v1647_v54  ;;  %2379 = vmatpush2.msra.mxu1 %v1649_v55 }
 0x224   : > { %2309 = vmatprep.subr.mxu0 %v1632_v57  ;;  %2380 = vmatprep.subr.mxu1 %v1634_v58 }
 0x225   : > { %2310 = vmatpush2.msra.mxu0 %v1631_v59  ;;  %2381 = vmatpush2.msra.mxu1 %v1633_v60 }
 0x226   : > { %2311 = vmatprep.subr.mxu0 %v1616_v61  ;;  %2382 = vmatprep.subr.mxu1 %v1618_v62 }
 0x227   : > { %2312 = vmatpush2.msra.mxu0 %v1615_v0  ;;  %2383 = vmatpush2.msra.mxu1 %v1617_v1 }
 0x228   : > { %2313 = vmatprep.subr.mxu0 %v1600_v2  ;;  %2384 = vmatprep.subr.mxu1 %v1602_v3  ;;  %v1895_v13 = vpop.f32.mrf.mxu0  ;;  %v1966_v15 = vpop.f32.mrf.mxu1 }
 0x229   : > { %2314 = vmatpush2.msra.mxu0 %v1599_v4  ;;  %2385 = vmatpush2.msra.mxu1 %v1601_v5 }
 0x22a   : > { %2315 = vmatprep.subr.mxu0 %v1584_v6  ;;  %2386 = vmatprep.subr.mxu1 %v1586_v7  ;;  %v1897_v18 = vpop.f32.mrf.mxu0  ;;  %v1968_v22 = vpop.f32.mrf.mxu1 }
 0x22b   : > { %2316 = vmatpush2.msra.mxu0 %v1583_v11  ;;  %2387 = vmatpush2.msra.mxu1 %v1585_v12 }
 0x22c   : > { %2317 = vmatprep.subr.mxu0 %v1568_v56  ;;  %2388 = vmatprep.subr.mxu1 %v1570_v16  ;;  %v4522_v23 = vpop.permute.xlu0 %1815 }
 0x22d   : > { %2318 = vmatpush2.msra.mxu0 %v1567_v17  ;;  %2319 = vmatprep.mubr.f32.mxu0 %v4097_v63  ;;  %v1896_v24 = vadd.f32 %v1895_v13, %v4522_v23  ;;  %v1898_v25 = vadd.f32 %v1897_v18, %v4522_v23  ;;  %v1967_v26 = vadd.f32 %v1966_v15, %v4522_v23 }
 0x22e   : > { %2389 = vmatpush2.msra.mxu1 %v1569_v19  ;;  %2390 = vmatprep.mubr.f32.mxu1 %v4097_v63  ;;  %v1969_v27 = vadd.f32 %v1968_v22, %v4522_v23 }
 0x22f   : > { %2320 = vmatmul.mubr.f32.vlgmr.msra.gmra.mxu0 %v4376_v14  ;;  %2391 = vmatmul.mubr.f32.vlgmr.msra.gmra.mxu1 %v4376_v14  ;;  %v2397_v28 = vmax.f32 %v1896_v24, 0.0  ;;  %v2398_v29 = vmax.f32 %v1898_v25, 0.0  ;;  %v2399_v31 = vmax.f32 %v1967_v26, 0.0 }
 0x230   : > { %v2400_v32 = vmax.f32 %v1969_v27, 0.0 }
 0x231   : > { %v2429_v33 = vcombine.low %v2397_v28, %v2398_v29 }
 0x232   : > { %v2430_v34 = vcombine.low %v2399_v31, %v2400_v32 }
 0x233   : > { %v2437_v35 = vrot.slane %v2429_v33, %v4533_v30 }
 0x234   : > { %v2444_v63 = vrot.slane %v2430_v34, %v4533_v30 }
 0x236   : > { %v2445_v14 = vcombine.low %v2437_v35, %v2444_v63 }
 0x238   : > { %2501 = vst [vmem:[%s4540_s5] sm:$0xff] %v2445_v14 }
 0x26a   : > { %v2037_v36 = vpop.f32.mrf.mxu0  ;;  %v2108_v37 = vpop.f32.mrf.mxu1 }
 0x26b   : > { %v2038_v38 = vadd.f32 %v2037_v36, %v4522_v23  ;;  %v2109_v39 = vadd.f32 %v2108_v37, %v4522_v23 }
 0x26c   : > { %v2039_v40 = vpop.f32.mrf.mxu0  ;;  %v2110_v41 = vpop.f32.mrf.mxu1 }
 0x26d   : > { %v2401_v42 = vmax.f32 %v2038_v38, 0.0  ;;  %v2403_v43 = vmax.f32 %v2109_v39, 0.0  ;;  %v2040_v44 = vadd.f32 %v2039_v40, %v4522_v23  ;;  %v2111_v45 = vadd.f32 %v2110_v41, %v4522_v23 }
 0x26f   : > { %v2402_v46 = vmax.f32 %v2040_v44, 0.0  ;;  %v2404_v47 = vmax.f32 %v2111_v45, 0.0 }
 0x271   : > { %v2446_v48 = vcombine.low %v2401_v42, %v2402_v46  ;;  %v2447_v49 = vcombine.low %v2403_v43, %v2404_v47 }
 0x273   : > { %v2454_v50 = vrot.slane %v2446_v48, %v4533_v30  ;;  %v2461_v51 = vrot.slane %v2447_v49, %v4533_v30 }
 0x275   : > { %v2462_v52 = vcombine.low %v2454_v50, %v2461_v51 }
 0x277   : > { %2502 = vst [vmem:[%s4540_s5 + $0x8] sm:$0xff] %v2462_v52 }
 0x2ad   : > { %v2179_v53 = vpop.f32.mrf.mxu0  ;;  %v2250_v54 = vpop.f32.mrf.mxu1 }
 0x2ae   : > { %v2180_v55 = vadd.f32 %v2179_v53, %v4522_v23  ;;  %v2251_v57 = vadd.f32 %v2250_v54, %v4522_v23 }
 0x2af   : > { %v2181_v58 = vpop.f32.mrf.mxu0  ;;  %v2252_v59 = vpop.f32.mrf.mxu1 }
 0x2b0   : > { %v2405_v60 = vmax.f32 %v2180_v55, 0.0  ;;  %v2407_v61 = vmax.f32 %v2251_v57, 0.0  ;;  %v2182_v62 = vadd.f32 %v2181_v58, %v4522_v23  ;;  %v2253_v0 = vadd.f32 %v2252_v59, %v4522_v23 }
 0x2b2   : > { %v2406_v1 = vmax.f32 %v2182_v62, 0.0  ;;  %v2408_v2 = vmax.f32 %v2253_v0, 0.0 }
 0x2b4   : > { %v2463_v3 = vcombine.low %v2405_v60, %v2406_v1  ;;  %v2464_v4 = vcombine.low %v2407_v61, %v2408_v2 }
 0x2b6   : > { %v2471_v5 = vrot.slane %v2463_v3, %v4533_v30  ;;  %v2478_v6 = vrot.slane %v2464_v4, %v4533_v30 }
 0x2b8   : > { %v2479_v7 = vcombine.low %v2471_v5, %v2478_v6 }
 0x2ba   : > { %2503 = vst [vmem:[%s4540_s5 + $0x10] sm:$0xff] %v2479_v7 }
 0x2ef   : > { %v2321_v8 = vpop.f32.mrf.mxu0  ;;  %v2392_v9 = vpop.f32.mrf.mxu1 }
 0x2f0   : > { %v2322_v10 = vadd.f32 %v2321_v8, %v4522_v23  ;;  %v2393_v11 = vadd.f32 %v2392_v9, %v4522_v23 }
 0x2f1   : > { %v2323_v12 = vpop.f32.mrf.mxu0  ;;  %v2394_v13 = vpop.f32.mrf.mxu1 }
 0x2f2   : > { %v2324_v15 = vadd.f32 %v2323_v12, %v4522_v23  ;;  %v2395_v56 = vadd.f32 %v2394_v13, %v4522_v23  ;;  %v2409_v16 = vmax.f32 %v2322_v10, 0.0  ;;  %v2411_v17 = vmax.f32 %v2393_v11, 0.0 }
 0x2f4   : > { %v2410_v18 = vmax.f32 %v2324_v15, 0.0  ;;  %v2412_v19 = vmax.f32 %v2395_v56, 0.0 }
 0x2f6   : > { %v2480_v20 = vcombine.low %v2409_v16, %v2410_v18  ;;  %v2481_v21 = vcombine.low %v2411_v17, %v2412_v19 }
 0x2f8   : > { %v2488_v22 = vrot.slane %v2480_v20, %v4533_v30  ;;  %v2495_v24 = vrot.slane %v2481_v21, %v4533_v30 }
 0x2fa   : > { %v2496_v25 = vcombine.low %v2488_v22, %v2495_v24 }
 0x2fc   : > { %2504 = vst [vmem:[%s4540_s5 + $0x18] sm:$0xff] %v2496_v25 }
 0x2fd PF: > { %s13_s20 = sadd.s32 1, %s2814_s20   ;;  %s4597_s12 = smov %s2786_s13 }
 0x2fe   : > { %p10_p0 = scmp.ge.s32.totalorder %s13_s20, 14   ;;  %s4598_s13 = smov %s2909_s4 }
 0x2ff   : > { %s4599_s14 = smov %s2802_s17  ;;  %s4600_s15 = smov %s2806_s18 }
 0x300   : > { %s4601_s16 = smov %s2810_s19  ;;  %s4602_s17 = smov %s4612_s21 }
 0x301   : > { %s4603_s18 = smov %s4608_s22  ;;  %s4604_s19 = smov %s4614_s23 }
 0x302   :  { %12 = sbr.rel (!%p10_p0) target bundleno = 5 (0x5), region = 96 }

// kernel: rmasknet_forward.17
= control target key start
LH: loop header
LB: loop body
LE: loop exit
PB: predicated region body
PF: predicated region fallthrough
CT: control target
= control target key end

     0   :  { %s1843_s12 = smov 0   ;;  %s1845_s13 = smov 0   ;;  %s2398_s0 = inlined_call_operand.vmem [shape: f32[3,2,54,4096], index: 0, kind: input, shape index: {}]   ;;  %s2399_s1 = inlined_call_operand.vmem [shape: f32[3,2,54], index: 1, kind: input, shape index: {}]   ;;  %s2400_s2 = inlined_call_operand.vmem [shape: f32[3,2,1], index: 2, kind: input, shape index: {}]   ;;  %s2401_s3 = inlined_call_operand.vmem [shape: f32[3,2,2,4096], index: 3, kind: output, shape index: {}]  }
   0x1   :  { %s1847_s14 = smov 0   ;;  %s1849_s15 = smov 0  }
   0x2   :  { %s1851_s16 = smov 0   ;;  %s1853_s17 = smov 0  }
   0x3   :  { %s1855_s18 = smov 0   ;;  %s1857_s19 = smov 0  }
   0x4   :  { %s1859_s20 = smov 0  }
   0x5 LB: > { %s25_s21 = sadd.s32 1, %s1806_s17  ;;  %s28_s22 = sadd.s32 1, %s1810_s18  ;;  %s1818_s20 = sphi %s1859_s20, %s13_s20   ;;  %s1814_s19 = sphi %s1857_s19, %s2410_s19   ;;  %s1810_s18 = sphi %s1855_s18, %s2409_s18   ;;  %s1806_s17 = sphi %s1853_s17, %s2408_s17   ;;  %s1802_s16 = sphi %s1851_s16, %s2407_s16   ;;  %s1798_s15 = sphi %s1849_s15, %s2406_s15   ;;  %s1794_s14 = sphi %s1847_s14, %s2405_s14   ;;  %s1790_s13 = sphi %s1845_s13, %s2404_s13   ;;  %s1786_s12 = sphi %s1843_s12, %s2403_s12  }
   0x6   : > { %p26_p0 = scmp.ge.s32.totalorder %s25_s21, 2  ;;  %p50_p1 = scmp.ne.s32.totalorder %s1790_s13, %s1786_s12 }
   0x7   : > { %p51_p2 = scmp.eq.s32.totalorder %s1818_s20, 0  ;;  %s32_s23 = sadd.s32 1, %s1814_s19 }
   0x8   : > { %s2412_s22 = smov (!%p26_p0, %s28_s22), %s1810_s18  ;;  %s2418_s21 = smov (%p26_p0, %s25_s21), 0 }
   0x9   : > { %p30_p3 = scmp.ge.s32.totalorder %s2412_s22, 2  ;;  %p1895_p4 = por %p51_p2, %p50_p1 }
   0xa   : > { %s39_s26 = ssub.s32 %s1806_s17, %s2418_s21  ;;  %s43_s30 = sadd.s32 1, %s1790_s13 }
   0xb   : > { %s2414_s22 = smov (%p30_p3, %s2412_s22), 0  ;;  %s2416_s23 = smov (!%p30_p3, %s32_s23), %s1814_s19 }
   0xc   : > { %p34_p5 = scmp.ge.s32.totalorder %s2416_s23, 3  ;;  %s37_s25 = ssub.s32 %s1810_s18, %s2414_s22 }
   0xd   : > { %p1568_p7 = scmp.ge.s32.totalorder %s1818_s20, 12 }
   0xe   : > { %s2420_s23 = smov (%p34_p5, %s2416_s23), 0 }
   0xf   : > { %s36_s27 = ssub.s32 %s1814_s19, %s2420_s23 }
  0x10   : > { %s38_s28 = sor.u32 %s37_s25, %s36_s27  ;;  %158 = sbr.rel (%p1568_p7) target bundleno = 86 (0x56), region = 16 }
  0x11   : > { %s40_s29 = sor.u32 %s39_s26, %s38_s28 }
  0x12   : > { %p41_p6 = scmp.eq.s32.totalorder %s40_s29, 0 }
  0x14   : > { %s1914_s4 = scalar_select %p41_p6, %s1790_s13, %s43_s30  }
  0x15   : > { %161 = sbr.rel (!%p1895_p4) target bundleno = 86 (0x56), region = 20  ;;  %s163_s5 = sand.u32 (%p1895_p4), 1, %s1790_s13  }
  0x16   : > { %s1604_s6 = smul.u32 (%p1895_p4), 896, %s163_s5  ;;  %s1569_s7 = sshll.u32 (%p1895_p4), %s1806_s17, 4 }
  0x17   : > { %s1605_s8 = smul.u32 (%p1895_p4), 224, %s1810_s18 }
  0x18   : > { %s1606_s9 = smul.u32 (%p1895_p4), 448, %s1814_s19  ;;  %s1931_s24 = scalar_lea.vmem (%p1895_p4), [#allocation2], %s1604_s6 }
  0x19   : > { %s168_s10 = sadd.s32 (%p1895_p4), %s1605_s8, %s1569_s7 }
  0x1a   : > { %s170_s11 = sadd.s32 %s1606_s9, %s168_s10 }
  0x1b   : > { %s1570_s25 = sshll.u32 %s170_s11, 3 }
  0x1c   : > { %s1926_s28 = scalar_lea.vmem %s2398_s0, %s1570_s25 }
  0x1d   : > { %v185_v0 = vld [vmem:[%s1926_s28] sm:$0xff]  ;;  %v187_v1 = vld [vmem:[%s1926_s28 + $0x8] sm:$0xff]  ;;  %v189_v2 = vld [vmem:[%s1926_s28 + $0x10] sm:$0xff] }
  0x1e   : > { %186 = vst [vmem:[%s1931_s24] sm:$0xff] %v185_v0  ;;  %188 = vst [vmem:[%s1931_s24 + $0x8] sm:$0xff] %v187_v1  ;;  %v191_v3 = vld [vmem:[%s1926_s28 + $0x18] sm:$0xff]  ;;  %v193_v4 = vld [vmem:[%s1926_s28 + $0x20] sm:$0xff] }
  0x1f   : > { %190 = vst [vmem:[%s1931_s24 + $0x10] sm:$0xff] %v189_v2  ;;  %v195_v5 = vld [vmem:[%s1926_s28 + $0x28] sm:$0xff]  ;;  %192 = vst [vmem:[%s1931_s24 + $0x18] sm:$0xff] %v191_v3  ;;  %v197_v6 = vld [vmem:[%s1926_s28 + $0x30] sm:$0xff] }
  0x20   : > { %194 = vst [vmem:[%s1931_s24 + $0x20] sm:$0xff] %v193_v4  ;;  %196 = vst [vmem:[%s1931_s24 + $0x28] sm:$0xff] %v195_v5  ;;  %v199_v7 = vld [vmem:[%s1926_s28 + $0x38] sm:$0xff]  ;;  %v201_v8 = vld [vmem:[%s1926_s28 + $0x40] sm:$0xff] }
  0x21   : > { %198 = vst [vmem:[%s1931_s24 + $0x30] sm:$0xff] %v197_v6  ;;  %200 = vst [vmem:[%s1931_s24 + $0x38] sm:$0xff] %v199_v7  ;;  %v203_v9 = vld [vmem:[%s1926_s28 + $0x48] sm:$0xff]  ;;  %v205_v10 = vld [vmem:[%s1926_s28 + $0x50] sm:$0xff] }
  0x22   : > { %202 = vst [vmem:[%s1931_s24 + $0x40] sm:$0xff] %v201_v8  ;;  %v207_v11 = vld [vmem:[%s1926_s28 + $0x58] sm:$0xff]  ;;  %204 = vst [vmem:[%s1931_s24 + $0x48] sm:$0xff] %v203_v9  ;;  %v209_v12 = vld [vmem:[%s1926_s28 + $0x60] sm:$0xff] }
  0x23   : > { %206 = vst [vmem:[%s1931_s24 + $0x50] sm:$0xff] %v205_v10  ;;  %208 = vst [vmem:[%s1931_s24 + $0x58] sm:$0xff] %v207_v11  ;;  %v211_v13 = vld [vmem:[%s1926_s28 + $0x68] sm:$0xff]  ;;  %v213_v14 = vld [vmem:[%s1926_s28 + $0x70] sm:$0xff] }
  0x24   : > { %210 = vst [vmem:[%s1931_s24 + $0x60] sm:$0xff] %v209_v12  ;;  %212 = vst [vmem:[%s1931_s24 + $0x68] sm:$0xff] %v211_v13  ;;  %v215_v15 = vld [vmem:[%s1926_s28 + $0x78] sm:$0xff]  ;;  %v217_v16 = vld [vmem:[%s1926_s28 + $0x100] sm:$0xff] }
  0x25   : > { %214 = vst [vmem:[%s1931_s24 + $0x70] sm:$0xff] %v213_v14  ;;  %v219_v17 = vld [vmem:[%s1926_s28 + $0x108] sm:$0xff]  ;;  %216 = vst [vmem:[%s1931_s24 + $0x78] sm:$0xff] %v215_v15  ;;  %v221_v18 = vld [vmem:[%s1926_s28 + $0x110] sm:$0xff] }
  0x26   : > { %218 = vst [vmem:[%s1931_s24 + $0x80] sm:$0xff] %v217_v16  ;;  %220 = vst [vmem:[%s1931_s24 + $0x88] sm:$0xff] %v219_v17  ;;  %v223_v19 = vld [vmem:[%s1926_s28 + $0x118] sm:$0xff]  ;;  %v225_v20 = vld [vmem:[%s1926_s28 + $0x120] sm:$0xff] }
  0x27   : > { %222 = vst [vmem:[%s1931_s24 + $0x90] sm:$0xff] %v221_v18  ;;  %224 = vst [vmem:[%s1931_s24 + $0x98] sm:$0xff] %v223_v19  ;;  %v227_v21 = vld [vmem:[%s1926_s28 + $0x128] sm:$0xff]  ;;  %v229_v22 = vld [vmem:[%s1926_s28 + $0x130] sm:$0xff] }
  0x28   : > { %226 = vst [vmem:[%s1931_s24 + $0xa0] sm:$0xff] %v225_v20  ;;  %v231_v23 = vld [vmem:[%s1926_s28 + $0x138] sm:$0xff]  ;;  %228 = vst [vmem:[%s1931_s24 + $0xa8] sm:$0xff] %v227_v21  ;;  %v233_v24 = vld [vmem:[%s1926_s28 + $0x140] sm:$0xff] }
  0x29   : > { %230 = vst [vmem:[%s1931_s24 + $0xb0] sm:$0xff] %v229_v22  ;;  %232 = vst [vmem:[%s1931_s24 + $0xb8] sm:$0xff] %v231_v23  ;;  %v235_v25 = vld [vmem:[%s1926_s28 + $0x148] sm:$0xff]  ;;  %v237_v26 = vld [vmem:[%s1926_s28 + $0x150] sm:$0xff] }
  0x2a   : > { %234 = vst [vmem:[%s1931_s24 + $0xc0] sm:$0xff] %v233_v24  ;;  %236 = vst [vmem:[%s1931_s24 + $0xc8] sm:$0xff] %v235_v25  ;;  %v239_v27 = vld [vmem:[%s1926_s28 + $0x158] sm:$0xff]  ;;  %v241_v28 = vld [vmem:[%s1926_s28 + $0x160] sm:$0xff] }
  0x2b   : > { %238 = vst [vmem:[%s1931_s24 + $0xd0] sm:$0xff] %v237_v26  ;;  %v243_v29 = vld [vmem:[%s1926_s28 + $0x168] sm:$0xff]  ;;  %240 = vst [vmem:[%s1931_s24 + $0xd8] sm:$0xff] %v239_v27  ;;  %v245_v30 = vld [vmem:[%s1926_s28 + $0x170] sm:$0xff] }
  0x2c   : > { %242 = vst [vmem:[%s1931_s24 + $0xe0] sm:$0xff] %v241_v28  ;;  %244 = vst [vmem:[%s1931_s24 + $0xe8] sm:$0xff] %v243_v29  ;;  %v247_v31 = vld [vmem:[%s1926_s28 + $0x178] sm:$0xff]  ;;  %v249_v32 = vld [vmem:[%s1926_s28 + $0x200] sm:$0xff] }
  0x2d   : > { %246 = vst [vmem:[%s1931_s24 + $0xf0] sm:$0xff] %v245_v30  ;;  %248 = vst [vmem:[%s1931_s24 + $0xf8] sm:$0xff] %v247_v31  ;;  %v251_v33 = vld [vmem:[%s1926_s28 + $0x208] sm:$0xff]  ;;  %v253_v34 = vld [vmem:[%s1926_s28 + $0x210] sm:$0xff] }
  0x2e   : > { %250 = vst [vmem:[%s1931_s24 + $0x100] sm:$0xff] %v249_v32  ;;  %v255_v35 = vld [vmem:[%s1926_s28 + $0x218] sm:$0xff]  ;;  %252 = vst [vmem:[%s1931_s24 + $0x108] sm:$0xff] %v251_v33  ;;  %v257_v36 = vld [vmem:[%s1926_s28 + $0x220] sm:$0xff] }
  0x2f   : > { %254 = vst [vmem:[%s1931_s24 + $0x110] sm:$0xff] %v253_v34  ;;  %256 = vst [vmem:[%s1931_s24 + $0x118] sm:$0xff] %v255_v35  ;;  %v259_v37 = vld [vmem:[%s1926_s28 + $0x228] sm:$0xff]  ;;  %v261_v38 = vld [vmem:[%s1926_s28 + $0x230] sm:$0xff] }
  0x30   : > { %258 = vst [vmem:[%s1931_s24 + $0x120] sm:$0xff] %v257_v36  ;;  %260 = vst [vmem:[%s1931_s24 + $0x128] sm:$0xff] %v259_v37  ;;  %v263_v39 = vld [vmem:[%s1926_s28 + $0x238] sm:$0xff]  ;;  %v265_v40 = vld [vmem:[%s1926_s28 + $0x240] sm:$0xff] }
  0x31   : > { %262 = vst [vmem:[%s1931_s24 + $0x130] sm:$0xff] %v261_v38  ;;  %v267_v41 = vld [vmem:[%s1926_s28 + $0x248] sm:$0xff]  ;;  %264 = vst [vmem:[%s1931_s24 + $0x138] sm:$0xff] %v263_v39  ;;  %v269_v42 = vld [vmem:[%s1926_s28 + $0x250] sm:$0xff] }
  0x32   : > { %266 = vst [vmem:[%s1931_s24 + $0x140] sm:$0xff] %v265_v40  ;;  %268 = vst [vmem:[%s1931_s24 + $0x148] sm:$0xff] %v267_v41  ;;  %v271_v43 = vld [vmem:[%s1926_s28 + $0x258] sm:$0xff]  ;;  %v273_v44 = vld [vmem:[%s1926_s28 + $0x260] sm:$0xff] }
  0x33   : > { %270 = vst [vmem:[%s1931_s24 + $0x150] sm:$0xff] %v269_v42  ;;  %272 = vst [vmem:[%s1931_s24 + $0x158] sm:$0xff] %v271_v43  ;;  %v275_v45 = vld [vmem:[%s1926_s28 + $0x268] sm:$0xff]  ;;  %v277_v46 = vld [vmem:[%s1926_s28 + $0x270] sm:$0xff] }
  0x34   : > { %274 = vst [vmem:[%s1931_s24 + $0x160] sm:$0xff] %v273_v44  ;;  %v279_v47 = vld [vmem:[%s1926_s28 + $0x278] sm:$0xff]  ;;  %276 = vst [vmem:[%s1931_s24 + $0x168] sm:$0xff] %v275_v45  ;;  %v281_v48 = vld [vmem:[%s1926_s28 + $0x300] sm:$0xff] }
  0x35   : > { %278 = vst [vmem:[%s1931_s24 + $0x170] sm:$0xff] %v277_v46  ;;  %280 = vst [vmem:[%s1931_s24 + $0x178] sm:$0xff] %v279_v47  ;;  %v283_v49 = vld [vmem:[%s1926_s28 + $0x308] sm:$0xff]  ;;  %v285_v50 = vld [vmem:[%s1926_s28 + $0x310] sm:$0xff] }
  0x36   : > { %282 = vst [vmem:[%s1931_s24 + $0x180] sm:$0xff] %v281_v48  ;;  %284 = vst [vmem:[%s1931_s24 + $0x188] sm:$0xff] %v283_v49  ;;  %v287_v51 = vld [vmem:[%s1926_s28 + $0x318] sm:$0xff]  ;;  %v289_v52 = vld [vmem:[%s1926_s28 + $0x320] sm:$0xff] }
  0x37   : > { %286 = vst [vmem:[%s1931_s24 + $0x190] sm:$0xff] %v285_v50  ;;  %v291_v53 = vld [vmem:[%s1926_s28 + $0x328] sm:$0xff]  ;;  %288 = vst [vmem:[%s1931_s24 + $0x198] sm:$0xff] %v287_v51  ;;  %v293_v54 = vld [vmem:[%s1926_s28 + $0x330] sm:$0xff] }
  0x38   : > { %290 = vst [vmem:[%s1931_s24 + $0x1a0] sm:$0xff] %v289_v52  ;;  %292 = vst [vmem:[%s1931_s24 + $0x1a8] sm:$0xff] %v291_v53  ;;  %v295_v55 = vld [vmem:[%s1926_s28 + $0x338] sm:$0xff]  ;;  %v297_v56 = vld [vmem:[%s1926_s28 + $0x340] sm:$0xff] }
  0x39   : > { %294 = vst [vmem:[%s1931_s24 + $0x1b0] sm:$0xff] %v293_v54  ;;  %296 = vst [vmem:[%s1931_s24 + $0x1b8] sm:$0xff] %v295_v55  ;;  %v299_v57 = vld [vmem:[%s1926_s28 + $0x348] sm:$0xff]  ;;  %v301_v58 = vld [vmem:[%s1926_s28 + $0x350] sm:$0xff] }
  0x3a   : > { %298 = vst [vmem:[%s1931_s24 + $0x1c0] sm:$0xff] %v297_v56  ;;  %v303_v59 = vld [vmem:[%s1926_s28 + $0x358] sm:$0xff]  ;;  %300 = vst [vmem:[%s1931_s24 + $0x1c8] sm:$0xff] %v299_v57  ;;  %v305_v60 = vld [vmem:[%s1926_s28 + $0x360] sm:$0xff] }
  0x3b   : > { %302 = vst [vmem:[%s1931_s24 + $0x1d0] sm:$0xff] %v301_v58  ;;  %304 = vst [vmem:[%s1931_s24 + $0x1d8] sm:$0xff] %v303_v59  ;;  %v307_v61 = vld [vmem:[%s1926_s28 + $0x368] sm:$0xff]  ;;  %v309_v62 = vld [vmem:[%s1926_s28 + $0x370] sm:$0xff] }
  0x3c   : > { %306 = vst [vmem:[%s1931_s24 + $0x1e0] sm:$0xff] %v305_v60  ;;  %308 = vst [vmem:[%s1931_s24 + $0x1e8] sm:$0xff] %v307_v61  ;;  %v311_v63 = vld [vmem:[%s1926_s28 + $0x378] sm:$0xff]  ;;  %v313_v0 = vld [vmem:[%s1926_s28 + $0x400] sm:$0xff] }
  0x3d   : > { %310 = vst [vmem:[%s1931_s24 + $0x1f0] sm:$0xff] %v309_v62  ;;  %v315_v1 = vld [vmem:[%s1926_s28 + $0x408] sm:$0xff]  ;;  %312 = vst [vmem:[%s1931_s24 + $0x1f8] sm:$0xff] %v311_v63  ;;  %v317_v2 = vld [vmem:[%s1926_s28 + $0x410] sm:$0xff] }
  0x3e   : > { %314 = vst [vmem:[%s1931_s24 + $0x200] sm:$0xff] %v313_v0  ;;  %316 = vst [vmem:[%s1931_s24 + $0x208] sm:$0xff] %v315_v1  ;;  %v319_v3 = vld [vmem:[%s1926_s28 + $0x418] sm:$0xff]  ;;  %v321_v4 = vld [vmem:[%s1926_s28 + $0x420] sm:$0xff] }
  0x3f   : > { %318 = vst [vmem:[%s1931_s24 + $0x210] sm:$0xff] %v317_v2  ;;  %320 = vst [vmem:[%s1931_s24 + $0x218] sm:$0xff] %v319_v3  ;;  %v323_v5 = vld [vmem:[%s1926_s28 + $0x428] sm:$0xff]  ;;  %v325_v6 = vld [vmem:[%s1926_s28 + $0x430] sm:$0xff] }
  0x40   : > { %322 = vst [vmem:[%s1931_s24 + $0x220] sm:$0xff] %v321_v4  ;;  %v327_v7 = vld [vmem:[%s1926_s28 + $0x438] sm:$0xff]  ;;  %324 = vst [vmem:[%s1931_s24 + $0x228] sm:$0xff] %v323_v5  ;;  %v329_v8 = vld [vmem:[%s1926_s28 + $0x440] sm:$0xff] }
  0x41   : > { %326 = vst [vmem:[%s1931_s24 + $0x230] sm:$0xff] %v325_v6  ;;  %328 = vst [vmem:[%s1931_s24 + $0x238] sm:$0xff] %v327_v7  ;;  %v331_v9 = vld [vmem:[%s1926_s28 + $0x448] sm:$0xff]  ;;  %v333_v10 = vld [vmem:[%s1926_s28 + $0x450] sm:$0xff] }
  0x42   : > { %330 = vst [vmem:[%s1931_s24 + $0x240] sm:$0xff] %v329_v8  ;;  %332 = vst [vmem:[%s1931_s24 + $0x248] sm:$0xff] %v331_v9  ;;  %v335_v11 = vld [vmem:[%s1926_s28 + $0x458] sm:$0xff]  ;;  %v337_v12 = vld [vmem:[%s1926_s28 + $0x460] sm:$0xff] }
  0x43   : > { %334 = vst [vmem:[%s1931_s24 + $0x250] sm:$0xff] %v333_v10  ;;  %v339_v13 = vld [vmem:[%s1926_s28 + $0x468] sm:$0xff]  ;;  %336 = vst [vmem:[%s1931_s24 + $0x258] sm:$0xff] %v335_v11  ;;  %v341_v14 = vld [vmem:[%s1926_s28 + $0x470] sm:$0xff] }
  0x44   : > { %338 = vst [vmem:[%s1931_s24 + $0x260] sm:$0xff] %v337_v12  ;;  %340 = vst [vmem:[%s1931_s24 + $0x268] sm:$0xff] %v339_v13  ;;  %v343_v15 = vld [vmem:[%s1926_s28 + $0x478] sm:$0xff]  ;;  %v345_v16 = vld [vmem:[%s1926_s28 + $0x500] sm:$0xff] }
  0x45   : > { %342 = vst [vmem:[%s1931_s24 + $0x270] sm:$0xff] %v341_v14  ;;  %344 = vst [vmem:[%s1931_s24 + $0x278] sm:$0xff] %v343_v15  ;;  %v347_v17 = vld [vmem:[%s1926_s28 + $0x508] sm:$0xff]  ;;  %v349_v18 = vld [vmem:[%s1926_s28 + $0x510] sm:$0xff] }
  0x46   : > { %346 = vst [vmem:[%s1931_s24 + $0x280] sm:$0xff] %v345_v16  ;;  %v351_v19 = vld [vmem:[%s1926_s28 + $0x518] sm:$0xff]  ;;  %348 = vst [vmem:[%s1931_s24 + $0x288] sm:$0xff] %v347_v17  ;;  %v353_v20 = vld [vmem:[%s1926_s28 + $0x520] sm:$0xff] }
  0x47   : > { %350 = vst [vmem:[%s1931_s24 + $0x290] sm:$0xff] %v349_v18  ;;  %352 = vst [vmem:[%s1931_s24 + $0x298] sm:$0xff] %v351_v19  ;;  %v355_v21 = vld [vmem:[%s1926_s28 + $0x528] sm:$0xff]  ;;  %v357_v22 = vld [vmem:[%s1926_s28 + $0x530] sm:$0xff] }
  0x48   : > { %354 = vst [vmem:[%s1931_s24 + $0x2a0] sm:$0xff] %v353_v20  ;;  %356 = vst [vmem:[%s1931_s24 + $0x2a8] sm:$0xff] %v355_v21  ;;  %v359_v23 = vld [vmem:[%s1926_s28 + $0x538] sm:$0xff]  ;;  %v361_v24 = vld [vmem:[%s1926_s28 + $0x540] sm:$0xff] }
  0x49   : > { %358 = vst [vmem:[%s1931_s24 + $0x2b0] sm:$0xff] %v357_v22  ;;  %v363_v25 = vld [vmem:[%s1926_s28 + $0x548] sm:$0xff]  ;;  %360 = vst [vmem:[%s1931_s24 + $0x2b8] sm:$0xff] %v359_v23  ;;  %v365_v26 = vld [vmem:[%s1926_s28 + $0x550] sm:$0xff] }
  0x4a   : > { %362 = vst [vmem:[%s1931_s24 + $0x2c0] sm:$0xff] %v361_v24  ;;  %364 = vst [vmem:[%s1931_s24 + $0x2c8] sm:$0xff] %v363_v25  ;;  %v367_v27 = vld [vmem:[%s1926_s28 + $0x558] sm:$0xff]  ;;  %v369_v28 = vld [vmem:[%s1926_s28 + $0x560] sm:$0xff] }
  0x4b   : > { %366 = vst [vmem:[%s1931_s24 + $0x2d0] sm:$0xff] %v365_v26  ;;  %368 = vst [vmem:[%s1931_s24 + $0x2d8] sm:$0xff] %v367_v27  ;;  %v371_v29 = vld [vmem:[%s1926_s28 + $0x568] sm:$0xff]  ;;  %v373_v30 = vld [vmem:[%s1926_s28 + $0x570] sm:$0xff] }
  0x4c   : > { %370 = vst [vmem:[%s1931_s24 + $0x2e0] sm:$0xff] %v369_v28  ;;  %v375_v31 = vld [vmem:[%s1926_s28 + $0x578] sm:$0xff]  ;;  %372 = vst [vmem:[%s1931_s24 + $0x2e8] sm:$0xff] %v371_v29  ;;  %v377_v32 = vld [vmem:[%s1926_s28 + $0x600] sm:$0xff] }
  0x4d   : > { %374 = vst [vmem:[%s1931_s24 + $0x2f0] sm:$0xff] %v373_v30  ;;  %376 = vst [vmem:[%s1931_s24 + $0x2f8] sm:$0xff] %v375_v31  ;;  %v379_v33 = vld [vmem:[%s1926_s28 + $0x608] sm:$0xff]  ;;  %v381_v34 = vld [vmem:[%s1926_s28 + $0x610] sm:$0xff] }
  0x4e   : > { %378 = vst [vmem:[%s1931_s24 + $0x300] sm:$0xff] %v377_v32  ;;  %380 = vst [vmem:[%s1931_s24 + $0x308] sm:$0xff] %v379_v33  ;;  %v383_v35 = vld [vmem:[%s1926_s28 + $0x618] sm:$0xff]  ;;  %v385_v36 = vld [vmem:[%s1926_s28 + $0x620] sm:$0xff] }
  0x4f   : > { %382 = vst [vmem:[%s1931_s24 + $0x310] sm:$0xff] %v381_v34  ;;  %v387_v37 = vld [vmem:[%s1926_s28 + $0x628] sm:$0xff]  ;;  %384 = vst [vmem:[%s1931_s24 + $0x318] sm:$0xff] %v383_v35  ;;  %v389_v38 = vld [vmem:[%s1926_s28 + $0x630] sm:$0xff] }
  0x50   : > { %386 = vst [vmem:[%s1931_s24 + $0x320] sm:$0xff] %v385_v36  ;;  %388 = vst [vmem:[%s1931_s24 + $0x328] sm:$0xff] %v387_v37  ;;  %v391_v39 = vld [vmem:[%s1926_s28 + $0x638] sm:$0xff]  ;;  %v393_v40 = vld [vmem:[%s1926_s28 + $0x640] sm:$0xff] }
  0x51   : > { %390 = vst [vmem:[%s1931_s24 + $0x330] sm:$0xff] %v389_v38  ;;  %392 = vst [vmem:[%s1931_s24 + $0x338] sm:$0xff] %v391_v39  ;;  %v395_v41 = vld [vmem:[%s1926_s28 + $0x648] sm:$0xff]  ;;  %v397_v42 = vld [vmem:[%s1926_s28 + $0x650] sm:$0xff] }
  0x52   : > { %394 = vst [vmem:[%s1931_s24 + $0x340] sm:$0xff] %v393_v40  ;;  %v399_v43 = vld [vmem:[%s1926_s28 + $0x658] sm:$0xff]  ;;  %396 = vst [vmem:[%s1931_s24 + $0x348] sm:$0xff] %v395_v41  ;;  %v401_v44 = vld [vmem:[%s1926_s28 + $0x660] sm:$0xff] }
  0x53   : > { %398 = vst [vmem:[%s1931_s24 + $0x350] sm:$0xff] %v397_v42  ;;  %400 = vst [vmem:[%s1931_s24 + $0x358] sm:$0xff] %v399_v43  ;;  %v403_v45 = vld [vmem:[%s1926_s28 + $0x668] sm:$0xff]  ;;  %v405_v46 = vld [vmem:[%s1926_s28 + $0x670] sm:$0xff] }
  0x54   : > { %402 = vst [vmem:[%s1931_s24 + $0x360] sm:$0xff] %v401_v44  ;;  %404 = vst [vmem:[%s1931_s24 + $0x368] sm:$0xff] %v403_v45  ;;  %v407_v47 = vld [vmem:[%s1926_s28 + $0x678] sm:$0xff] }
  0x55   : > { %406 = vst [vmem:[%s1931_s24 + $0x370] sm:$0xff] %v405_v46  ;;  %408 = vst [vmem:[%s1931_s24 + $0x378] sm:$0xff] %v407_v47 }
  0x56 PF: > { %p1571_p8 = scmp.ge.s32.totalorder %s1818_s20, 1  ;;  %p427_p9 = scmp.lt.s32.totalorder %s1818_s20, 13 }
  0x58   : > { %p428_p10 = pnand %p1571_p8, %p427_p9 }
  0x59   : > { %s434_s29 = sand.u32 (!%p428_p10), 1, %s1786_s12   ;;  %p474_p11 = scmp.lt.s32.totalorder (!%p428_p10), %s1802_s16, 2 }
  0x5a   : > { %431 = sbr.rel (%p428_p10) target bundleno = 402 (0x192), region = 51  ;;  %s1574_s25 = sshll.u32 (!%p428_p10), %s1794_s14, 4 }
  0x5b   : > { %s1607_s30 = smul.u32 (!%p428_p10), 896, %s434_s29  ;;  %p485_p12 = scmp.lt.s32.totalorder (!%p428_p10), %s1798_s15, 1 }
  0x5c   : > { %p487_p13 = scmp.lt.s32.totalorder (!%p428_p10), %s1574_s25, 31 }
  0x5d   : > { %s2160_s5 = scalar_lea.vmem (!%p428_p10), [#allocation2], %s1607_s30 }
  0x5f   : > { %v1820_v48 = vmov 0.0   ;;  %vm619_vm0 = vcmask 1045504   ;;  %v1821_v49 = vmov 0   ;;  %v593_v50 = vld [vmem:[%s2160_s5 + $0x308] sm:$0x3f]  ;;  %v579_v55 = vld [vmem:[%s2160_s5 + $0x298] sm:$0xff] }
  0x60   : > { %732 = vmatprep.mubr.f32.mxu0 %v1820_v48  ;;  %803 = vmatprep.mubr.f32.mxu1 %v1820_v48  ;;  %v595_v51 = vld [vmem:[%s2160_s5 + $0x318] sm:$0x3f]  ;;  %v592_v52 = vld [vmem:[%s2160_s5 + $0x300] sm:$0x3f]  ;;  %v594_v53 = vld [vmem:[%s2160_s5 + $0x310] sm:$0x3f] }
  0x61   : > { %1683 = vset.pattern.permute.xlu0 %v1821_v49  ;;  %1578 = vmatprep.subr.msk.mxu0 %vm619_vm0, %v593_v50  ;;  %v577_v54 = vld [vmem:[%s2160_s5 + $0x288] sm:$0xff]  ;;  %v576_v56 = vld [vmem:[%s2160_s5 + $0x280] sm:$0xff]  ;;  %v578_v57 = vld [vmem:[%s2160_s5 + $0x290] sm:$0xff]  ;;  %s2422_s16 = smov (!%p474_p11, %s1802_s16), 2  ;;  %vm615_vm1 = vcmask 441344   ;;  %s2424_s15 = smov (!%p485_p12, %s1798_s15), 1 }
  0x62   : > { %1581 = vmatprep.subr.msk.mxu1 %vm619_vm0, %v595_v51  ;;  %1579 = vmatpush1.msk.msra.mxu0 %vm619_vm0, %v592_v52  ;;  %v561_v58 = vld [vmem:[%s2160_s5 + $0x208] sm:$0xff]  ;;  %v563_v59 = vld [vmem:[%s2160_s5 + $0x218] sm:$0xff]  ;;  %v560_v60 = vld [vmem:[%s2160_s5 + $0x200] sm:$0xff]  ;;  %s1572_s12 = sshll.u32 %s2422_s16, 1  ;;  %s2426_s25 = smov (!%p487_p13, %s1574_s25), 31 }
  0x63   : > { %1582 = vmatpush1.msk.msra.mxu1 %vm619_vm0, %v594_v53  ;;  %688 = vmatprep.subr.mxu0 %v577_v54  ;;  %v562_v61 = vld [vmem:[%s2160_s5 + $0x210] sm:$0xff]  ;;  %v545_v62 = vld [vmem:[%s2160_s5 + $0x188] sm:$0xff]  ;;  %v547_v63 = vld [vmem:[%s2160_s5 + $0x198] sm:$0xff]  ;;  %s477_s8 = scalar_lea.vmem %s2399_s1, %s1572_s12  ;;  %s481_s11 = scalar_lea.vmem %s2400_s2, %s1572_s12 }
  0x64   : > { %759 = vmatprep.subr.mxu1 %v579_v55  ;;  %689 = vmatpush1.msra.mxu0 %v576_v56  ;;  %v544_v0 = vld [vmem:[%s2160_s5 + $0x180] sm:$0xff]  ;;  %v546_v1 = vld [vmem:[%s2160_s5 + $0x190] sm:$0xff]  ;;  %v529_v2 = vld [vmem:[%s2160_s5 + $0x108] sm:$0xff]  ;;  %s1575_s14 = sshll.u32 %s2424_s15, 5  ;;  %s1576_s27 = sshll.u32 %s2422_s16, 6 }
  0x65   : > { %760 = vmatpush1.msra.mxu1 %v578_v57  ;;  %690 = vmatprep.subr.mxu0 %v561_v58  ;;  %v531_v3 = vld [vmem:[%s2160_s5 + $0x118] sm:$0xff]  ;;  %v528_v4 = vld [vmem:[%s2160_s5 + $0x100] sm:$0xff]  ;;  %v530_v5 = vld [vmem:[%s2160_s5 + $0x110] sm:$0xff]  ;;  %s490_s26 = sadd.s32 %s1575_s14, %s2426_s25 }
  0x66   : > { %761 = vmatprep.subr.mxu1 %v563_v59  ;;  %691 = vmatpush1.msra.mxu0 %v560_v60  ;;  %v513_v6 = vld [vmem:[%s2160_s5 + $0x88] sm:$0xff]  ;;  %v515_v7 = vld [vmem:[%s2160_s5 + $0x98] sm:$0xff]  ;;  %v512_v8 = vld [vmem:[%s2160_s5 + $0x80] sm:$0xff]  ;;  %s492_s15 = sadd.s32 %s1576_s27, %s490_s26 }
  0x67   : > { %762 = vmatpush1.msra.mxu1 %v562_v61  ;;  %692 = vmatprep.subr.mxu0 %v545_v62  ;;  %v514_v9 = vld [vmem:[%s2160_s5 + $0x90] sm:$0xff]  ;;  %v497_v10 = vld [vmem:[%s2160_s5 + $0x8] sm:$0xff]  ;;  %v499_v11 = vld [vmem:[%s2160_s5 + $0x18] sm:$0xff]  ;;  %s1577_s16 = sshll.u32 %s492_s15, 1 }
  0x68   : > { %763 = vmatprep.subr.mxu1 %v547_v63  ;;  %693 = vmatpush1.msra.mxu0 %v544_v0  ;;  %v496_v12 = vld [vmem:[%s2160_s5] sm:$0xff]  ;;  %v498_v13 = vld [vmem:[%s2160_s5 + $0x10] sm:$0xff]  ;;  %v597_v15 = vld [vmem:[%s2160_s5 + $0x328] sm:$0x3f]  ;;  %s2355_s29 = scalar_lea.vmem %s2401_s3, %s1577_s16 }
  0x69   : > { %764 = vmatpush1.msra.mxu1 %v546_v1  ;;  %694 = vmatprep.subr.mxu0 %v529_v2  ;;  %v2205_v14 = vld [vmem:[%s477_s8] sm:$0x3]  ;;  %v599_v16 = vld [vmem:[%s2160_s5 + $0x338] sm:$0x3f]  ;;  %v598_v18 = vld [vmem:[%s2160_s5 + $0x330] sm:$0x3f] }
  0x6a   : > { %765 = vmatprep.subr.mxu1 %v531_v3  ;;  %695 = vmatpush1.msra.mxu0 %v528_v4  ;;  %v596_v17 = vld [vmem:[%s2160_s5 + $0x320] sm:$0x3f]  ;;  %v581_v19 = vld [vmem:[%s2160_s5 + $0x2a8] sm:$0xff]  ;;  %v583_v20 = vld [vmem:[%s2160_s5 + $0x2b8] sm:$0xff] }
  0x6b   : > { %766 = vmatpush1.msra.mxu1 %v530_v5  ;;  %696 = vmatprep.subr.mxu0 %v513_v6  ;;  %v580_v21 = vld [vmem:[%s2160_s5 + $0x2a0] sm:$0xff]  ;;  %v582_v22 = vld [vmem:[%s2160_s5 + $0x2b0] sm:$0xff]  ;;  %v565_v23 = vld [vmem:[%s2160_s5 + $0x228] sm:$0xff] }
  0x6c   : > { %767 = vmatprep.subr.mxu1 %v515_v7  ;;  %697 = vmatpush1.msra.mxu0 %v512_v8  ;;  %v567_v24 = vld [vmem:[%s2160_s5 + $0x238] sm:$0xff]  ;;  %v564_v25 = vld [vmem:[%s2160_s5 + $0x220] sm:$0xff]  ;;  %v566_v26 = vld [vmem:[%s2160_s5 + $0x230] sm:$0xff] }
  0x6d   : > { %768 = vmatpush1.msra.mxu1 %v514_v9  ;;  %698 = vmatprep.subr.mxu0 %v497_v10  ;;  %v549_v27 = vld [vmem:[%s2160_s5 + $0x1a8] sm:$0xff]  ;;  %v551_v28 = vld [vmem:[%s2160_s5 + $0x1b8] sm:$0xff]  ;;  %v548_v29 = vld [vmem:[%s2160_s5 + $0x1a0] sm:$0xff] }
  0x6e   : > { %769 = vmatprep.subr.mxu1 %v499_v11  ;;  %699 = vmatpush1.msra.mxu0 %v496_v12  ;;  %v550_v30 = vld [vmem:[%s2160_s5 + $0x1b0] sm:$0xff]  ;;  %v533_v31 = vld [vmem:[%s2160_s5 + $0x128] sm:$0xff]  ;;  %v535_v32 = vld [vmem:[%s2160_s5 + $0x138] sm:$0xff] }
  0x6f   : > { %770 = vmatpush1.msra.mxu1 %v498_v13  ;;  %1580 = vmatmul.mubr.msk.f32.vlgmr.msra.gmra.mxu0 %vm615_vm1, %v2205_v14  ;;  %v532_v33 = vld [vmem:[%s2160_s5 + $0x120] sm:$0xff]  ;;  %v534_v34 = vld [vmem:[%s2160_s5 + $0x130] sm:$0xff]  ;;  %v517_v35 = vld [vmem:[%s2160_s5 + $0xa8] sm:$0xff] }
  0x70   : > { %1583 = vmatmul.mubr.msk.f32.vlgmr.msra.gmra.mxu1 %vm615_vm1, %v2205_v14  ;;  %1584 = vmatprep.subr.msk.mxu0 %vm619_vm0, %v597_v15  ;;  %v519_v36 = vld [vmem:[%s2160_s5 + $0xb8] sm:$0xff]  ;;  %v516_v37 = vld [vmem:[%s2160_s5 + $0xa0] sm:$0xff]  ;;  %v518_v38 = vld [vmem:[%s2160_s5 + $0xb0] sm:$0xff] }
  0x71   : > { %1587 = vmatprep.subr.msk.mxu1 %vm619_vm0, %v599_v16  ;;  %1585 = vmatpush1.msk.msra.mxu0 %vm619_vm0, %v596_v17  ;;  %v501_v39 = vld [vmem:[%s2160_s5 + $0x28] sm:$0xff]  ;;  %v503_v40 = vld [vmem:[%s2160_s5 + $0x38] sm:$0xff]  ;;  %v500_v41 = vld [vmem:[%s2160_s5 + $0x20] sm:$0xff] }
  0x72   : > { %1588 = vmatpush1.msk.msra.mxu1 %vm619_vm0, %v598_v18  ;;  %830 = vmatprep.subr.mxu0 %v581_v19  ;;  %v502_v42 = vld [vmem:[%s2160_s5 + $0x30] sm:$0xff]  ;;  %v601_v43 = vld [vmem:[%s2160_s5 + $0x348] sm:$0x3f]  ;;  %v603_v44 = vld [vmem:[%s2160_s5 + $0x358] sm:$0x3f] }
  0x73   : > { %901 = vmatprep.subr.mxu1 %v583_v20  ;;  %831 = vmatpush1.msra.mxu0 %v580_v21  ;;  %v600_v45 = vld [vmem:[%s2160_s5 + $0x340] sm:$0x3f]  ;;  %v602_v46 = vld [vmem:[%s2160_s5 + $0x350] sm:$0x3f]  ;;  %v585_v47 = vld [vmem:[%s2160_s5 + $0x2c8] sm:$0xff] }
  0x74   : > { %902 = vmatpush1.msra.mxu1 %v582_v22  ;;  %832 = vmatprep.subr.mxu0 %v565_v23  ;;  %v587_v49 = vld [vmem:[%s2160_s5 + $0x2d8] sm:$0xff]  ;;  %v584_v50 = vld [vmem:[%s2160_s5 + $0x2c0] sm:$0xff]  ;;  %v586_v51 = vld [vmem:[%s2160_s5 + $0x2d0] sm:$0xff] }
  0x75   : > { %903 = vmatprep.subr.mxu1 %v567_v24  ;;  %833 = vmatpush1.msra.mxu0 %v564_v25  ;;  %v569_v52 = vld [vmem:[%s2160_s5 + $0x248] sm:$0xff]  ;;  %v571_v53 = vld [vmem:[%s2160_s5 + $0x258] sm:$0xff]  ;;  %v568_v54 = vld [vmem:[%s2160_s5 + $0x240] sm:$0xff] }
  0x76   : > { %904 = vmatpush1.msra.mxu1 %v566_v26  ;;  %834 = vmatprep.subr.mxu0 %v549_v27  ;;  %v570_v55 = vld [vmem:[%s2160_s5 + $0x250] sm:$0xff]  ;;  %v553_v56 = vld [vmem:[%s2160_s5 + $0x1c8] sm:$0xff]  ;;  %v555_v57 = vld [vmem:[%s2160_s5 + $0x1d8] sm:$0xff] }
  0x77   : > { %905 = vmatprep.subr.mxu1 %v551_v28  ;;  %835 = vmatpush1.msra.mxu0 %v548_v29  ;;  %v552_v58 = vld [vmem:[%s2160_s5 + $0x1c0] sm:$0xff]  ;;  %v554_v59 = vld [vmem:[%s2160_s5 + $0x1d0] sm:$0xff]  ;;  %v537_v60 = vld [vmem:[%s2160_s5 + $0x148] sm:$0xff] }
  0x78   : > { %906 = vmatpush1.msra.mxu1 %v550_v30  ;;  %836 = vmatprep.subr.mxu0 %v533_v31  ;;  %v539_v61 = vld [vmem:[%s2160_s5 + $0x158] sm:$0xff]  ;;  %v536_v62 = vld [vmem:[%s2160_s5 + $0x140] sm:$0xff]  ;;  %v538_v63 = vld [vmem:[%s2160_s5 + $0x150] sm:$0xff] }
  0x79   : > { %907 = vmatprep.subr.mxu1 %v535_v32  ;;  %837 = vmatpush1.msra.mxu0 %v532_v33  ;;  %v521_v0 = vld [vmem:[%s2160_s5 + $0xc8] sm:$0xff]  ;;  %v523_v1 = vld [vmem:[%s2160_s5 + $0xd8] sm:$0xff]  ;;  %v520_v2 = vld [vmem:[%s2160_s5 + $0xc0] sm:$0xff] }
  0x7a   : > { %908 = vmatpush1.msra.mxu1 %v534_v34  ;;  %838 = vmatprep.subr.mxu0 %v517_v35  ;;  %v522_v3 = vld [vmem:[%s2160_s5 + $0xd0] sm:$0xff]  ;;  %v505_v4 = vld [vmem:[%s2160_s5 + $0x48] sm:$0xff]  ;;  %v507_v5 = vld [vmem:[%s2160_s5 + $0x58] sm:$0xff] }
  0x7b   : > { %909 = vmatprep.subr.mxu1 %v519_v36  ;;  %839 = vmatpush1.msra.mxu0 %v516_v37  ;;  %v504_v6 = vld [vmem:[%s2160_s5 + $0x40] sm:$0xff]  ;;  %v506_v7 = vld [vmem:[%s2160_s5 + $0x50] sm:$0xff]  ;;  %v605_v8 = vld [vmem:[%s2160_s5 + $0x368] sm:$0x3f] }
  0x7c   : > { %910 = vmatpush1.msra.mxu1 %v518_v38  ;;  %840 = vmatprep.subr.mxu0 %v501_v39  ;;  %v607_v9 = vld [vmem:[%s2160_s5 + $0x378] sm:$0x3f]  ;;  %v604_v10 = vld [vmem:[%s2160_s5 + $0x360] sm:$0x3f]  ;;  %v606_v11 = vld [vmem:[%s2160_s5 + $0x370] sm:$0x3f] }
  0x7d   : > { %911 = vmatprep.subr.mxu1 %v503_v40  ;;  %841 = vmatpush1.msra.mxu0 %v500_v41  ;;  %v589_v12 = vld [vmem:[%s2160_s5 + $0x2e8] sm:$0xff]  ;;  %v591_v13 = vld [vmem:[%s2160_s5 + $0x2f8] sm:$0xff]  ;;  %v588_v15 = vld [vmem:[%s2160_s5 + $0x2e0] sm:$0xff] }
  0x7e   : > { %874 = vmatprep.mubr.f32.mxu0 %v1820_v48  ;;  %912 = vmatpush1.msra.mxu1 %v502_v42  ;;  %v590_v16 = vld [vmem:[%s2160_s5 + $0x2f0] sm:$0xff]  ;;  %v573_v17 = vld [vmem:[%s2160_s5 + $0x268] sm:$0xff]  ;;  %v575_v18 = vld [vmem:[%s2160_s5 + $0x278] sm:$0xff] }
  0x7f   : > { %945 = vmatprep.mubr.f32.mxu1 %v1820_v48  ;;  %1586 = vmatmul.mubr.msk.f32.vlgmr.msra.gmra.mxu0 %vm615_vm1, %v2205_v14  ;;  %v572_v19 = vld [vmem:[%s2160_s5 + $0x260] sm:$0xff]  ;;  %v574_v20 = vld [vmem:[%s2160_s5 + $0x270] sm:$0xff]  ;;  %v557_v21 = vld [vmem:[%s2160_s5 + $0x1e8] sm:$0xff] }
  0x80   : > { %1589 = vmatmul.mubr.msk.f32.vlgmr.msra.gmra.mxu1 %vm615_vm1, %v2205_v14  ;;  %1590 = vmatprep.subr.msk.mxu0 %vm619_vm0, %v601_v43  ;;  %v559_v22 = vld [vmem:[%s2160_s5 + $0x1f8] sm:$0xff]  ;;  %v556_v23 = vld [vmem:[%s2160_s5 + $0x1e0] sm:$0xff]  ;;  %v558_v24 = vld [vmem:[%s2160_s5 + $0x1f0] sm:$0xff] }
  0x81   : > { %1593 = vmatprep.subr.msk.mxu1 %vm619_vm0, %v603_v44  ;;  %1591 = vmatpush1.msk.msra.mxu0 %vm619_vm0, %v600_v45  ;;  %v541_v25 = vld [vmem:[%s2160_s5 + $0x168] sm:$0xff]  ;;  %v543_v26 = vld [vmem:[%s2160_s5 + $0x178] sm:$0xff]  ;;  %v540_v27 = vld [vmem:[%s2160_s5 + $0x160] sm:$0xff] }
  0x82   : > { %1594 = vmatpush1.msk.msra.mxu1 %vm619_vm0, %v602_v46  ;;  %972 = vmatprep.subr.mxu0 %v585_v47  ;;  %v542_v28 = vld [vmem:[%s2160_s5 + $0x170] sm:$0xff]  ;;  %v525_v29 = vld [vmem:[%s2160_s5 + $0xe8] sm:$0xff]  ;;  %v527_v30 = vld [vmem:[%s2160_s5 + $0xf8] sm:$0xff] }
  0x83   : > { %1043 = vmatprep.subr.mxu1 %v587_v49  ;;  %973 = vmatpush1.msra.mxu0 %v584_v50  ;;  %v524_v31 = vld [vmem:[%s2160_s5 + $0xe0] sm:$0xff]  ;;  %v526_v32 = vld [vmem:[%s2160_s5 + $0xf0] sm:$0xff]  ;;  %v509_v33 = vld [vmem:[%s2160_s5 + $0x68] sm:$0xff] }
  0x84   : > { %1044 = vmatpush1.msra.mxu1 %v586_v51  ;;  %974 = vmatprep.subr.mxu0 %v569_v52  ;;  %v511_v34 = vld [vmem:[%s2160_s5 + $0x78] sm:$0xff]  ;;  %v508_v35 = vld [vmem:[%s2160_s5 + $0x60] sm:$0xff]  ;;  %v510_v36 = vld [vmem:[%s2160_s5 + $0x70] sm:$0xff] }
  0x85   : > { %1045 = vmatprep.subr.mxu1 %v571_v53  ;;  %975 = vmatpush1.msra.mxu0 %v568_v54  ;;  %v609_v37 = vld [vmem:[%s481_s11] sm:$0x3] }
  0x86   : > { %1046 = vmatpush1.msra.mxu1 %v570_v55  ;;  %976 = vmatprep.subr.mxu0 %v553_v56 }
  0x87   : > { %1047 = vmatprep.subr.mxu1 %v555_v57  ;;  %977 = vmatpush1.msra.mxu0 %v552_v58 }
  0x88   : > { %1048 = vmatpush1.msra.mxu1 %v554_v59  ;;  %978 = vmatprep.subr.mxu0 %v537_v60 }
  0x89   : > { %1049 = vmatprep.subr.mxu1 %v539_v61  ;;  %979 = vmatpush1.msra.mxu0 %v536_v62 }
  0x8a   : > { %1050 = vmatpush1.msra.mxu1 %v538_v63  ;;  %980 = vmatprep.subr.mxu0 %v521_v0 }
  0x8b   : > { %1051 = vmatprep.subr.mxu1 %v523_v1  ;;  %981 = vmatpush1.msra.mxu0 %v520_v2 }
  0x8c   : > { %1052 = vmatpush1.msra.mxu1 %v522_v3  ;;  %982 = vmatprep.subr.mxu0 %v505_v4 }
  0x8d   : > { %1053 = vmatprep.subr.mxu1 %v507_v5  ;;  %983 = vmatpush1.msra.mxu0 %v504_v6 }
  0x8e   : > { %1016 = vmatprep.mubr.f32.mxu0 %v1820_v48  ;;  %1054 = vmatpush1.msra.mxu1 %v506_v7 }
  0x8f   : > { %1087 = vmatprep.mubr.f32.mxu1 %v1820_v48  ;;  %1592 = vmatmul.mubr.msk.f32.vlgmr.msra.gmra.mxu0 %vm615_vm1, %v2205_v14 }
  0x90   : > { %1595 = vmatmul.mubr.msk.f32.vlgmr.msra.gmra.mxu1 %vm615_vm1, %v2205_v14  ;;  %1596 = vmatprep.subr.msk.mxu0 %vm619_vm0, %v605_v8 }
  0x91   : > { %1599 = vmatprep.subr.msk.mxu1 %vm619_vm0, %v607_v9  ;;  %1597 = vmatpush1.msk.msra.mxu0 %vm619_vm0, %v604_v10 }
  0x92   : > { %1600 = vmatpush1.msk.msra.mxu1 %vm619_vm0, %v606_v11  ;;  %1114 = vmatprep.subr.mxu0 %v589_v12 }
  0x93   : > { %1185 = vmatprep.subr.mxu1 %v591_v13  ;;  %1115 = vmatpush1.msra.mxu0 %v588_v15  ;;  %v1822_v15 = vmov 1983009808  }
  0x94   : > { %1186 = vmatpush1.msra.mxu1 %v590_v16  ;;  %1116 = vmatprep.subr.mxu0 %v573_v17  ;;  %v1351_v16 = vunpack.c.l.s4 %v1822_v15  ;;  %v1353_v17 = vlaneseq }
  0x95   : > { %1187 = vmatprep.subr.mxu1 %v575_v18  ;;  %1117 = vmatpush1.msra.mxu0 %v572_v19 }
  0x96   : > { %1188 = vmatpush1.msra.mxu1 %v574_v20  ;;  %1118 = vmatprep.subr.mxu0 %v557_v21  ;;  %v1352_v18 = vunpack.c.0.s8 %v1351_v16  ;;  %v1354_v19 = vshrl.u32 %v1353_v17, 7 }
  0x97   : > { %1189 = vmatprep.subr.mxu1 %v559_v22  ;;  %1119 = vmatpush1.msra.mxu0 %v556_v23 }
  0x98   : > { %1190 = vmatpush1.msra.mxu1 %v558_v24  ;;  %1120 = vmatprep.subr.mxu0 %v541_v25 }
  0x99   : > { %1191 = vmatprep.subr.mxu1 %v543_v26  ;;  %1121 = vmatpush1.msra.mxu0 %v540_v27 }
  0x9a   : > { %1192 = vmatpush1.msra.mxu1 %v542_v28  ;;  %1122 = vmatprep.subr.mxu0 %v525_v29 }
  0x9b   : > { %1193 = vmatprep.subr.mxu1 %v527_v30  ;;  %1123 = vmatpush1.msra.mxu0 %v524_v31  ;;  %v2348_v31 = vsub.s32 %v1352_v18, %v1354_v19 }
  0x9c   : > { %1194 = vmatpush1.msra.mxu1 %v526_v32  ;;  %1124 = vmatprep.subr.mxu0 %v509_v33 }
  0x9d   : > { %1195 = vmatprep.subr.mxu1 %v511_v34  ;;  %1125 = vmatpush1.msra.mxu0 %v508_v35 }
  0x9e   : > { %1158 = vmatprep.mubr.f32.mxu0 %v1820_v48  ;;  %1196 = vmatpush1.msra.mxu1 %v510_v36 }
  0x9f   : > { %1229 = vmatprep.mubr.f32.mxu1 %v1820_v48  ;;  %1598 = vmatmul.mubr.msk.f32.vlgmr.msra.gmra.mxu0 %vm615_vm1, %v2205_v14 }
  0xa0   : > { %1601 = vmatmul.mubr.msk.f32.vlgmr.msra.gmra.mxu1 %vm615_vm1, %v2205_v14  ;;  %612 = vperm.xlu0 %1683, %v609_v37  }
 0x11b   : > { %v2330_v38 = vpop.permute.xlu0 %612 }
 0x12f   : > { %v734_v39 = vpop.f32.mrf.mxu0 }
 0x130   : > { %v805_v40 = vpop.f32.mrf.mxu1  ;;  %v735_v41 = vadd.f32 %v734_v39, %v2330_v38 }
 0x131   : > { %v806_v42 = vadd.f32 %v805_v40, %v2330_v38  ;;  %v736_v43 = vpop.f32.mrf.mxu0 }
 0x132   : > { %v807_v44 = vpop.f32.mrf.mxu1  ;;  %v737_v45 = vadd.f32 %v736_v43, %v2330_v38  ;;  %v1236_v48 = vsub.f32 0.0, %v735_v41 }
 0x133   : > { %v808_v46 = vadd.f32 %v807_v44, %v2330_v38  ;;  %v1238_v47 = vsub.f32 0.0, %v806_v42 }
 0x134   : > { %v1237_v49 = vsub.f32 0.0, %v737_v45  ;;  %v1252_v50 = vmul.f32 1.442695, %v1236_v48 }
 0x135   : > { %v1239_v14 = vsub.f32 0.0, %v808_v46  ;;  %v1256_v51 = vmul.f32 1.442695, %v1238_v47 }
 0x136   : > { %1684 = vpow2.f32 %v1252_v50  ;;  %v1254_v52 = vmul.f32 1.442695, %v1237_v49 }
 0x137   : > { %v1258_v53 = vmul.f32 1.442695, %v1239_v14  ;;  %1686 = vpow2.f32 %v1256_v51 }
 0x138   : > { %1688 = vpow2.f32 %v1254_v52 }
 0x139   : > { %1690 = vpow2.f32 %v1258_v53 }
 0x13f   : > { %v876_v54 = vpop.f32.mrf.mxu0 }
 0x140   : > { %v947_v55 = vpop.f32.mrf.mxu1  ;;  %v877_v56 = vadd.f32 %v876_v54, %v2330_v38 }
 0x141   : > { %v948_v57 = vadd.f32 %v947_v55, %v2330_v38  ;;  %v878_v58 = vpop.f32.mrf.mxu0 }
 0x142   : > { %v949_v59 = vpop.f32.mrf.mxu1  ;;  %v1240_v60 = vsub.f32 0.0, %v877_v56  ;;  %v879_v61 = vadd.f32 %v878_v58, %v2330_v38 }
 0x143   : > { %v950_v62 = vadd.f32 %v949_v59, %v2330_v38  ;;  %v1685_v63 = vpop.eup %1684  ;;  %v1242_v0 = vsub.f32 0.0, %v948_v57 }
 0x144   : > { %v1687_v1 = vpop.eup %1686  ;;  %v1284_v2 = vadd.f32 1.0, %v1685_v63  ;;  %v1241_v3 = vsub.f32 0.0, %v879_v61  ;;  %v1260_v9 = vmul.f32 1.442695, %v1240_v60 }
 0x145   : > { %v1689_v4 = vpop.eup %1688  ;;  %v1286_v5 = vadd.f32 1.0, %v1687_v1  ;;  %v1243_v6 = vsub.f32 0.0, %v950_v62  ;;  %v1264_v11 = vmul.f32 1.442695, %v1242_v0 }
 0x146   : > { %v1691_v7 = vpop.eup %1690  ;;  %v1285_v8 = vadd.f32 1.0, %v1689_v4  ;;  %1692 = vrcp.f32 %v1284_v2  ;;  %v1262_v12 = vmul.f32 1.442695, %v1241_v3 }
 0x147   : > { %v1287_v10 = vadd.f32 1.0, %v1691_v7  ;;  %1694 = vrcp.f32 %v1286_v5  ;;  %v1266_v13 = vmul.f32 1.442695, %v1243_v6 }
 0x148   : > { %1696 = vrcp.f32 %v1285_v8 }
 0x149   : > { %1698 = vrcp.f32 %v1287_v10 }
 0x14a   : > { %1700 = vpow2.f32 %v1260_v9 }
 0x14b   : > { %1702 = vpow2.f32 %v1264_v11 }
 0x14c   : > { %1704 = vpow2.f32 %v1262_v12 }
 0x14d   : > { %1706 = vpow2.f32 %v1266_v13 }
 0x14f   : > { %v1018_v20 = vpop.f32.mrf.mxu0 }
 0x150   : > { %v1089_v21 = vpop.f32.mrf.mxu1  ;;  %v1019_v22 = vadd.f32 %v1018_v20, %v2330_v38 }
 0x151   : > { %v1090_v23 = vadd.f32 %v1089_v21, %v2330_v38  ;;  %v1020_v24 = vpop.f32.mrf.mxu0 }
 0x152   : > { %v1091_v25 = vpop.f32.mrf.mxu1  ;;  %v1244_v26 = vsub.f32 0.0, %v1019_v22  ;;  %v1021_v28 = vadd.f32 %v1020_v24, %v2330_v38 }
 0x153   : > { %v1246_v27 = vsub.f32 0.0, %v1090_v23  ;;  %v1092_v29 = vadd.f32 %v1091_v25, %v2330_v38  ;;  %v1693_v30 = vpop.eup %1692 }
 0x154   : > { %v1695_v32 = vpop.eup %1694  ;;  %v1268_v33 = vmul.f32 1.442695, %v1244_v26  ;;  %v1245_v35 = vsub.f32 0.0, %v1021_v28 }
 0x155   : > { %v1272_v34 = vmul.f32 1.442695, %v1246_v27  ;;  %v1247_v36 = vsub.f32 0.0, %v1092_v29  ;;  %v1697_v37 = vpop.eup %1696 }
 0x156   : > { %v1699_v39 = vpop.eup %1698  ;;  %v1348_v40 = vcombine.low %v1693_v30, %v1697_v37  ;;  %1708 = vpow2.f32 %v1268_v33  ;;  %v1270_v41 = vmul.f32 1.442695, %v1245_v35 }
 0x157   : > { %v1274_v42 = vmul.f32 1.442695, %v1247_v36  ;;  %v1701_v43 = vpop.eup %1700  ;;  %v1349_v44 = vcombine.low %v1695_v32, %v1699_v39  ;;  %1710 = vpow2.f32 %v1272_v34 }
 0x158   : > { %v1703_v45 = vpop.eup %1702  ;;  %v1356_v48 = vrot.slane %v1348_v40, %v2348_v31  ;;  %v1288_v46 = vadd.f32 1.0, %v1701_v43  ;;  %1712 = vpow2.f32 %v1270_v41 }
 0x159   : > { %v1705_v47 = vpop.eup %1704  ;;  %v1363_v49 = vrot.slane %v1349_v44, %v2348_v31  ;;  %v1290_v50 = vadd.f32 1.0, %v1703_v45  ;;  %1714 = vpow2.f32 %v1274_v42 }
 0x15a   : > { %v1707_v14 = vpop.eup %1706  ;;  %1716 = vrcp.f32 %v1288_v46  ;;  %v1289_v51 = vadd.f32 1.0, %v1705_v47 }
 0x15b   : > { %v1364_v52 = vcombine.low %v1356_v48, %v1363_v49  ;;  %1718 = vrcp.f32 %v1290_v50  ;;  %v1291_v53 = vadd.f32 1.0, %v1707_v14 }
 0x15c   : > { %1720 = vrcp.f32 %v1289_v51 }
 0x15d   : > { %1420 = vst [vmem:[%s2355_s29] sm:$0xff] %v1364_v52  ;;  %1722 = vrcp.f32 %v1291_v53 }
 0x15f   : > { %v1160_v54 = vpop.f32.mrf.mxu0 }
 0x160   : > { %v1231_v55 = vpop.f32.mrf.mxu1  ;;  %v1161_v56 = vadd.f32 %v1160_v54, %v2330_v38 }
 0x161   : > { %v1232_v57 = vadd.f32 %v1231_v55, %v2330_v38  ;;  %v1162_v58 = vpop.f32.mrf.mxu0 }
 0x162   : > { %v1233_v59 = vpop.f32.mrf.mxu1  ;;  %v1248_v60 = vsub.f32 0.0, %v1161_v56  ;;  %v1163_v61 = vadd.f32 %v1162_v58, %v2330_v38 }
 0x163   : > { %v1234_v62 = vadd.f32 %v1233_v59, %v2330_v38  ;;  %v1709_v63 = vpop.eup %1708  ;;  %v1250_v0 = vsub.f32 0.0, %v1232_v57 }
 0x164   : > { %v1711_v1 = vpop.eup %1710  ;;  %v1292_v2 = vadd.f32 1.0, %v1709_v63  ;;  %v1249_v3 = vsub.f32 0.0, %v1163_v61  ;;  %v1276_v9 = vmul.f32 1.442695, %v1248_v60 }
 0x165   : > { %v1713_v4 = vpop.eup %1712  ;;  %v1294_v5 = vadd.f32 1.0, %v1711_v1  ;;  %v1251_v6 = vsub.f32 0.0, %v1234_v62  ;;  %v1280_v12 = vmul.f32 1.442695, %v1250_v0 }
 0x166   : > { %v1715_v7 = vpop.eup %1714  ;;  %1724 = vrcp.f32 %v1292_v2  ;;  %v1293_v8 = vadd.f32 1.0, %v1713_v4  ;;  %v1278_v38 = vmul.f32 1.442695, %v1249_v3 }
 0x167   : > { %v1717_v10 = vpop.eup %1716  ;;  %1726 = vrcp.f32 %v1294_v5  ;;  %v1295_v11 = vadd.f32 1.0, %v1715_v7  ;;  %v1282_v16 = vmul.f32 1.442695, %v1251_v6 }
 0x168   : > { %v1719_v13 = vpop.eup %1718  ;;  %1728 = vrcp.f32 %v1293_v8 }
 0x169   : > { %v1721_v15 = vpop.eup %1720  ;;  %1730 = vrcp.f32 %v1295_v11 }
 0x16a   : > { %v1723_v17 = vpop.eup %1722  ;;  %v1365_v18 = vcombine.low %v1717_v10, %v1721_v15  ;;  %1732 = vpow2.f32 %v1276_v9 }
 0x16b   : > { %v1366_v19 = vcombine.low %v1719_v13, %v1723_v17  ;;  %1734 = vpow2.f32 %v1280_v12 }
 0x16c   : > { %v1373_v20 = vrot.slane %v1365_v18, %v2348_v31  ;;  %1736 = vpow2.f32 %v1278_v38 }
 0x16d   : > { %v1380_v21 = vrot.slane %v1366_v19, %v2348_v31  ;;  %1738 = vpow2.f32 %v1282_v16 }
 0x16f   : > { %v1381_v22 = vcombine.low %v1373_v20, %v1380_v21 }
 0x171   : > { %1421 = vst [vmem:[%s2355_s29 + $0x8] sm:$0xff] %v1381_v22 }
 0x173   : > { %v1725_v23 = vpop.eup %1724 }
 0x174   : > { %v1727_v24 = vpop.eup %1726 }
 0x175   : > { %v1729_v25 = vpop.eup %1728 }
 0x176   : > { %v1731_v26 = vpop.eup %1730  ;;  %v1382_v27 = vcombine.low %v1725_v23, %v1729_v25 }
 0x177   : > { %v1733_v28 = vpop.eup %1732  ;;  %v1383_v29 = vcombine.low %v1727_v24, %v1731_v26 }
 0x178   : > { %v1735_v30 = vpop.eup %1734  ;;  %v1390_v32 = vrot.slane %v1382_v27, %v2348_v31  ;;  %v1296_v33 = vadd.f32 1.0, %v1733_v28 }
 0x179   : > { %v1737_v34 = vpop.eup %1736  ;;  %v1397_v35 = vrot.slane %v1383_v29, %v2348_v31  ;;  %v1298_v36 = vadd.f32 1.0, %v1735_v30 }
 0x17a   : > { %v1739_v37 = vpop.eup %1738  ;;  %1740 = vrcp.f32 %v1296_v33  ;;  %v1297_v39 = vadd.f32 1.0, %v1737_v34 }
 0x17b   : > { %v1398_v40 = vcombine.low %v1390_v32, %v1397_v35  ;;  %1742 = vrcp.f32 %v1298_v36  ;;  %v1299_v41 = vadd.f32 1.0, %v1739_v37 }
 0x17c   : > { %1744 = vrcp.f32 %v1297_v39 }
 0x17d   : > { %1422 = vst [vmem:[%s2355_s29 + $0x10] sm:$0xff] %v1398_v40  ;;  %1746 = vrcp.f32 %v1299_v41 }
 0x187   : > { %v1741_v42 = vpop.eup %1740 }
 0x188   : > { %v1743_v43 = vpop.eup %1742 }
 0x189   : > { %v1745_v44 = vpop.eup %1744 }
 0x18a   : > { %v1747_v45 = vpop.eup %1746  ;;  %v1399_v48 = vcombine.low %v1741_v42, %v1745_v44 }
 0x18b   : > { %v1400_v46 = vcombine.low %v1743_v43, %v1747_v45 }
 0x18c   : > { %v1407_v47 = vrot.slane %v1399_v48, %v2348_v31 }
 0x18d   : > { %v1414_v49 = vrot.slane %v1400_v46, %v2348_v31 }
 0x18f   : > { %v1415_v50 = vcombine.low %v1407_v47, %v1414_v49 }
 0x191   : > { %1423 = vst [vmem:[%s2355_s29 + $0x18] sm:$0xff] %v1415_v50 }
 0x192 PF: > { %s13_s20 = sadd.s32 1, %s1818_s20   ;;  %s2403_s12 = smov %s1790_s13 }
 0x193   : > { %p10_p0 = scmp.ge.s32.totalorder %s13_s20, 14   ;;  %s2404_s13 = smov %s1914_s4 }
 0x194   : > { %s2405_s14 = smov %s1806_s17  ;;  %s2406_s15 = smov %s1810_s18 }
 0x195   : > { %s2407_s16 = smov %s1814_s19  ;;  %s2408_s17 = smov %s2418_s21 }
 0x196   : > { %s2409_s18 = smov %s2414_s22  ;;  %s2410_s19 = smov %s2420_s23 }
 0x197   :  { %12 = sbr.rel (!%p10_p0) target bundleno = 5 (0x5), region = 96 }

// kernel: squeeze.3
= control target key start
LH: loop header
LB: loop body
LE: loop exit
PB: predicated region body
PF: predicated region fallthrough
CT: control target
= control target key end

     0   :  { %vm771_vm0 = vcmask 1047556   ;;  %s2382_s29 = smov 112   ;;  %s2385_s21 = smov 64   ;;  %vm323_vm1 = vcmask 130048   ;;  %s3174_s0 = inlined_call_operand.vmem [shape: f32[1,2,2,4096], index: 0, kind: input, shape index: {}]   ;;  %s3175_s1 = inlined_call_operand.hbm [shape: f32[2,2,16,16,16], index: 1, kind: output, shape index: {}]  }
   0x1   :  { %v2349_v0 = vld [vmem:[%s3174_s0 + $0x6] sm:$0x3]  ;;  %v2350_v1 = vld [vmem:[%s3174_s0 + $0x4] sm:$0x3]  ;;  %v2351_v2 = vld [vmem:[%s3174_s0 + $0x2] sm:$0x3] }
   0x2   :  { %310 = vst [vmem:[#allocation2 + $0x18] sm:$0x3] %v2349_v0  ;;  %315 = vst [vmem:[#allocation2 + $0x10] sm:$0x3] %v2350_v1  ;;  %v320_v3 = vld [vmem:[%s3174_s0] sm:$0x3] }
   0x3   :  { %319 = vst [vmem:[#allocation2 + $0x8] sm:$0x3] %v2351_v2  ;;  %v2341_v4 = vld [vmem:[%s3174_s0 + $0x16] sm:$0x3]  ;;  %321 = vst [vmem:[#allocation2] sm:$0x3] %v320_v3 }
   0x4   :  { %270 = vst [vmem:[#allocation2 + $0x58] sm:$0x3] %v2341_v4  ;;  %v2342_v5 = vld [vmem:[%s3174_s0 + $0x14] sm:$0x3]  ;;  %v2343_v6 = vld [vmem:[%s3174_s0 + $0x12] sm:$0x3] }
   0x5   :  { %v2344_v7 = vld [vmem:[%s3174_s0 + $0x10] sm:$0x3]  ;;  %275 = vst [vmem:[#allocation2 + $0x50] sm:$0x3] %v2342_v5  ;;  %280 = vst [vmem:[#allocation2 + $0x48] sm:$0x3] %v2343_v6 }
   0x6   :  { %285 = vst [vmem:[#allocation2 + $0x40] sm:$0x3] %v2344_v7  ;;  %v2345_v8 = vld [vmem:[%s3174_s0 + $0xe] sm:$0x3]  ;;  %v2346_v9 = vld [vmem:[%s3174_s0 + $0xc] sm:$0x3] }
   0x7   :  { %v2347_v10 = vld [vmem:[%s3174_s0 + $0xa] sm:$0x3]  ;;  %290 = vst [vmem:[#allocation2 + $0x38] sm:$0x3] %v2345_v8  ;;  %295 = vst [vmem:[#allocation2 + $0x30] sm:$0x3] %v2346_v9 }
   0x8   :  { %300 = vst [vmem:[#allocation2 + $0x28] sm:$0x3] %v2347_v10  ;;  %v2348_v11 = vld [vmem:[%s3174_s0 + $0x8] sm:$0x3]  ;;  %v2337_v12 = vld [vmem:[%s3174_s0 + $0x1e] sm:$0x3] }
   0x9   :  { %v2338_v13 = vld [vmem:[%s3174_s0 + $0x1c] sm:$0x3]  ;;  %305 = vst [vmem:[#allocation2 + $0x20] sm:$0x3] %v2348_v11  ;;  %250 = vst [vmem:[#allocation2 + $0x78] sm:$0x3] %v2337_v12 }
   0xa   :  { %255 = vst [vmem:[#allocation2 + $0x70] sm:$0x3] %v2338_v13  ;;  %v2339_v14 = vld [vmem:[%s3174_s0 + $0x1a] sm:$0x3]  ;;  %v2340_v15 = vld [vmem:[%s3174_s0 + $0x18] sm:$0x3] }
   0xb   :  { %v2333_v16 = vld [vmem:[%s3174_s0 + $0x26] sm:$0x3]  ;;  %260 = vst [vmem:[#allocation2 + $0x68] sm:$0x3] %v2339_v14  ;;  %265 = vst [vmem:[#allocation2 + $0x60] sm:$0x3] %v2340_v15 }
   0xc   :  { %230 = vst [vmem:[#allocation2 + $0x98] sm:$0x3] %v2333_v16  ;;  %v2334_v17 = vld [vmem:[%s3174_s0 + $0x24] sm:$0x3]  ;;  %v2335_v18 = vld [vmem:[%s3174_s0 + $0x22] sm:$0x3] }
   0xd   :  { %v2336_v19 = vld [vmem:[%s3174_s0 + $0x20] sm:$0x3]  ;;  %235 = vst [vmem:[#allocation2 + $0x90] sm:$0x3] %v2334_v17  ;;  %240 = vst [vmem:[#allocation2 + $0x88] sm:$0x3] %v2335_v18 }
   0xe   :  { %245 = vst [vmem:[#allocation2 + $0x80] sm:$0x3] %v2336_v19  ;;  %v2329_v20 = vld [vmem:[%s3174_s0 + $0x2e] sm:$0x3]  ;;  %v2330_v21 = vld [vmem:[%s3174_s0 + $0x2c] sm:$0x3] }
   0xf   :  { %v2331_v22 = vld [vmem:[%s3174_s0 + $0x2a] sm:$0x3]  ;;  %210 = vst [vmem:[#allocation2 + $0xb8] sm:$0x3] %v2329_v20  ;;  %215 = vst [vmem:[#allocation2 + $0xb0] sm:$0x3] %v2330_v21 }
  0x10   :  { %220 = vst [vmem:[#allocation2 + $0xa8] sm:$0x3] %v2331_v22  ;;  %v2332_v23 = vld [vmem:[%s3174_s0 + $0x28] sm:$0x3]  ;;  %v2325_v24 = vld [vmem:[%s3174_s0 + $0x36] sm:$0x3] }
  0x11   :  { %v2326_v25 = vld [vmem:[%s3174_s0 + $0x34] sm:$0x3]  ;;  %v768_v26 = vld [vmem:[#allocation2] ss:$8 sm:$0xf]  }
  0x12   :  { %v770_v27 = vld [vmem:[#allocation2 - $0x1f] ss:$8 sm:$0xf0]   ;;  %225 = vst [vmem:[#allocation2 + $0xa0] sm:$0x3] %v2332_v23 }
  0x13   :  { %190 = vst [vmem:[#allocation2 + $0xd8] sm:$0x3] %v2325_v24  ;;  %195 = vst [vmem:[#allocation2 + $0xd0] sm:$0x3] %v2326_v25  ;;  %v772_v28 = vsel %vm771_vm0, %v770_v27, %v768_v26  ;;  %v2327_v32 = vld [vmem:[%s3174_s0 + $0x32] sm:$0x3] }
  0x14   :  { %v794_v29 = vld [vmem:[#allocation2 + $0x40] ss:$8 sm:$0xf]   ;;  %v796_v30 = vld [vmem:[#allocation2 + $0x21] ss:$8 sm:$0xf0]   ;;  %773 = vrot.lane.b32.xlu0 %v772_v28, %s2382_s29 }
  0x15   :  { %v798_v31 = vsel %vm771_vm0, %v796_v30, %v794_v29  ;;  %v2328_v33 = vld [vmem:[%s3174_s0 + $0x30] sm:$0x3]  ;;  %v2321_v34 = vld [vmem:[%s3174_s0 + $0x3e] sm:$0x3]  ;;  %200 = vst [vmem:[#allocation2 + $0xc8] sm:$0x3] %v2327_v32 }
  0x16   :  { %799 = vrot.lane.b32.xlu1 %v798_v31, %s2382_s29  ;;  %v781_v35 = vld [vmem:[#allocation2 + $0x20] ss:$8 sm:$0xf]   ;;  %v783_v36 = vld [vmem:[#allocation2 + $0x1] ss:$8 sm:$0xf0]  }
  0x17   :  { %205 = vst [vmem:[#allocation2 + $0xc0] sm:$0x3] %v2328_v33  ;;  %170 = vst [vmem:[#allocation2 + $0xf8] sm:$0x3] %v2321_v34  ;;  %v785_v37 = vsel %vm771_vm0, %v783_v36, %v781_v35  ;;  %v2322_v43 = vld [vmem:[%s3174_s0 + $0x3c] sm:$0x3] }
  0x18   :  { %v807_v38 = vld [vmem:[#allocation2 + $0x60] ss:$8 sm:$0xf]   ;;  %v809_v39 = vld [vmem:[#allocation2 + $0x41] ss:$8 sm:$0xf0]   ;;  %786 = vrot.lane.b32.xlu0 %v785_v37, %s2382_s29 }
  0x19   :  { %v811_v40 = vsel %vm771_vm0, %v809_v39, %v807_v38  ;;  %v820_v41 = vld [vmem:[#allocation2 + $0x80] ss:$8 sm:$0xf]   ;;  %v822_v42 = vld [vmem:[#allocation2 + $0x61] ss:$8 sm:$0xf0]  }
  0x1a   :  { %v2323_v44 = vld [vmem:[%s3174_s0 + $0x3a] sm:$0x3]  ;;  %v2324_v45 = vld [vmem:[%s3174_s0 + $0x38] sm:$0x3]  ;;  %812 = vrot.lane.b32.xlu1 %v811_v40, %s2382_s29  ;;  %v824_v46 = vsel %vm771_vm0, %v822_v42, %v820_v41  ;;  %175 = vst [vmem:[#allocation2 + $0xf0] sm:$0x3] %v2322_v43 }
  0x1b   :  { %v833_v47 = vld [vmem:[#allocation2 + $0xa0] ss:$8 sm:$0xf]   ;;  %v835_v48 = vld [vmem:[#allocation2 + $0x81] ss:$8 sm:$0xf0]  }
  0x1c   :  { %180 = vst [vmem:[#allocation2 + $0xe8] sm:$0x3] %v2323_v44  ;;  %185 = vst [vmem:[#allocation2 + $0xe0] sm:$0x3] %v2324_v45  ;;  %v837_v49 = vsel %vm771_vm0, %v835_v48, %v833_v47  ;;  %v2317_v50 = vld [vmem:[%s3174_s0 + $0x46] sm:$0x3]  ;;  %825 = vrot.lane.b32.xlu0 %v824_v46, %s2382_s29 }
  0x1d   :  { %v2318_v51 = vld [vmem:[%s3174_s0 + $0x44] sm:$0x3]  ;;  %v2319_v52 = vld [vmem:[%s3174_s0 + $0x42] sm:$0x3]  ;;  %150 = vst [vmem:[#allocation2 + $0x118] sm:$0x3] %v2317_v50 }
  0x1e   :  { %155 = vst [vmem:[#allocation2 + $0x110] sm:$0x3] %v2318_v51  ;;  %160 = vst [vmem:[#allocation2 + $0x108] sm:$0x3] %v2319_v52  ;;  %v2320_v53 = vld [vmem:[%s3174_s0 + $0x40] sm:$0x3]  ;;  %838 = vrot.lane.b32.xlu1 %v837_v49, %s2382_s29 }
  0x1f   :  { %v2313_v54 = vld [vmem:[%s3174_s0 + $0x4e] sm:$0x3]  ;;  %v2314_v55 = vld [vmem:[%s3174_s0 + $0x4c] sm:$0x3]  ;;  %165 = vst [vmem:[#allocation2 + $0x100] sm:$0x3] %v2320_v53 }
  0x20   :  { %v846_v56 = vld [vmem:[#allocation2 + $0xc0] ss:$8 sm:$0xf]   ;;  %v848_v57 = vld [vmem:[#allocation2 + $0xa1] ss:$8 sm:$0xf0]  }
  0x21   :  { %130 = vst [vmem:[#allocation2 + $0x138] sm:$0x3] %v2313_v54  ;;  %135 = vst [vmem:[#allocation2 + $0x130] sm:$0x3] %v2314_v55  ;;  %v850_v58 = vsel %vm771_vm0, %v848_v57, %v846_v56  ;;  %v2315_v59 = vld [vmem:[%s3174_s0 + $0x4a] sm:$0x3] }
  0x22   :  { %v2316_v60 = vld [vmem:[%s3174_s0 + $0x48] sm:$0x3]  ;;  %v2309_v61 = vld [vmem:[%s3174_s0 + $0x56] sm:$0x3]  ;;  %140 = vst [vmem:[#allocation2 + $0x128] sm:$0x3] %v2315_v59  ;;  %851 = vrot.lane.b32.xlu0 %v850_v58, %s2382_s29 }
  0x23   :  { %145 = vst [vmem:[#allocation2 + $0x120] sm:$0x3] %v2316_v60  ;;  %110 = vst [vmem:[#allocation2 + $0x158] sm:$0x3] %v2309_v61  ;;  %v2310_v62 = vld [vmem:[%s3174_s0 + $0x54] sm:$0x3] }
  0x24   :  { %v2311_v63 = vld [vmem:[%s3174_s0 + $0x52] sm:$0x3]  ;;  %v2312_v0 = vld [vmem:[%s3174_s0 + $0x50] sm:$0x3]  ;;  %115 = vst [vmem:[#allocation2 + $0x150] sm:$0x3] %v2310_v62 }
  0x25   :  { %120 = vst [vmem:[#allocation2 + $0x148] sm:$0x3] %v2311_v63  ;;  %125 = vst [vmem:[#allocation2 + $0x140] sm:$0x3] %v2312_v0  ;;  %v2305_v1 = vld [vmem:[%s3174_s0 + $0x5e] sm:$0x3] }
  0x26   :  { %v2306_v2 = vld [vmem:[%s3174_s0 + $0x5c] sm:$0x3]  ;;  %v2307_v3 = vld [vmem:[%s3174_s0 + $0x5a] sm:$0x3]  ;;  %90 = vst [vmem:[#allocation2 + $0x178] sm:$0x3] %v2305_v1 }
  0x27   :  { %v859_v4 = vld [vmem:[#allocation2 + $0xe0] ss:$8 sm:$0xf]   ;;  %v861_v5 = vld [vmem:[#allocation2 + $0xc1] ss:$8 sm:$0xf0]  }
  0x28   :  { %95 = vst [vmem:[#allocation2 + $0x170] sm:$0x3] %v2306_v2  ;;  %100 = vst [vmem:[#allocation2 + $0x168] sm:$0x3] %v2307_v3  ;;  %v863_v6 = vsel %vm771_vm0, %v861_v5, %v859_v4  ;;  %v2308_v7 = vld [vmem:[%s3174_s0 + $0x58] sm:$0x3] }
  0x29   :  { %v2301_v8 = vld [vmem:[%s3174_s0 + $0x66] sm:$0x3]  ;;  %v2302_v9 = vld [vmem:[%s3174_s0 + $0x64] sm:$0x3]  ;;  %864 = vrot.lane.b32.xlu1 %v863_v6, %s2382_s29  ;;  %105 = vst [vmem:[#allocation2 + $0x160] sm:$0x3] %v2308_v7 }
  0x2a   :  { %70 = vst [vmem:[#allocation2 + $0x198] sm:$0x3] %v2301_v8  ;;  %75 = vst [vmem:[#allocation2 + $0x190] sm:$0x3] %v2302_v9  ;;  %v2303_v10 = vld [vmem:[%s3174_s0 + $0x62] sm:$0x3] }
  0x2b   :  { %v2304_v11 = vld [vmem:[%s3174_s0 + $0x60] sm:$0x3]  ;;  %v2297_v12 = vld [vmem:[%s3174_s0 + $0x6e] sm:$0x3]  ;;  %80 = vst [vmem:[#allocation2 + $0x188] sm:$0x3] %v2303_v10 }
  0x2c   :  { %v872_v13 = vld [vmem:[#allocation2 + $0x100] ss:$8 sm:$0xf]   ;;  %v874_v14 = vld [vmem:[#allocation2 + $0xe1] ss:$8 sm:$0xf0]  }
  0x2d   :  { %85 = vst [vmem:[#allocation2 + $0x180] sm:$0x3] %v2304_v11  ;;  %50 = vst [vmem:[#allocation2 + $0x1b8] sm:$0x3] %v2297_v12  ;;  %v876_v15 = vsel %vm771_vm0, %v874_v14, %v872_v13  ;;  %v2298_v16 = vld [vmem:[%s3174_s0 + $0x6c] sm:$0x3] }
  0x2e   :  { %v2299_v17 = vld [vmem:[%s3174_s0 + $0x6a] sm:$0x3]  ;;  %v2300_v18 = vld [vmem:[%s3174_s0 + $0x68] sm:$0x3]  ;;  %877 = vrot.lane.b32.xlu0 %v876_v15, %s2382_s29  ;;  %55 = vst [vmem:[#allocation2 + $0x1b0] sm:$0x3] %v2298_v16 }
  0x2f   :  { %v885_v19 = vld [vmem:[#allocation2 + $0x120] ss:$8 sm:$0xf]   ;;  %v887_v20 = vld [vmem:[#allocation2 + $0x101] ss:$8 sm:$0xf0]  }
  0x30   :  { %60 = vst [vmem:[#allocation2 + $0x1a8] sm:$0x3] %v2299_v17  ;;  %65 = vst [vmem:[#allocation2 + $0x1a0] sm:$0x3] %v2300_v18  ;;  %v889_v21 = vsel %vm771_vm0, %v887_v20, %v885_v19  ;;  %v2293_v25 = vld [vmem:[%s3174_s0 + $0x76] sm:$0x3] }
  0x31   :  { %v898_v22 = vld [vmem:[#allocation2 + $0x140] ss:$8 sm:$0xf]   ;;  %v900_v23 = vld [vmem:[#allocation2 + $0x121] ss:$8 sm:$0xf0]   ;;  %890 = vrot.lane.b32.xlu1 %v889_v21, %s2382_s29 }
  0x32   :  { %v902_v24 = vsel %vm771_vm0, %v900_v23, %v898_v22  ;;  %v2294_v26 = vld [vmem:[%s3174_s0 + $0x74] sm:$0x3]  ;;  %v2295_v27 = vld [vmem:[%s3174_s0 + $0x72] sm:$0x3]  ;;  %30 = vst [vmem:[#allocation2 + $0x1d8] sm:$0x3] %v2293_v25 }
  0x33   :  { %35 = vst [vmem:[#allocation2 + $0x1d0] sm:$0x3] %v2294_v26  ;;  %40 = vst [vmem:[#allocation2 + $0x1c8] sm:$0x3] %v2295_v27  ;;  %v2296_v28 = vld [vmem:[%s3174_s0 + $0x70] sm:$0x3]  ;;  %903 = vrot.lane.b32.xlu0 %v902_v24, %s2382_s29 }
  0x34   :  { %v2289_v29 = vld [vmem:[%s3174_s0 + $0x7e] sm:$0x3]  ;;  %v2290_v30 = vld [vmem:[%s3174_s0 + $0x7c] sm:$0x3]  ;;  %45 = vst [vmem:[#allocation2 + $0x1c0] sm:$0x3] %v2296_v28 }
  0x35   :  { %v911_v31 = vld [vmem:[#allocation2 + $0x160] ss:$8 sm:$0xf]   ;;  %v913_v32 = vld [vmem:[#allocation2 + $0x141] ss:$8 sm:$0xf0]  }
  0x36   :  { %10 = vst [vmem:[#allocation2 + $0x1f8] sm:$0x3] %v2289_v29  ;;  %15 = vst [vmem:[#allocation2 + $0x1f0] sm:$0x3] %v2290_v30  ;;  %v915_v33 = vsel %vm771_vm0, %v913_v32, %v911_v31  ;;  %v2291_v37 = vld [vmem:[%s3174_s0 + $0x7a] sm:$0x3] }
  0x37   :  { %v924_v34 = vld [vmem:[#allocation2 + $0x180] ss:$8 sm:$0xf]   ;;  %v926_v35 = vld [vmem:[#allocation2 + $0x161] ss:$8 sm:$0xf0]   ;;  %916 = vrot.lane.b32.xlu1 %v915_v33, %s2382_s29 }
  0x38   :  { %v928_v36 = vsel %vm771_vm0, %v926_v35, %v924_v34  ;;  %v2292_v38 = vld [vmem:[%s3174_s0 + $0x78] sm:$0x3]  ;;  %20 = vst [vmem:[#allocation2 + $0x1e8] sm:$0x3] %v2291_v37  ;;  %s2383_s0 = smov 96  }
  0x39   :  { %v937_v39 = vld [vmem:[#allocation2 + $0x1a0] ss:$8 sm:$0xf]   ;;  %v939_v40 = vld [vmem:[#allocation2 + $0x181] ss:$8 sm:$0xf0]   ;;  %929 = vrot.lane.b32.xlu0 %v928_v36, %s2382_s29 }
  0x3a   :  { %25 = vst [vmem:[#allocation2 + $0x1e0] sm:$0x3] %v2292_v38  ;;  %v941_v41 = vsel %vm771_vm0, %v939_v40, %v937_v39  ;;  %v975_v42 = vld [vmem:[#allocation2] ss:$8 sm:$0xf]  }
  0x3b   :  { %942 = vrot.lane.b32.xlu1 %v941_v41, %s2382_s29  ;;  %v977_v43 = vld [vmem:[#allocation2 - $0x1f] ss:$8 sm:$0xf0]   ;;  %v950_v44 = vld [vmem:[#allocation2 + $0x1c0] ss:$8 sm:$0xf]  }
  0x3c   :  { %v952_v45 = vld [vmem:[#allocation2 + $0x1a1] ss:$8 sm:$0xf0]   ;;  %v988_v47 = vld [vmem:[#allocation2 + $0x20] ss:$8 sm:$0xf]   ;;  %v979_v51 = vsel %vm771_vm0, %v977_v43, %v975_v42 }
  0x3d   :  { %v954_v46 = vsel %vm771_vm0, %v952_v45, %v950_v44  ;;  %v990_v48 = vld [vmem:[#allocation2 + $0x1] ss:$8 sm:$0xf0]   ;;  %v1001_v53 = vld [vmem:[#allocation2 + $0x40] ss:$8 sm:$0xf]  }
  0x3e   :  { %955 = vrot.lane.b32.xlu0 %v954_v46, %s2382_s29  ;;  %v1003_v54 = vld [vmem:[#allocation2 + $0x21] ss:$8 sm:$0xf0]   ;;  %v992_v55 = vsel %vm771_vm0, %v990_v48, %v988_v47  ;;  %v1014_v57 = vld [vmem:[#allocation2 + $0x60] ss:$8 sm:$0xf]  }
  0x3f   :  { %v1005_v56 = vsel %vm771_vm0, %v1003_v54, %v1001_v53  ;;  %v1016_v58 = vld [vmem:[#allocation2 + $0x41] ss:$8 sm:$0xf0]   ;;  %v1027_v59 = vld [vmem:[#allocation2 + $0x80] ss:$8 sm:$0xf]  }
  0x40   :  { %v1029_v60 = vld [vmem:[#allocation2 + $0x61] ss:$8 sm:$0xf0]   ;;  %v1018_v61 = vsel %vm771_vm0, %v1016_v58, %v1014_v57  ;;  %v1040_v63 = vld [vmem:[#allocation2 + $0xa0] ss:$8 sm:$0xf]  }
  0x41   :  { %v963_v49 = vld [vmem:[#allocation2 + $0x1e0] ss:$8 sm:$0xf]   ;;  %v965_v50 = vld [vmem:[#allocation2 + $0x1c1] ss:$8 sm:$0xf0]   ;;  %v1031_v62 = vsel %vm771_vm0, %v1029_v60, %v1027_v59 }
  0x42   :  { %v967_v52 = vsel %vm771_vm0, %v965_v50, %v963_v49  ;;  %980 = vrot.lane.b32.xlu0 %v979_v51, %s2383_s0  ;;  %v1042_v0 = vld [vmem:[#allocation2 + $0x81] ss:$8 sm:$0xf0]   ;;  %v1053_v1 = vld [vmem:[#allocation2 + $0xc0] ss:$8 sm:$0xf]  }
  0x43   :  { %968 = vrot.lane.b32.xlu1 %v967_v52, %s2382_s29  ;;  %v1055_v2 = vld [vmem:[#allocation2 + $0xa1] ss:$8 sm:$0xf0]   ;;  %v1044_v3 = vsel %vm771_vm0, %v1042_v0, %v1040_v63  ;;  %v1066_v5 = vld [vmem:[#allocation2 + $0xe0] ss:$8 sm:$0xf]  }
  0x44   :  { %v1057_v4 = vsel %vm771_vm0, %v1055_v2, %v1053_v1  ;;  %v1068_v6 = vld [vmem:[#allocation2 + $0xc1] ss:$8 sm:$0xf0]   ;;  %v1079_v7 = vld [vmem:[#allocation2 + $0x100] ss:$8 sm:$0xf]  }
  0x45   :  { %v1081_v8 = vld [vmem:[#allocation2 + $0xe1] ss:$8 sm:$0xf0]   ;;  %v1070_v9 = vsel %vm771_vm0, %v1068_v6, %v1066_v5  ;;  %v1092_v11 = vld [vmem:[#allocation2 + $0x120] ss:$8 sm:$0xf]  }
  0x46   :  { %1006 = vrot.lane.b32.xlu0 %v1005_v56, %s2383_s0  ;;  %v1083_v10 = vsel %vm771_vm0, %v1081_v8, %v1079_v7  ;;  %v1094_v12 = vld [vmem:[#allocation2 + $0x101] ss:$8 sm:$0xf0]   ;;  %v1105_v13 = vld [vmem:[#allocation2 + $0x140] ss:$8 sm:$0xf]  }
  0x47   :  { %993 = vrot.lane.b32.xlu1 %v992_v55, %s2383_s0  ;;  %v1107_v14 = vld [vmem:[#allocation2 + $0x121] ss:$8 sm:$0xf0]   ;;  %v1096_v15 = vsel %vm771_vm0, %v1094_v12, %v1092_v11  ;;  %v1118_v17 = vld [vmem:[#allocation2 + $0x160] ss:$8 sm:$0xf]  }
  0x48   :  { %v1109_v16 = vsel %vm771_vm0, %v1107_v14, %v1105_v13  ;;  %v1120_v18 = vld [vmem:[#allocation2 + $0x141] ss:$8 sm:$0xf0]   ;;  %v1131_v19 = vld [vmem:[#allocation2 + $0x180] ss:$8 sm:$0xf]  }
  0x49   :  { %v1133_v20 = vld [vmem:[#allocation2 + $0x161] ss:$8 sm:$0xf0]   ;;  %v1122_v21 = vsel %vm771_vm0, %v1120_v18, %v1118_v17  ;;  %v1144_v23 = vld [vmem:[#allocation2 + $0x1a0] ss:$8 sm:$0xf]  }
  0x4a   :  { %1032 = vrot.lane.b32.xlu0 %v1031_v62, %s2383_s0  ;;  %v1135_v22 = vsel %vm771_vm0, %v1133_v20, %v1131_v19  ;;  %v1146_v24 = vld [vmem:[#allocation2 + $0x181] ss:$8 sm:$0xf0]   ;;  %v1157_v25 = vld [vmem:[#allocation2 + $0x1c0] ss:$8 sm:$0xf]  }
  0x4b   :  { %1019 = vrot.lane.b32.xlu1 %v1018_v61, %s2383_s0  ;;  %v1159_v26 = vld [vmem:[#allocation2 + $0x1a1] ss:$8 sm:$0xf0]   ;;  %v1148_v27 = vsel %vm771_vm0, %v1146_v24, %v1144_v23  ;;  %v1170_v29 = vld [vmem:[#allocation2 + $0x1e0] ss:$8 sm:$0xf]  }
  0x4c   :  { %v1161_v28 = vsel %vm771_vm0, %v1159_v26, %v1157_v25  ;;  %v1172_v30 = vld [vmem:[#allocation2 + $0x1c1] ss:$8 sm:$0xf0]   ;;  %v1182_v31 = vld [vmem:[#allocation2] ss:$8 sm:$0xf]  }
  0x4d   :  { %v1184_v32 = vld [vmem:[#allocation2 - $0x1f] ss:$8 sm:$0xf0]   ;;  %v1174_v33 = vsel %vm771_vm0, %v1172_v30, %v1170_v29  ;;  %v1195_v35 = vld [vmem:[#allocation2 + $0x20] ss:$8 sm:$0xf]  }
  0x4e   :  { %1058 = vrot.lane.b32.xlu0 %v1057_v4, %s2383_s0  ;;  %v1186_v34 = vsel %vm771_vm0, %v1184_v32, %v1182_v31  ;;  %v1197_v36 = vld [vmem:[#allocation2 + $0x1] ss:$8 sm:$0xf0]   ;;  %v1208_v37 = vld [vmem:[#allocation2 + $0x40] ss:$8 sm:$0xf]  }
  0x4f   :  { %1045 = vrot.lane.b32.xlu1 %v1044_v3, %s2383_s0  ;;  %v1210_v38 = vld [vmem:[#allocation2 + $0x21] ss:$8 sm:$0xf0]   ;;  %s2384_s29 = smov 80   ;;  %v1199_v39 = vsel %vm771_vm0, %v1197_v36, %v1195_v35 }
  0x50   :  { %v1212_v40 = vsel %vm771_vm0, %v1210_v38, %v1208_v37  ;;  %v1221_v41 = vld [vmem:[#allocation2 + $0x60] ss:$8 sm:$0xf]   ;;  %v1223_v42 = vld [vmem:[#allocation2 + $0x41] ss:$8 sm:$0xf0]  }
  0x51   :  { %v1234_v43 = vld [vmem:[#allocation2 + $0x80] ss:$8 sm:$0xf]   ;;  %v1236_v44 = vld [vmem:[#allocation2 + $0x61] ss:$8 sm:$0xf0]   ;;  %v1225_v45 = vsel %vm771_vm0, %v1223_v42, %v1221_v41 }
  0x52   :  { %1084 = vrot.lane.b32.xlu0 %v1083_v10, %s2383_s0  ;;  %v1238_v46 = vsel %vm771_vm0, %v1236_v44, %v1234_v43  ;;  %v1247_v47 = vld [vmem:[#allocation2 + $0xa0] ss:$8 sm:$0xf]   ;;  %v1249_v48 = vld [vmem:[#allocation2 + $0x81] ss:$8 sm:$0xf0]  }
  0x53   :  { %1071 = vrot.lane.b32.xlu1 %v1070_v9, %s2383_s0  ;;  %v1260_v49 = vld [vmem:[#allocation2 + $0xc0] ss:$8 sm:$0xf]   ;;  %v1262_v50 = vld [vmem:[#allocation2 + $0xa1] ss:$8 sm:$0xf0]   ;;  %v1251_v51 = vsel %vm771_vm0, %v1249_v48, %v1247_v47 }
  0x54   :  { %v1264_v52 = vsel %vm771_vm0, %v1262_v50, %v1260_v49  ;;  %v1273_v53 = vld [vmem:[#allocation2 + $0xe0] ss:$8 sm:$0xf]   ;;  %v1275_v54 = vld [vmem:[#allocation2 + $0xc1] ss:$8 sm:$0xf0]  }
  0x55   :  { %v1286_v55 = vld [vmem:[#allocation2 + $0x100] ss:$8 sm:$0xf]   ;;  %v1288_v56 = vld [vmem:[#allocation2 + $0xe1] ss:$8 sm:$0xf0]   ;;  %v1277_v57 = vsel %vm771_vm0, %v1275_v54, %v1273_v53 }
  0x56   :  { %1110 = vrot.lane.b32.xlu0 %v1109_v16, %s2383_s0  ;;  %v1290_v58 = vsel %vm771_vm0, %v1288_v56, %v1286_v55  ;;  %v1299_v59 = vld [vmem:[#allocation2 + $0x120] ss:$8 sm:$0xf]   ;;  %v1301_v60 = vld [vmem:[#allocation2 + $0x101] ss:$8 sm:$0xf0]  }
  0x57   :  { %1097 = vrot.lane.b32.xlu1 %v1096_v15, %s2383_s0  ;;  %v1312_v61 = vld [vmem:[#allocation2 + $0x140] ss:$8 sm:$0xf]   ;;  %v1314_v62 = vld [vmem:[#allocation2 + $0x121] ss:$8 sm:$0xf0]   ;;  %v1303_v63 = vsel %vm771_vm0, %v1301_v60, %v1299_v59 }
  0x58   :  { %v1316_v0 = vsel %vm771_vm0, %v1314_v62, %v1312_v61  ;;  %v1325_v1 = vld [vmem:[#allocation2 + $0x160] ss:$8 sm:$0xf]   ;;  %v1327_v2 = vld [vmem:[#allocation2 + $0x141] ss:$8 sm:$0xf0]  }
  0x59   :  { %v1338_v3 = vld [vmem:[#allocation2 + $0x180] ss:$8 sm:$0xf]   ;;  %v1340_v4 = vld [vmem:[#allocation2 + $0x161] ss:$8 sm:$0xf0]   ;;  %v1329_v5 = vsel %vm771_vm0, %v1327_v2, %v1325_v1 }
  0x5a   :  { %1136 = vrot.lane.b32.xlu0 %v1135_v22, %s2383_s0  ;;  %v1342_v6 = vsel %vm771_vm0, %v1340_v4, %v1338_v3  ;;  %v1351_v7 = vld [vmem:[#allocation2 + $0x1a0] ss:$8 sm:$0xf]   ;;  %v1353_v8 = vld [vmem:[#allocation2 + $0x181] ss:$8 sm:$0xf0]  }
  0x5b   :  { %1123 = vrot.lane.b32.xlu1 %v1122_v21, %s2383_s0  ;;  %v1364_v9 = vld [vmem:[#allocation2 + $0x1c0] ss:$8 sm:$0xf]   ;;  %v1366_v10 = vld [vmem:[#allocation2 + $0x1a1] ss:$8 sm:$0xf0]   ;;  %v1355_v11 = vsel %vm771_vm0, %v1353_v8, %v1351_v7 }
  0x5c   :  { %v1368_v12 = vsel %vm771_vm0, %v1366_v10, %v1364_v9  ;;  %v1377_v13 = vld [vmem:[#allocation2 + $0x1e0] ss:$8 sm:$0xf]   ;;  %v1379_v14 = vld [vmem:[#allocation2 + $0x1c1] ss:$8 sm:$0xf0]  }
  0x5d   :  { %v1389_v15 = vld [vmem:[#allocation2] ss:$8 sm:$0xf]   ;;  %v1391_v16 = vld [vmem:[#allocation2 - $0x1f] ss:$8 sm:$0xf0]   ;;  %v1381_v17 = vsel %vm771_vm0, %v1379_v14, %v1377_v13 }
  0x5e   :  { %1162 = vrot.lane.b32.xlu0 %v1161_v28, %s2383_s0  ;;  %v1393_v18 = vsel %vm771_vm0, %v1391_v16, %v1389_v15  ;;  %v1402_v19 = vld [vmem:[#allocation2 + $0x20] ss:$8 sm:$0xf]   ;;  %v1404_v20 = vld [vmem:[#allocation2 + $0x1] ss:$8 sm:$0xf0]  }
  0x5f   :  { %1149 = vrot.lane.b32.xlu1 %v1148_v27, %s2383_s0  ;;  %v1415_v21 = vld [vmem:[#allocation2 + $0x40] ss:$8 sm:$0xf]   ;;  %v1417_v22 = vld [vmem:[#allocation2 + $0x21] ss:$8 sm:$0xf0]   ;;  %v1406_v23 = vsel %vm771_vm0, %v1404_v20, %v1402_v19 }
  0x60   :  { %v1419_v24 = vsel %vm771_vm0, %v1417_v22, %v1415_v21  ;;  %v1428_v25 = vld [vmem:[#allocation2 + $0x60] ss:$8 sm:$0xf]   ;;  %v1430_v26 = vld [vmem:[#allocation2 + $0x41] ss:$8 sm:$0xf0]  }
  0x61   :  { %v1441_v27 = vld [vmem:[#allocation2 + $0x80] ss:$8 sm:$0xf]   ;;  %v1443_v28 = vld [vmem:[#allocation2 + $0x61] ss:$8 sm:$0xf0]   ;;  %v1432_v29 = vsel %vm771_vm0, %v1430_v26, %v1428_v25 }
  0x62   :  { %1187 = vrot.lane.b32.xlu0 %v1186_v34, %s2384_s29  ;;  %v1445_v30 = vsel %vm771_vm0, %v1443_v28, %v1441_v27  ;;  %v1454_v31 = vld [vmem:[#allocation2 + $0xa0] ss:$8 sm:$0xf]   ;;  %v1456_v32 = vld [vmem:[#allocation2 + $0x81] ss:$8 sm:$0xf0]  }
  0x63   :  { %1175 = vrot.lane.b32.xlu1 %v1174_v33, %s2383_s0  ;;  %v1467_v33 = vld [vmem:[#allocation2 + $0xc0] ss:$8 sm:$0xf]   ;;  %v1469_v34 = vld [vmem:[#allocation2 + $0xa1] ss:$8 sm:$0xf0]   ;;  %v1458_v35 = vsel %vm771_vm0, %v1456_v32, %v1454_v31 }
  0x64   :  { %v1471_v36 = vsel %vm771_vm0, %v1469_v34, %v1467_v33  ;;  %v1480_v37 = vld [vmem:[#allocation2 + $0xe0] ss:$8 sm:$0xf]   ;;  %v1482_v38 = vld [vmem:[#allocation2 + $0xc1] ss:$8 sm:$0xf0]  }
  0x65   :  { %v1484_v41 = vsel %vm771_vm0, %v1482_v38, %v1480_v37  ;;  %v1506_v43 = vld [vmem:[#allocation2 + $0x120] ss:$8 sm:$0xf]   ;;  %v1508_v44 = vld [vmem:[#allocation2 + $0x101] ss:$8 sm:$0xf0]  }
  0x66   :  { %1213 = vrot.lane.b32.xlu0 %v1212_v40, %s2384_s29  ;;  %v1495_v40 = vld [vmem:[#allocation2 + $0xe1] ss:$8 sm:$0xf0]   ;;  %v1510_v47 = vsel %vm771_vm0, %v1508_v44, %v1506_v43  ;;  %v1545_v53 = vld [vmem:[#allocation2 + $0x180] ss:$8 sm:$0xf]  }
  0x67   :  { %1200 = vrot.lane.b32.xlu1 %v1199_v39, %s2384_s29  ;;  %v1493_v39 = vld [vmem:[#allocation2 + $0x100] ss:$8 sm:$0xf]   ;;  %v1547_v54 = vld [vmem:[#allocation2 + $0x161] ss:$8 sm:$0xf0]  }
  0x68   :  { %v1497_v42 = vsel %vm771_vm0, %v1495_v40, %v1493_v39  ;;  %v1558_v59 = vld [vmem:[#allocation2 + $0x1a0] ss:$8 sm:$0xf]   ;;  %v1560_v60 = vld [vmem:[#allocation2 + $0x181] ss:$8 sm:$0xf0]  }
  0x69   :  { %v1571_v61 = vld [vmem:[#allocation2 + $0x1c0] ss:$8 sm:$0xf]   ;;  %v1573_v62 = vld [vmem:[#allocation2 + $0x1a1] ss:$8 sm:$0xf0]  }
  0x6a   :  { %1239 = vrot.lane.b32.xlu0 %v1238_v46, %s2384_s29  ;;  %v1521_v46 = vld [vmem:[#allocation2 + $0x121] ss:$8 sm:$0xf0]   ;;  %v1584_v1 = vld [vmem:[#allocation2 + $0x1e0] ss:$8 sm:$0xf]   ;;  %v1575_v3 = vsel %vm771_vm0, %v1573_v62, %v1571_v61 }
  0x6b   :  { %1226 = vrot.lane.b32.xlu1 %v1225_v45, %s2384_s29  ;;  %v1519_v45 = vld [vmem:[#allocation2 + $0x140] ss:$8 sm:$0xf]   ;;  %v1586_v4 = vld [vmem:[#allocation2 + $0x1c1] ss:$8 sm:$0xf0]  }
  0x6c   :  { %v1523_v50 = vsel %vm771_vm0, %v1521_v46, %v1519_v45 }
  0x6e   :  { %1265 = vrot.lane.b32.xlu0 %v1264_v52, %s2384_s29  ;;  %v1534_v52 = vld [vmem:[#allocation2 + $0x141] ss:$8 sm:$0xf0]  }
  0x6f   :  { %1252 = vrot.lane.b32.xlu1 %v1251_v51, %s2384_s29  ;;  %v1532_v51 = vld [vmem:[#allocation2 + $0x160] ss:$8 sm:$0xf]  }
  0x70   :  { %v1536_v55 = vsel %vm771_vm0, %v1534_v52, %v1532_v51 }
  0x72   :  { %1291 = vrot.lane.b32.xlu0 %v1290_v58, %s2384_s29  ;;  %v1549_v58 = vsel %vm771_vm0, %v1547_v54, %v1545_v53 }
  0x73   :  { %1278 = vrot.lane.b32.xlu1 %v1277_v57, %s2384_s29 }
  0x76   :  { %1317 = vrot.lane.b32.xlu0 %v1316_v0, %s2384_s29 }
  0x77   :  { %1304 = vrot.lane.b32.xlu1 %v1303_v63, %s2384_s29  ;;  %v1562_v63 = vsel %vm771_vm0, %v1560_v60, %v1558_v59 }
  0x7a   :  { %1343 = vrot.lane.b32.xlu0 %v1342_v6, %s2384_s29  ;;  %v1598_v6 = vld [vmem:[#allocation2 - $0x1f] ss:$8 sm:$0xf0]  }
  0x7b   :  { %1330 = vrot.lane.b32.xlu1 %v1329_v5, %s2384_s29  ;;  %v1596_v5 = vld [vmem:[#allocation2] ss:$8 sm:$0xf]  }
  0x7e   :  { %1369 = vrot.lane.b32.xlu0 %v1368_v12, %s2384_s29 }
  0x7f   :  { %1356 = vrot.lane.b32.xlu1 %v1355_v11, %s2384_s29 }
  0x82   :  { %1394 = vrot.lane.b32.xlu0 %v1393_v18, %s2385_s21 }
  0x83   :  { %1382 = vrot.lane.b32.xlu1 %v1381_v17, %s2384_s29 }
  0x86   :  { %1420 = vrot.lane.b32.xlu0 %v1419_v24, %s2385_s21  ;;  %v774_v48 = vpop.permute.xlu0 %773  }
  0x87   :  { %1407 = vrot.lane.b32.xlu1 %v1406_v23, %s2385_s21  ;;  %777 = vst.msk [vmem:[#allocation0 + $0x1] ss:$8 sm:$0xf] %vm323_vm1, %v774_v48   ;;  %779 = vst.msk [vmem:[#allocation0 + $0xe1] ss:$8 sm:$0xf0] %vm323_vm1, %v774_v48  }
  0x88   :  { %v800_v49 = vpop.permute.xlu1 %799  }
  0x89   :  { %803 = vst.msk [vmem:[#allocation0 + $0x41] ss:$8 sm:$0xf] %vm323_vm1, %v800_v49   ;;  %805 = vst.msk [vmem:[#allocation0 + $0x121] ss:$8 sm:$0xf0] %vm323_vm1, %v800_v49  }
  0x8a   :  { %1446 = vrot.lane.b32.xlu0 %v1445_v30, %s2385_s21  ;;  %v787_v56 = vpop.permute.xlu0 %786  }
  0x8b   :  { %1433 = vrot.lane.b32.xlu1 %v1432_v29, %s2385_s21  ;;  %790 = vst.msk [vmem:[#allocation0 + $0x21] ss:$8 sm:$0xf] %vm323_vm1, %v787_v56   ;;  %792 = vst.msk [vmem:[#allocation0 + $0x101] ss:$8 sm:$0xf0] %vm323_vm1, %v787_v56  }
  0x8c   :  { %v813_v57 = vpop.permute.xlu1 %812  }
  0x8d   :  { %816 = vst.msk [vmem:[#allocation0 + $0x61] ss:$8 sm:$0xf] %vm323_vm1, %v813_v57   ;;  %818 = vst.msk [vmem:[#allocation0 + $0x141] ss:$8 sm:$0xf0] %vm323_vm1, %v813_v57  }
  0x8e   :  { %1472 = vrot.lane.b32.xlu0 %v1471_v36, %s2385_s21  ;;  %v826_v0 = vpop.permute.xlu0 %825  }
  0x8f   :  { %1459 = vrot.lane.b32.xlu1 %v1458_v35, %s2385_s21  ;;  %829 = vst.msk [vmem:[#allocation0 + $0x81] ss:$8 sm:$0xf] %vm323_vm1, %v826_v0   ;;  %831 = vst.msk [vmem:[#allocation0 + $0x161] ss:$8 sm:$0xf0] %vm323_vm1, %v826_v0  }
  0x90   :  { %v839_v2 = vpop.permute.xlu1 %838  }
  0x91   :  { %842 = vst.msk [vmem:[#allocation0 + $0xa1] ss:$8 sm:$0xf] %vm323_vm1, %v839_v2   ;;  %844 = vst.msk [vmem:[#allocation0 + $0x181] ss:$8 sm:$0xf0] %vm323_vm1, %v839_v2  }
  0x92   :  { %1498 = vrot.lane.b32.xlu0 %v1497_v42, %s2385_s21 }
  0x93   :  { %1485 = vrot.lane.b32.xlu1 %v1484_v41, %s2385_s21 }
  0x96   :  { %1524 = vrot.lane.b32.xlu0 %v1523_v50, %s2385_s21 }
  0x97   :  { %1511 = vrot.lane.b32.xlu1 %v1510_v47, %s2385_s21 }
  0x9a   :  { %1550 = vrot.lane.b32.xlu0 %v1549_v58, %s2385_s21 }
  0x9b   :  { %1537 = vrot.lane.b32.xlu1 %v1536_v55, %s2385_s21 }
  0x9c   :  { %2 = vsyncpa [#allocation1], 0  ;;  %v1588_v7 = vsel %vm771_vm0, %v1586_v4, %v1584_v1  ;;  %v852_v8 = vpop.permute.xlu0 %851   ;;  %v1600_v9 = vsel %vm771_vm0, %v1598_v6, %v1596_v5  ;;  %v1609_v10 = vld [vmem:[#allocation2 + $0x20] ss:$8 sm:$0xf]   ;;  %v865_v12 = vpop.permute.xlu1 %864   ;;  %s2386_s22 = smov 48  }
  0x9d   :  { %855 = vst.msk [vmem:[#allocation0 + $0xc1] ss:$8 sm:$0xf] %vm323_vm1, %v852_v8   ;;  %857 = vst.msk [vmem:[#allocation0 + $0x1a1] ss:$8 sm:$0xf0] %vm323_vm1, %v852_v8  }
  0x9e   :  { %1576 = vrot.lane.b32.xlu0 %v1575_v3, %s2385_s21  ;;  %v1611_v11 = vld [vmem:[#allocation2 + $0x1] ss:$8 sm:$0xf0]   ;;  %v1622_v13 = vld [vmem:[#allocation2 + $0x40] ss:$8 sm:$0xf]  }
  0x9f   :  { %1563 = vrot.lane.b32.xlu1 %v1562_v63, %s2385_s21  ;;  %v1624_v14 = vld [vmem:[#allocation2 + $0x21] ss:$8 sm:$0xf0]   ;;  %868 = vst.msk [vmem:[#allocation0 + $0xe1] ss:$8 sm:$0xf] %vm323_vm1, %v865_v12   ;;  %v1613_v15 = vsel %vm771_vm0, %v1611_v11, %v1609_v10 }
  0xa0   :  { %870 = vst.msk [vmem:[#allocation0 + $0x1c1] ss:$8 sm:$0xf0] %vm323_vm1, %v865_v12   ;;  %v878_v16 = vpop.permute.xlu0 %877   ;;  %v1626_v17 = vsel %vm771_vm0, %v1624_v14, %v1622_v13  ;;  %v1635_v18 = vld [vmem:[#allocation2 + $0x60] ss:$8 sm:$0xf]  }
  0xa1   :  { %v1637_v19 = vld [vmem:[#allocation2 + $0x41] ss:$8 sm:$0xf0]   ;;  %881 = vst.msk [vmem:[#allocation0 + $0x201] ss:$8 sm:$0xf] %vm323_vm1, %v878_v16  }
  0xa2   :  { %1601 = vrot.lane.b32.xlu0 %v1600_v9, %s2386_s22  ;;  %883 = vst.msk [vmem:[#allocation0 + $0x2e1] ss:$8 sm:$0xf0] %vm323_vm1, %v878_v16   ;;  %v1648_v20 = vld [vmem:[#allocation2 + $0x80] ss:$8 sm:$0xf]   ;;  %v1639_v23 = vsel %vm771_vm0, %v1637_v19, %v1635_v18 }
  0xa3   :  { %1589 = vrot.lane.b32.xlu1 %v1588_v7, %s2385_s21  ;;  %v1650_v21 = vld [vmem:[#allocation2 + $0x61] ss:$8 sm:$0xf0]   ;;  %v891_v22 = vpop.permute.xlu1 %890   ;;  %v1661_v26 = vld [vmem:[#allocation2 + $0xa0] ss:$8 sm:$0xf]  }
  0xa4   :  { %894 = vst.msk [vmem:[#allocation0 + $0x221] ss:$8 sm:$0xf] %vm323_vm1, %v891_v22   ;;  %896 = vst.msk [vmem:[#allocation0 + $0x301] ss:$8 sm:$0xf0] %vm323_vm1, %v891_v22   ;;  %v1652_v25 = vsel %vm771_vm0, %v1650_v21, %v1648_v20 }
  0xa5   :  { %v904_v24 = vpop.permute.xlu0 %903   ;;  %v1663_v27 = vld [vmem:[#allocation2 + $0x81] ss:$8 sm:$0xf0]   ;;  %v1674_v28 = vld [vmem:[#allocation2 + $0xc0] ss:$8 sm:$0xf]  }
  0xa6   :  { %1627 = vrot.lane.b32.xlu0 %v1626_v17, %s2386_s22  ;;  %907 = vst.msk [vmem:[#allocation0 + $0x241] ss:$8 sm:$0xf] %vm323_vm1, %v904_v24   ;;  %909 = vst.msk [vmem:[#allocation0 + $0x321] ss:$8 sm:$0xf0] %vm323_vm1, %v904_v24   ;;  %v1665_v31 = vsel %vm771_vm0, %v1663_v27, %v1661_v26 }
  0xa7   :  { %1614 = vrot.lane.b32.xlu1 %v1613_v15, %s2386_s22  ;;  %v1676_v29 = vld [vmem:[#allocation2 + $0xa1] ss:$8 sm:$0xf0]   ;;  %v1687_v34 = vld [vmem:[#allocation2 + $0xe0] ss:$8 sm:$0xf]  }
  0xa8   :  { %v1678_v33 = vsel %vm771_vm0, %v1676_v29, %v1674_v28  ;;  %v1689_v35 = vld [vmem:[#allocation2 + $0xc1] ss:$8 sm:$0xf0]   ;;  %v1700_v36 = vld [vmem:[#allocation2 + $0x100] ss:$8 sm:$0xf]  }
  0xa9   :  { %v917_v30 = vpop.permute.xlu1 %916   ;;  %v1702_v37 = vld [vmem:[#allocation2 + $0xe1] ss:$8 sm:$0xf0]   ;;  %v1691_v39 = vsel %vm771_vm0, %v1689_v35, %v1687_v34  ;;  %v1713_v41 = vld [vmem:[#allocation2 + $0x120] ss:$8 sm:$0xf]  }
  0xaa   :  { %920 = vst.msk [vmem:[#allocation0 + $0x261] ss:$8 sm:$0xf] %vm323_vm1, %v917_v30   ;;  %922 = vst.msk [vmem:[#allocation0 + $0x341] ss:$8 sm:$0xf0] %vm323_vm1, %v917_v30   ;;  %1653 = vrot.lane.b32.xlu0 %v1652_v25, %s2386_s22  ;;  %v1704_v40 = vsel %vm771_vm0, %v1702_v37, %v1700_v36 }
  0xab   :  { %1640 = vrot.lane.b32.xlu1 %v1639_v23, %s2386_s22  ;;  %v930_v32 = vpop.permute.xlu0 %929   ;;  %v1715_v42 = vld [vmem:[#allocation2 + $0x101] ss:$8 sm:$0xf0]   ;;  %v1726_v44 = vld [vmem:[#allocation2 + $0x140] ss:$8 sm:$0xf]  }
  0xac   :  { %933 = vst.msk [vmem:[#allocation0 + $0x281] ss:$8 sm:$0xf] %vm323_vm1, %v930_v32   ;;  %935 = vst.msk [vmem:[#allocation0 + $0x361] ss:$8 sm:$0xf0] %vm323_vm1, %v930_v32   ;;  %v1717_v46 = vsel %vm771_vm0, %v1715_v42, %v1713_v41 }
  0xad   :  { %v943_v38 = vpop.permute.xlu1 %942   ;;  %v1728_v45 = vld [vmem:[#allocation2 + $0x121] ss:$8 sm:$0xf0]   ;;  %v1739_v49 = vld [vmem:[#allocation2 + $0x160] ss:$8 sm:$0xf]  }
  0xae   :  { %946 = vst.msk [vmem:[#allocation0 + $0x2a1] ss:$8 sm:$0xf] %vm323_vm1, %v943_v38   ;;  %948 = vst.msk [vmem:[#allocation0 + $0x381] ss:$8 sm:$0xf0] %vm323_vm1, %v943_v38   ;;  %1679 = vrot.lane.b32.xlu0 %v1678_v33, %s2386_s22  ;;  %v1730_v48 = vsel %vm771_vm0, %v1728_v45, %v1726_v44 }
  0xaf   :  { %1666 = vrot.lane.b32.xlu1 %v1665_v31, %s2386_s22  ;;  %v1741_v50 = vld [vmem:[#allocation2 + $0x141] ss:$8 sm:$0xf0]   ;;  %v1752_v52 = vld [vmem:[#allocation2 + $0x180] ss:$8 sm:$0xf]  }
  0xb0   :  { %v956_v43 = vpop.permute.xlu0 %955   ;;  %v1754_v53 = vld [vmem:[#allocation2 + $0x161] ss:$8 sm:$0xf0]   ;;  %v1743_v54 = vsel %vm771_vm0, %v1741_v50, %v1739_v49  ;;  %v1765_v57 = vld [vmem:[#allocation2 + $0x1a0] ss:$8 sm:$0xf]  }
  0xb1   :  { %959 = vst.msk [vmem:[#allocation0 + $0x2c1] ss:$8 sm:$0xf] %vm323_vm1, %v956_v43   ;;  %961 = vst.msk [vmem:[#allocation0 + $0x3a1] ss:$8 sm:$0xf0] %vm323_vm1, %v956_v43   ;;  %v1756_v56 = vsel %vm771_vm0, %v1754_v53, %v1752_v52 }
  0xb2   :  { %1705 = vrot.lane.b32.xlu0 %v1704_v40, %s2386_s22  ;;  %v1767_v58 = vld [vmem:[#allocation2 + $0x181] ss:$8 sm:$0xf0]   ;;  %v1778_v60 = vld [vmem:[#allocation2 + $0x1c0] ss:$8 sm:$0xf]  }
  0xb3   :  { %1692 = vrot.lane.b32.xlu1 %v1691_v39, %s2386_s22  ;;  %v1780_v61 = vld [vmem:[#allocation2 + $0x1a1] ss:$8 sm:$0xf0]   ;;  %v1769_v62 = vsel %vm771_vm0, %v1767_v58, %v1765_v57  ;;  %v1791_v1 = vld [vmem:[#allocation2 + $0x1e0] ss:$8 sm:$0xf]  }
  0xb4   :  { %v981_v51 = vpop.permute.xlu0 %980   ;;  %v1782_v0 = vsel %vm771_vm0, %v1780_v61, %v1778_v60  ;;  %v1793_v2 = vld [vmem:[#allocation2 + $0x1c1] ss:$8 sm:$0xf0]   ;;  %v1803_v4 = vld [vmem:[#allocation2] ss:$8 sm:$0xf]  }
  0xb5   :  { %v969_v47 = vpop.permute.xlu1 %968   ;;  %984 = vst.msk [vmem:[#allocation0 + $0x2] ss:$8 sm:$0xf] %vm323_vm1, %v981_v51   ;;  %986 = vst.msk [vmem:[#allocation0 + $0xe2] ss:$8 sm:$0xf0] %vm323_vm1, %v981_v51   ;;  %v1795_v6 = vsel %vm771_vm0, %v1793_v2, %v1791_v1 }
  0xb6   :  { %972 = vst.msk [vmem:[#allocation0 + $0x2e1] ss:$8 sm:$0xf] %vm323_vm1, %v969_v47   ;;  %974 = vst.msk [vmem:[#allocation0 + $0x3c1] ss:$8 sm:$0xf0] %vm323_vm1, %v969_v47   ;;  %1731 = vrot.lane.b32.xlu0 %v1730_v48, %s2386_s22 }
  0xb7   :  { %1718 = vrot.lane.b32.xlu1 %v1717_v46, %s2386_s22  ;;  %v1805_v5 = vld [vmem:[#allocation2 - $0x1f] ss:$8 sm:$0xf0]   ;;  %v1816_v9 = vld [vmem:[#allocation2 + $0x20] ss:$8 sm:$0xf]  }
  0xb8   :  { %v1007_v59 = vpop.permute.xlu0 %1006   ;;  %v1807_v8 = vsel %vm771_vm0, %v1805_v5, %v1803_v4  ;;  %v1818_v10 = vld [vmem:[#allocation2 + $0x1] ss:$8 sm:$0xf0]   ;;  %v1829_v12 = vld [vmem:[#allocation2 + $0x40] ss:$8 sm:$0xf]  }
  0xb9   :  { %v994_v55 = vpop.permute.xlu1 %993   ;;  %1010 = vst.msk [vmem:[#allocation0 + $0x42] ss:$8 sm:$0xf] %vm323_vm1, %v1007_v59   ;;  %1012 = vst.msk [vmem:[#allocation0 + $0x122] ss:$8 sm:$0xf0] %vm323_vm1, %v1007_v59   ;;  %v1820_v14 = vsel %vm771_vm0, %v1818_v10, %v1816_v9 }
  0xba   :  { %997 = vst.msk [vmem:[#allocation0 + $0x22] ss:$8 sm:$0xf] %vm323_vm1, %v994_v55   ;;  %999 = vst.msk [vmem:[#allocation0 + $0x102] ss:$8 sm:$0xf0] %vm323_vm1, %v994_v55   ;;  %1757 = vrot.lane.b32.xlu0 %v1756_v56, %s2386_s22 }
  0xbb   :  { %1744 = vrot.lane.b32.xlu1 %v1743_v54, %s2386_s22  ;;  %v1831_v13 = vld [vmem:[#allocation2 + $0x21] ss:$8 sm:$0xf0]   ;;  %s2387_s23 = smov 32   ;;  %s2388_s24 = smov 16  }
  0xbc   :  { %v1033_v3 = vpop.permute.xlu0 %1032   ;;  %v1833_v16 = vsel %vm771_vm0, %v1831_v13, %v1829_v12  ;;  %v1842_v17 = vld [vmem:[#allocation2 + $0x60] ss:$8 sm:$0xf]   ;;  %v1844_v18 = vld [vmem:[#allocation2 + $0x41] ss:$8 sm:$0xf0]  }
  0xbd   :  { %v1020_v63 = vpop.permute.xlu1 %1019   ;;  %1036 = vst.msk [vmem:[#allocation0 + $0x82] ss:$8 sm:$0xf] %vm323_vm1, %v1033_v3   ;;  %1038 = vst.msk [vmem:[#allocation0 + $0x162] ss:$8 sm:$0xf0] %vm323_vm1, %v1033_v3   ;;  %v1846_v22 = vsel %vm771_vm0, %v1844_v18, %v1842_v17 }
  0xbe   :  { %1023 = vst.msk [vmem:[#allocation0 + $0x62] ss:$8 sm:$0xf] %vm323_vm1, %v1020_v63   ;;  %1025 = vst.msk [vmem:[#allocation0 + $0x142] ss:$8 sm:$0xf0] %vm323_vm1, %v1020_v63   ;;  %1783 = vrot.lane.b32.xlu0 %v1782_v0, %s2386_s22 }
  0xbf   :  { %1770 = vrot.lane.b32.xlu1 %v1769_v62, %s2386_s22  ;;  %v1855_v20 = vld [vmem:[#allocation2 + $0x80] ss:$8 sm:$0xf]   ;;  %v1857_v21 = vld [vmem:[#allocation2 + $0x61] ss:$8 sm:$0xf0]  }
  0xc0   :  { %v1059_v11 = vpop.permute.xlu0 %1058   ;;  %v1859_v24 = vsel %vm771_vm0, %v1857_v21, %v1855_v20  ;;  %v1868_v25 = vld [vmem:[#allocation2 + $0xa0] ss:$8 sm:$0xf]   ;;  %v1870_v26 = vld [vmem:[#allocation2 + $0x81] ss:$8 sm:$0xf0]  }
  0xc1   :  { %v1046_v7 = vpop.permute.xlu1 %1045   ;;  %1062 = vst.msk [vmem:[#allocation0 + $0xc2] ss:$8 sm:$0xf] %vm323_vm1, %v1059_v11   ;;  %1064 = vst.msk [vmem:[#allocation0 + $0x1a2] ss:$8 sm:$0xf0] %vm323_vm1, %v1059_v11   ;;  %v1872_v30 = vsel %vm771_vm0, %v1870_v26, %v1868_v25 }
  0xc2   :  { %1049 = vst.msk [vmem:[#allocation0 + $0xa2] ss:$8 sm:$0xf] %vm323_vm1, %v1046_v7   ;;  %1051 = vst.msk [vmem:[#allocation0 + $0x182] ss:$8 sm:$0xf0] %vm323_vm1, %v1046_v7   ;;  %1808 = vrot.lane.b32.xlu0 %v1807_v8, %s2387_s23 }
  0xc3   :  { %1796 = vrot.lane.b32.xlu1 %v1795_v6, %s2386_s22  ;;  %v1881_v28 = vld [vmem:[#allocation2 + $0xc0] ss:$8 sm:$0xf]   ;;  %v1883_v29 = vld [vmem:[#allocation2 + $0xa1] ss:$8 sm:$0xf0]  }
  0xc4   :  { %v1085_v19 = vpop.permute.xlu0 %1084   ;;  %v1885_v32 = vsel %vm771_vm0, %v1883_v29, %v1881_v28  ;;  %v1894_v33 = vld [vmem:[#allocation2 + $0xe0] ss:$8 sm:$0xf]   ;;  %v1896_v34 = vld [vmem:[#allocation2 + $0xc1] ss:$8 sm:$0xf0]  }
  0xc5   :  { %v1072_v15 = vpop.permute.xlu1 %1071   ;;  %1088 = vst.msk [vmem:[#allocation0 + $0x202] ss:$8 sm:$0xf] %vm323_vm1, %v1085_v19   ;;  %1090 = vst.msk [vmem:[#allocation0 + $0x2e2] ss:$8 sm:$0xf0] %vm323_vm1, %v1085_v19   ;;  %v1898_v38 = vsel %vm771_vm0, %v1896_v34, %v1894_v33 }
  0xc6   :  { %1075 = vst.msk [vmem:[#allocation0 + $0xe2] ss:$8 sm:$0xf] %vm323_vm1, %v1072_v15   ;;  %1077 = vst.msk [vmem:[#allocation0 + $0x1c2] ss:$8 sm:$0xf0] %vm323_vm1, %v1072_v15   ;;  %1834 = vrot.lane.b32.xlu0 %v1833_v16, %s2387_s23 }
  0xc7   :  { %1821 = vrot.lane.b32.xlu1 %v1820_v14, %s2387_s23  ;;  %v1907_v36 = vld [vmem:[#allocation2 + $0x100] ss:$8 sm:$0xf]   ;;  %v1909_v37 = vld [vmem:[#allocation2 + $0xe1] ss:$8 sm:$0xf0]  }
  0xc8   :  { %v1111_v27 = vpop.permute.xlu0 %1110   ;;  %v1911_v40 = vsel %vm771_vm0, %v1909_v37, %v1907_v36  ;;  %v1920_v41 = vld [vmem:[#allocation2 + $0x120] ss:$8 sm:$0xf]   ;;  %v1922_v42 = vld [vmem:[#allocation2 + $0x101] ss:$8 sm:$0xf0]  }
  0xc9   :  { %v1098_v23 = vpop.permute.xlu1 %1097   ;;  %1114 = vst.msk [vmem:[#allocation0 + $0x242] ss:$8 sm:$0xf] %vm323_vm1, %v1111_v27   ;;  %1116 = vst.msk [vmem:[#allocation0 + $0x322] ss:$8 sm:$0xf0] %vm323_vm1, %v1111_v27   ;;  %v1924_v46 = vsel %vm771_vm0, %v1922_v42, %v1920_v41 }
  0xca   :  { %1101 = vst.msk [vmem:[#allocation0 + $0x222] ss:$8 sm:$0xf] %vm323_vm1, %v1098_v23   ;;  %1103 = vst.msk [vmem:[#allocation0 + $0x302] ss:$8 sm:$0xf0] %vm323_vm1, %v1098_v23   ;;  %1860 = vrot.lane.b32.xlu0 %v1859_v24, %s2387_s23 }
  0xcb   :  { %1847 = vrot.lane.b32.xlu1 %v1846_v22, %s2387_s23  ;;  %v1933_v44 = vld [vmem:[#allocation2 + $0x140] ss:$8 sm:$0xf]   ;;  %v1935_v45 = vld [vmem:[#allocation2 + $0x121] ss:$8 sm:$0xf0]  }
  0xcc   :  { %v1137_v35 = vpop.permute.xlu0 %1136   ;;  %v1937_v48 = vsel %vm771_vm0, %v1935_v45, %v1933_v44  ;;  %v1946_v49 = vld [vmem:[#allocation2 + $0x160] ss:$8 sm:$0xf]   ;;  %v1948_v50 = vld [vmem:[#allocation2 + $0x141] ss:$8 sm:$0xf0]  }
  0xcd   :  { %v1124_v31 = vpop.permute.xlu1 %1123   ;;  %1140 = vst.msk [vmem:[#allocation0 + $0x282] ss:$8 sm:$0xf] %vm323_vm1, %v1137_v35   ;;  %1142 = vst.msk [vmem:[#allocation0 + $0x362] ss:$8 sm:$0xf0] %vm323_vm1, %v1137_v35   ;;  %v1950_v54 = vsel %vm771_vm0, %v1948_v50, %v1946_v49 }
  0xce   :  { %1127 = vst.msk [vmem:[#allocation0 + $0x262] ss:$8 sm:$0xf] %vm323_vm1, %v1124_v31   ;;  %1129 = vst.msk [vmem:[#allocation0 + $0x342] ss:$8 sm:$0xf0] %vm323_vm1, %v1124_v31   ;;  %1886 = vrot.lane.b32.xlu0 %v1885_v32, %s2387_s23 }
  0xcf   :  { %1873 = vrot.lane.b32.xlu1 %v1872_v30, %s2387_s23  ;;  %v1959_v52 = vld [vmem:[#allocation2 + $0x180] ss:$8 sm:$0xf]   ;;  %v1961_v53 = vld [vmem:[#allocation2 + $0x161] ss:$8 sm:$0xf0]  }
  0xd0   :  { %v1163_v43 = vpop.permute.xlu0 %1162   ;;  %v1963_v56 = vsel %vm771_vm0, %v1961_v53, %v1959_v52  ;;  %v1972_v57 = vld [vmem:[#allocation2 + $0x1a0] ss:$8 sm:$0xf]   ;;  %v1974_v58 = vld [vmem:[#allocation2 + $0x181] ss:$8 sm:$0xf0]  }
  0xd1   :  { %v1150_v39 = vpop.permute.xlu1 %1149   ;;  %1166 = vst.msk [vmem:[#allocation0 + $0x2c2] ss:$8 sm:$0xf] %vm323_vm1, %v1163_v43   ;;  %1168 = vst.msk [vmem:[#allocation0 + $0x3a2] ss:$8 sm:$0xf0] %vm323_vm1, %v1163_v43   ;;  %v1976_v62 = vsel %vm771_vm0, %v1974_v58, %v1972_v57 }
  0xd2   :  { %1153 = vst.msk [vmem:[#allocation0 + $0x2a2] ss:$8 sm:$0xf] %vm323_vm1, %v1150_v39   ;;  %1155 = vst.msk [vmem:[#allocation0 + $0x382] ss:$8 sm:$0xf0] %vm323_vm1, %v1150_v39   ;;  %1912 = vrot.lane.b32.xlu0 %v1911_v40, %s2387_s23 }
  0xd3   :  { %1899 = vrot.lane.b32.xlu1 %v1898_v38, %s2387_s23  ;;  %v1985_v60 = vld [vmem:[#allocation2 + $0x1c0] ss:$8 sm:$0xf]   ;;  %v1987_v61 = vld [vmem:[#allocation2 + $0x1a1] ss:$8 sm:$0xf0]  }
  0xd4   :  { %v1188_v51 = vpop.permute.xlu0 %1187   ;;  %v1989_v0 = vsel %vm771_vm0, %v1987_v61, %v1985_v60  ;;  %v1998_v1 = vld [vmem:[#allocation2 + $0x1e0] ss:$8 sm:$0xf]   ;;  %v2000_v2 = vld [vmem:[#allocation2 + $0x1c1] ss:$8 sm:$0xf0]  }
  0xd5   :  { %v1176_v47 = vpop.permute.xlu1 %1175   ;;  %1191 = vst.msk [vmem:[#allocation0 + $0x3] ss:$8 sm:$0xf] %vm323_vm1, %v1188_v51   ;;  %1193 = vst.msk [vmem:[#allocation0 + $0xe3] ss:$8 sm:$0xf0] %vm323_vm1, %v1188_v51   ;;  %v2002_v6 = vsel %vm771_vm0, %v2000_v2, %v1998_v1 }
  0xd6   :  { %1179 = vst.msk [vmem:[#allocation0 + $0x2e2] ss:$8 sm:$0xf] %vm323_vm1, %v1176_v47   ;;  %1181 = vst.msk [vmem:[#allocation0 + $0x3c2] ss:$8 sm:$0xf0] %vm323_vm1, %v1176_v47   ;;  %1938 = vrot.lane.b32.xlu0 %v1937_v48, %s2387_s23 }
  0xd7   :  { %1925 = vrot.lane.b32.xlu1 %v1924_v46, %s2387_s23  ;;  %v2010_v4 = vld [vmem:[#allocation2] ss:$8 sm:$0xf]   ;;  %v2012_v5 = vld [vmem:[#allocation2 - $0x1f] ss:$8 sm:$0xf0]  }
  0xd8   :  { %v1214_v59 = vpop.permute.xlu0 %1213   ;;  %v2014_v8 = vsel %vm771_vm0, %v2012_v5, %v2010_v4  ;;  %v2023_v9 = vld [vmem:[#allocation2 + $0x20] ss:$8 sm:$0xf]   ;;  %v2025_v10 = vld [vmem:[#allocation2 + $0x1] ss:$8 sm:$0xf0]  }
  0xd9   :  { %v1201_v55 = vpop.permute.xlu1 %1200   ;;  %1217 = vst.msk [vmem:[#allocation0 + $0x43] ss:$8 sm:$0xf] %vm323_vm1, %v1214_v59   ;;  %1219 = vst.msk [vmem:[#allocation0 + $0x123] ss:$8 sm:$0xf0] %vm323_vm1, %v1214_v59   ;;  %v2027_v14 = vsel %vm771_vm0, %v2025_v10, %v2023_v9 }
  0xda   :  { %1204 = vst.msk [vmem:[#allocation0 + $0x23] ss:$8 sm:$0xf] %vm323_vm1, %v1201_v55   ;;  %1206 = vst.msk [vmem:[#allocation0 + $0x103] ss:$8 sm:$0xf0] %vm323_vm1, %v1201_v55   ;;  %1964 = vrot.lane.b32.xlu0 %v1963_v56, %s2387_s23 }
  0xdb   :  { %1951 = vrot.lane.b32.xlu1 %v1950_v54, %s2387_s23  ;;  %v2036_v12 = vld [vmem:[#allocation2 + $0x40] ss:$8 sm:$0xf]   ;;  %v2038_v13 = vld [vmem:[#allocation2 + $0x21] ss:$8 sm:$0xf0]  }
  0xdc   :  { %v1240_v3 = vpop.permute.xlu0 %1239   ;;  %v2040_v16 = vsel %vm771_vm0, %v2038_v13, %v2036_v12  ;;  %v2049_v17 = vld [vmem:[#allocation2 + $0x60] ss:$8 sm:$0xf]   ;;  %v2051_v18 = vld [vmem:[#allocation2 + $0x41] ss:$8 sm:$0xf0]  }
  0xdd   :  { %v1227_v63 = vpop.permute.xlu1 %1226   ;;  %1243 = vst.msk [vmem:[#allocation0 + $0x83] ss:$8 sm:$0xf] %vm323_vm1, %v1240_v3   ;;  %1245 = vst.msk [vmem:[#allocation0 + $0x163] ss:$8 sm:$0xf0] %vm323_vm1, %v1240_v3   ;;  %v2053_v22 = vsel %vm771_vm0, %v2051_v18, %v2049_v17 }
  0xde   :  { %1230 = vst.msk [vmem:[#allocation0 + $0x63] ss:$8 sm:$0xf] %vm323_vm1, %v1227_v63   ;;  %1232 = vst.msk [vmem:[#allocation0 + $0x143] ss:$8 sm:$0xf0] %vm323_vm1, %v1227_v63   ;;  %1990 = vrot.lane.b32.xlu0 %v1989_v0, %s2387_s23 }
  0xdf   :  { %1977 = vrot.lane.b32.xlu1 %v1976_v62, %s2387_s23  ;;  %v2062_v20 = vld [vmem:[#allocation2 + $0x80] ss:$8 sm:$0xf]   ;;  %v2064_v21 = vld [vmem:[#allocation2 + $0x61] ss:$8 sm:$0xf0]  }
  0xe0   :  { %v1266_v11 = vpop.permute.xlu0 %1265   ;;  %v2066_v24 = vsel %vm771_vm0, %v2064_v21, %v2062_v20  ;;  %v2075_v25 = vld [vmem:[#allocation2 + $0xa0] ss:$8 sm:$0xf]   ;;  %v2077_v26 = vld [vmem:[#allocation2 + $0x81] ss:$8 sm:$0xf0]  }
  0xe1   :  { %v1253_v7 = vpop.permute.xlu1 %1252   ;;  %1269 = vst.msk [vmem:[#allocation0 + $0xc3] ss:$8 sm:$0xf] %vm323_vm1, %v1266_v11   ;;  %1271 = vst.msk [vmem:[#allocation0 + $0x1a3] ss:$8 sm:$0xf0] %vm323_vm1, %v1266_v11   ;;  %v2079_v30 = vsel %vm771_vm0, %v2077_v26, %v2075_v25 }
  0xe2   :  { %1256 = vst.msk [vmem:[#allocation0 + $0xa3] ss:$8 sm:$0xf] %vm323_vm1, %v1253_v7   ;;  %1258 = vst.msk [vmem:[#allocation0 + $0x183] ss:$8 sm:$0xf0] %vm323_vm1, %v1253_v7   ;;  %2015 = vrot.lane.b32.xlu0 %v2014_v8, %s2388_s24 }
  0xe3   :  { %2003 = vrot.lane.b32.xlu1 %v2002_v6, %s2387_s23  ;;  %v2088_v28 = vld [vmem:[#allocation2 + $0xc0] ss:$8 sm:$0xf]   ;;  %v2090_v29 = vld [vmem:[#allocation2 + $0xa1] ss:$8 sm:$0xf0]  }
  0xe4   :  { %v1292_v19 = vpop.permute.xlu0 %1291   ;;  %v2092_v32 = vsel %vm771_vm0, %v2090_v29, %v2088_v28  ;;  %v2101_v33 = vld [vmem:[#allocation2 + $0xe0] ss:$8 sm:$0xf]   ;;  %v2103_v34 = vld [vmem:[#allocation2 + $0xc1] ss:$8 sm:$0xf0]  }
  0xe5   :  { %v1279_v15 = vpop.permute.xlu1 %1278   ;;  %1295 = vst.msk [vmem:[#allocation0 + $0x203] ss:$8 sm:$0xf] %vm323_vm1, %v1292_v19   ;;  %1297 = vst.msk [vmem:[#allocation0 + $0x2e3] ss:$8 sm:$0xf0] %vm323_vm1, %v1292_v19   ;;  %v2105_v38 = vsel %vm771_vm0, %v2103_v34, %v2101_v33 }
  0xe6   :  { %1282 = vst.msk [vmem:[#allocation0 + $0xe3] ss:$8 sm:$0xf] %vm323_vm1, %v1279_v15   ;;  %1284 = vst.msk [vmem:[#allocation0 + $0x1c3] ss:$8 sm:$0xf0] %vm323_vm1, %v1279_v15   ;;  %2041 = vrot.lane.b32.xlu0 %v2040_v16, %s2388_s24 }
  0xe7   :  { %2028 = vrot.lane.b32.xlu1 %v2027_v14, %s2388_s24  ;;  %v2114_v36 = vld [vmem:[#allocation2 + $0x100] ss:$8 sm:$0xf]   ;;  %v2116_v37 = vld [vmem:[#allocation2 + $0xe1] ss:$8 sm:$0xf0]  }
  0xe8   :  { %v1318_v27 = vpop.permute.xlu0 %1317   ;;  %v2118_v40 = vsel %vm771_vm0, %v2116_v37, %v2114_v36  ;;  %v2127_v41 = vld [vmem:[#allocation2 + $0x120] ss:$8 sm:$0xf]   ;;  %v2129_v42 = vld [vmem:[#allocation2 + $0x101] ss:$8 sm:$0xf0]  }
  0xe9   :  { %v1305_v23 = vpop.permute.xlu1 %1304   ;;  %1321 = vst.msk [vmem:[#allocation0 + $0x243] ss:$8 sm:$0xf] %vm323_vm1, %v1318_v27   ;;  %1323 = vst.msk [vmem:[#allocation0 + $0x323] ss:$8 sm:$0xf0] %vm323_vm1, %v1318_v27   ;;  %v2131_v48 = vsel %vm771_vm0, %v2129_v42, %v2127_v41 }
  0xea   :  { %1308 = vst.msk [vmem:[#allocation0 + $0x223] ss:$8 sm:$0xf] %vm323_vm1, %v1305_v23   ;;  %1310 = vst.msk [vmem:[#allocation0 + $0x303] ss:$8 sm:$0xf0] %vm323_vm1, %v1305_v23   ;;  %2067 = vrot.lane.b32.xlu0 %v2066_v24, %s2388_s24 }
  0xeb   :  { %2054 = vrot.lane.b32.xlu1 %v2053_v22, %s2388_s24  ;;  %v2140_v44 = vld [vmem:[#allocation2 + $0x140] ss:$8 sm:$0xf]   ;;  %v2142_v45 = vld [vmem:[#allocation2 + $0x121] ss:$8 sm:$0xf0]  }
  0xec   :  { %v1344_v35 = vpop.permute.xlu0 %1343   ;;  %v2153_v46 = vld [vmem:[#allocation2 + $0x160] ss:$8 sm:$0xf]   ;;  %v2155_v47 = vld [vmem:[#allocation2 + $0x141] ss:$8 sm:$0xf0]   ;;  %v2144_v52 = vsel %vm771_vm0, %v2142_v45, %v2140_v44 }
  0xed   :  { %v1331_v31 = vpop.permute.xlu1 %1330   ;;  %1347 = vst.msk [vmem:[#allocation0 + $0x283] ss:$8 sm:$0xf] %vm323_vm1, %v1344_v35   ;;  %1349 = vst.msk [vmem:[#allocation0 + $0x363] ss:$8 sm:$0xf0] %vm323_vm1, %v1344_v35   ;;  %v2157_v1 = vsel %vm771_vm0, %v2155_v47, %v2153_v46 }
  0xee   :  { %1334 = vst.msk [vmem:[#allocation0 + $0x263] ss:$8 sm:$0xf] %vm323_vm1, %v1331_v31   ;;  %1336 = vst.msk [vmem:[#allocation0 + $0x343] ss:$8 sm:$0xf0] %vm323_vm1, %v1331_v31   ;;  %2093 = vrot.lane.b32.xlu0 %v2092_v32, %s2388_s24 }
  0xef   :  { %2080 = vrot.lane.b32.xlu1 %v2079_v30, %s2388_s24  ;;  %v2166_v49 = vld [vmem:[#allocation2 + $0x180] ss:$8 sm:$0xf]   ;;  %v2168_v50 = vld [vmem:[#allocation2 + $0x161] ss:$8 sm:$0xf0]  }
  0xf0   :  { %v1370_v43 = vpop.permute.xlu0 %1369   ;;  %v322_v53 = vld [vmem:[#allocation2] sm:$0x3]   ;;  %v328_v54 = vld [vmem:[#allocation2 + $0x8] sm:$0x3]   ;;  %v335_v55 = vld [vmem:[#allocation2 + $0x10] sm:$0x3]   ;;  %v2170_v8 = vsel %vm771_vm0, %v2168_v50, %v2166_v49 }
  0xf1   :  { %v1357_v39 = vpop.permute.xlu1 %1356   ;;  %1373 = vst.msk [vmem:[#allocation0 + $0x2c3] ss:$8 sm:$0xf] %vm323_vm1, %v1370_v43   ;;  %1375 = vst.msk [vmem:[#allocation0 + $0x3a3] ss:$8 sm:$0xf0] %vm323_vm1, %v1370_v43  }
  0xf2   :  { %1360 = vst.msk [vmem:[#allocation0 + $0x2a3] ss:$8 sm:$0xf] %vm323_vm1, %v1357_v39   ;;  %1362 = vst.msk [vmem:[#allocation0 + $0x383] ss:$8 sm:$0xf0] %vm323_vm1, %v1357_v39   ;;  %2119 = vrot.lane.b32.xlu0 %v2118_v40, %s2388_s24 }
  0xf3   :  { %2106 = vrot.lane.b32.xlu1 %v2105_v38, %s2388_s24  ;;  %324 = vst.msk [vmem:[#allocation0] sm:$0x1] %vm323_vm1, %v322_v53   ;;  %326 = vst.msk [vmem:[#allocation0 + $0xff] sm:$0x2] %vm323_vm1, %v322_v53   ;;  %v342_v57 = vld [vmem:[#allocation2 + $0x18] sm:$0x3]  }
  0xf4   :  { %v1395_v56 = vpop.permute.xlu0 %1394   ;;  %331 = vst.msk [vmem:[#allocation0 + $0x8] sm:$0x1] %vm323_vm1, %v328_v54   ;;  %333 = vst.msk [vmem:[#allocation0 + $0x107] sm:$0x2] %vm323_vm1, %v328_v54   ;;  %v349_v58 = vld [vmem:[#allocation2 + $0x20] sm:$0x3]  }
  0xf5   :  { %v1383_v51 = vpop.permute.xlu1 %1382   ;;  %338 = vst.msk [vmem:[#allocation0 + $0x10] sm:$0x1] %vm323_vm1, %v335_v55   ;;  %340 = vst.msk [vmem:[#allocation0 + $0x10f] sm:$0x2] %vm323_vm1, %v335_v55   ;;  %v356_v59 = vld [vmem:[#allocation2 + $0x28] sm:$0x3]  }
  0xf6   :  { %1386 = vst.msk [vmem:[#allocation0 + $0x2e3] ss:$8 sm:$0xf] %vm323_vm1, %v1383_v51   ;;  %1388 = vst.msk [vmem:[#allocation0 + $0x3c3] ss:$8 sm:$0xf0] %vm323_vm1, %v1383_v51   ;;  %2145 = vrot.lane.b32.xlu0 %v2144_v52, %s2388_s24 }
  0xf7   :  { %2132 = vrot.lane.b32.xlu1 %v2131_v48, %s2388_s24  ;;  %1398 = vst.msk [vmem:[#allocation0 + $0x4] ss:$8 sm:$0xf] %vm323_vm1, %v1395_v56   ;;  %1400 = vst.msk [vmem:[#allocation0 + $0xe4] ss:$8 sm:$0xf0] %vm323_vm1, %v1395_v56  }
  0xf8   :  { %v2909_v60 = vld [vmem:[#allocation2 + $0x1a0] ss:$8 sm:$0xf]   ;;  %v2181_v61 = vld [vmem:[#allocation2 + $0x181] ss:$8 sm:$0xf0]   ;;  %v1421_v12 = vpop.permute.xlu0 %1420  }
  0xf9   :  { %345 = vst.msk [vmem:[#allocation0 + $0x18] sm:$0x1] %vm323_vm1, %v342_v57   ;;  %347 = vst.msk [vmem:[#allocation0 + $0x117] sm:$0x2] %vm323_vm1, %v342_v57   ;;  %v363_v62 = vld [vmem:[#allocation2 + $0x30] sm:$0x3]   ;;  %v1408_v7 = vpop.permute.xlu1 %1407   ;;  %v2183_v21 = vsel %vm771_vm0, %v2181_v61, %v2909_v60 }
  0xfa   :  { %352 = vst.msk [vmem:[#allocation0 + $0x20] sm:$0x1] %vm323_vm1, %v349_v58   ;;  %354 = vst.msk [vmem:[#allocation0 + $0x11f] sm:$0x2] %vm323_vm1, %v349_v58   ;;  %v370_v63 = vld [vmem:[#allocation2 + $0x38] sm:$0x3]   ;;  %2171 = vrot.lane.b32.xlu0 %v2170_v8, %s2388_s24 }
  0xfb   :  { %359 = vst.msk [vmem:[#allocation0 + $0x28] sm:$0x1] %vm323_vm1, %v356_v59   ;;  %361 = vst.msk [vmem:[#allocation0 + $0x127] sm:$0x2] %vm323_vm1, %v356_v59   ;;  %v377_v0 = vld [vmem:[#allocation2 + $0x40] sm:$0x3]   ;;  %2158 = vrot.lane.b32.xlu1 %v2157_v1, %s2388_s24 }
  0xfc   :  { %v2192_v2 = vld [vmem:[#allocation2 + $0x1c0] ss:$8 sm:$0xf]   ;;  %v2194_v3 = vld [vmem:[#allocation2 + $0x1a1] ss:$8 sm:$0xf0]   ;;  %v1447_v30 = vpop.permute.xlu0 %1446  }
  0xfd   :  { %366 = vst.msk [vmem:[#allocation0 + $0x30] sm:$0x1] %vm323_vm1, %v363_v62   ;;  %368 = vst.msk [vmem:[#allocation0 + $0x12f] sm:$0x2] %vm323_vm1, %v363_v62   ;;  %v384_v4 = vld [vmem:[#allocation2 + $0x48] sm:$0x3]   ;;  %v1434_v25 = vpop.permute.xlu1 %1433   ;;  %v2196_v26 = vsel %vm771_vm0, %v2194_v3, %v2192_v2 }
  0xfe   :  { %373 = vst.msk [vmem:[#allocation0 + $0x38] sm:$0x1] %vm323_vm1, %v370_v63   ;;  %375 = vst.msk [vmem:[#allocation0 + $0x137] sm:$0x2] %vm323_vm1, %v370_v63   ;;  %v391_v5 = vld [vmem:[#allocation2 + $0x50] sm:$0x3]   ;;  %2197 = vrot.lane.b32.xlu0 %v2196_v26, %s2388_s24 }
  0xff   :  { %380 = vst.msk [vmem:[#allocation0 + $0x40] sm:$0x1] %vm323_vm1, %v377_v0   ;;  %382 = vst.msk [vmem:[#allocation0 + $0x13f] sm:$0x2] %vm323_vm1, %v377_v0   ;;  %v398_v6 = vld [vmem:[#allocation2 + $0x58] sm:$0x3]   ;;  %2184 = vrot.lane.b32.xlu1 %v2183_v21, %s2388_s24 }
 0x100   :  { %387 = vst.msk [vmem:[#allocation0 + $0x48] sm:$0x1] %vm323_vm1, %v384_v4   ;;  %389 = vst.msk [vmem:[#allocation0 + $0x147] sm:$0x2] %vm323_vm1, %v384_v4   ;;  %v405_v9 = vld [vmem:[#allocation2 + $0x60] sm:$0x3]   ;;  %v1473_v45 = vpop.permute.xlu0 %1472  }
 0x101   :  { %394 = vst.msk [vmem:[#allocation0 + $0x50] sm:$0x1] %vm323_vm1, %v391_v5   ;;  %396 = vst.msk [vmem:[#allocation0 + $0x14f] sm:$0x2] %vm323_vm1, %v391_v5   ;;  %v412_v10 = vld [vmem:[#allocation2 + $0x68] sm:$0x3]   ;;  %v1460_v41 = vpop.permute.xlu1 %1459  }
 0x102   :  { %401 = vst.msk [vmem:[#allocation0 + $0x58] sm:$0x1] %vm323_vm1, %v398_v6   ;;  %403 = vst.msk [vmem:[#allocation0 + $0x157] sm:$0x2] %vm323_vm1, %v398_v6   ;;  %v419_v11 = vld [vmem:[#allocation2 + $0x70] sm:$0x3]  }
 0x103   :  { %1411 = vst.msk [vmem:[#allocation0 + $0x24] ss:$8 sm:$0xf] %vm323_vm1, %v1408_v7   ;;  %1413 = vst.msk [vmem:[#allocation0 + $0x104] ss:$8 sm:$0xf0] %vm323_vm1, %v1408_v7  }
 0x104   :  { %408 = vst.msk [vmem:[#allocation0 + $0x60] sm:$0x1] %vm323_vm1, %v405_v9   ;;  %410 = vst.msk [vmem:[#allocation0 + $0x15f] sm:$0x2] %vm323_vm1, %v405_v9   ;;  %v426_v13 = vld [vmem:[#allocation2 + $0x78] sm:$0x3]   ;;  %v1499_v59 = vpop.permute.xlu0 %1498  }
 0x105   :  { %415 = vst.msk [vmem:[#allocation0 + $0x68] sm:$0x1] %vm323_vm1, %v412_v10   ;;  %417 = vst.msk [vmem:[#allocation0 + $0x167] sm:$0x2] %vm323_vm1, %v412_v10   ;;  %v433_v14 = vld [vmem:[#allocation2 + $0x80] sm:$0x3]   ;;  %v1486_v55 = vpop.permute.xlu1 %1485  }
 0x106   :  { %422 = vst.msk [vmem:[#allocation0 + $0x70] sm:$0x1] %vm323_vm1, %v419_v11   ;;  %424 = vst.msk [vmem:[#allocation0 + $0x16f] sm:$0x2] %vm323_vm1, %v419_v11   ;;  %v440_v15 = vld [vmem:[#allocation2 + $0x88] sm:$0x3]  }
 0x107   :  { %1424 = vst.msk [vmem:[#allocation0 + $0x44] ss:$8 sm:$0xf] %vm323_vm1, %v1421_v12   ;;  %1426 = vst.msk [vmem:[#allocation0 + $0x124] ss:$8 sm:$0xf0] %vm323_vm1, %v1421_v12  }
 0x108   :  { %v2205_v16 = vld [vmem:[#allocation2 + $0x1e0] ss:$8 sm:$0xf]   ;;  %v2207_v17 = vld [vmem:[#allocation2 + $0x1c1] ss:$8 sm:$0xf0]   ;;  %v1525_v9 = vpop.permute.xlu0 %1524  }
 0x109   :  { %429 = vst.msk [vmem:[#allocation0 + $0x78] sm:$0x1] %vm323_vm1, %v426_v13   ;;  %431 = vst.msk [vmem:[#allocation0 + $0x177] sm:$0x2] %vm323_vm1, %v426_v13   ;;  %v447_v18 = vld [vmem:[#allocation2 + $0x90] sm:$0x3]   ;;  %v2209_v37 = vsel %vm771_vm0, %v2207_v17, %v2205_v16  ;;  %v1512_v5 = vpop.permute.xlu1 %1511  }
 0x10a   :  { %436 = vst.msk [vmem:[#allocation0 + $0x80] sm:$0x1] %vm323_vm1, %v433_v14   ;;  %438 = vst.msk [vmem:[#allocation0 + $0x17f] sm:$0x2] %vm323_vm1, %v433_v14   ;;  %v454_v19 = vld [vmem:[#allocation2 + $0x98] sm:$0x3]   ;;  %2210 = vrot.lane.b32.xlu1 %v2209_v37, %s2388_s24 }
 0x10b   :  { %443 = vst.msk [vmem:[#allocation0 + $0x88] sm:$0x1] %vm323_vm1, %v440_v15   ;;  %445 = vst.msk [vmem:[#allocation0 + $0x187] sm:$0x2] %vm323_vm1, %v440_v15   ;;  %v461_v20 = vld [vmem:[#allocation2 + $0xa0] sm:$0x3]  }
 0x10c   :  { %450 = vst.msk [vmem:[#allocation0 + $0x90] sm:$0x1] %vm323_vm1, %v447_v18   ;;  %452 = vst.msk [vmem:[#allocation0 + $0x18f] sm:$0x2] %vm323_vm1, %v447_v18   ;;  %v468_v22 = vld [vmem:[#allocation2 + $0xa8] sm:$0x3]   ;;  %v1551_v12 = vpop.permute.xlu0 %1550  }
 0x10d   :  { %457 = vst.msk [vmem:[#allocation0 + $0x98] sm:$0x1] %vm323_vm1, %v454_v19   ;;  %459 = vst.msk [vmem:[#allocation0 + $0x197] sm:$0x2] %vm323_vm1, %v454_v19   ;;  %v475_v23 = vld [vmem:[#allocation2 + $0xb0] sm:$0x3]   ;;  %v1538_v11 = vpop.permute.xlu1 %1537  }
 0x10e   :  { %464 = vst.msk [vmem:[#allocation0 + $0xa0] sm:$0x1] %vm323_vm1, %v461_v20   ;;  %466 = vst.msk [vmem:[#allocation0 + $0x19f] sm:$0x2] %vm323_vm1, %v461_v20   ;;  %v482_v24 = vld [vmem:[#allocation2 + $0xb8] sm:$0x3]  }
 0x10f   :  { %471 = vst.msk [vmem:[#allocation0 + $0xa8] sm:$0x1] %vm323_vm1, %v468_v22   ;;  %473 = vst.msk [vmem:[#allocation0 + $0x1a7] sm:$0x2] %vm323_vm1, %v468_v22   ;;  %v489_v27 = vld [vmem:[#allocation2 + $0xc0] sm:$0x3]  }
 0x110   :  { %478 = vst.msk [vmem:[#allocation0 + $0xb0] sm:$0x1] %vm323_vm1, %v475_v23   ;;  %480 = vst.msk [vmem:[#allocation0 + $0x1af] sm:$0x2] %vm323_vm1, %v475_v23   ;;  %v496_v28 = vld [vmem:[#allocation2 + $0xc8] sm:$0x3]   ;;  %v1577_v14 = vpop.permute.xlu0 %1576  }
 0x111   :  { %485 = vst.msk [vmem:[#allocation0 + $0xb8] sm:$0x1] %vm323_vm1, %v482_v24   ;;  %487 = vst.msk [vmem:[#allocation0 + $0x1b7] sm:$0x2] %vm323_vm1, %v482_v24   ;;  %v503_v29 = vld [vmem:[#allocation2 + $0xd0] sm:$0x3]   ;;  %v1564_v13 = vpop.permute.xlu1 %1563  }
 0x112   :  { %1437 = vst.msk [vmem:[#allocation0 + $0x64] ss:$8 sm:$0xf] %vm323_vm1, %v1434_v25   ;;  %1439 = vst.msk [vmem:[#allocation0 + $0x144] ss:$8 sm:$0xf0] %vm323_vm1, %v1434_v25  }
 0x113   :  { %492 = vst.msk [vmem:[#allocation0 + $0xc0] sm:$0x1] %vm323_vm1, %v489_v27   ;;  %494 = vst.msk [vmem:[#allocation0 + $0x1bf] sm:$0x2] %vm323_vm1, %v489_v27   ;;  %v510_v31 = vld [vmem:[#allocation2 + $0xd8] sm:$0x3]  }
 0x114   :  { %499 = vst.msk [vmem:[#allocation0 + $0xc8] sm:$0x1] %vm323_vm1, %v496_v28   ;;  %501 = vst.msk [vmem:[#allocation0 + $0x1c7] sm:$0x2] %vm323_vm1, %v496_v28   ;;  %v517_v32 = vld [vmem:[#allocation2 + $0xe0] sm:$0x3]   ;;  %v1602_v16 = vpop.permute.xlu0 %1601  }
 0x115   :  { %506 = vst.msk [vmem:[#allocation0 + $0xd0] sm:$0x1] %vm323_vm1, %v503_v29   ;;  %508 = vst.msk [vmem:[#allocation0 + $0x1cf] sm:$0x2] %vm323_vm1, %v503_v29   ;;  %v524_v33 = vld [vmem:[#allocation2 + $0xe8] sm:$0x3]   ;;  %v1590_v15 = vpop.permute.xlu1 %1589  }
 0x116   :  { %1450 = vst.msk [vmem:[#allocation0 + $0x84] ss:$8 sm:$0xf] %vm323_vm1, %v1447_v30   ;;  %1452 = vst.msk [vmem:[#allocation0 + $0x164] ss:$8 sm:$0xf0] %vm323_vm1, %v1447_v30  }
 0x117   :  { %513 = vst.msk [vmem:[#allocation0 + $0xd8] sm:$0x1] %vm323_vm1, %v510_v31   ;;  %515 = vst.msk [vmem:[#allocation0 + $0x1d7] sm:$0x2] %vm323_vm1, %v510_v31   ;;  %v531_v34 = vld [vmem:[#allocation2 + $0xf0] sm:$0x3]  }
 0x118   :  { %520 = vst.msk [vmem:[#allocation0 + $0xe0] sm:$0x1] %vm323_vm1, %v517_v32   ;;  %522 = vst.msk [vmem:[#allocation0 + $0x1df] sm:$0x2] %vm323_vm1, %v517_v32   ;;  %v538_v35 = vld [vmem:[#allocation2 + $0xf8] sm:$0x3]   ;;  %v1628_v18 = vpop.permute.xlu0 %1627  }
 0x119   :  { %527 = vst.msk [vmem:[#allocation0 + $0xe8] sm:$0x1] %vm323_vm1, %v524_v33   ;;  %529 = vst.msk [vmem:[#allocation0 + $0x1e7] sm:$0x2] %vm323_vm1, %v524_v33   ;;  %v545_v36 = vld [vmem:[#allocation2 + $0x100] sm:$0x3]   ;;  %v1615_v17 = vpop.permute.xlu1 %1614  }
 0x11a   :  { %534 = vst.msk [vmem:[#allocation0 + $0xf0] sm:$0x1] %vm323_vm1, %v531_v34   ;;  %536 = vst.msk [vmem:[#allocation0 + $0x1ef] sm:$0x2] %vm323_vm1, %v531_v34   ;;  %v552_v38 = vld [vmem:[#allocation2 + $0x108] sm:$0x3]  }
 0x11b   :  { %541 = vst.msk [vmem:[#allocation0 + $0xf8] sm:$0x1] %vm323_vm1, %v538_v35   ;;  %543 = vst.msk [vmem:[#allocation0 + $0x1f7] sm:$0x2] %vm323_vm1, %v538_v35   ;;  %v559_v39 = vld [vmem:[#allocation2 + $0x110] sm:$0x3]  }
 0x11c   :  { %548 = vst.msk [vmem:[#allocation0 + $0x200] sm:$0x1] %vm323_vm1, %v545_v36   ;;  %550 = vst.msk [vmem:[#allocation0 + $0x2ff] sm:$0x2] %vm323_vm1, %v545_v36   ;;  %v566_v40 = vld [vmem:[#allocation2 + $0x118] sm:$0x3]   ;;  %v1654_v20 = vpop.permute.xlu0 %1653  }
 0x11d   :  { %555 = vst.msk [vmem:[#allocation0 + $0x208] sm:$0x1] %vm323_vm1, %v552_v38   ;;  %557 = vst.msk [vmem:[#allocation0 + $0x307] sm:$0x2] %vm323_vm1, %v552_v38   ;;  %v573_v42 = vld [vmem:[#allocation2 + $0x120] sm:$0x3]   ;;  %v1641_v19 = vpop.permute.xlu1 %1640  }
 0x11e   :  { %562 = vst.msk [vmem:[#allocation0 + $0x210] sm:$0x1] %vm323_vm1, %v559_v39   ;;  %564 = vst.msk [vmem:[#allocation0 + $0x30f] sm:$0x2] %vm323_vm1, %v559_v39   ;;  %v580_v43 = vld [vmem:[#allocation2 + $0x128] sm:$0x3]  }
 0x11f   :  { %569 = vst.msk [vmem:[#allocation0 + $0x218] sm:$0x1] %vm323_vm1, %v566_v40   ;;  %571 = vst.msk [vmem:[#allocation0 + $0x317] sm:$0x2] %vm323_vm1, %v566_v40   ;;  %v587_v44 = vld [vmem:[#allocation2 + $0x130] sm:$0x3]  }
 0x120   :  { %1463 = vst.msk [vmem:[#allocation0 + $0xa4] ss:$8 sm:$0xf] %vm323_vm1, %v1460_v41   ;;  %1465 = vst.msk [vmem:[#allocation0 + $0x184] ss:$8 sm:$0xf0] %vm323_vm1, %v1460_v41   ;;  %v1680_v22 = vpop.permute.xlu0 %1679  }
 0x121   :  { %576 = vst.msk [vmem:[#allocation0 + $0x220] sm:$0x1] %vm323_vm1, %v573_v42   ;;  %578 = vst.msk [vmem:[#allocation0 + $0x31f] sm:$0x2] %vm323_vm1, %v573_v42   ;;  %v594_v46 = vld [vmem:[#allocation2 + $0x138] sm:$0x3]   ;;  %v1667_v21 = vpop.permute.xlu1 %1666  }
 0x122   :  { %583 = vst.msk [vmem:[#allocation0 + $0x228] sm:$0x1] %vm323_vm1, %v580_v43   ;;  %585 = vst.msk [vmem:[#allocation0 + $0x327] sm:$0x2] %vm323_vm1, %v580_v43   ;;  %v601_v47 = vld [vmem:[#allocation2 + $0x140] sm:$0x3]  }
 0x123   :  { %590 = vst.msk [vmem:[#allocation0 + $0x230] sm:$0x1] %vm323_vm1, %v587_v44   ;;  %592 = vst.msk [vmem:[#allocation0 + $0x32f] sm:$0x2] %vm323_vm1, %v587_v44   ;;  %v608_v48 = vld [vmem:[#allocation2 + $0x148] sm:$0x3]  }
 0x124   :  { %1476 = vst.msk [vmem:[#allocation0 + $0xc4] ss:$8 sm:$0xf] %vm323_vm1, %v1473_v45   ;;  %1478 = vst.msk [vmem:[#allocation0 + $0x1a4] ss:$8 sm:$0xf0] %vm323_vm1, %v1473_v45   ;;  %v1706_v24 = vpop.permute.xlu0 %1705  }
 0x125   :  { %597 = vst.msk [vmem:[#allocation0 + $0x238] sm:$0x1] %vm323_vm1, %v594_v46   ;;  %599 = vst.msk [vmem:[#allocation0 + $0x337] sm:$0x2] %vm323_vm1, %v594_v46   ;;  %v615_v49 = vld [vmem:[#allocation2 + $0x150] sm:$0x3]   ;;  %v1693_v23 = vpop.permute.xlu1 %1692  }
 0x126   :  { %604 = vst.msk [vmem:[#allocation0 + $0x240] sm:$0x1] %vm323_vm1, %v601_v47   ;;  %606 = vst.msk [vmem:[#allocation0 + $0x33f] sm:$0x2] %vm323_vm1, %v601_v47   ;;  %v622_v50 = vld [vmem:[#allocation2 + $0x158] sm:$0x3]  }
 0x127   :  { %611 = vst.msk [vmem:[#allocation0 + $0x248] sm:$0x1] %vm323_vm1, %v608_v48   ;;  %613 = vst.msk [vmem:[#allocation0 + $0x347] sm:$0x2] %vm323_vm1, %v608_v48   ;;  %v629_v51 = vld [vmem:[#allocation2 + $0x160] sm:$0x3]  }
 0x128   :  { %618 = vst.msk [vmem:[#allocation0 + $0x250] sm:$0x1] %vm323_vm1, %v615_v49   ;;  %620 = vst.msk [vmem:[#allocation0 + $0x34f] sm:$0x2] %vm323_vm1, %v615_v49   ;;  %v636_v52 = vld [vmem:[#allocation2 + $0x168] sm:$0x3]   ;;  %v1732_v26 = vpop.permute.xlu0 %1731  }
 0x129   :  { %625 = vst.msk [vmem:[#allocation0 + $0x258] sm:$0x1] %vm323_vm1, %v622_v50   ;;  %627 = vst.msk [vmem:[#allocation0 + $0x357] sm:$0x2] %vm323_vm1, %v622_v50   ;;  %v643_v53 = vld [vmem:[#allocation2 + $0x170] sm:$0x3]   ;;  %v1719_v25 = vpop.permute.xlu1 %1718  }
 0x12a   :  { %632 = vst.msk [vmem:[#allocation0 + $0x260] sm:$0x1] %vm323_vm1, %v629_v51   ;;  %634 = vst.msk [vmem:[#allocation0 + $0x35f] sm:$0x2] %vm323_vm1, %v629_v51   ;;  %v650_v54 = vld [vmem:[#allocation2 + $0x178] sm:$0x3]  }
 0x12b   :  { %639 = vst.msk [vmem:[#allocation0 + $0x268] sm:$0x1] %vm323_vm1, %v636_v52   ;;  %641 = vst.msk [vmem:[#allocation0 + $0x367] sm:$0x2] %vm323_vm1, %v636_v52   ;;  %v657_v56 = vld [vmem:[#allocation2 + $0x180] sm:$0x3]  }
 0x12c   :  { %646 = vst.msk [vmem:[#allocation0 + $0x270] sm:$0x1] %vm323_vm1, %v643_v53   ;;  %648 = vst.msk [vmem:[#allocation0 + $0x36f] sm:$0x2] %vm323_vm1, %v643_v53   ;;  %v664_v57 = vld [vmem:[#allocation2 + $0x188] sm:$0x3]   ;;  %v1758_v28 = vpop.permute.xlu0 %1757  }
 0x12d   :  { %653 = vst.msk [vmem:[#allocation0 + $0x278] sm:$0x1] %vm323_vm1, %v650_v54   ;;  %655 = vst.msk [vmem:[#allocation0 + $0x377] sm:$0x2] %vm323_vm1, %v650_v54   ;;  %v671_v58 = vld [vmem:[#allocation2 + $0x190] sm:$0x3]   ;;  %v1745_v27 = vpop.permute.xlu1 %1744  }
 0x12e   :  { %1489 = vst.msk [vmem:[#allocation0 + $0xe4] ss:$8 sm:$0xf] %vm323_vm1, %v1486_v55   ;;  %1491 = vst.msk [vmem:[#allocation0 + $0x1c4] ss:$8 sm:$0xf0] %vm323_vm1, %v1486_v55  }
 0x12f   :  { %660 = vst.msk [vmem:[#allocation0 + $0x280] sm:$0x1] %vm323_vm1, %v657_v56   ;;  %662 = vst.msk [vmem:[#allocation0 + $0x37f] sm:$0x2] %vm323_vm1, %v657_v56   ;;  %v678_v60 = vld [vmem:[#allocation2 + $0x198] sm:$0x3]  }
 0x130   :  { %667 = vst.msk [vmem:[#allocation0 + $0x288] sm:$0x1] %vm323_vm1, %v664_v57   ;;  %669 = vst.msk [vmem:[#allocation0 + $0x387] sm:$0x2] %vm323_vm1, %v664_v57   ;;  %v685_v61 = vld [vmem:[#allocation2 + $0x1a0] sm:$0x3]   ;;  %v1784_v30 = vpop.permute.xlu0 %1783  }
 0x131   :  { %674 = vst.msk [vmem:[#allocation0 + $0x290] sm:$0x1] %vm323_vm1, %v671_v58   ;;  %676 = vst.msk [vmem:[#allocation0 + $0x38f] sm:$0x2] %vm323_vm1, %v671_v58   ;;  %v692_v62 = vld [vmem:[#allocation2 + $0x1a8] sm:$0x3]   ;;  %v1771_v29 = vpop.permute.xlu1 %1770  }
 0x132   :  { %1502 = vst.msk [vmem:[#allocation0 + $0x204] ss:$8 sm:$0xf] %vm323_vm1, %v1499_v59   ;;  %1504 = vst.msk [vmem:[#allocation0 + $0x2e4] ss:$8 sm:$0xf0] %vm323_vm1, %v1499_v59  }
 0x133   :  { %681 = vst.msk [vmem:[#allocation0 + $0x298] sm:$0x1] %vm323_vm1, %v678_v60   ;;  %683 = vst.msk [vmem:[#allocation0 + $0x397] sm:$0x2] %vm323_vm1, %v678_v60   ;;  %v699_v63 = vld [vmem:[#allocation2 + $0x1b0] sm:$0x3]  }
 0x134   :  { %688 = vst.msk [vmem:[#allocation0 + $0x2a0] sm:$0x1] %vm323_vm1, %v685_v61   ;;  %690 = vst.msk [vmem:[#allocation0 + $0x39f] sm:$0x2] %vm323_vm1, %v685_v61   ;;  %v706_v0 = vld [vmem:[#allocation2 + $0x1b8] sm:$0x3]   ;;  %v1809_v32 = vpop.permute.xlu0 %1808  }
 0x135   :  { %695 = vst.msk [vmem:[#allocation0 + $0x2a8] sm:$0x1] %vm323_vm1, %v692_v62   ;;  %697 = vst.msk [vmem:[#allocation0 + $0x3a7] sm:$0x2] %vm323_vm1, %v692_v62   ;;  %v713_v1 = vld [vmem:[#allocation2 + $0x1c0] sm:$0x3]   ;;  %v1797_v31 = vpop.permute.xlu1 %1796  }
 0x136   :  { %702 = vst.msk [vmem:[#allocation0 + $0x2b0] sm:$0x1] %vm323_vm1, %v699_v63   ;;  %704 = vst.msk [vmem:[#allocation0 + $0x3af] sm:$0x2] %vm323_vm1, %v699_v63   ;;  %v720_v2 = vld [vmem:[#allocation2 + $0x1c8] sm:$0x3]  }
 0x137   :  { %709 = vst.msk [vmem:[#allocation0 + $0x2b8] sm:$0x1] %vm323_vm1, %v706_v0   ;;  %711 = vst.msk [vmem:[#allocation0 + $0x3b7] sm:$0x2] %vm323_vm1, %v706_v0   ;;  %v727_v3 = vld [vmem:[#allocation2 + $0x1d0] sm:$0x3]  }
 0x138   :  { %716 = vst.msk [vmem:[#allocation0 + $0x2c0] sm:$0x1] %vm323_vm1, %v713_v1   ;;  %718 = vst.msk [vmem:[#allocation0 + $0x3bf] sm:$0x2] %vm323_vm1, %v713_v1   ;;  %v734_v4 = vld [vmem:[#allocation2 + $0x1d8] sm:$0x3]   ;;  %v1835_v34 = vpop.permute.xlu0 %1834  }
 0x139   :  { %723 = vst.msk [vmem:[#allocation0 + $0x2c8] sm:$0x1] %vm323_vm1, %v720_v2   ;;  %725 = vst.msk [vmem:[#allocation0 + $0x3c7] sm:$0x2] %vm323_vm1, %v720_v2   ;;  %v741_v6 = vld [vmem:[#allocation2 + $0x1e0] sm:$0x3]   ;;  %v1822_v33 = vpop.permute.xlu1 %1821  }
 0x13a   :  { %730 = vst.msk [vmem:[#allocation0 + $0x2d0] sm:$0x1] %vm323_vm1, %v727_v3   ;;  %732 = vst.msk [vmem:[#allocation0 + $0x3cf] sm:$0x2] %vm323_vm1, %v727_v3   ;;  %v748_v7 = vld [vmem:[#allocation2 + $0x1e8] sm:$0x3]  }
 0x13b   :  { %737 = vst.msk [vmem:[#allocation0 + $0x2d8] sm:$0x1] %vm323_vm1, %v734_v4   ;;  %739 = vst.msk [vmem:[#allocation0 + $0x3d7] sm:$0x2] %vm323_vm1, %v734_v4   ;;  %v755_v8 = vld [vmem:[#allocation2 + $0x1f0] sm:$0x3]  }
 0x13c   :  { %1515 = vst.msk [vmem:[#allocation0 + $0x224] ss:$8 sm:$0xf] %vm323_vm1, %v1512_v5   ;;  %1517 = vst.msk [vmem:[#allocation0 + $0x304] ss:$8 sm:$0xf0] %vm323_vm1, %v1512_v5   ;;  %v1861_v36 = vpop.permute.xlu0 %1860  }
 0x13d   :  { %744 = vst.msk [vmem:[#allocation0 + $0x2e0] sm:$0x1] %vm323_vm1, %v741_v6   ;;  %746 = vst.msk [vmem:[#allocation0 + $0x3df] sm:$0x2] %vm323_vm1, %v741_v6   ;;  %v762_v10 = vld [vmem:[#allocation2 + $0x1f8] sm:$0x3]   ;;  %v1848_v35 = vpop.permute.xlu1 %1847  }
 0x13e   :  { %751 = vst.msk [vmem:[#allocation0 + $0x2e8] sm:$0x1] %vm323_vm1, %v748_v7   ;;  %753 = vst.msk [vmem:[#allocation0 + $0x3e7] sm:$0x2] %vm323_vm1, %v748_v7   ;;  %s2389_s25 = smov [#allocation0]  }
 0x13f   :  { %758 = vst.msk [vmem:[#allocation0 + $0x2f0] sm:$0x1] %vm323_vm1, %v755_v8   ;;  %760 = vst.msk [vmem:[#allocation0 + $0x3ef] sm:$0x2] %vm323_vm1, %v755_v8   ;;  %s2221_s26 = sshll.u32 %s2389_s25, 4  ;;  %s2222_s26 = int_to_ptr.vmem [resolvable:$true] %s2221_s26 }
 0x140   :  { %1528 = vst.msk [vmem:[#allocation0 + $0x244] ss:$8 sm:$0xf] %vm323_vm1, %v1525_v9   ;;  %1530 = vst.msk [vmem:[#allocation0 + $0x324] ss:$8 sm:$0xf0] %vm323_vm1, %v1525_v9   ;;  %v1887_v38 = vpop.permute.xlu0 %1886   ;;  %p2365_p1 = scmp.lt.s32.totalorder %s2222_s26, %s2222_s26 }
 0x141   :  { %765 = vst.msk [vmem:[#allocation0 + $0x2f8] sm:$0x1] %vm323_vm1, %v762_v10   ;;  %767 = vst.msk [vmem:[#allocation0 + $0x3f7] sm:$0x2] %vm323_vm1, %v762_v10   ;;  %v1874_v37 = vpop.permute.xlu1 %1873   ;;  %s2360_s27 = scalar_lea.vmem %s2222_s26, 16384 }
 0x142   :  { %1541 = vst.msk [vmem:[#allocation0 + $0x264] ss:$8 sm:$0xf] %vm323_vm1, %v1538_v11   ;;  %1543 = vst.msk [vmem:[#allocation0 + $0x344] ss:$8 sm:$0xf0] %vm323_vm1, %v1538_v11   ;;  %p2361_p0 = scmp.ne.s32.totalorder %s2222_s26, %s2360_s27  ;;  %p2366_p2 = scmp.lt.s32.totalorder %s2360_s27, %s2360_s27 }
 0x143   :  { %1554 = vst.msk [vmem:[#allocation0 + $0x284] ss:$8 sm:$0xf] %vm323_vm1, %v1551_v12   ;;  %1556 = vst.msk [vmem:[#allocation0 + $0x364] ss:$8 sm:$0xf0] %vm323_vm1, %v1551_v12  }
 0x144   :  { %1567 = vst.msk [vmem:[#allocation0 + $0x2a4] ss:$8 sm:$0xf] %vm323_vm1, %v1564_v13   ;;  %1569 = vst.msk [vmem:[#allocation0 + $0x384] ss:$8 sm:$0xf0] %vm323_vm1, %v1564_v13   ;;  %v1913_v40 = vpop.permute.xlu0 %1912   ;;  %p2367_p3 = por %p2366_p2, %p2365_p1 }
 0x145   :  { %1580 = vst.msk [vmem:[#allocation0 + $0x2c4] ss:$8 sm:$0xf] %vm323_vm1, %v1577_v14   ;;  %1582 = vst.msk [vmem:[#allocation0 + $0x3a4] ss:$8 sm:$0xf0] %vm323_vm1, %v1577_v14   ;;  %v1900_v39 = vpop.permute.xlu1 %1899  }
 0x146   :  { %1593 = vst.msk [vmem:[#allocation0 + $0x2e4] ss:$8 sm:$0xf] %vm323_vm1, %v1590_v15   ;;  %1595 = vst.msk [vmem:[#allocation0 + $0x3c4] ss:$8 sm:$0xf0] %vm323_vm1, %v1590_v15   ;;  %p2368_p4 = pnand %p2367_p3, %p2361_p0 }
 0x147   :  { %1605 = vst.msk [vmem:[#allocation0 + $0x5] ss:$8 sm:$0xf] %vm323_vm1, %v1602_v16   ;;  %1607 = vst.msk [vmem:[#allocation0 + $0xe5] ss:$8 sm:$0xf0] %vm323_vm1, %v1602_v16  }
 0x148   :  { %1618 = vst.msk [vmem:[#allocation0 + $0x25] ss:$8 sm:$0xf] %vm323_vm1, %v1615_v17   ;;  %1620 = vst.msk [vmem:[#allocation0 + $0x105] ss:$8 sm:$0xf0] %vm323_vm1, %v1615_v17   ;;  %v1939_v42 = vpop.permute.xlu0 %1938  }
 0x149   :  { %1631 = vst.msk [vmem:[#allocation0 + $0x45] ss:$8 sm:$0xf] %vm323_vm1, %v1628_v18   ;;  %1633 = vst.msk [vmem:[#allocation0 + $0x125] ss:$8 sm:$0xf0] %vm323_vm1, %v1628_v18   ;;  %v1926_v41 = vpop.permute.xlu1 %1925  }
 0x14a   :  { %1644 = vst.msk [vmem:[#allocation0 + $0x65] ss:$8 sm:$0xf] %vm323_vm1, %v1641_v19   ;;  %1646 = vst.msk [vmem:[#allocation0 + $0x145] ss:$8 sm:$0xf0] %vm323_vm1, %v1641_v19  }
 0x14b   :  { %1657 = vst.msk [vmem:[#allocation0 + $0x85] ss:$8 sm:$0xf] %vm323_vm1, %v1654_v20   ;;  %1659 = vst.msk [vmem:[#allocation0 + $0x165] ss:$8 sm:$0xf0] %vm323_vm1, %v1654_v20  }
 0x14c   :  { %1670 = vst.msk [vmem:[#allocation0 + $0xa5] ss:$8 sm:$0xf] %vm323_vm1, %v1667_v21   ;;  %1672 = vst.msk [vmem:[#allocation0 + $0x185] ss:$8 sm:$0xf0] %vm323_vm1, %v1667_v21   ;;  %v1965_v44 = vpop.permute.xlu0 %1964  }
 0x14d   :  { %1683 = vst.msk [vmem:[#allocation0 + $0xc5] ss:$8 sm:$0xf] %vm323_vm1, %v1680_v22   ;;  %1685 = vst.msk [vmem:[#allocation0 + $0x1a5] ss:$8 sm:$0xf0] %vm323_vm1, %v1680_v22   ;;  %v1952_v43 = vpop.permute.xlu1 %1951  }
 0x14e   :  { %1696 = vst.msk [vmem:[#allocation0 + $0xe5] ss:$8 sm:$0xf] %vm323_vm1, %v1693_v23   ;;  %1698 = vst.msk [vmem:[#allocation0 + $0x1c5] ss:$8 sm:$0xf0] %vm323_vm1, %v1693_v23  }
 0x14f   :  { %1709 = vst.msk [vmem:[#allocation0 + $0x205] ss:$8 sm:$0xf] %vm323_vm1, %v1706_v24   ;;  %1711 = vst.msk [vmem:[#allocation0 + $0x2e5] ss:$8 sm:$0xf0] %vm323_vm1, %v1706_v24  }
 0x150   :  { %1722 = vst.msk [vmem:[#allocation0 + $0x225] ss:$8 sm:$0xf] %vm323_vm1, %v1719_v25   ;;  %1724 = vst.msk [vmem:[#allocation0 + $0x305] ss:$8 sm:$0xf0] %vm323_vm1, %v1719_v25   ;;  %v1991_v46 = vpop.permute.xlu0 %1990  }
 0x151   :  { %1735 = vst.msk [vmem:[#allocation0 + $0x245] ss:$8 sm:$0xf] %vm323_vm1, %v1732_v26   ;;  %1737 = vst.msk [vmem:[#allocation0 + $0x325] ss:$8 sm:$0xf0] %vm323_vm1, %v1732_v26   ;;  %v1978_v45 = vpop.permute.xlu1 %1977  }
 0x152   :  { %1748 = vst.msk [vmem:[#allocation0 + $0x265] ss:$8 sm:$0xf] %vm323_vm1, %v1745_v27   ;;  %1750 = vst.msk [vmem:[#allocation0 + $0x345] ss:$8 sm:$0xf0] %vm323_vm1, %v1745_v27  }
 0x153   :  { %1761 = vst.msk [vmem:[#allocation0 + $0x285] ss:$8 sm:$0xf] %vm323_vm1, %v1758_v28   ;;  %1763 = vst.msk [vmem:[#allocation0 + $0x365] ss:$8 sm:$0xf0] %vm323_vm1, %v1758_v28  }
 0x154   :  { %1774 = vst.msk [vmem:[#allocation0 + $0x2a5] ss:$8 sm:$0xf] %vm323_vm1, %v1771_v29   ;;  %1776 = vst.msk [vmem:[#allocation0 + $0x385] ss:$8 sm:$0xf0] %vm323_vm1, %v1771_v29   ;;  %v2016_v48 = vpop.permute.xlu0 %2015  }
 0x155   :  { %1787 = vst.msk [vmem:[#allocation0 + $0x2c5] ss:$8 sm:$0xf] %vm323_vm1, %v1784_v30   ;;  %1789 = vst.msk [vmem:[#allocation0 + $0x3a5] ss:$8 sm:$0xf0] %vm323_vm1, %v1784_v30   ;;  %v2004_v47 = vpop.permute.xlu1 %2003  }
 0x156   :  { %1800 = vst.msk [vmem:[#allocation0 + $0x2e5] ss:$8 sm:$0xf] %vm323_vm1, %v1797_v31   ;;  %1802 = vst.msk [vmem:[#allocation0 + $0x3c5] ss:$8 sm:$0xf0] %vm323_vm1, %v1797_v31  }
 0x157   :  { %1812 = vst.msk [vmem:[#allocation0 + $0x6] ss:$8 sm:$0xf] %vm323_vm1, %v1809_v32   ;;  %1814 = vst.msk [vmem:[#allocation0 + $0xe6] ss:$8 sm:$0xf0] %vm323_vm1, %v1809_v32  }
 0x158   :  { %1825 = vst.msk [vmem:[#allocation0 + $0x26] ss:$8 sm:$0xf] %vm323_vm1, %v1822_v33   ;;  %1827 = vst.msk [vmem:[#allocation0 + $0x106] ss:$8 sm:$0xf0] %vm323_vm1, %v1822_v33   ;;  %v2042_v50 = vpop.permute.xlu0 %2041  }
 0x159   :  { %1838 = vst.msk [vmem:[#allocation0 + $0x46] ss:$8 sm:$0xf] %vm323_vm1, %v1835_v34   ;;  %1840 = vst.msk [vmem:[#allocation0 + $0x126] ss:$8 sm:$0xf0] %vm323_vm1, %v1835_v34   ;;  %v2029_v49 = vpop.permute.xlu1 %2028  }
 0x15a   :  { %1851 = vst.msk [vmem:[#allocation0 + $0x66] ss:$8 sm:$0xf] %vm323_vm1, %v1848_v35   ;;  %1853 = vst.msk [vmem:[#allocation0 + $0x146] ss:$8 sm:$0xf0] %vm323_vm1, %v1848_v35  }
 0x15b   :  { %1864 = vst.msk [vmem:[#allocation0 + $0x86] ss:$8 sm:$0xf] %vm323_vm1, %v1861_v36   ;;  %1866 = vst.msk [vmem:[#allocation0 + $0x166] ss:$8 sm:$0xf0] %vm323_vm1, %v1861_v36  }
 0x15c   :  { %1877 = vst.msk [vmem:[#allocation0 + $0xa6] ss:$8 sm:$0xf] %vm323_vm1, %v1874_v37   ;;  %1879 = vst.msk [vmem:[#allocation0 + $0x186] ss:$8 sm:$0xf0] %vm323_vm1, %v1874_v37   ;;  %v2068_v52 = vpop.permute.xlu0 %2067  }
 0x15d   :  { %1890 = vst.msk [vmem:[#allocation0 + $0xc6] ss:$8 sm:$0xf] %vm323_vm1, %v1887_v38   ;;  %1892 = vst.msk [vmem:[#allocation0 + $0x1a6] ss:$8 sm:$0xf0] %vm323_vm1, %v1887_v38   ;;  %v2055_v51 = vpop.permute.xlu1 %2054  }
 0x15e   :  { %1903 = vst.msk [vmem:[#allocation0 + $0xe6] ss:$8 sm:$0xf] %vm323_vm1, %v1900_v39   ;;  %1905 = vst.msk [vmem:[#allocation0 + $0x1c6] ss:$8 sm:$0xf0] %vm323_vm1, %v1900_v39  }
 0x15f   :  { %1916 = vst.msk [vmem:[#allocation0 + $0x206] ss:$8 sm:$0xf] %vm323_vm1, %v1913_v40   ;;  %1918 = vst.msk [vmem:[#allocation0 + $0x2e6] ss:$8 sm:$0xf0] %vm323_vm1, %v1913_v40  }
 0x160   :  { %1929 = vst.msk [vmem:[#allocation0 + $0x226] ss:$8 sm:$0xf] %vm323_vm1, %v1926_v41   ;;  %1931 = vst.msk [vmem:[#allocation0 + $0x306] ss:$8 sm:$0xf0] %vm323_vm1, %v1926_v41   ;;  %v2094_v54 = vpop.permute.xlu0 %2093  }
 0x161   :  { %1942 = vst.msk [vmem:[#allocation0 + $0x246] ss:$8 sm:$0xf] %vm323_vm1, %v1939_v42   ;;  %1944 = vst.msk [vmem:[#allocation0 + $0x326] ss:$8 sm:$0xf0] %vm323_vm1, %v1939_v42   ;;  %v2081_v53 = vpop.permute.xlu1 %2080  }
 0x162   :  { %1955 = vst.msk [vmem:[#allocation0 + $0x266] ss:$8 sm:$0xf] %vm323_vm1, %v1952_v43   ;;  %1957 = vst.msk [vmem:[#allocation0 + $0x346] ss:$8 sm:$0xf0] %vm323_vm1, %v1952_v43  }
 0x163   :  { %1968 = vst.msk [vmem:[#allocation0 + $0x286] ss:$8 sm:$0xf] %vm323_vm1, %v1965_v44   ;;  %1970 = vst.msk [vmem:[#allocation0 + $0x366] ss:$8 sm:$0xf0] %vm323_vm1, %v1965_v44  }
 0x164   :  { %1981 = vst.msk [vmem:[#allocation0 + $0x2a6] ss:$8 sm:$0xf] %vm323_vm1, %v1978_v45   ;;  %1983 = vst.msk [vmem:[#allocation0 + $0x386] ss:$8 sm:$0xf0] %vm323_vm1, %v1978_v45   ;;  %v2120_v56 = vpop.permute.xlu0 %2119  }
 0x165   :  { %1994 = vst.msk [vmem:[#allocation0 + $0x2c6] ss:$8 sm:$0xf] %vm323_vm1, %v1991_v46   ;;  %1996 = vst.msk [vmem:[#allocation0 + $0x3a6] ss:$8 sm:$0xf0] %vm323_vm1, %v1991_v46   ;;  %v2107_v55 = vpop.permute.xlu1 %2106  }
 0x166   :  { %2007 = vst.msk [vmem:[#allocation0 + $0x2e6] ss:$8 sm:$0xf] %vm323_vm1, %v2004_v47   ;;  %2009 = vst.msk [vmem:[#allocation0 + $0x3c6] ss:$8 sm:$0xf0] %vm323_vm1, %v2004_v47  }
 0x167   :  { %2019 = vst.msk [vmem:[#allocation0 + $0x7] ss:$8 sm:$0xf] %vm323_vm1, %v2016_v48   ;;  %2021 = vst.msk [vmem:[#allocation0 + $0xe7] ss:$8 sm:$0xf0] %vm323_vm1, %v2016_v48  }
 0x168   :  { %2032 = vst.msk [vmem:[#allocation0 + $0x27] ss:$8 sm:$0xf] %vm323_vm1, %v2029_v49   ;;  %2034 = vst.msk [vmem:[#allocation0 + $0x107] ss:$8 sm:$0xf0] %vm323_vm1, %v2029_v49   ;;  %v2146_v58 = vpop.permute.xlu0 %2145  }
 0x169   :  { %2045 = vst.msk [vmem:[#allocation0 + $0x47] ss:$8 sm:$0xf] %vm323_vm1, %v2042_v50   ;;  %2047 = vst.msk [vmem:[#allocation0 + $0x127] ss:$8 sm:$0xf0] %vm323_vm1, %v2042_v50   ;;  %v2133_v57 = vpop.permute.xlu1 %2132  }
 0x16a   :  { %2058 = vst.msk [vmem:[#allocation0 + $0x67] ss:$8 sm:$0xf] %vm323_vm1, %v2055_v51   ;;  %2060 = vst.msk [vmem:[#allocation0 + $0x147] ss:$8 sm:$0xf0] %vm323_vm1, %v2055_v51  }
 0x16b   :  { %2071 = vst.msk [vmem:[#allocation0 + $0x87] ss:$8 sm:$0xf] %vm323_vm1, %v2068_v52   ;;  %2073 = vst.msk [vmem:[#allocation0 + $0x167] ss:$8 sm:$0xf0] %vm323_vm1, %v2068_v52  }
 0x16c   :  { %2084 = vst.msk [vmem:[#allocation0 + $0xa7] ss:$8 sm:$0xf] %vm323_vm1, %v2081_v53   ;;  %2086 = vst.msk [vmem:[#allocation0 + $0x187] ss:$8 sm:$0xf0] %vm323_vm1, %v2081_v53   ;;  %v2172_v60 = vpop.permute.xlu0 %2171  }
 0x16d   :  { %2097 = vst.msk [vmem:[#allocation0 + $0xc7] ss:$8 sm:$0xf] %vm323_vm1, %v2094_v54   ;;  %2099 = vst.msk [vmem:[#allocation0 + $0x1a7] ss:$8 sm:$0xf0] %vm323_vm1, %v2094_v54   ;;  %v2159_v59 = vpop.permute.xlu1 %2158  }
 0x16e   :  { %2110 = vst.msk [vmem:[#allocation0 + $0xe7] ss:$8 sm:$0xf] %vm323_vm1, %v2107_v55   ;;  %2112 = vst.msk [vmem:[#allocation0 + $0x1c7] ss:$8 sm:$0xf0] %vm323_vm1, %v2107_v55  }
 0x16f   :  { %2123 = vst.msk [vmem:[#allocation0 + $0x207] ss:$8 sm:$0xf] %vm323_vm1, %v2120_v56   ;;  %2125 = vst.msk [vmem:[#allocation0 + $0x2e7] ss:$8 sm:$0xf0] %vm323_vm1, %v2120_v56  }
 0x170   :  { %2136 = vst.msk [vmem:[#allocation0 + $0x227] ss:$8 sm:$0xf] %vm323_vm1, %v2133_v57   ;;  %2138 = vst.msk [vmem:[#allocation0 + $0x307] ss:$8 sm:$0xf0] %vm323_vm1, %v2133_v57   ;;  %v2198_v62 = vpop.permute.xlu0 %2197  }
 0x171   :  { %2149 = vst.msk [vmem:[#allocation0 + $0x247] ss:$8 sm:$0xf] %vm323_vm1, %v2146_v58   ;;  %2151 = vst.msk [vmem:[#allocation0 + $0x327] ss:$8 sm:$0xf0] %vm323_vm1, %v2146_v58   ;;  %v2185_v61 = vpop.permute.xlu1 %2184  }
 0x172   :  { %2162 = vst.msk [vmem:[#allocation0 + $0x267] ss:$8 sm:$0xf] %vm323_vm1, %v2159_v59   ;;  %2164 = vst.msk [vmem:[#allocation0 + $0x347] ss:$8 sm:$0xf0] %vm323_vm1, %v2159_v59  }
 0x173   :  { %2175 = vst.msk [vmem:[#allocation0 + $0x287] ss:$8 sm:$0xf] %vm323_vm1, %v2172_v60   ;;  %2177 = vst.msk [vmem:[#allocation0 + $0x367] ss:$8 sm:$0xf0] %vm323_vm1, %v2172_v60  }
 0x174   :  { %2188 = vst.msk [vmem:[#allocation0 + $0x2a7] ss:$8 sm:$0xf] %vm323_vm1, %v2185_v61   ;;  %2190 = vst.msk [vmem:[#allocation0 + $0x387] ss:$8 sm:$0xf0] %vm323_vm1, %v2185_v61  }
 0x175   :  { %2201 = vst.msk [vmem:[#allocation0 + $0x2c7] ss:$8 sm:$0xf] %vm323_vm1, %v2198_v62   ;;  %2203 = vst.msk [vmem:[#allocation0 + $0x3a7] ss:$8 sm:$0xf0] %vm323_vm1, %v2198_v62  }
 0x17c   :  { %v2211_v63 = vpop.permute.xlu1 %2210  }
 0x17d   :  { %2214 = vst.msk [vmem:[#allocation0 + $0x2e7] ss:$8 sm:$0xf] %vm323_vm1, %v2211_v63   ;;  %2216 = vst.msk [vmem:[#allocation0 + $0x3c7] ss:$8 sm:$0xf0] %vm323_vm1, %v2211_v63  }
 0x17e   :  { %2371 = shalt.err (!%p2368_p4)
}
 0x17f   :  { %2224 = dma.vmem_to_hbm [thread:$0]  %s2222_s26, 16384, %s3175_s1, [#allocation1]  }
 0x180   :  { %2380 = dma.done.wait [#allocation1], 16384  }
 0x181   :  { %2381 = vsyncadd [#allocation1], 4294950912 }
 0x182   :  { %2226 = vsyncpa [#allocation1], 1 }

</bundles_post_ra>
